<compile_context>
chip_gen: v6e
topology: v6e:2x2x1
jax: 0.10.0
libtpu: 0.0.40
codegen_flags: <defaults>
</compile_context>

<pallas_src>
import jax
import jax.numpy as jnp
from jax.experimental import pallas as pl
from jax.experimental.pallas import tpu as pltpu

BN_EPS = 1e-5
_PAD = 128   # zero lane-halo each side of flattened H*W (keeps center 128-aligned)


# --------------------------------------------------------------------------- #
# Fused multi-layer Conv3DLSTM kernel (one grid step == one batch element)
# --------------------------------------------------------------------------- #
def _make_fused_kernel(D, H, W, layer_meta, Cmax):
    HW = H * W
    L = len(layer_meta)
    for m in layer_meta:
        kd, kh, kw = m["ksize"]
        assert (kh // 2) * W + (kw // 2) <= _PAD, "spatial halo exceeds lane padding"
        assert kw // 2 < W and kh // 2 < H and kd // 2 <= D

    def kernel(*refs):
        x_ref = refs[0]
        wrefs = refs[1:1 + 4 * L]
        h_ref = refs[1 + 4 * L]
        c_ref = refs[2 + 4 * L]
        apad_ref = refs[3 + 4 * L]

        # Zero the lane halos every grid step.  A @pl.when(program_id(0)==0)
        # guard would be cheaper but is unsafe with "parallel" batch sharding:
        # on v7x each TensorCore has its own scratch and only one core ever
        # executes grid index 0.
        apad_ref[:, :, :_PAD] = jnp.zeros((D, Cmax, _PAD), jnp.float32)
        apad_ref[:, :, _PAD + HW:] = jnp.zeros((D, Cmax, _PAD), jnp.float32)

        # W-edge validity masks, keyed by horizontal tap offset; shared across
        # depths and layers (hoisted once per kernel trace).
        col = jax.lax.broadcasted_iota(jnp.int32, (1, HW), 1) % W
        _mask_cache = {}

        def wmask(cw):
            if cw == 0:
                return None
            if cw not in _mask_cache:
                ok = jnp.logical_and(col + cw >= 0, col + cw <= W - 1)
                _mask_cache[cw] = ok.astype(jnp.float32)
            return _mask_cache[cw]

        # Layer-0 input -> padded activation scratch (channels on sublanes,
        # flattened H*W on lanes, one slab per depth slice).
        Cx0 = layer_meta[0]["cin"]
        for d in range(D):
            apad_ref[d, :Cx0, _PAD:_PAD + HW] = x_ref[:, d * HW:(d + 1) * HW]

        for l, meta in enumerate(layer_meta):
            Cx, Hc = meta["cin"], meta["hidden"]
            kd, kh, kw = meta["ksize"]
            rd, rh, rw = kd // 2, kh // 2, kw // 2
            wdw_ref, sh1_ref, wg_ref, sg_ref = wrefs[4 * l:4 * l + 4]

            # Hoist loop-invariant weight-column slices / broadcasts.
            wcol = [wdw_ref[:, t:t + 1] for t in range(kd * kh * kw)]
            sh1b = jnp.broadcast_to(sh1_ref[...], (Cx, HW))

            # ---- depthwise kd x kh x kw conv + folded BN1 ------------------ #
            # Each (source depth dd, spatial offset) slab is sliced & masked
            # ONCE and accumulated (scaled by the per-ad tap weight) into every
            # output depth that consumes it; per-(d, dd) partial accumulators
            # keep the FMA chains short and independent for the scheduler.
            parts = {}
            for dd in range(D):
                for bh in range(kh):
                    for bw in range(kw):
                        off = (bh - rh) * W + (bw - rw)
                        s = apad_ref[dd, :Cx, _PAD + off:_PAD + off + HW]
                        m = wmask(bw - rw)
                        if m is not None:
                            s = s * m
                        for ad in range(kd):
                            d = dd + rd - ad          # output depth reading (dd, ad)
                            if d < 0 or d >= D:
                                continue
                            tap = (ad * kh + bh) * kw + bw
                            term = wcol[tap] * s
                            key = (d, dd)
                            parts[key] = term if key not in parts else parts[key] + term

            dw_d = []
            for d in range(D):
                acc = sh1b
                for dd in range(max(0, d - rd), min(D, d + rd + 1)):
                    acc = acc + parts[(d, dd)]
                dw_d.append(jnp.clip(acc, 0.0, 6.0))      # ReLU6
            dw = jnp.concatenate(dw_d, axis=-1)           # (Cx, D*HW), lane-dense

            # ---- 1x1x1 conv + folded BN2 + LSTM gates, batched over D ------ #
            # Contraction length Cx <= 16 is tiny: keep it on the VPU — an MXU
            # matmul with M=3*Hc<=24, K=Cx would waste >90% of the array and
            # add result-FIFO latency.  The (3*Hc, D*HW) operand width already
            # gives plenty of ILP, so a single accumulation chain is fine.
            z = wg_ref[:, 0:1] * dw[0:1, :]
            for cc in range(1, Cx):
                z = z + wg_ref[:, cc:cc + 1] * dw[cc:cc + 1, :]
            z = z + sg_ref[...]                            # (3*Hc, D*HW)

            i_g = jax.nn.sigmoid(z[0:Hc, :])               # exp/recip -> EUP slot
            o_g = jax.nn.sigmoid(z[Hc:2 * Hc, :])
            g_g = jnp.tanh(z[2 * Hc:3 * Hc, :])
            c_new = i_g * g_g                              # forget-gate * c0 == 0
            h_new = o_g * jnp.tanh(c_new)

            if l + 1 < L:
                # Next layer's input goes straight back into the padded VMEM
                # scratch -- the inter-layer activation never touches HBM.
                for d in range(D):
                    apad_ref[d, :Hc, _PAD:_PAD + HW] = h_new[:, d * HW:(d + 1) * HW]
            else:
                h_ref[...] = h_new                         # single lane-dense store
                c_ref[...] = c_new

    return kernel


def _fused_forward(x_flat, weights, layer_meta, D, H, W):
    """x_flat: (B, C_in, D*H*W) f32 (pure reshape of NCDHW).
    Returns (h, c), each (B, Hc_last, D*H*W)."""
    B, C_in, DHW = x_flat.shape
    HW = H * W
    L = len(layer_meta)
    Hc_last = layer_meta[-1]["hidden"]
    Cmax = max(m["cin"] for m in layer_meta)

    kernel = _make_fused_kernel(D, H, W, layer_meta, Cmax)

    in_specs = [pl.BlockSpec((None, C_in, DHW), lambda b: (b, 0, 0))]
    for w in weights:
        in_specs.append(pl.BlockSpec(w.shape, lambda b, nd=w.ndim: (0,) * nd))

    return pl.pallas_call(
        kernel,
        out_shape=(jax.ShapeDtypeStruct((B, Hc_last, DHW), jnp.float32),
                   jax.ShapeDtypeStruct((B, Hc_last, DHW), jnp.float32)),
        grid=(B,),
        in_specs=in_specs,
        out_specs=(pl.BlockSpec((None, Hc_last, DHW), lambda b: (b, 0, 0)),
                   pl.BlockSpec((None, Hc_last, DHW), lambda b: (b, 0, 0))),
        scratch_shapes=[pltpu.VMEM((D, Cmax, HW + 2 * _PAD), jnp.float32)],
        compiler_params=pltpu.CompilerParams(
            dimension_semantics=("parallel",)),    # batch across TCs on v7x
    )(x_flat, *weights)


# --------------------------------------------------------------------------- #
# Host-side parameter folding (conv bias + inference BN + zero-state constants)
# --------------------------------------------------------------------------- #
def _fold_cell_params(p, cin):
    kd, kh, kw = p["ksize"]
    Hc = p["hidden"]
    s1 = p["bn1_g"] * jax.lax.rsqrt(p["bn1_v"] + BN_EPS)           # (Ctot,)
    t1 = p["bn1_b"] - p["bn1_m"] * s1 + p["dw_b"] * s1             # (Ctot,)
    w1 = p["dw_w"] * s1[:, None, None, None]                       # (Ctot,kd,kh,kw)
    wdw = w1[:cin].reshape(cin, kd * kh * kw)                      # (Cx, ntap)
    sh1 = t1[:cin].reshape(cin, 1)

    # Hidden channels of the depthwise stage see an all-zero input -> constant
    # relu6(t1); push their 1x1-conv contribution into the pointwise shift.
    hconst = jnp.clip(t1[cin:], 0.0, 6.0)                          # (Hc,)
    s2 = p["bn2_g"] * jax.lax.rsqrt(p["bn2_v"] + BN_EPS)           # (4Hc,)
    w2 = p["pw_w"] * s2[:, None]                                   # (4Hc, Ctot)
    t2 = p["bn2_b"] - p["bn2_m"] * s2 + p["pw_b"] * s2 + w2[:, cin:] @ hconst

    keep = jnp.concatenate([jnp.arange(0, Hc), jnp.arange(2 * Hc, 4 * Hc)])  # i,o,g
    wg = w2[keep, :cin]                                            # (3Hc, Cx)
    sg = t2[keep].reshape(3 * Hc, 1)
    return wdw, sh1, wg, sg


# --------------------------------------------------------------------------- #
# Conv3DLSTM forward (hidden_state=None, zero-initialised states)
# --------------------------------------------------------------------------- #
def conv3d_lstm_forward(x, layer_params):
    """Mirrors Conv3DLSTM.forward(x, hidden_state=None).
    x: (B, C_in, D, H, W) with D == C_in (required by the torch concat on dim=1).
    Returns (layer_output_last, (h_last, c_last)) in NCDHW layout."""
    B, C_in, D, H, W = x.shape
    HW = H * W
    # (B, C, D*H*W): lane index = d*HW + h*W + w — pure reshape, no transpose.
    x_flat = x.reshape(B, C_in, D * HW)

    weights, layer_meta = [], []
    cin = C_in
    for p in layer_params:
        wdw, sh1, wg, sg = _fold_cell_params(p, cin)
        weights += [wdw, sh1, wg, sg]
        layer_meta.append(dict(cin=cin, hidden=p["hidden"], ksize=p["ksize"]))
        cin = p["hidden"]

    h, c = _fused_forward(x_flat, weights, layer_meta, D, H, W)
    Hc_last = layer_meta[-1]["hidden"]
    h5 = h.reshape(B, Hc_last, D, H, W)
    c5 = c.reshape(B, Hc_last, D, H, W)
    return h5, (h5, c5)


# --------------------------------------------------------------------------- #
# Pure-JAX reference (for correctness check)
# --------------------------------------------------------------------------- #
def _cell_ref(x, h_cur, c_cur, p):
    bc = lambda v: v[None, :, None, None, None]
    combined = jnp.concatenate([x, h_cur], axis=1)
    Ctot = combined.shape[1]
    kd, kh, kw = p["ksize"]
    w = p["dw_w"].reshape(Ctot, 1, kd, kh, kw)
    y = jax.lax.conv_general_dilated(
        combined, w, window_strides=(1, 1, 1),
        padding=((kd // 2, kd // 2), (kh // 2, kh // 2), (kw // 2, kw // 2)),
        dimension_numbers=("NCDHW", "OIDHW", "NCDHW"),
        feature_group_count=Ctot,
        precision=jax.lax.Precision.HIGHEST) + bc(p["dw_b"])
    y = (y - bc(p["bn1_m"])) / jnp.sqrt(bc(p["bn1_v"]) + BN_EPS) * bc(p["bn1_g"]) + bc(p["bn1_b"])
    y = jnp.clip(y, 0.0, 6.0)
    z = jnp.einsum("oc,bcdhw->bodhw", p["pw_w"], y,
                   precision=jax.lax.Precision.HIGHEST) + bc(p["pw_b"])
    z = (z - bc(p["bn2_m"])) / jnp.sqrt(bc(p["bn2_v"]) + BN_EPS) * bc(p["bn2_g"]) + bc(p["bn2_b"])
    hc = h_cur.shape[1]
    i = jax.nn.sigmoid(z[:, 0:hc])
    f = jax.nn.sigmoid(z[:, hc:2 * hc])
    o = jax.nn.sigmoid(z[:, 2 * hc:3 * hc])
    g = jnp.tanh(z[:, 3 * hc:4 * hc])
    c_next = f * c_cur + i * g
    h_next = o * jnp.tanh(c_next)
    return h_next, c_next


def _forward_ref(x, layer_params):
    B, _, D, H, W = x.shape
    cur = x
    h = c = None
    for p in layer_params:
        Hc = p["hidden"]
        h0 = jnp.zeros((B, Hc, D, H, W), jnp.float32)
        c0 = jnp.zeros((B, Hc, D, H, W), jnp.float32)
        h, c = _cell_ref(cur, h0, c0, p)
        cur = h
    return cur, (h, c)


# --------------------------------------------------------------------------- #
# Deterministic parameter initialization (synthetic; mirrors module shapes)
# --------------------------------------------------------------------------- #
def init_layer_params(key, cin, hc, ksize):
    kd, kh, kw = ksize
    ctot = cin + hc
    k = jax.random.split(key, 10)
    return dict(
        ksize=ksize, hidden=hc,
        dw_w=0.1 * jax.random.normal(k[0], (ctot, kd, kh, kw), jnp.float32),
        dw_b=0.05 * jax.random.normal(k[1], (ctot,), jnp.float32),
        bn1_g=1.0 + 0.1 * jax.random.normal(k[2], (ctot,), jnp.float32),
        bn1_b=0.05 * jax.random.normal(k[3], (ctot,), jnp.float32),
        bn1_m=0.05 * jax.random.normal(k[4], (ctot,), jnp.float32),
        bn1_v=1.0 + 0.1 * jnp.abs(jax.random.normal(k[5], (ctot,), jnp.float32)),
        pw_w=0.1 * jax.random.normal(k[6], (4 * hc, ctot), jnp.float32),
        pw_b=0.05 * jax.random.normal(k[7], (4 * hc,), jnp.float32),
        bn2_g=1.0 + 0.1 * jax.random.normal(k[8], (4 * hc,), jnp.float32),
        bn2_b=0.05 * jax.random.normal(k[9], (4 * hc,), jnp.float32),
        bn2_m=jnp.zeros((4 * hc,), jnp.float32),
        bn2_v=jnp.ones((4 * hc,), jnp.float32),
    )


if __name__ == "__main__":
    key = jax.random.PRNGKey(0)
    B, C_in, H, W = 2, 4, 16, 16
    D = C_in                 # the PyTorch module only runs when T == C == in_channels
    hidden = [8, 8]
    ksize = (3, 3, 3)
    num_layers = 2

    kx, kp = jax.random.split(key)
    x = jax.random.normal(kx, (B, C_in, D, H, W), jnp.float32)

    layer_params = []
    cprev = C_in
    pkeys = jax.random.split(kp, num_layers)
    for l in range(num_layers):
        layer_params.append(init_layer_params(pkeys[l], cprev, hidden[l], ksize))
        cprev = hidden[l]

    out, (h_last, c_last) = conv3d_lstm_forward(x, layer_params)
    jax.block_until_ready((out, h_last, c_last))

    # Correctness check against a pure-JAX reference.
    out_ref, (h_ref, c_ref) = _forward_ref(x, layer_params)
    jax.block_until_ready((out_ref, h_ref, c_ref))
    for a, b in ((out, out_ref), (h_last, h_ref), (c_last, c_ref)):
        err = float(jnp.max(jnp.abs(a - b)))
        assert err < 5e-3, f"mismatch vs reference: max abs err {err}"

    print("KERNEL_OK")
</pallas_src>

<mosaic_0001>
module attributes {stable_mosaic.version = 11 : i64} {
  func.func @kernel(%arg0: i32, %arg1: memref<1x4x1024xf32, #tpu.memory_space<vmem>>, %arg2: memref<4x27xf32, #tpu.memory_space<vmem>>, %arg3: memref<4x1xf32, #tpu.memory_space<vmem>>, %arg4: memref<24x4xf32, #tpu.memory_space<vmem>>, %arg5: memref<24x1xf32, #tpu.memory_space<vmem>>, %arg6: memref<8x27xf32, #tpu.memory_space<vmem>>, %arg7: memref<8x1xf32, #tpu.memory_space<vmem>>, %arg8: memref<24x8xf32, #tpu.memory_space<vmem>>, %arg9: memref<24x1xf32, #tpu.memory_space<vmem>>, %arg10: memref<1x8x1024xf32, #tpu.memory_space<vmem>>, %arg11: memref<1x8x1024xf32, #tpu.memory_space<vmem>>, %arg12: memref<4x8x512xf32, #tpu.memory_space<vmem>>) attributes {dimension_semantics = [#tpu.dimension_semantics<parallel>], iteration_bounds = array<i64: 2>, scalar_prefetch = 0 : i64, scratch_operands = 1 : i64, tpu.core_type = #tpu.core_type<tc>, window_params = [{transform_indices = @transform_0, window_bounds = array<i64: 1, 4, 1024>}, {pipeline_mode = #tpu.pipeline_mode<synchronous>, transform_indices = @transform_1, window_bounds = array<i64: 4, 27>}, {pipeline_mode = #tpu.pipeline_mode<synchronous>, transform_indices = @transform_2, window_bounds = array<i64: 4, 1>}, {pipeline_mode = #tpu.pipeline_mode<synchronous>, transform_indices = @transform_3, window_bounds = array<i64: 24, 4>}, {pipeline_mode = #tpu.pipeline_mode<synchronous>, transform_indices = @transform_4, window_bounds = array<i64: 24, 1>}, {pipeline_mode = #tpu.pipeline_mode<synchronous>, transform_indices = @transform_5, window_bounds = array<i64: 8, 27>}, {pipeline_mode = #tpu.pipeline_mode<synchronous>, transform_indices = @transform_6, window_bounds = array<i64: 8, 1>}, {pipeline_mode = #tpu.pipeline_mode<synchronous>, transform_indices = @transform_7, window_bounds = array<i64: 24, 8>}, {pipeline_mode = #tpu.pipeline_mode<synchronous>, transform_indices = @transform_8, window_bounds = array<i64: 24, 1>}, {transform_indices = @transform_9, window_bounds = array<i64: 1, 8, 1024>}, {transform_indices = @transform_10, window_bounds = array<i64: 1, 8, 1024>}]} {
    %cst = arith.constant 0.000000e+00 : f32
    %0 = vector.broadcast %cst : f32 to vector<4x8x128xf32>
    %c0 = arith.constant 0 : index
    %c0_0 = arith.constant 0 : index
    %c0_1 = arith.constant 0 : index
    %1 = vector.load %arg12[%c0, %c0_0, %c0_1] : memref<4x8x512xf32, #tpu.memory_space<vmem>>, vector<4x8x128xf32>
    tpu.vector_store %arg12[%c0, %c0_0, %c0_1], %0 {strides = array<i32>} : memref<4x8x512xf32, #tpu.memory_space<vmem>>, vector<4x8x128xf32>,
    %cst_2 = arith.constant 0.000000e+00 : f32
    %2 = vector.broadcast %cst_2 : f32 to vector<4x8x128xf32>
    %c0_3 = arith.constant 0 : index
    %c0_4 = arith.constant 0 : index
    %c384 = arith.constant 384 : index
    %3 = vector.load %arg12[%c0_3, %c0_4, %c384] : memref<4x8x512xf32, #tpu.memory_space<vmem>>, vector<4x8x128xf32>
    tpu.vector_store %arg12[%c0_3, %c0_4, %c384], %2 {strides = array<i32>} : memref<4x8x512xf32, #tpu.memory_space<vmem>>, vector<4x8x128xf32>,
    %4 = tpu.iota {dimensions = array<i32: 1>} : vector<1x256xi32>
    %c16_i32 = arith.constant 16 : i32
    %c0_i32 = arith.constant 0 : i32
    %5 = arith.cmpi eq, %c16_i32, %c0_i32 : i32
    %c1_i32 = arith.constant 1 : i32
    %6 = arith.select %5, %c1_i32, %c16_i32 : i32
    %7 = vector.broadcast %6 : i32 to vector<1x256xi32>
    %8 = arith.remsi %4, %7 : vector<1x256xi32>
    %c0_i32_5 = arith.constant 0 : i32
    %9 = vector.broadcast %c0_i32_5 : i32 to vector<1x256xi32>
    %10 = arith.cmpi ne, %8, %9 : vector<1x256xi32>
    %c0_i32_6 = arith.constant 0 : i32
    %11 = vector.broadcast %c0_i32_6 : i32 to vector<1x256xi32>
    %12 = arith.cmpi slt, %8, %11 : vector<1x256xi32>
    %c0_i32_7 = arith.constant 0 : i32
    %13 = arith.cmpi slt, %6, %c0_i32_7 : i32
    %14 = vector.broadcast %13 : i1 to vector<1x256xi1>
    %15 = vector.broadcast %14 : vector<1x256xi1> to vector<1x256xi1>
    %16 = arith.xori %12, %15 : vector<1x256xi1>
    %17 = arith.andi %16, %10 : vector<1x256xi1>
    %18 = vector.broadcast %6 : i32 to vector<1x256xi32>
    %19 = arith.addi %8, %18 : vector<1x256xi32>
    %20 = arith.select %17, %19, %8 : vector<1x256xi1>, vector<1x256xi32>
    %c0_8 = arith.constant 0 : index
    %c0_9 = arith.constant 0 : index
    %c0_10 = arith.constant 0 : index
    %21 = vector.load %arg1[%c0_8, %c0_9, %c0_10] : memref<1x4x1024xf32, #tpu.memory_space<vmem>>, vector<1x4x256xf32>
    %22 = vector.shape_cast %21 : vector<1x4x256xf32> to vector<4x256xf32>
    %c0_11 = arith.constant 0 : index
    %c0_12 = arith.constant 0 : index
    %c128 = arith.constant 128 : index
    %23 = vector.load %arg12[%c0_11, %c0_12, %c128] : memref<4x8x512xf32, #tpu.memory_space<vmem>>, vector<1x4x256xf32>
    %24 = vector.shape_cast %23 : vector<1x4x256xf32> to vector<4x256xf32>
    %25 = vector.shape_cast %22 : vector<4x256xf32> to vector<1x4x256xf32>
    tpu.vector_store %arg12[%c0_11, %c0_12, %c128], %25 {strides = array<i32>} : memref<4x8x512xf32, #tpu.memory_space<vmem>>, vector<1x4x256xf32>,
    %c0_13 = arith.constant 0 : index
    %c0_14 = arith.constant 0 : index
    %c256 = arith.constant 256 : index
    %26 = vector.load %arg1[%c0_13, %c0_14, %c256] : memref<1x4x1024xf32, #tpu.memory_space<vmem>>, vector<1x4x256xf32>
    %27 = vector.shape_cast %26 : vector<1x4x256xf32> to vector<4x256xf32>
    %c1 = arith.constant 1 : index
    %c0_15 = arith.constant 0 : index
    %c128_16 = arith.constant 128 : index
    %28 = vector.load %arg12[%c1, %c0_15, %c128_16] : memref<4x8x512xf32, #tpu.memory_space<vmem>>, vector<1x4x256xf32>
    %29 = vector.shape_cast %28 : vector<1x4x256xf32> to vector<4x256xf32>
    %30 = vector.shape_cast %27 : vector<4x256xf32> to vector<1x4x256xf32>
    tpu.vector_store %arg12[%c1, %c0_15, %c128_16], %30 {strides = array<i32>} : memref<4x8x512xf32, #tpu.memory_space<vmem>>, vector<1x4x256xf32>,
    %c0_17 = arith.constant 0 : index
    %c0_18 = arith.constant 0 : index
    %c512 = arith.constant 512 : index
    %31 = vector.load %arg1[%c0_17, %c0_18, %c512] : memref<1x4x1024xf32, #tpu.memory_space<vmem>>, vector<1x4x256xf32>
    %32 = vector.shape_cast %31 : vector<1x4x256xf32> to vector<4x256xf32>
    %c2 = arith.constant 2 : index
    %c0_19 = arith.constant 0 : index
    %c128_20 = arith.constant 128 : index
    %33 = vector.load %arg12[%c2, %c0_19, %c128_20] : memref<4x8x512xf32, #tpu.memory_space<vmem>>, vector<1x4x256xf32>
    %34 = vector.shape_cast %33 : vector<1x4x256xf32> to vector<4x256xf32>
    %35 = vector.shape_cast %32 : vector<4x256xf32> to vector<1x4x256xf32>
    tpu.vector_store %arg12[%c2, %c0_19, %c128_20], %35 {strides = array<i32>} : memref<4x8x512xf32, #tpu.memory_space<vmem>>, vector<1x4x256xf32>,
    %c0_21 = arith.constant 0 : index
    %c0_22 = arith.constant 0 : index
    %c768 = arith.constant 768 : index
    %36 = vector.load %arg1[%c0_21, %c0_22, %c768] : memref<1x4x1024xf32, #tpu.memory_space<vmem>>, vector<1x4x256xf32>
    %37 = vector.shape_cast %36 : vector<1x4x256xf32> to vector<4x256xf32>
    %c3 = arith.constant 3 : index
    %c0_23 = arith.constant 0 : index
    %c128_24 = arith.constant 128 : index
    %38 = vector.load %arg12[%c3, %c0_23, %c128_24] : memref<4x8x512xf32, #tpu.memory_space<vmem>>, vector<1x4x256xf32>
    %39 = vector.shape_cast %38 : vector<1x4x256xf32> to vector<4x256xf32>
    %40 = vector.shape_cast %37 : vector<4x256xf32> to vector<1x4x256xf32>
    tpu.vector_store %arg12[%c3, %c0_23, %c128_24], %40 {strides = array<i32>} : memref<4x8x512xf32, #tpu.memory_space<vmem>>, vector<1x4x256xf32>,
    %c0_25 = arith.constant 0 : index
    %c0_26 = arith.constant 0 : index
    %41 = vector.load %arg2[%c0_25, %c0_26] : memref<4x27xf32, #tpu.memory_space<vmem>>, vector<4x1xf32>
    %c0_27 = arith.constant 0 : index
    %c1_28 = arith.constant 1 : index
    %42 = vector.load %arg2[%c0_27, %c1_28] : memref<4x27xf32, #tpu.memory_space<vmem>>, vector<4x1xf32>
    %c0_29 = arith.constant 0 : index
    %c2_30 = arith.constant 2 : index
    %43 = vector.load %arg2[%c0_29, %c2_30] : memref<4x27xf32, #tpu.memory_space<vmem>>, vector<4x1xf32>
    %c0_31 = arith.constant 0 : index
    %c3_32 = arith.constant 3 : index
    %44 = vector.load %arg2[%c0_31, %c3_32] : memref<4x27xf32, #tpu.memory_space<vmem>>, vector<4x1xf32>
    %c0_33 = arith.constant 0 : index
    %c4 = arith.constant 4 : index
    %45 = vector.load %arg2[%c0_33, %c4] : memref<4x27xf32, #tpu.memory_space<vmem>>, vector<4x1xf32>
    %c0_34 = arith.constant 0 : index
    %c5 = arith.constant 5 : index
    %46 = vector.load %arg2[%c0_34, %c5] : memref<4x27xf32, #tpu.memory_space<vmem>>, vector<4x1xf32>
    %c0_35 = arith.constant 0 : index
    %c6 = arith.constant 6 : index
    %47 = vector.load %arg2[%c0_35, %c6] : memref<4x27xf32, #tpu.memory_space<vmem>>, vector<4x1xf32>
    %c0_36 = arith.constant 0 : index
    %c7 = arith.constant 7 : index
    %48 = vector.load %arg2[%c0_36, %c7] : memref<4x27xf32, #tpu.memory_space<vmem>>, vector<4x1xf32>
    %c0_37 = arith.constant 0 : index
    %c8 = arith.constant 8 : index
    %49 = vector.load %arg2[%c0_37, %c8] : memref<4x27xf32, #tpu.memory_space<vmem>>, vector<4x1xf32>
    %c0_38 = arith.constant 0 : index
    %c9 = arith.constant 9 : index
    %50 = vector.load %arg2[%c0_38, %c9] : memref<4x27xf32, #tpu.memory_space<vmem>>, vector<4x1xf32>
    %c0_39 = arith.constant 0 : index
    %c10 = arith.constant 10 : index
    %51 = vector.load %arg2[%c0_39, %c10] : memref<4x27xf32, #tpu.memory_space<vmem>>, vector<4x1xf32>
    %c0_40 = arith.constant 0 : index
    %c11 = arith.constant 11 : index
    %52 = vector.load %arg2[%c0_40, %c11] : memref<4x27xf32, #tpu.memory_space<vmem>>, vector<4x1xf32>
    %c0_41 = arith.constant 0 : index
    %c12 = arith.constant 12 : index
    %53 = vector.load %arg2[%c0_41, %c12] : memref<4x27xf32, #tpu.memory_space<vmem>>, vector<4x1xf32>
    %c0_42 = arith.constant 0 : index
    %c13 = arith.constant 13 : index
    %54 = vector.load %arg2[%c0_42, %c13] : memref<4x27xf32, #tpu.memory_space<vmem>>, vector<4x1xf32>
    %c0_43 = arith.constant 0 : index
    %c14 = arith.constant 14 : index
    %55 = vector.load %arg2[%c0_43, %c14] : memref<4x27xf32, #tpu.memory_space<vmem>>, vector<4x1xf32>
    %c0_44 = arith.constant 0 : index
    %c15 = arith.constant 15 : index
    %56 = vector.load %arg2[%c0_44, %c15] : memref<4x27xf32, #tpu.memory_space<vmem>>, vector<4x1xf32>
    %c0_45 = arith.constant 0 : index
    %c16 = arith.constant 16 : index
    %57 = vector.load %arg2[%c0_45, %c16] : memref<4x27xf32, #tpu.memory_space<vmem>>, vector<4x1xf32>
    %c0_46 = arith.constant 0 : index
    %c17 = arith.constant 17 : index
    %58 = vector.load %arg2[%c0_46, %c17] : memref<4x27xf32, #tpu.memory_space<vmem>>, vector<4x1xf32>
    %c0_47 = arith.constant 0 : index
    %c18 = arith.constant 18 : index
    %59 = vector.load %arg2[%c0_47, %c18] : memref<4x27xf32, #tpu.memory_space<vmem>>, vector<4x1xf32>
    %c0_48 = arith.constant 0 : index
    %c19 = arith.constant 19 : index
    %60 = vector.load %arg2[%c0_48, %c19] : memref<4x27xf32, #tpu.memory_space<vmem>>, vector<4x1xf32>
    %c0_49 = arith.constant 0 : index
    %c20 = arith.constant 20 : index
    %61 = vector.load %arg2[%c0_49, %c20] : memref<4x27xf32, #tpu.memory_space<vmem>>, vector<4x1xf32>
    %c0_50 = arith.constant 0 : index
    %c21 = arith.constant 21 : index
    %62 = vector.load %arg2[%c0_50, %c21] : memref<4x27xf32, #tpu.memory_space<vmem>>, vector<4x1xf32>
    %c0_51 = arith.constant 0 : index
    %c22 = arith.constant 22 : index
    %63 = vector.load %arg2[%c0_51, %c22] : memref<4x27xf32, #tpu.memory_space<vmem>>, vector<4x1xf32>
    %c0_52 = arith.constant 0 : index
    %c23 = arith.constant 23 : index
    %64 = vector.load %arg2[%c0_52, %c23] : memref<4x27xf32, #tpu.memory_space<vmem>>, vector<4x1xf32>
    %c0_53 = arith.constant 0 : index
    %c24 = arith.constant 24 : index
    %65 = vector.load %arg2[%c0_53, %c24] : memref<4x27xf32, #tpu.memory_space<vmem>>, vector<4x1xf32>
    %c0_54 = arith.constant 0 : index
    %c25 = arith.constant 25 : index
    %66 = vector.load %arg2[%c0_54, %c25] : memref<4x27xf32, #tpu.memory_space<vmem>>, vector<4x1xf32>
    %c0_55 = arith.constant 0 : index
    %c26 = arith.constant 26 : index
    %67 = vector.load %arg2[%c0_55, %c26] : memref<4x27xf32, #tpu.memory_space<vmem>>, vector<4x1xf32>
    %c0_56 = arith.constant 0 : index
    %c0_57 = arith.constant 0 : index
    %68 = vector.load %arg3[%c0_56, %c0_57] : memref<4x1xf32, #tpu.memory_space<vmem>>, vector<4x1xf32>
    %69 = vector.shape_cast %68 : vector<4x1xf32> to vector<4x1xf32>
    %70 = vector.broadcast %69 : vector<4x1xf32> to vector<4x256xf32>
    %c0_58 = arith.constant 0 : index
    %c0_59 = arith.constant 0 : index
    %c111 = arith.constant 111 : index
    %71 = vector.load %arg12[%c0_58, %c0_59, %c111] : memref<4x8x512xf32, #tpu.memory_space<vmem>>, vector<1x4x256xf32>
    %72 = vector.shape_cast %71 : vector<1x4x256xf32> to vector<4x256xf32>
    %c-1_i32 = arith.constant -1 : i32
    %73 = vector.broadcast %c-1_i32 : i32 to vector<1x256xi32>
    %74 = arith.addi %20, %73 : vector<1x256xi32>
    %c0_i32_60 = arith.constant 0 : i32
    %75 = vector.broadcast %c0_i32_60 : i32 to vector<1x256xi32>
    %76 = arith.cmpi sge, %74, %75 : vector<1x256xi32>
    %c-1_i32_61 = arith.constant -1 : i32
    %77 = vector.broadcast %c-1_i32_61 : i32 to vector<1x256xi32>
    %78 = arith.addi %20, %77 : vector<1x256xi32>
    %c15_i32 = arith.constant 15 : i32
    %79 = vector.broadcast %c15_i32 : i32 to vector<1x256xi32>
    %80 = arith.cmpi sle, %78, %79 : vector<1x256xi32>
    %81 = arith.andi %76, %80 : vector<1x256xi1>
    %82 = arith.extui %81 : vector<1x256xi1> to vector<1x256xi32>
    %83 = arith.sitofp %82 : vector<1x256xi32> to vector<1x256xf32>
    %84 = vector.broadcast %83 : vector<1x256xf32> to vector<4x256xf32>
    %85 = arith.mulf %72, %84 : vector<4x256xf32>
    %86 = vector.broadcast %41 : vector<4x1xf32> to vector<4x256xf32>
    %87 = arith.mulf %86, %85 : vector<4x256xf32>
    %88 = vector.broadcast %50 : vector<4x1xf32> to vector<4x256xf32>
    %89 = arith.mulf %88, %85 : vector<4x256xf32>
    %c0_62 = arith.constant 0 : index
    %c0_63 = arith.constant 0 : index
    %c112 = arith.constant 112 : index
    %90 = vector.load %arg12[%c0_62, %c0_63, %c112] : memref<4x8x512xf32, #tpu.memory_space<vmem>>, vector<1x4x256xf32>
    %91 = vector.shape_cast %90 : vector<1x4x256xf32> to vector<4x256xf32>
    %92 = vector.broadcast %42 : vector<4x1xf32> to vector<4x256xf32>
    %93 = arith.mulf %92, %91 : vector<4x256xf32>
    %94 = arith.addf %87, %93 : vector<4x256xf32>
    %95 = vector.broadcast %51 : vector<4x1xf32> to vector<4x256xf32>
    %96 = arith.mulf %95, %91 : vector<4x256xf32>
    %97 = arith.addf %89, %96 : vector<4x256xf32>
    %c0_64 = arith.constant 0 : index
    %c0_65 = arith.constant 0 : index
    %c113 = arith.constant 113 : index
    %98 = vector.load %arg12[%c0_64, %c0_65, %c113] : memref<4x8x512xf32, #tpu.memory_space<vmem>>, vector<1x4x256xf32>
    %99 = vector.shape_cast %98 : vector<1x4x256xf32> to vector<4x256xf32>
    %c1_i32_66 = arith.constant 1 : i32
    %100 = vector.broadcast %c1_i32_66 : i32 to vector<1x256xi32>
    %101 = arith.addi %20, %100 : vector<1x256xi32>
    %c0_i32_67 = arith.constant 0 : i32
    %102 = vector.broadcast %c0_i32_67 : i32 to vector<1x256xi32>
    %103 = arith.cmpi sge, %101, %102 : vector<1x256xi32>
    %c1_i32_68 = arith.constant 1 : i32
    %104 = vector.broadcast %c1_i32_68 : i32 to vector<1x256xi32>
    %105 = arith.addi %20, %104 : vector<1x256xi32>
    %c15_i32_69 = arith.constant 15 : i32
    %106 = vector.broadcast %c15_i32_69 : i32 to vector<1x256xi32>
    %107 = arith.cmpi sle, %105, %106 : vector<1x256xi32>
    %108 = arith.andi %103, %107 : vector<1x256xi1>
    %109 = arith.extui %108 : vector<1x256xi1> to vector<1x256xi32>
    %110 = arith.sitofp %109 : vector<1x256xi32> to vector<1x256xf32>
    %111 = vector.broadcast %110 : vector<1x256xf32> to vector<4x256xf32>
    %112 = arith.mulf %99, %111 : vector<4x256xf32>
    %113 = vector.broadcast %43 : vector<4x1xf32> to vector<4x256xf32>
    %114 = arith.mulf %113, %112 : vector<4x256xf32>
    %115 = arith.addf %94, %114 : vector<4x256xf32>
    %116 = vector.broadcast %52 : vector<4x1xf32> to vector<4x256xf32>
    %117 = arith.mulf %116, %112 : vector<4x256xf32>
    %118 = arith.addf %97, %117 : vector<4x256xf32>
    %c0_70 = arith.constant 0 : index
    %c0_71 = arith.constant 0 : index
    %c127 = arith.constant 127 : index
    %119 = vector.load %arg12[%c0_70, %c0_71, %c127] : memref<4x8x512xf32, #tpu.memory_space<vmem>>, vector<1x4x256xf32>
    %120 = vector.shape_cast %119 : vector<1x4x256xf32> to vector<4x256xf32>
    %121 = vector.broadcast %83 : vector<1x256xf32> to vector<4x256xf32>
    %122 = arith.mulf %120, %121 : vector<4x256xf32>
    %123 = vector.broadcast %44 : vector<4x1xf32> to vector<4x256xf32>
    %124 = arith.mulf %123, %122 : vector<4x256xf32>
    %125 = arith.addf %115, %124 : vector<4x256xf32>
    %126 = vector.broadcast %53 : vector<4x1xf32> to vector<4x256xf32>
    %127 = arith.mulf %126, %122 : vector<4x256xf32>
    %128 = arith.addf %118, %127 : vector<4x256xf32>
    %c0_72 = arith.constant 0 : index
    %c0_73 = arith.constant 0 : index
    %c128_74 = arith.constant 128 : index
    %129 = vector.load %arg12[%c0_72, %c0_73, %c128_74] : memref<4x8x512xf32, #tpu.memory_space<vmem>>, vector<1x4x256xf32>
    %130 = vector.shape_cast %129 : vector<1x4x256xf32> to vector<4x256xf32>
    %131 = vector.broadcast %45 : vector<4x1xf32> to vector<4x256xf32>
    %132 = arith.mulf %131, %130 : vector<4x256xf32>
    %133 = arith.addf %125, %132 : vector<4x256xf32>
    %134 = vector.broadcast %54 : vector<4x1xf32> to vector<4x256xf32>
    %135 = arith.mulf %134, %130 : vector<4x256xf32>
    %136 = arith.addf %128, %135 : vector<4x256xf32>
    %c0_75 = arith.constant 0 : index
    %c0_76 = arith.constant 0 : index
    %c129 = arith.constant 129 : index
    %137 = vector.load %arg12[%c0_75, %c0_76, %c129] : memref<4x8x512xf32, #tpu.memory_space<vmem>>, vector<1x4x256xf32>
    %138 = vector.shape_cast %137 : vector<1x4x256xf32> to vector<4x256xf32>
    %139 = vector.broadcast %110 : vector<1x256xf32> to vector<4x256xf32>
    %140 = arith.mulf %138, %139 : vector<4x256xf32>
    %141 = vector.broadcast %46 : vector<4x1xf32> to vector<4x256xf32>
    %142 = arith.mulf %141, %140 : vector<4x256xf32>
    %143 = arith.addf %133, %142 : vector<4x256xf32>
    %144 = vector.broadcast %55 : vector<4x1xf32> to vector<4x256xf32>
    %145 = arith.mulf %144, %140 : vector<4x256xf32>
    %146 = arith.addf %136, %145 : vector<4x256xf32>
    %c0_77 = arith.constant 0 : index
    %c0_78 = arith.constant 0 : index
    %c143 = arith.constant 143 : index
    %147 = vector.load %arg12[%c0_77, %c0_78, %c143] : memref<4x8x512xf32, #tpu.memory_space<vmem>>, vector<1x4x256xf32>
    %148 = vector.shape_cast %147 : vector<1x4x256xf32> to vector<4x256xf32>
    %149 = vector.broadcast %83 : vector<1x256xf32> to vector<4x256xf32>
    %150 = arith.mulf %148, %149 : vector<4x256xf32>
    %151 = vector.broadcast %47 : vector<4x1xf32> to vector<4x256xf32>
    %152 = arith.mulf %151, %150 : vector<4x256xf32>
    %153 = arith.addf %143, %152 : vector<4x256xf32>
    %154 = vector.broadcast %56 : vector<4x1xf32> to vector<4x256xf32>
    %155 = arith.mulf %154, %150 : vector<4x256xf32>
    %156 = arith.addf %146, %155 : vector<4x256xf32>
    %c0_79 = arith.constant 0 : index
    %c0_80 = arith.constant 0 : index
    %c144 = arith.constant 144 : index
    %157 = vector.load %arg12[%c0_79, %c0_80, %c144] : memref<4x8x512xf32, #tpu.memory_space<vmem>>, vector<1x4x256xf32>
    %158 = vector.shape_cast %157 : vector<1x4x256xf32> to vector<4x256xf32>
    %159 = vector.broadcast %48 : vector<4x1xf32> to vector<4x256xf32>
    %160 = arith.mulf %159, %158 : vector<4x256xf32>
    %161 = arith.addf %153, %160 : vector<4x256xf32>
    %162 = vector.broadcast %57 : vector<4x1xf32> to vector<4x256xf32>
    %163 = arith.mulf %162, %158 : vector<4x256xf32>
    %164 = arith.addf %156, %163 : vector<4x256xf32>
    %c0_81 = arith.constant 0 : index
    %c0_82 = arith.constant 0 : index
    %c145 = arith.constant 145 : index
    %165 = vector.load %arg12[%c0_81, %c0_82, %c145] : memref<4x8x512xf32, #tpu.memory_space<vmem>>, vector<1x4x256xf32>
    %166 = vector.shape_cast %165 : vector<1x4x256xf32> to vector<4x256xf32>
    %167 = vector.broadcast %110 : vector<1x256xf32> to vector<4x256xf32>
    %168 = arith.mulf %166, %167 : vector<4x256xf32>
    %169 = vector.broadcast %49 : vector<4x1xf32> to vector<4x256xf32>
    %170 = arith.mulf %169, %168 : vector<4x256xf32>
    %171 = arith.addf %161, %170 : vector<4x256xf32>
    %172 = vector.broadcast %58 : vector<4x1xf32> to vector<4x256xf32>
    %173 = arith.mulf %172, %168 : vector<4x256xf32>
    %174 = arith.addf %164, %173 : vector<4x256xf32>
    %c1_83 = arith.constant 1 : index
    %c0_84 = arith.constant 0 : index
    %c111_85 = arith.constant 111 : index
    %175 = vector.load %arg12[%c1_83, %c0_84, %c111_85] : memref<4x8x512xf32, #tpu.memory_space<vmem>>, vector<1x4x256xf32>
    %176 = vector.shape_cast %175 : vector<1x4x256xf32> to vector<4x256xf32>
    %177 = vector.broadcast %83 : vector<1x256xf32> to vector<4x256xf32>
    %178 = arith.mulf %176, %177 : vector<4x256xf32>
    %179 = vector.broadcast %41 : vector<4x1xf32> to vector<4x256xf32>
    %180 = arith.mulf %179, %178 : vector<4x256xf32>
    %181 = vector.broadcast %50 : vector<4x1xf32> to vector<4x256xf32>
    %182 = arith.mulf %181, %178 : vector<4x256xf32>
    %183 = vector.broadcast %59 : vector<4x1xf32> to vector<4x256xf32>
    %184 = arith.mulf %183, %178 : vector<4x256xf32>
    %c1_86 = arith.constant 1 : index
    %c0_87 = arith.constant 0 : index
    %c112_88 = arith.constant 112 : index
    %185 = vector.load %arg12[%c1_86, %c0_87, %c112_88] : memref<4x8x512xf32, #tpu.memory_space<vmem>>, vector<1x4x256xf32>
    %186 = vector.shape_cast %185 : vector<1x4x256xf32> to vector<4x256xf32>
    %187 = vector.broadcast %42 : vector<4x1xf32> to vector<4x256xf32>
    %188 = arith.mulf %187, %186 : vector<4x256xf32>
    %189 = arith.addf %180, %188 : vector<4x256xf32>
    %190 = vector.broadcast %51 : vector<4x1xf32> to vector<4x256xf32>
    %191 = arith.mulf %190, %186 : vector<4x256xf32>
    %192 = arith.addf %182, %191 : vector<4x256xf32>
    %193 = vector.broadcast %60 : vector<4x1xf32> to vector<4x256xf32>
    %194 = arith.mulf %193, %186 : vector<4x256xf32>
    %195 = arith.addf %184, %194 : vector<4x256xf32>
    %c1_89 = arith.constant 1 : index
    %c0_90 = arith.constant 0 : index
    %c113_91 = arith.constant 113 : index
    %196 = vector.load %arg12[%c1_89, %c0_90, %c113_91] : memref<4x8x512xf32, #tpu.memory_space<vmem>>, vector<1x4x256xf32>
    %197 = vector.shape_cast %196 : vector<1x4x256xf32> to vector<4x256xf32>
    %198 = vector.broadcast %110 : vector<1x256xf32> to vector<4x256xf32>
    %199 = arith.mulf %197, %198 : vector<4x256xf32>
    %200 = vector.broadcast %43 : vector<4x1xf32> to vector<4x256xf32>
    %201 = arith.mulf %200, %199 : vector<4x256xf32>
    %202 = arith.addf %189, %201 : vector<4x256xf32>
    %203 = vector.broadcast %52 : vector<4x1xf32> to vector<4x256xf32>
    %204 = arith.mulf %203, %199 : vector<4x256xf32>
    %205 = arith.addf %192, %204 : vector<4x256xf32>
    %206 = vector.broadcast %61 : vector<4x1xf32> to vector<4x256xf32>
    %207 = arith.mulf %206, %199 : vector<4x256xf32>
    %208 = arith.addf %195, %207 : vector<4x256xf32>
    %c1_92 = arith.constant 1 : index
    %c0_93 = arith.constant 0 : index
    %c127_94 = arith.constant 127 : index
    %209 = vector.load %arg12[%c1_92, %c0_93, %c127_94] : memref<4x8x512xf32, #tpu.memory_space<vmem>>, vector<1x4x256xf32>
    %210 = vector.shape_cast %209 : vector<1x4x256xf32> to vector<4x256xf32>
    %211 = vector.broadcast %83 : vector<1x256xf32> to vector<4x256xf32>
    %212 = arith.mulf %210, %211 : vector<4x256xf32>
    %213 = vector.broadcast %44 : vector<4x1xf32> to vector<4x256xf32>
    %214 = arith.mulf %213, %212 : vector<4x256xf32>
    %215 = arith.addf %202, %214 : vector<4x256xf32>
    %216 = vector.broadcast %53 : vector<4x1xf32> to vector<4x256xf32>
    %217 = arith.mulf %216, %212 : vector<4x256xf32>
    %218 = arith.addf %205, %217 : vector<4x256xf32>
    %219 = vector.broadcast %62 : vector<4x1xf32> to vector<4x256xf32>
    %220 = arith.mulf %219, %212 : vector<4x256xf32>
    %221 = arith.addf %208, %220 : vector<4x256xf32>
    %c1_95 = arith.constant 1 : index
    %c0_96 = arith.constant 0 : index
    %c128_97 = arith.constant 128 : index
    %222 = vector.load %arg12[%c1_95, %c0_96, %c128_97] : memref<4x8x512xf32, #tpu.memory_space<vmem>>, vector<1x4x256xf32>
    %223 = vector.shape_cast %222 : vector<1x4x256xf32> to vector<4x256xf32>
    %224 = vector.broadcast %45 : vector<4x1xf32> to vector<4x256xf32>
    %225 = arith.mulf %224, %223 : vector<4x256xf32>
    %226 = arith.addf %215, %225 : vector<4x256xf32>
    %227 = vector.broadcast %54 : vector<4x1xf32> to vector<4x256xf32>
    %228 = arith.mulf %227, %223 : vector<4x256xf32>
    %229 = arith.addf %218, %228 : vector<4x256xf32>
    %230 = vector.broadcast %63 : vector<4x1xf32> to vector<4x256xf32>
    %231 = arith.mulf %230, %223 : vector<4x256xf32>
    %232 = arith.addf %221, %231 : vector<4x256xf32>
    %c1_98 = arith.constant 1 : index
    %c0_99 = arith.constant 0 : index
    %c129_100 = arith.constant 129 : index
    %233 = vector.load %arg12[%c1_98, %c0_99, %c129_100] : memref<4x8x512xf32, #tpu.memory_space<vmem>>, vector<1x4x256xf32>
    %234 = vector.shape_cast %233 : vector<1x4x256xf32> to vector<4x256xf32>
    %235 = vector.broadcast %110 : vector<1x256xf32> to vector<4x256xf32>
    %236 = arith.mulf %234, %235 : vector<4x256xf32>
    %237 = vector.broadcast %46 : vector<4x1xf32> to vector<4x256xf32>
    %238 = arith.mulf %237, %236 : vector<4x256xf32>
    %239 = arith.addf %226, %238 : vector<4x256xf32>
    %240 = vector.broadcast %55 : vector<4x1xf32> to vector<4x256xf32>
    %241 = arith.mulf %240, %236 : vector<4x256xf32>
    %242 = arith.addf %229, %241 : vector<4x256xf32>
    %243 = vector.broadcast %64 : vector<4x1xf32> to vector<4x256xf32>
    %244 = arith.mulf %243, %236 : vector<4x256xf32>
    %245 = arith.addf %232, %244 : vector<4x256xf32>
    %c1_101 = arith.constant 1 : index
    %c0_102 = arith.constant 0 : index
    %c143_103 = arith.constant 143 : index
    %246 = vector.load %arg12[%c1_101, %c0_102, %c143_103] : memref<4x8x512xf32, #tpu.memory_space<vmem>>, vector<1x4x256xf32>
    %247 = vector.shape_cast %246 : vector<1x4x256xf32> to vector<4x256xf32>
    %248 = vector.broadcast %83 : vector<1x256xf32> to vector<4x256xf32>
    %249 = arith.mulf %247, %248 : vector<4x256xf32>
    %250 = vector.broadcast %47 : vector<4x1xf32> to vector<4x256xf32>
    %251 = arith.mulf %250, %249 : vector<4x256xf32>
    %252 = arith.addf %239, %251 : vector<4x256xf32>
    %253 = vector.broadcast %56 : vector<4x1xf32> to vector<4x256xf32>
    %254 = arith.mulf %253, %249 : vector<4x256xf32>
    %255 = arith.addf %242, %254 : vector<4x256xf32>
    %256 = vector.broadcast %65 : vector<4x1xf32> to vector<4x256xf32>
    %257 = arith.mulf %256, %249 : vector<4x256xf32>
    %258 = arith.addf %245, %257 : vector<4x256xf32>
    %c1_104 = arith.constant 1 : index
    %c0_105 = arith.constant 0 : index
    %c144_106 = arith.constant 144 : index
    %259 = vector.load %arg12[%c1_104, %c0_105, %c144_106] : memref<4x8x512xf32, #tpu.memory_space<vmem>>, vector<1x4x256xf32>
    %260 = vector.shape_cast %259 : vector<1x4x256xf32> to vector<4x256xf32>
    %261 = vector.broadcast %48 : vector<4x1xf32> to vector<4x256xf32>
    %262 = arith.mulf %261, %260 : vector<4x256xf32>
    %263 = arith.addf %252, %262 : vector<4x256xf32>
    %264 = vector.broadcast %57 : vector<4x1xf32> to vector<4x256xf32>
    %265 = arith.mulf %264, %260 : vector<4x256xf32>
    %266 = arith.addf %255, %265 : vector<4x256xf32>
    %267 = vector.broadcast %66 : vector<4x1xf32> to vector<4x256xf32>
    %268 = arith.mulf %267, %260 : vector<4x256xf32>
    %269 = arith.addf %258, %268 : vector<4x256xf32>
    %c1_107 = arith.constant 1 : index
    %c0_108 = arith.constant 0 : index
    %c145_109 = arith.constant 145 : index
    %270 = vector.load %arg12[%c1_107, %c0_108, %c145_109] : memref<4x8x512xf32, #tpu.memory_space<vmem>>, vector<1x4x256xf32>
    %271 = vector.shape_cast %270 : vector<1x4x256xf32> to vector<4x256xf32>
    %272 = vector.broadcast %110 : vector<1x256xf32> to vector<4x256xf32>
    %273 = arith.mulf %271, %272 : vector<4x256xf32>
    %274 = vector.broadcast %49 : vector<4x1xf32> to vector<4x256xf32>
    %275 = arith.mulf %274, %273 : vector<4x256xf32>
    %276 = arith.addf %263, %275 : vector<4x256xf32>
    %277 = vector.broadcast %58 : vector<4x1xf32> to vector<4x256xf32>
    %278 = arith.mulf %277, %273 : vector<4x256xf32>
    %279 = arith.addf %266, %278 : vector<4x256xf32>
    %280 = vector.broadcast %67 : vector<4x1xf32> to vector<4x256xf32>
    %281 = arith.mulf %280, %273 : vector<4x256xf32>
    %282 = arith.addf %269, %281 : vector<4x256xf32>
    %c2_110 = arith.constant 2 : index
    %c0_111 = arith.constant 0 : index
    %c111_112 = arith.constant 111 : index
    %283 = vector.load %arg12[%c2_110, %c0_111, %c111_112] : memref<4x8x512xf32, #tpu.memory_space<vmem>>, vector<1x4x256xf32>
    %284 = vector.shape_cast %283 : vector<1x4x256xf32> to vector<4x256xf32>
    %285 = vector.broadcast %83 : vector<1x256xf32> to vector<4x256xf32>
    %286 = arith.mulf %284, %285 : vector<4x256xf32>
    %287 = vector.broadcast %41 : vector<4x1xf32> to vector<4x256xf32>
    %288 = arith.mulf %287, %286 : vector<4x256xf32>
    %289 = vector.broadcast %50 : vector<4x1xf32> to vector<4x256xf32>
    %290 = arith.mulf %289, %286 : vector<4x256xf32>
    %291 = vector.broadcast %59 : vector<4x1xf32> to vector<4x256xf32>
    %292 = arith.mulf %291, %286 : vector<4x256xf32>
    %c2_113 = arith.constant 2 : index
    %c0_114 = arith.constant 0 : index
    %c112_115 = arith.constant 112 : index
    %293 = vector.load %arg12[%c2_113, %c0_114, %c112_115] : memref<4x8x512xf32, #tpu.memory_space<vmem>>, vector<1x4x256xf32>
    %294 = vector.shape_cast %293 : vector<1x4x256xf32> to vector<4x256xf32>
    %295 = vector.broadcast %42 : vector<4x1xf32> to vector<4x256xf32>
    %296 = arith.mulf %295, %294 : vector<4x256xf32>
    %297 = arith.addf %288, %296 : vector<4x256xf32>
    %298 = vector.broadcast %51 : vector<4x1xf32> to vector<4x256xf32>
    %299 = arith.mulf %298, %294 : vector<4x256xf32>
    %300 = arith.addf %290, %299 : vector<4x256xf32>
    %301 = vector.broadcast %60 : vector<4x1xf32> to vector<4x256xf32>
    %302 = arith.mulf %301, %294 : vector<4x256xf32>
    %303 = arith.addf %292, %302 : vector<4x256xf32>
    %c2_116 = arith.constant 2 : index
    %c0_117 = arith.constant 0 : index
    %c113_118 = arith.constant 113 : index
    %304 = vector.load %arg12[%c2_116, %c0_117, %c113_118] : memref<4x8x512xf32, #tpu.memory_space<vmem>>, vector<1x4x256xf32>
    %305 = vector.shape_cast %304 : vector<1x4x256xf32> to vector<4x256xf32>
    %306 = vector.broadcast %110 : vector<1x256xf32> to vector<4x256xf32>
    %307 = arith.mulf %305, %306 : vector<4x256xf32>
    %308 = vector.broadcast %43 : vector<4x1xf32> to vector<4x256xf32>
    %309 = arith.mulf %308, %307 : vector<4x256xf32>
    %310 = arith.addf %297, %309 : vector<4x256xf32>
    %311 = vector.broadcast %52 : vector<4x1xf32> to vector<4x256xf32>
    %312 = arith.mulf %311, %307 : vector<4x256xf32>
    %313 = arith.addf %300, %312 : vector<4x256xf32>
    %314 = vector.broadcast %61 : vector<4x1xf32> to vector<4x256xf32>
    %315 = arith.mulf %314, %307 : vector<4x256xf32>
    %316 = arith.addf %303, %315 : vector<4x256xf32>
    %c2_119 = arith.constant 2 : index
    %c0_120 = arith.constant 0 : index
    %c127_121 = arith.constant 127 : index
    %317 = vector.load %arg12[%c2_119, %c0_120, %c127_121] : memref<4x8x512xf32, #tpu.memory_space<vmem>>, vector<1x4x256xf32>
    %318 = vector.shape_cast %317 : vector<1x4x256xf32> to vector<4x256xf32>
    %319 = vector.broadcast %83 : vector<1x256xf32> to vector<4x256xf32>
    %320 = arith.mulf %318, %319 : vector<4x256xf32>
    %321 = vector.broadcast %44 : vector<4x1xf32> to vector<4x256xf32>
    %322 = arith.mulf %321, %320 : vector<4x256xf32>
    %323 = arith.addf %310, %322 : vector<4x256xf32>
    %324 = vector.broadcast %53 : vector<4x1xf32> to vector<4x256xf32>
    %325 = arith.mulf %324, %320 : vector<4x256xf32>
    %326 = arith.addf %313, %325 : vector<4x256xf32>
    %327 = vector.broadcast %62 : vector<4x1xf32> to vector<4x256xf32>
    %328 = arith.mulf %327, %320 : vector<4x256xf32>
    %329 = arith.addf %316, %328 : vector<4x256xf32>
    %c2_122 = arith.constant 2 : index
    %c0_123 = arith.constant 0 : index
    %c128_124 = arith.constant 128 : index
    %330 = vector.load %arg12[%c2_122, %c0_123, %c128_124] : memref<4x8x512xf32, #tpu.memory_space<vmem>>, vector<1x4x256xf32>
    %331 = vector.shape_cast %330 : vector<1x4x256xf32> to vector<4x256xf32>
    %332 = vector.broadcast %45 : vector<4x1xf32> to vector<4x256xf32>
    %333 = arith.mulf %332, %331 : vector<4x256xf32>
    %334 = arith.addf %323, %333 : vector<4x256xf32>
    %335 = vector.broadcast %54 : vector<4x1xf32> to vector<4x256xf32>
    %336 = arith.mulf %335, %331 : vector<4x256xf32>
    %337 = arith.addf %326, %336 : vector<4x256xf32>
    %338 = vector.broadcast %63 : vector<4x1xf32> to vector<4x256xf32>
    %339 = arith.mulf %338, %331 : vector<4x256xf32>
    %340 = arith.addf %329, %339 : vector<4x256xf32>
    %c2_125 = arith.constant 2 : index
    %c0_126 = arith.constant 0 : index
    %c129_127 = arith.constant 129 : index
    %341 = vector.load %arg12[%c2_125, %c0_126, %c129_127] : memref<4x8x512xf32, #tpu.memory_space<vmem>>, vector<1x4x256xf32>
    %342 = vector.shape_cast %341 : vector<1x4x256xf32> to vector<4x256xf32>
    %343 = vector.broadcast %110 : vector<1x256xf32> to vector<4x256xf32>
    %344 = arith.mulf %342, %343 : vector<4x256xf32>
    %345 = vector.broadcast %46 : vector<4x1xf32> to vector<4x256xf32>
    %346 = arith.mulf %345, %344 : vector<4x256xf32>
    %347 = arith.addf %334, %346 : vector<4x256xf32>
    %348 = vector.broadcast %55 : vector<4x1xf32> to vector<4x256xf32>
    %349 = arith.mulf %348, %344 : vector<4x256xf32>
    %350 = arith.addf %337, %349 : vector<4x256xf32>
    %351 = vector.broadcast %64 : vector<4x1xf32> to vector<4x256xf32>
    %352 = arith.mulf %351, %344 : vector<4x256xf32>
    %353 = arith.addf %340, %352 : vector<4x256xf32>
    %c2_128 = arith.constant 2 : index
    %c0_129 = arith.constant 0 : index
    %c143_130 = arith.constant 143 : index
    %354 = vector.load %arg12[%c2_128, %c0_129, %c143_130] : memref<4x8x512xf32, #tpu.memory_space<vmem>>, vector<1x4x256xf32>
    %355 = vector.shape_cast %354 : vector<1x4x256xf32> to vector<4x256xf32>
    %356 = vector.broadcast %83 : vector<1x256xf32> to vector<4x256xf32>
    %357 = arith.mulf %355, %356 : vector<4x256xf32>
    %358 = vector.broadcast %47 : vector<4x1xf32> to vector<4x256xf32>
    %359 = arith.mulf %358, %357 : vector<4x256xf32>
    %360 = arith.addf %347, %359 : vector<4x256xf32>
    %361 = vector.broadcast %56 : vector<4x1xf32> to vector<4x256xf32>
    %362 = arith.mulf %361, %357 : vector<4x256xf32>
    %363 = arith.addf %350, %362 : vector<4x256xf32>
    %364 = vector.broadcast %65 : vector<4x1xf32> to vector<4x256xf32>
    %365 = arith.mulf %364, %357 : vector<4x256xf32>
    %366 = arith.addf %353, %365 : vector<4x256xf32>
    %c2_131 = arith.constant 2 : index
    %c0_132 = arith.constant 0 : index
    %c144_133 = arith.constant 144 : index
    %367 = vector.load %arg12[%c2_131, %c0_132, %c144_133] : memref<4x8x512xf32, #tpu.memory_space<vmem>>, vector<1x4x256xf32>
    %368 = vector.shape_cast %367 : vector<1x4x256xf32> to vector<4x256xf32>
    %369 = vector.broadcast %48 : vector<4x1xf32> to vector<4x256xf32>
    %370 = arith.mulf %369, %368 : vector<4x256xf32>
    %371 = arith.addf %360, %370 : vector<4x256xf32>
    %372 = vector.broadcast %57 : vector<4x1xf32> to vector<4x256xf32>
    %373 = arith.mulf %372, %368 : vector<4x256xf32>
    %374 = arith.addf %363, %373 : vector<4x256xf32>
    %375 = vector.broadcast %66 : vector<4x1xf32> to vector<4x256xf32>
    %376 = arith.mulf %375, %368 : vector<4x256xf32>
    %377 = arith.addf %366, %376 : vector<4x256xf32>
    %c2_134 = arith.constant 2 : index
    %c0_135 = arith.constant 0 : index
    %c145_136 = arith.constant 145 : index
    %378 = vector.load %arg12[%c2_134, %c0_135, %c145_136] : memref<4x8x512xf32, #tpu.memory_space<vmem>>, vector<1x4x256xf32>
    %379 = vector.shape_cast %378 : vector<1x4x256xf32> to vector<4x256xf32>
    %380 = vector.broadcast %110 : vector<1x256xf32> to vector<4x256xf32>
    %381 = arith.mulf %379, %380 : vector<4x256xf32>
    %382 = vector.broadcast %49 : vector<4x1xf32> to vector<4x256xf32>
    %383 = arith.mulf %382, %381 : vector<4x256xf32>
    %384 = arith.addf %371, %383 : vector<4x256xf32>
    %385 = vector.broadcast %58 : vector<4x1xf32> to vector<4x256xf32>
    %386 = arith.mulf %385, %381 : vector<4x256xf32>
    %387 = arith.addf %374, %386 : vector<4x256xf32>
    %388 = vector.broadcast %67 : vector<4x1xf32> to vector<4x256xf32>
    %389 = arith.mulf %388, %381 : vector<4x256xf32>
    %390 = arith.addf %377, %389 : vector<4x256xf32>
    %c3_137 = arith.constant 3 : index
    %c0_138 = arith.constant 0 : index
    %c111_139 = arith.constant 111 : index
    %391 = vector.load %arg12[%c3_137, %c0_138, %c111_139] : memref<4x8x512xf32, #tpu.memory_space<vmem>>, vector<1x4x256xf32>
    %392 = vector.shape_cast %391 : vector<1x4x256xf32> to vector<4x256xf32>
    %393 = vector.broadcast %83 : vector<1x256xf32> to vector<4x256xf32>
    %394 = arith.mulf %392, %393 : vector<4x256xf32>
    %395 = vector.broadcast %50 : vector<4x1xf32> to vector<4x256xf32>
    %396 = arith.mulf %395, %394 : vector<4x256xf32>
    %397 = vector.broadcast %59 : vector<4x1xf32> to vector<4x256xf32>
    %398 = arith.mulf %397, %394 : vector<4x256xf32>
    %c3_140 = arith.constant 3 : index
    %c0_141 = arith.constant 0 : index
    %c112_142 = arith.constant 112 : index
    %399 = vector.load %arg12[%c3_140, %c0_141, %c112_142] : memref<4x8x512xf32, #tpu.memory_space<vmem>>, vector<1x4x256xf32>
    %400 = vector.shape_cast %399 : vector<1x4x256xf32> to vector<4x256xf32>
    %401 = vector.broadcast %51 : vector<4x1xf32> to vector<4x256xf32>
    %402 = arith.mulf %401, %400 : vector<4x256xf32>
    %403 = arith.addf %396, %402 : vector<4x256xf32>
    %404 = vector.broadcast %60 : vector<4x1xf32> to vector<4x256xf32>
    %405 = arith.mulf %404, %400 : vector<4x256xf32>
    %406 = arith.addf %398, %405 : vector<4x256xf32>
    %c3_143 = arith.constant 3 : index
    %c0_144 = arith.constant 0 : index
    %c113_145 = arith.constant 113 : index
    %407 = vector.load %arg12[%c3_143, %c0_144, %c113_145] : memref<4x8x512xf32, #tpu.memory_space<vmem>>, vector<1x4x256xf32>
    %408 = vector.shape_cast %407 : vector<1x4x256xf32> to vector<4x256xf32>
    %409 = vector.broadcast %110 : vector<1x256xf32> to vector<4x256xf32>
    %410 = arith.mulf %408, %409 : vector<4x256xf32>
    %411 = vector.broadcast %52 : vector<4x1xf32> to vector<4x256xf32>
    %412 = arith.mulf %411, %410 : vector<4x256xf32>
    %413 = arith.addf %403, %412 : vector<4x256xf32>
    %414 = vector.broadcast %61 : vector<4x1xf32> to vector<4x256xf32>
    %415 = arith.mulf %414, %410 : vector<4x256xf32>
    %416 = arith.addf %406, %415 : vector<4x256xf32>
    %c3_146 = arith.constant 3 : index
    %c0_147 = arith.constant 0 : index
    %c127_148 = arith.constant 127 : index
    %417 = vector.load %arg12[%c3_146, %c0_147, %c127_148] : memref<4x8x512xf32, #tpu.memory_space<vmem>>, vector<1x4x256xf32>
    %418 = vector.shape_cast %417 : vector<1x4x256xf32> to vector<4x256xf32>
    %419 = vector.broadcast %83 : vector<1x256xf32> to vector<4x256xf32>
    %420 = arith.mulf %418, %419 : vector<4x256xf32>
    %421 = vector.broadcast %53 : vector<4x1xf32> to vector<4x256xf32>
    %422 = arith.mulf %421, %420 : vector<4x256xf32>
    %423 = arith.addf %413, %422 : vector<4x256xf32>
    %424 = vector.broadcast %62 : vector<4x1xf32> to vector<4x256xf32>
    %425 = arith.mulf %424, %420 : vector<4x256xf32>
    %426 = arith.addf %416, %425 : vector<4x256xf32>
    %c3_149 = arith.constant 3 : index
    %c0_150 = arith.constant 0 : index
    %c128_151 = arith.constant 128 : index
    %427 = vector.load %arg12[%c3_149, %c0_150, %c128_151] : memref<4x8x512xf32, #tpu.memory_space<vmem>>, vector<1x4x256xf32>
    %428 = vector.shape_cast %427 : vector<1x4x256xf32> to vector<4x256xf32>
    %429 = vector.broadcast %54 : vector<4x1xf32> to vector<4x256xf32>
    %430 = arith.mulf %429, %428 : vector<4x256xf32>
    %431 = arith.addf %423, %430 : vector<4x256xf32>
    %432 = vector.broadcast %63 : vector<4x1xf32> to vector<4x256xf32>
    %433 = arith.mulf %432, %428 : vector<4x256xf32>
    %434 = arith.addf %426, %433 : vector<4x256xf32>
    %c3_152 = arith.constant 3 : index
    %c0_153 = arith.constant 0 : index
    %c129_154 = arith.constant 129 : index
    %435 = vector.load %arg12[%c3_152, %c0_153, %c129_154] : memref<4x8x512xf32, #tpu.memory_space<vmem>>, vector<1x4x256xf32>
    %436 = vector.shape_cast %435 : vector<1x4x256xf32> to vector<4x256xf32>
    %437 = vector.broadcast %110 : vector<1x256xf32> to vector<4x256xf32>
    %438 = arith.mulf %436, %437 : vector<4x256xf32>
    %439 = vector.broadcast %55 : vector<4x1xf32> to vector<4x256xf32>
    %440 = arith.mulf %439, %438 : vector<4x256xf32>
    %441 = arith.addf %431, %440 : vector<4x256xf32>
    %442 = vector.broadcast %64 : vector<4x1xf32> to vector<4x256xf32>
    %443 = arith.mulf %442, %438 : vector<4x256xf32>
    %444 = arith.addf %434, %443 : vector<4x256xf32>
    %c3_155 = arith.constant 3 : index
    %c0_156 = arith.constant 0 : index
    %c143_157 = arith.constant 143 : index
    %445 = vector.load %arg12[%c3_155, %c0_156, %c143_157] : memref<4x8x512xf32, #tpu.memory_space<vmem>>, vector<1x4x256xf32>
    %446 = vector.shape_cast %445 : vector<1x4x256xf32> to vector<4x256xf32>
    %447 = vector.broadcast %83 : vector<1x256xf32> to vector<4x256xf32>
    %448 = arith.mulf %446, %447 : vector<4x256xf32>
    %449 = vector.broadcast %56 : vector<4x1xf32> to vector<4x256xf32>
    %450 = arith.mulf %449, %448 : vector<4x256xf32>
    %451 = arith.addf %441, %450 : vector<4x256xf32>
    %452 = vector.broadcast %65 : vector<4x1xf32> to vector<4x256xf32>
    %453 = arith.mulf %452, %448 : vector<4x256xf32>
    %454 = arith.addf %444, %453 : vector<4x256xf32>
    %c3_158 = arith.constant 3 : index
    %c0_159 = arith.constant 0 : index
    %c144_160 = arith.constant 144 : index
    %455 = vector.load %arg12[%c3_158, %c0_159, %c144_160] : memref<4x8x512xf32, #tpu.memory_space<vmem>>, vector<1x4x256xf32>
    %456 = vector.shape_cast %455 : vector<1x4x256xf32> to vector<4x256xf32>
    %457 = vector.broadcast %57 : vector<4x1xf32> to vector<4x256xf32>
    %458 = arith.mulf %457, %456 : vector<4x256xf32>
    %459 = arith.addf %451, %458 : vector<4x256xf32>
    %460 = vector.broadcast %66 : vector<4x1xf32> to vector<4x256xf32>
    %461 = arith.mulf %460, %456 : vector<4x256xf32>
    %462 = arith.addf %454, %461 : vector<4x256xf32>
    %c3_161 = arith.constant 3 : index
    %c0_162 = arith.constant 0 : index
    %c145_163 = arith.constant 145 : index
    %463 = vector.load %arg12[%c3_161, %c0_162, %c145_163] : memref<4x8x512xf32, #tpu.memory_space<vmem>>, vector<1x4x256xf32>
    %464 = vector.shape_cast %463 : vector<1x4x256xf32> to vector<4x256xf32>
    %465 = vector.broadcast %110 : vector<1x256xf32> to vector<4x256xf32>
    %466 = arith.mulf %464, %465 : vector<4x256xf32>
    %467 = vector.broadcast %58 : vector<4x1xf32> to vector<4x256xf32>
    %468 = arith.mulf %467, %466 : vector<4x256xf32>
    %469 = arith.addf %459, %468 : vector<4x256xf32>
    %470 = vector.broadcast %67 : vector<4x1xf32> to vector<4x256xf32>
    %471 = arith.mulf %470, %466 : vector<4x256xf32>
    %472 = arith.addf %462, %471 : vector<4x256xf32>
    %473 = arith.addf %70, %174 : vector<4x256xf32>
    %474 = arith.addf %473, %282 : vector<4x256xf32>
    %cst_164 = arith.constant 0.000000e+00 : f32
    %cst_165 = arith.constant 6.000000e+00 : f32
    %475 = vector.broadcast %cst_164 : f32 to vector<4x256xf32>
    %476 = arith.maximumf %475, %474 : vector<4x256xf32>
    %477 = vector.broadcast %cst_165 : f32 to vector<4x256xf32>
    %478 = arith.minimumf %477, %476 : vector<4x256xf32>
    %479 = arith.addf %70, %171 : vector<4x256xf32>
    %480 = arith.addf %479, %279 : vector<4x256xf32>
    %481 = arith.addf %480, %390 : vector<4x256xf32>
    %cst_166 = arith.constant 0.000000e+00 : f32
    %cst_167 = arith.constant 6.000000e+00 : f32
    %482 = vector.broadcast %cst_166 : f32 to vector<4x256xf32>
    %483 = arith.maximumf %482, %481 : vector<4x256xf32>
    %484 = vector.broadcast %cst_167 : f32 to vector<4x256xf32>
    %485 = arith.minimumf %484, %483 : vector<4x256xf32>
    %486 = arith.addf %70, %276 : vector<4x256xf32>
    %487 = arith.addf %486, %387 : vector<4x256xf32>
    %488 = arith.addf %487, %472 : vector<4x256xf32>
    %cst_168 = arith.constant 0.000000e+00 : f32
    %cst_169 = arith.constant 6.000000e+00 : f32
    %489 = vector.broadcast %cst_168 : f32 to vector<4x256xf32>
    %490 = arith.maximumf %489, %488 : vector<4x256xf32>
    %491 = vector.broadcast %cst_169 : f32 to vector<4x256xf32>
    %492 = arith.minimumf %491, %490 : vector<4x256xf32>
    %493 = arith.addf %70, %384 : vector<4x256xf32>
    %494 = arith.addf %493, %469 : vector<4x256xf32>
    %cst_170 = arith.constant 0.000000e+00 : f32
    %cst_171 = arith.constant 6.000000e+00 : f32
    %495 = vector.broadcast %cst_170 : f32 to vector<4x256xf32>
    %496 = arith.maximumf %495, %494 : vector<4x256xf32>
    %497 = vector.broadcast %cst_171 : f32 to vector<4x256xf32>
    %498 = arith.minimumf %497, %496 : vector<4x256xf32>
    %499 = tpu.concatenate %478, %485, %492, %498 in 1 : vector<4x256xf32>, vector<4x256xf32>, vector<4x256xf32>, vector<4x256xf32> -> vector<4x1024xf32>
    %c0_172 = arith.constant 0 : index
    %c0_173 = arith.constant 0 : index
    %500 = vector.load %arg4[%c0_172, %c0_173] : memref<24x4xf32, #tpu.memory_space<vmem>>, vector<24x1xf32>
    %501 = vector.extract_strided_slice %499 {offsets = [0, 0], sizes = [1, 1024], strides = [1, 1]} : vector<4x1024xf32> to vector<1x1024xf32>
    %502 = vector.broadcast %500 : vector<24x1xf32> to vector<24x1024xf32>
    %503 = vector.broadcast %501 : vector<1x1024xf32> to vector<24x1024xf32>
    %504 = arith.mulf %502, %503 : vector<24x1024xf32>
    %c0_174 = arith.constant 0 : index
    %c1_175 = arith.constant 1 : index
    %505 = vector.load %arg4[%c0_174, %c1_175] : memref<24x4xf32, #tpu.memory_space<vmem>>, vector<24x1xf32>
    %506 = vector.extract_strided_slice %499 {offsets = [1, 0], sizes = [1, 1024], strides = [1, 1]} : vector<4x1024xf32> to vector<1x1024xf32>
    %507 = vector.broadcast %505 : vector<24x1xf32> to vector<24x1024xf32>
    %508 = vector.broadcast %506 : vector<1x1024xf32> to vector<24x1024xf32>
    %509 = arith.mulf %507, %508 : vector<24x1024xf32>
    %510 = arith.addf %504, %509 : vector<24x1024xf32>
    %c0_176 = arith.constant 0 : index
    %c2_177 = arith.constant 2 : index
    %511 = vector.load %arg4[%c0_176, %c2_177] : memref<24x4xf32, #tpu.memory_space<vmem>>, vector<24x1xf32>
    %512 = vector.extract_strided_slice %499 {offsets = [2, 0], sizes = [1, 1024], strides = [1, 1]} : vector<4x1024xf32> to vector<1x1024xf32>
    %513 = vector.broadcast %511 : vector<24x1xf32> to vector<24x1024xf32>
    %514 = vector.broadcast %512 : vector<1x1024xf32> to vector<24x1024xf32>
    %515 = arith.mulf %513, %514 : vector<24x1024xf32>
    %516 = arith.addf %510, %515 : vector<24x1024xf32>
    %c0_178 = arith.constant 0 : index
    %c3_179 = arith.constant 3 : index
    %517 = vector.load %arg4[%c0_178, %c3_179] : memref<24x4xf32, #tpu.memory_space<vmem>>, vector<24x1xf32>
    %518 = vector.extract_strided_slice %499 {offsets = [3, 0], sizes = [1, 1024], strides = [1, 1]} : vector<4x1024xf32> to vector<1x1024xf32>
    %519 = vector.broadcast %517 : vector<24x1xf32> to vector<24x1024xf32>
    %520 = vector.broadcast %518 : vector<1x1024xf32> to vector<24x1024xf32>
    %521 = arith.mulf %519, %520 : vector<24x1024xf32>
    %522 = arith.addf %516, %521 : vector<24x1024xf32>
    %c0_180 = arith.constant 0 : index
    %c0_181 = arith.constant 0 : index
    %523 = vector.load %arg5[%c0_180, %c0_181] : memref<24x1xf32, #tpu.memory_space<vmem>>, vector<24x1xf32>
    %524 = vector.broadcast %523 : vector<24x1xf32> to vector<24x1024xf32>
    %525 = arith.addf %522, %524 : vector<24x1024xf32>
    %526 = vector.extract_strided_slice %525 {offsets = [0, 0], sizes = [8, 1024], strides = [1, 1]} : vector<24x1024xf32> to vector<8x1024xf32>
    %527 = arith.negf %526 : vector<8x1024xf32>
    %528 = math.exp %527 : vector<8x1024xf32>
    %cst_182 = arith.constant 1.000000e+00 : f32
    %529 = vector.broadcast %cst_182 : f32 to vector<8x1024xf32>
    %530 = arith.addf %529, %528 : vector<8x1024xf32>
    %531 = arith.divf %529, %530 : vector<8x1024xf32>
    %532 = vector.extract_strided_slice %525 {offsets = [8, 0], sizes = [8, 1024], strides = [1, 1]} : vector<24x1024xf32> to vector<8x1024xf32>
    %533 = arith.negf %532 : vector<8x1024xf32>
    %534 = math.exp %533 : vector<8x1024xf32>
    %cst_183 = arith.constant 1.000000e+00 : f32
    %535 = vector.broadcast %cst_183 : f32 to vector<8x1024xf32>
    %536 = arith.addf %535, %534 : vector<8x1024xf32>
    %537 = arith.divf %535, %536 : vector<8x1024xf32>
    %538 = vector.extract_strided_slice %525 {offsets = [16, 0], sizes = [8, 1024], strides = [1, 1]} : vector<24x1024xf32> to vector<8x1024xf32>
    %539 = math.tanh %538 : vector<8x1024xf32>
    %540 = arith.mulf %531, %539 : vector<8x1024xf32>
    %541 = math.tanh %540 : vector<8x1024xf32>
    %542 = arith.mulf %537, %541 : vector<8x1024xf32>
    %543 = vector.extract_strided_slice %542 {offsets = [0, 0], sizes = [8, 256], strides = [1, 1]} : vector<8x1024xf32> to vector<8x256xf32>
    %c0_184 = arith.constant 0 : index
    %c0_185 = arith.constant 0 : index
    %c128_186 = arith.constant 128 : index
    %544 = vector.load %arg12[%c0_184, %c0_185, %c128_186] : memref<4x8x512xf32, #tpu.memory_space<vmem>>, vector<1x8x256xf32>
    %545 = vector.shape_cast %544 : vector<1x8x256xf32> to vector<8x256xf32>
    %546 = vector.shape_cast %543 : vector<8x256xf32> to vector<1x8x256xf32>
    tpu.vector_store %arg12[%c0_184, %c0_185, %c128_186], %546 {strides = array<i32>} : memref<4x8x512xf32, #tpu.memory_space<vmem>>, vector<1x8x256xf32>,
    %547 = vector.extract_strided_slice %542 {offsets = [0, 256], sizes = [8, 256], strides = [1, 1]} : vector<8x1024xf32> to vector<8x256xf32>
    %c1_187 = arith.constant 1 : index
    %c0_188 = arith.constant 0 : index
    %c128_189 = arith.constant 128 : index
    %548 = vector.load %arg12[%c1_187, %c0_188, %c128_189] : memref<4x8x512xf32, #tpu.memory_space<vmem>>, vector<1x8x256xf32>
    %549 = vector.shape_cast %548 : vector<1x8x256xf32> to vector<8x256xf32>
    %550 = vector.shape_cast %547 : vector<8x256xf32> to vector<1x8x256xf32>
    tpu.vector_store %arg12[%c1_187, %c0_188, %c128_189], %550 {strides = array<i32>} : memref<4x8x512xf32, #tpu.memory_space<vmem>>, vector<1x8x256xf32>,
    %551 = vector.extract_strided_slice %542 {offsets = [0, 512], sizes = [8, 256], strides = [1, 1]} : vector<8x1024xf32> to vector<8x256xf32>
    %c2_190 = arith.constant 2 : index
    %c0_191 = arith.constant 0 : index
    %c128_192 = arith.constant 128 : index
    %552 = vector.load %arg12[%c2_190, %c0_191, %c128_192] : memref<4x8x512xf32, #tpu.memory_space<vmem>>, vector<1x8x256xf32>
    %553 = vector.shape_cast %552 : vector<1x8x256xf32> to vector<8x256xf32>
    %554 = vector.shape_cast %551 : vector<8x256xf32> to vector<1x8x256xf32>
    tpu.vector_store %arg12[%c2_190, %c0_191, %c128_192], %554 {strides = array<i32>} : memref<4x8x512xf32, #tpu.memory_space<vmem>>, vector<1x8x256xf32>,
    %555 = vector.extract_strided_slice %542 {offsets = [0, 768], sizes = [8, 256], strides = [1, 1]} : vector<8x1024xf32> to vector<8x256xf32>
    %c3_193 = arith.constant 3 : index
    %c0_194 = arith.constant 0 : index
    %c128_195 = arith.constant 128 : index
    %556 = vector.load %arg12[%c3_193, %c0_194, %c128_195] : memref<4x8x512xf32, #tpu.memory_space<vmem>>, vector<1x8x256xf32>
    %557 = vector.shape_cast %556 : vector<1x8x256xf32> to vector<8x256xf32>
    %558 = vector.shape_cast %555 : vector<8x256xf32> to vector<1x8x256xf32>
    tpu.vector_store %arg12[%c3_193, %c0_194, %c128_195], %558 {strides = array<i32>} : memref<4x8x512xf32, #tpu.memory_space<vmem>>, vector<1x8x256xf32>,
    %c0_196 = arith.constant 0 : index
    %c0_197 = arith.constant 0 : index
    %559 = vector.load %arg6[%c0_196, %c0_197] : memref<8x27xf32, #tpu.memory_space<vmem>>, vector<8x1xf32>
    %c0_198 = arith.constant 0 : index
    %c1_199 = arith.constant 1 : index
    %560 = vector.load %arg6[%c0_198, %c1_199] : memref<8x27xf32, #tpu.memory_space<vmem>>, vector<8x1xf32>
    %c0_200 = arith.constant 0 : index
    %c2_201 = arith.constant 2 : index
    %561 = vector.load %arg6[%c0_200, %c2_201] : memref<8x27xf32, #tpu.memory_space<vmem>>, vector<8x1xf32>
    %c0_202 = arith.constant 0 : index
    %c3_203 = arith.constant 3 : index
    %562 = vector.load %arg6[%c0_202, %c3_203] : memref<8x27xf32, #tpu.memory_space<vmem>>, vector<8x1xf32>
    %c0_204 = arith.constant 0 : index
    %c4_205 = arith.constant 4 : index
    %563 = vector.load %arg6[%c0_204, %c4_205] : memref<8x27xf32, #tpu.memory_space<vmem>>, vector<8x1xf32>
    %c0_206 = arith.constant 0 : index
    %c5_207 = arith.constant 5 : index
    %564 = vector.load %arg6[%c0_206, %c5_207] : memref<8x27xf32, #tpu.memory_space<vmem>>, vector<8x1xf32>
    %c0_208 = arith.constant 0 : index
    %c6_209 = arith.constant 6 : index
    %565 = vector.load %arg6[%c0_208, %c6_209] : memref<8x27xf32, #tpu.memory_space<vmem>>, vector<8x1xf32>
    %c0_210 = arith.constant 0 : index
    %c7_211 = arith.constant 7 : index
    %566 = vector.load %arg6[%c0_210, %c7_211] : memref<8x27xf32, #tpu.memory_space<vmem>>, vector<8x1xf32>
    %c0_212 = arith.constant 0 : index
    %c8_213 = arith.constant 8 : index
    %567 = vector.load %arg6[%c0_212, %c8_213] : memref<8x27xf32, #tpu.memory_space<vmem>>, vector<8x1xf32>
    %c0_214 = arith.constant 0 : index
    %c9_215 = arith.constant 9 : index
    %568 = vector.load %arg6[%c0_214, %c9_215] : memref<8x27xf32, #tpu.memory_space<vmem>>, vector<8x1xf32>
    %c0_216 = arith.constant 0 : index
    %c10_217 = arith.constant 10 : index
    %569 = vector.load %arg6[%c0_216, %c10_217] : memref<8x27xf32, #tpu.memory_space<vmem>>, vector<8x1xf32>
    %c0_218 = arith.constant 0 : index
    %c11_219 = arith.constant 11 : index
    %570 = vector.load %arg6[%c0_218, %c11_219] : memref<8x27xf32, #tpu.memory_space<vmem>>, vector<8x1xf32>
    %c0_220 = arith.constant 0 : index
    %c12_221 = arith.constant 12 : index
    %571 = vector.load %arg6[%c0_220, %c12_221] : memref<8x27xf32, #tpu.memory_space<vmem>>, vector<8x1xf32>
    %c0_222 = arith.constant 0 : index
    %c13_223 = arith.constant 13 : index
    %572 = vector.load %arg6[%c0_222, %c13_223] : memref<8x27xf32, #tpu.memory_space<vmem>>, vector<8x1xf32>
    %c0_224 = arith.constant 0 : index
    %c14_225 = arith.constant 14 : index
    %573 = vector.load %arg6[%c0_224, %c14_225] : memref<8x27xf32, #tpu.memory_space<vmem>>, vector<8x1xf32>
    %c0_226 = arith.constant 0 : index
    %c15_227 = arith.constant 15 : index
    %574 = vector.load %arg6[%c0_226, %c15_227] : memref<8x27xf32, #tpu.memory_space<vmem>>, vector<8x1xf32>
    %c0_228 = arith.constant 0 : index
    %c16_229 = arith.constant 16 : index
    %575 = vector.load %arg6[%c0_228, %c16_229] : memref<8x27xf32, #tpu.memory_space<vmem>>, vector<8x1xf32>
    %c0_230 = arith.constant 0 : index
    %c17_231 = arith.constant 17 : index
    %576 = vector.load %arg6[%c0_230, %c17_231] : memref<8x27xf32, #tpu.memory_space<vmem>>, vector<8x1xf32>
    %c0_232 = arith.constant 0 : index
    %c18_233 = arith.constant 18 : index
    %577 = vector.load %arg6[%c0_232, %c18_233] : memref<8x27xf32, #tpu.memory_space<vmem>>, vector<8x1xf32>
    %c0_234 = arith.constant 0 : index
    %c19_235 = arith.constant 19 : index
    %578 = vector.load %arg6[%c0_234, %c19_235] : memref<8x27xf32, #tpu.memory_space<vmem>>, vector<8x1xf32>
    %c0_236 = arith.constant 0 : index
    %c20_237 = arith.constant 20 : index
    %579 = vector.load %arg6[%c0_236, %c20_237] : memref<8x27xf32, #tpu.memory_space<vmem>>, vector<8x1xf32>
    %c0_238 = arith.constant 0 : index
    %c21_239 = arith.constant 21 : index
    %580 = vector.load %arg6[%c0_238, %c21_239] : memref<8x27xf32, #tpu.memory_space<vmem>>, vector<8x1xf32>
    %c0_240 = arith.constant 0 : index
    %c22_241 = arith.constant 22 : index
    %581 = vector.load %arg6[%c0_240, %c22_241] : memref<8x27xf32, #tpu.memory_space<vmem>>, vector<8x1xf32>
    %c0_242 = arith.constant 0 : index
    %c23_243 = arith.constant 23 : index
    %582 = vector.load %arg6[%c0_242, %c23_243] : memref<8x27xf32, #tpu.memory_space<vmem>>, vector<8x1xf32>
    %c0_244 = arith.constant 0 : index
    %c24_245 = arith.constant 24 : index
    %583 = vector.load %arg6[%c0_244, %c24_245] : memref<8x27xf32, #tpu.memory_space<vmem>>, vector<8x1xf32>
    %c0_246 = arith.constant 0 : index
    %c25_247 = arith.constant 25 : index
    %584 = vector.load %arg6[%c0_246, %c25_247] : memref<8x27xf32, #tpu.memory_space<vmem>>, vector<8x1xf32>
    %c0_248 = arith.constant 0 : index
    %c26_249 = arith.constant 26 : index
    %585 = vector.load %arg6[%c0_248, %c26_249] : memref<8x27xf32, #tpu.memory_space<vmem>>, vector<8x1xf32>
    %c0_250 = arith.constant 0 : index
    %c0_251 = arith.constant 0 : index
    %586 = vector.load %arg7[%c0_250, %c0_251] : memref<8x1xf32, #tpu.memory_space<vmem>>, vector<8x1xf32>
    %587 = vector.shape_cast %586 : vector<8x1xf32> to vector<8x1xf32>
    %588 = vector.broadcast %587 : vector<8x1xf32> to vector<8x256xf32>
    %c0_252 = arith.constant 0 : index
    %c0_253 = arith.constant 0 : index
    %c111_254 = arith.constant 111 : index
    %589 = vector.load %arg12[%c0_252, %c0_253, %c111_254] : memref<4x8x512xf32, #tpu.memory_space<vmem>>, vector<1x8x256xf32>
    %590 = vector.shape_cast %589 : vector<1x8x256xf32> to vector<8x256xf32>
    %591 = vector.broadcast %83 : vector<1x256xf32> to vector<8x256xf32>
    %592 = arith.mulf %590, %591 : vector<8x256xf32>
    %593 = vector.broadcast %559 : vector<8x1xf32> to vector<8x256xf32>
    %594 = arith.mulf %593, %592 : vector<8x256xf32>
    %595 = vector.broadcast %568 : vector<8x1xf32> to vector<8x256xf32>
    %596 = arith.mulf %595, %592 : vector<8x256xf32>
    %c0_255 = arith.constant 0 : index
    %c0_256 = arith.constant 0 : index
    %c112_257 = arith.constant 112 : index
    %597 = vector.load %arg12[%c0_255, %c0_256, %c112_257] : memref<4x8x512xf32, #tpu.memory_space<vmem>>, vector<1x8x256xf32>
    %598 = vector.shape_cast %597 : vector<1x8x256xf32> to vector<8x256xf32>
    %599 = vector.broadcast %560 : vector<8x1xf32> to vector<8x256xf32>
    %600 = arith.mulf %599, %598 : vector<8x256xf32>
    %601 = arith.addf %594, %600 : vector<8x256xf32>
    %602 = vector.broadcast %569 : vector<8x1xf32> to vector<8x256xf32>
    %603 = arith.mulf %602, %598 : vector<8x256xf32>
    %604 = arith.addf %596, %603 : vector<8x256xf32>
    %c0_258 = arith.constant 0 : index
    %c0_259 = arith.constant 0 : index
    %c113_260 = arith.constant 113 : index
    %605 = vector.load %arg12[%c0_258, %c0_259, %c113_260] : memref<4x8x512xf32, #tpu.memory_space<vmem>>, vector<1x8x256xf32>
    %606 = vector.shape_cast %605 : vector<1x8x256xf32> to vector<8x256xf32>
    %607 = vector.broadcast %110 : vector<1x256xf32> to vector<8x256xf32>
    %608 = arith.mulf %606, %607 : vector<8x256xf32>
    %609 = vector.broadcast %561 : vector<8x1xf32> to vector<8x256xf32>
    %610 = arith.mulf %609, %608 : vector<8x256xf32>
    %611 = arith.addf %601, %610 : vector<8x256xf32>
    %612 = vector.broadcast %570 : vector<8x1xf32> to vector<8x256xf32>
    %613 = arith.mulf %612, %608 : vector<8x256xf32>
    %614 = arith.addf %604, %613 : vector<8x256xf32>
    %c0_261 = arith.constant 0 : index
    %c0_262 = arith.constant 0 : index
    %c127_263 = arith.constant 127 : index
    %615 = vector.load %arg12[%c0_261, %c0_262, %c127_263] : memref<4x8x512xf32, #tpu.memory_space<vmem>>, vector<1x8x256xf32>
    %616 = vector.shape_cast %615 : vector<1x8x256xf32> to vector<8x256xf32>
    %617 = vector.broadcast %83 : vector<1x256xf32> to vector<8x256xf32>
    %618 = arith.mulf %616, %617 : vector<8x256xf32>
    %619 = vector.broadcast %562 : vector<8x1xf32> to vector<8x256xf32>
    %620 = arith.mulf %619, %618 : vector<8x256xf32>
    %621 = arith.addf %611, %620 : vector<8x256xf32>
    %622 = vector.broadcast %571 : vector<8x1xf32> to vector<8x256xf32>
    %623 = arith.mulf %622, %618 : vector<8x256xf32>
    %624 = arith.addf %614, %623 : vector<8x256xf32>
    %c0_264 = arith.constant 0 : index
    %c0_265 = arith.constant 0 : index
    %c128_266 = arith.constant 128 : index
    %625 = vector.load %arg12[%c0_264, %c0_265, %c128_266] : memref<4x8x512xf32, #tpu.memory_space<vmem>>, vector<1x8x256xf32>
    %626 = vector.shape_cast %625 : vector<1x8x256xf32> to vector<8x256xf32>
    %627 = vector.broadcast %563 : vector<8x1xf32> to vector<8x256xf32>
    %628 = arith.mulf %627, %626 : vector<8x256xf32>
    %629 = arith.addf %621, %628 : vector<8x256xf32>
    %630 = vector.broadcast %572 : vector<8x1xf32> to vector<8x256xf32>
    %631 = arith.mulf %630, %626 : vector<8x256xf32>
    %632 = arith.addf %624, %631 : vector<8x256xf32>
    %c0_267 = arith.constant 0 : index
    %c0_268 = arith.constant 0 : index
    %c129_269 = arith.constant 129 : index
    %633 = vector.load %arg12[%c0_267, %c0_268, %c129_269] : memref<4x8x512xf32, #tpu.memory_space<vmem>>, vector<1x8x256xf32>
    %634 = vector.shape_cast %633 : vector<1x8x256xf32> to vector<8x256xf32>
    %635 = vector.broadcast %110 : vector<1x256xf32> to vector<8x256xf32>
    %636 = arith.mulf %634, %635 : vector<8x256xf32>
    %637 = vector.broadcast %564 : vector<8x1xf32> to vector<8x256xf32>
    %638 = arith.mulf %637, %636 : vector<8x256xf32>
    %639 = arith.addf %629, %638 : vector<8x256xf32>
    %640 = vector.broadcast %573 : vector<8x1xf32> to vector<8x256xf32>
    %641 = arith.mulf %640, %636 : vector<8x256xf32>
    %642 = arith.addf %632, %641 : vector<8x256xf32>
    %c0_270 = arith.constant 0 : index
    %c0_271 = arith.constant 0 : index
    %c143_272 = arith.constant 143 : index
    %643 = vector.load %arg12[%c0_270, %c0_271, %c143_272] : memref<4x8x512xf32, #tpu.memory_space<vmem>>, vector<1x8x256xf32>
    %644 = vector.shape_cast %643 : vector<1x8x256xf32> to vector<8x256xf32>
    %645 = vector.broadcast %83 : vector<1x256xf32> to vector<8x256xf32>
    %646 = arith.mulf %644, %645 : vector<8x256xf32>
    %647 = vector.broadcast %565 : vector<8x1xf32> to vector<8x256xf32>
    %648 = arith.mulf %647, %646 : vector<8x256xf32>
    %649 = arith.addf %639, %648 : vector<8x256xf32>
    %650 = vector.broadcast %574 : vector<8x1xf32> to vector<8x256xf32>
    %651 = arith.mulf %650, %646 : vector<8x256xf32>
    %652 = arith.addf %642, %651 : vector<8x256xf32>
    %c0_273 = arith.constant 0 : index
    %c0_274 = arith.constant 0 : index
    %c144_275 = arith.constant 144 : index
    %653 = vector.load %arg12[%c0_273, %c0_274, %c144_275] : memref<4x8x512xf32, #tpu.memory_space<vmem>>, vector<1x8x256xf32>
    %654 = vector.shape_cast %653 : vector<1x8x256xf32> to vector<8x256xf32>
    %655 = vector.broadcast %566 : vector<8x1xf32> to vector<8x256xf32>
    %656 = arith.mulf %655, %654 : vector<8x256xf32>
    %657 = arith.addf %649, %656 : vector<8x256xf32>
    %658 = vector.broadcast %575 : vector<8x1xf32> to vector<8x256xf32>
    %659 = arith.mulf %658, %654 : vector<8x256xf32>
    %660 = arith.addf %652, %659 : vector<8x256xf32>
    %c0_276 = arith.constant 0 : index
    %c0_277 = arith.constant 0 : index
    %c145_278 = arith.constant 145 : index
    %661 = vector.load %arg12[%c0_276, %c0_277, %c145_278] : memref<4x8x512xf32, #tpu.memory_space<vmem>>, vector<1x8x256xf32>
    %662 = vector.shape_cast %661 : vector<1x8x256xf32> to vector<8x256xf32>
    %663 = vector.broadcast %110 : vector<1x256xf32> to vector<8x256xf32>
    %664 = arith.mulf %662, %663 : vector<8x256xf32>
    %665 = vector.broadcast %567 : vector<8x1xf32> to vector<8x256xf32>
    %666 = arith.mulf %665, %664 : vector<8x256xf32>
    %667 = arith.addf %657, %666 : vector<8x256xf32>
    %668 = vector.broadcast %576 : vector<8x1xf32> to vector<8x256xf32>
    %669 = arith.mulf %668, %664 : vector<8x256xf32>
    %670 = arith.addf %660, %669 : vector<8x256xf32>
    %c1_279 = arith.constant 1 : index
    %c0_280 = arith.constant 0 : index
    %c111_281 = arith.constant 111 : index
    %671 = vector.load %arg12[%c1_279, %c0_280, %c111_281] : memref<4x8x512xf32, #tpu.memory_space<vmem>>, vector<1x8x256xf32>
    %672 = vector.shape_cast %671 : vector<1x8x256xf32> to vector<8x256xf32>
    %673 = vector.broadcast %83 : vector<1x256xf32> to vector<8x256xf32>
    %674 = arith.mulf %672, %673 : vector<8x256xf32>
    %675 = vector.broadcast %559 : vector<8x1xf32> to vector<8x256xf32>
    %676 = arith.mulf %675, %674 : vector<8x256xf32>
    %677 = vector.broadcast %568 : vector<8x1xf32> to vector<8x256xf32>
    %678 = arith.mulf %677, %674 : vector<8x256xf32>
    %679 = vector.broadcast %577 : vector<8x1xf32> to vector<8x256xf32>
    %680 = arith.mulf %679, %674 : vector<8x256xf32>
    %c1_282 = arith.constant 1 : index
    %c0_283 = arith.constant 0 : index
    %c112_284 = arith.constant 112 : index
    %681 = vector.load %arg12[%c1_282, %c0_283, %c112_284] : memref<4x8x512xf32, #tpu.memory_space<vmem>>, vector<1x8x256xf32>
    %682 = vector.shape_cast %681 : vector<1x8x256xf32> to vector<8x256xf32>
    %683 = vector.broadcast %560 : vector<8x1xf32> to vector<8x256xf32>
    %684 = arith.mulf %683, %682 : vector<8x256xf32>
    %685 = arith.addf %676, %684 : vector<8x256xf32>
    %686 = vector.broadcast %569 : vector<8x1xf32> to vector<8x256xf32>
    %687 = arith.mulf %686, %682 : vector<8x256xf32>
    %688 = arith.addf %678, %687 : vector<8x256xf32>
    %689 = vector.broadcast %578 : vector<8x1xf32> to vector<8x256xf32>
    %690 = arith.mulf %689, %682 : vector<8x256xf32>
    %691 = arith.addf %680, %690 : vector<8x256xf32>
    %c1_285 = arith.constant 1 : index
    %c0_286 = arith.constant 0 : index
    %c113_287 = arith.constant 113 : index
    %692 = vector.load %arg12[%c1_285, %c0_286, %c113_287] : memref<4x8x512xf32, #tpu.memory_space<vmem>>, vector<1x8x256xf32>
    %693 = vector.shape_cast %692 : vector<1x8x256xf32> to vector<8x256xf32>
    %694 = vector.broadcast %110 : vector<1x256xf32> to vector<8x256xf32>
    %695 = arith.mulf %693, %694 : vector<8x256xf32>
    %696 = vector.broadcast %561 : vector<8x1xf32> to vector<8x256xf32>
    %697 = arith.mulf %696, %695 : vector<8x256xf32>
    %698 = arith.addf %685, %697 : vector<8x256xf32>
    %699 = vector.broadcast %570 : vector<8x1xf32> to vector<8x256xf32>
    %700 = arith.mulf %699, %695 : vector<8x256xf32>
    %701 = arith.addf %688, %700 : vector<8x256xf32>
    %702 = vector.broadcast %579 : vector<8x1xf32> to vector<8x256xf32>
    %703 = arith.mulf %702, %695 : vector<8x256xf32>
    %704 = arith.addf %691, %703 : vector<8x256xf32>
    %c1_288 = arith.constant 1 : index
    %c0_289 = arith.constant 0 : index
    %c127_290 = arith.constant 127 : index
    %705 = vector.load %arg12[%c1_288, %c0_289, %c127_290] : memref<4x8x512xf32, #tpu.memory_space<vmem>>, vector<1x8x256xf32>
    %706 = vector.shape_cast %705 : vector<1x8x256xf32> to vector<8x256xf32>
    %707 = vector.broadcast %83 : vector<1x256xf32> to vector<8x256xf32>
    %708 = arith.mulf %706, %707 : vector<8x256xf32>
    %709 = vector.broadcast %562 : vector<8x1xf32> to vector<8x256xf32>
    %710 = arith.mulf %709, %708 : vector<8x256xf32>
    %711 = arith.addf %698, %710 : vector<8x256xf32>
    %712 = vector.broadcast %571 : vector<8x1xf32> to vector<8x256xf32>
    %713 = arith.mulf %712, %708 : vector<8x256xf32>
    %714 = arith.addf %701, %713 : vector<8x256xf32>
    %715 = vector.broadcast %580 : vector<8x1xf32> to vector<8x256xf32>
    %716 = arith.mulf %715, %708 : vector<8x256xf32>
    %717 = arith.addf %704, %716 : vector<8x256xf32>
    %c1_291 = arith.constant 1 : index
    %c0_292 = arith.constant 0 : index
    %c128_293 = arith.constant 128 : index
    %718 = vector.load %arg12[%c1_291, %c0_292, %c128_293] : memref<4x8x512xf32, #tpu.memory_space<vmem>>, vector<1x8x256xf32>
    %719 = vector.shape_cast %718 : vector<1x8x256xf32> to vector<8x256xf32>
    %720 = vector.broadcast %563 : vector<8x1xf32> to vector<8x256xf32>
    %721 = arith.mulf %720, %719 : vector<8x256xf32>
    %722 = arith.addf %711, %721 : vector<8x256xf32>
    %723 = vector.broadcast %572 : vector<8x1xf32> to vector<8x256xf32>
    %724 = arith.mulf %723, %719 : vector<8x256xf32>
    %725 = arith.addf %714, %724 : vector<8x256xf32>
    %726 = vector.broadcast %581 : vector<8x1xf32> to vector<8x256xf32>
    %727 = arith.mulf %726, %719 : vector<8x256xf32>
    %728 = arith.addf %717, %727 : vector<8x256xf32>
    %c1_294 = arith.constant 1 : index
    %c0_295 = arith.constant 0 : index
    %c129_296 = arith.constant 129 : index
    %729 = vector.load %arg12[%c1_294, %c0_295, %c129_296] : memref<4x8x512xf32, #tpu.memory_space<vmem>>, vector<1x8x256xf32>
    %730 = vector.shape_cast %729 : vector<1x8x256xf32> to vector<8x256xf32>
    %731 = vector.broadcast %110 : vector<1x256xf32> to vector<8x256xf32>
    %732 = arith.mulf %730, %731 : vector<8x256xf32>
    %733 = vector.broadcast %564 : vector<8x1xf32> to vector<8x256xf32>
    %734 = arith.mulf %733, %732 : vector<8x256xf32>
    %735 = arith.addf %722, %734 : vector<8x256xf32>
    %736 = vector.broadcast %573 : vector<8x1xf32> to vector<8x256xf32>
    %737 = arith.mulf %736, %732 : vector<8x256xf32>
    %738 = arith.addf %725, %737 : vector<8x256xf32>
    %739 = vector.broadcast %582 : vector<8x1xf32> to vector<8x256xf32>
    %740 = arith.mulf %739, %732 : vector<8x256xf32>
    %741 = arith.addf %728, %740 : vector<8x256xf32>
    %c1_297 = arith.constant 1 : index
    %c0_298 = arith.constant 0 : index
    %c143_299 = arith.constant 143 : index
    %742 = vector.load %arg12[%c1_297, %c0_298, %c143_299] : memref<4x8x512xf32, #tpu.memory_space<vmem>>, vector<1x8x256xf32>
    %743 = vector.shape_cast %742 : vector<1x8x256xf32> to vector<8x256xf32>
    %744 = vector.broadcast %83 : vector<1x256xf32> to vector<8x256xf32>
    %745 = arith.mulf %743, %744 : vector<8x256xf32>
    %746 = vector.broadcast %565 : vector<8x1xf32> to vector<8x256xf32>
    %747 = arith.mulf %746, %745 : vector<8x256xf32>
    %748 = arith.addf %735, %747 : vector<8x256xf32>
    %749 = vector.broadcast %574 : vector<8x1xf32> to vector<8x256xf32>
    %750 = arith.mulf %749, %745 : vector<8x256xf32>
    %751 = arith.addf %738, %750 : vector<8x256xf32>
    %752 = vector.broadcast %583 : vector<8x1xf32> to vector<8x256xf32>
    %753 = arith.mulf %752, %745 : vector<8x256xf32>
    %754 = arith.addf %741, %753 : vector<8x256xf32>
    %c1_300 = arith.constant 1 : index
    %c0_301 = arith.constant 0 : index
    %c144_302 = arith.constant 144 : index
    %755 = vector.load %arg12[%c1_300, %c0_301, %c144_302] : memref<4x8x512xf32, #tpu.memory_space<vmem>>, vector<1x8x256xf32>
    %756 = vector.shape_cast %755 : vector<1x8x256xf32> to vector<8x256xf32>
    %757 = vector.broadcast %566 : vector<8x1xf32> to vector<8x256xf32>
    %758 = arith.mulf %757, %756 : vector<8x256xf32>
    %759 = arith.addf %748, %758 : vector<8x256xf32>
    %760 = vector.broadcast %575 : vector<8x1xf32> to vector<8x256xf32>
    %761 = arith.mulf %760, %756 : vector<8x256xf32>
    %762 = arith.addf %751, %761 : vector<8x256xf32>
    %763 = vector.broadcast %584 : vector<8x1xf32> to vector<8x256xf32>
    %764 = arith.mulf %763, %756 : vector<8x256xf32>
    %765 = arith.addf %754, %764 : vector<8x256xf32>
    %c1_303 = arith.constant 1 : index
    %c0_304 = arith.constant 0 : index
    %c145_305 = arith.constant 145 : index
    %766 = vector.load %arg12[%c1_303, %c0_304, %c145_305] : memref<4x8x512xf32, #tpu.memory_space<vmem>>, vector<1x8x256xf32>
    %767 = vector.shape_cast %766 : vector<1x8x256xf32> to vector<8x256xf32>
    %768 = vector.broadcast %110 : vector<1x256xf32> to vector<8x256xf32>
    %769 = arith.mulf %767, %768 : vector<8x256xf32>
    %770 = vector.broadcast %567 : vector<8x1xf32> to vector<8x256xf32>
    %771 = arith.mulf %770, %769 : vector<8x256xf32>
    %772 = arith.addf %759, %771 : vector<8x256xf32>
    %773 = vector.broadcast %576 : vector<8x1xf32> to vector<8x256xf32>
    %774 = arith.mulf %773, %769 : vector<8x256xf32>
    %775 = arith.addf %762, %774 : vector<8x256xf32>
    %776 = vector.broadcast %585 : vector<8x1xf32> to vector<8x256xf32>
    %777 = arith.mulf %776, %769 : vector<8x256xf32>
    %778 = arith.addf %765, %777 : vector<8x256xf32>
    %c2_306 = arith.constant 2 : index
    %c0_307 = arith.constant 0 : index
    %c111_308 = arith.constant 111 : index
    %779 = vector.load %arg12[%c2_306, %c0_307, %c111_308] : memref<4x8x512xf32, #tpu.memory_space<vmem>>, vector<1x8x256xf32>
    %780 = vector.shape_cast %779 : vector<1x8x256xf32> to vector<8x256xf32>
    %781 = vector.broadcast %83 : vector<1x256xf32> to vector<8x256xf32>
    %782 = arith.mulf %780, %781 : vector<8x256xf32>
    %783 = vector.broadcast %559 : vector<8x1xf32> to vector<8x256xf32>
    %784 = arith.mulf %783, %782 : vector<8x256xf32>
    %785 = vector.broadcast %568 : vector<8x1xf32> to vector<8x256xf32>
    %786 = arith.mulf %785, %782 : vector<8x256xf32>
    %787 = vector.broadcast %577 : vector<8x1xf32> to vector<8x256xf32>
    %788 = arith.mulf %787, %782 : vector<8x256xf32>
    %c2_309 = arith.constant 2 : index
    %c0_310 = arith.constant 0 : index
    %c112_311 = arith.constant 112 : index
    %789 = vector.load %arg12[%c2_309, %c0_310, %c112_311] : memref<4x8x512xf32, #tpu.memory_space<vmem>>, vector<1x8x256xf32>
    %790 = vector.shape_cast %789 : vector<1x8x256xf32> to vector<8x256xf32>
    %791 = vector.broadcast %560 : vector<8x1xf32> to vector<8x256xf32>
    %792 = arith.mulf %791, %790 : vector<8x256xf32>
    %793 = arith.addf %784, %792 : vector<8x256xf32>
    %794 = vector.broadcast %569 : vector<8x1xf32> to vector<8x256xf32>
    %795 = arith.mulf %794, %790 : vector<8x256xf32>
    %796 = arith.addf %786, %795 : vector<8x256xf32>
    %797 = vector.broadcast %578 : vector<8x1xf32> to vector<8x256xf32>
    %798 = arith.mulf %797, %790 : vector<8x256xf32>
    %799 = arith.addf %788, %798 : vector<8x256xf32>
    %c2_312 = arith.constant 2 : index
    %c0_313 = arith.constant 0 : index
    %c113_314 = arith.constant 113 : index
    %800 = vector.load %arg12[%c2_312, %c0_313, %c113_314] : memref<4x8x512xf32, #tpu.memory_space<vmem>>, vector<1x8x256xf32>
    %801 = vector.shape_cast %800 : vector<1x8x256xf32> to vector<8x256xf32>
    %802 = vector.broadcast %110 : vector<1x256xf32> to vector<8x256xf32>
    %803 = arith.mulf %801, %802 : vector<8x256xf32>
    %804 = vector.broadcast %561 : vector<8x1xf32> to vector<8x256xf32>
    %805 = arith.mulf %804, %803 : vector<8x256xf32>
    %806 = arith.addf %793, %805 : vector<8x256xf32>
    %807 = vector.broadcast %570 : vector<8x1xf32> to vector<8x256xf32>
    %808 = arith.mulf %807, %803 : vector<8x256xf32>
    %809 = arith.addf %796, %808 : vector<8x256xf32>
    %810 = vector.broadcast %579 : vector<8x1xf32> to vector<8x256xf32>
    %811 = arith.mulf %810, %803 : vector<8x256xf32>
    %812 = arith.addf %799, %811 : vector<8x256xf32>
    %c2_315 = arith.constant 2 : index
    %c0_316 = arith.constant 0 : index
    %c127_317 = arith.constant 127 : index
    %813 = vector.load %arg12[%c2_315, %c0_316, %c127_317] : memref<4x8x512xf32, #tpu.memory_space<vmem>>, vector<1x8x256xf32>
    %814 = vector.shape_cast %813 : vector<1x8x256xf32> to vector<8x256xf32>
    %815 = vector.broadcast %83 : vector<1x256xf32> to vector<8x256xf32>
    %816 = arith.mulf %814, %815 : vector<8x256xf32>
    %817 = vector.broadcast %562 : vector<8x1xf32> to vector<8x256xf32>
    %818 = arith.mulf %817, %816 : vector<8x256xf32>
    %819 = arith.addf %806, %818 : vector<8x256xf32>
    %820 = vector.broadcast %571 : vector<8x1xf32> to vector<8x256xf32>
    %821 = arith.mulf %820, %816 : vector<8x256xf32>
    %822 = arith.addf %809, %821 : vector<8x256xf32>
    %823 = vector.broadcast %580 : vector<8x1xf32> to vector<8x256xf32>
    %824 = arith.mulf %823, %816 : vector<8x256xf32>
    %825 = arith.addf %812, %824 : vector<8x256xf32>
    %c2_318 = arith.constant 2 : index
    %c0_319 = arith.constant 0 : index
    %c128_320 = arith.constant 128 : index
    %826 = vector.load %arg12[%c2_318, %c0_319, %c128_320] : memref<4x8x512xf32, #tpu.memory_space<vmem>>, vector<1x8x256xf32>
    %827 = vector.shape_cast %826 : vector<1x8x256xf32> to vector<8x256xf32>
    %828 = vector.broadcast %563 : vector<8x1xf32> to vector<8x256xf32>
    %829 = arith.mulf %828, %827 : vector<8x256xf32>
    %830 = arith.addf %819, %829 : vector<8x256xf32>
    %831 = vector.broadcast %572 : vector<8x1xf32> to vector<8x256xf32>
    %832 = arith.mulf %831, %827 : vector<8x256xf32>
    %833 = arith.addf %822, %832 : vector<8x256xf32>
    %834 = vector.broadcast %581 : vector<8x1xf32> to vector<8x256xf32>
    %835 = arith.mulf %834, %827 : vector<8x256xf32>
    %836 = arith.addf %825, %835 : vector<8x256xf32>
    %c2_321 = arith.constant 2 : index
    %c0_322 = arith.constant 0 : index
    %c129_323 = arith.constant 129 : index
    %837 = vector.load %arg12[%c2_321, %c0_322, %c129_323] : memref<4x8x512xf32, #tpu.memory_space<vmem>>, vector<1x8x256xf32>
    %838 = vector.shape_cast %837 : vector<1x8x256xf32> to vector<8x256xf32>
    %839 = vector.broadcast %110 : vector<1x256xf32> to vector<8x256xf32>
    %840 = arith.mulf %838, %839 : vector<8x256xf32>
    %841 = vector.broadcast %564 : vector<8x1xf32> to vector<8x256xf32>
    %842 = arith.mulf %841, %840 : vector<8x256xf32>
    %843 = arith.addf %830, %842 : vector<8x256xf32>
    %844 = vector.broadcast %573 : vector<8x1xf32> to vector<8x256xf32>
    %845 = arith.mulf %844, %840 : vector<8x256xf32>
    %846 = arith.addf %833, %845 : vector<8x256xf32>
    %847 = vector.broadcast %582 : vector<8x1xf32> to vector<8x256xf32>
    %848 = arith.mulf %847, %840 : vector<8x256xf32>
    %849 = arith.addf %836, %848 : vector<8x256xf32>
    %c2_324 = arith.constant 2 : index
    %c0_325 = arith.constant 0 : index
    %c143_326 = arith.constant 143 : index
    %850 = vector.load %arg12[%c2_324, %c0_325, %c143_326] : memref<4x8x512xf32, #tpu.memory_space<vmem>>, vector<1x8x256xf32>
    %851 = vector.shape_cast %850 : vector<1x8x256xf32> to vector<8x256xf32>
    %852 = vector.broadcast %83 : vector<1x256xf32> to vector<8x256xf32>
    %853 = arith.mulf %851, %852 : vector<8x256xf32>
    %854 = vector.broadcast %565 : vector<8x1xf32> to vector<8x256xf32>
    %855 = arith.mulf %854, %853 : vector<8x256xf32>
    %856 = arith.addf %843, %855 : vector<8x256xf32>
    %857 = vector.broadcast %574 : vector<8x1xf32> to vector<8x256xf32>
    %858 = arith.mulf %857, %853 : vector<8x256xf32>
    %859 = arith.addf %846, %858 : vector<8x256xf32>
    %860 = vector.broadcast %583 : vector<8x1xf32> to vector<8x256xf32>
    %861 = arith.mulf %860, %853 : vector<8x256xf32>
    %862 = arith.addf %849, %861 : vector<8x256xf32>
    %c2_327 = arith.constant 2 : index
    %c0_328 = arith.constant 0 : index
    %c144_329 = arith.constant 144 : index
    %863 = vector.load %arg12[%c2_327, %c0_328, %c144_329] : memref<4x8x512xf32, #tpu.memory_space<vmem>>, vector<1x8x256xf32>
    %864 = vector.shape_cast %863 : vector<1x8x256xf32> to vector<8x256xf32>
    %865 = vector.broadcast %566 : vector<8x1xf32> to vector<8x256xf32>
    %866 = arith.mulf %865, %864 : vector<8x256xf32>
    %867 = arith.addf %856, %866 : vector<8x256xf32>
    %868 = vector.broadcast %575 : vector<8x1xf32> to vector<8x256xf32>
    %869 = arith.mulf %868, %864 : vector<8x256xf32>
    %870 = arith.addf %859, %869 : vector<8x256xf32>
    %871 = vector.broadcast %584 : vector<8x1xf32> to vector<8x256xf32>
    %872 = arith.mulf %871, %864 : vector<8x256xf32>
    %873 = arith.addf %862, %872 : vector<8x256xf32>
    %c2_330 = arith.constant 2 : index
    %c0_331 = arith.constant 0 : index
    %c145_332 = arith.constant 145 : index
    %874 = vector.load %arg12[%c2_330, %c0_331, %c145_332] : memref<4x8x512xf32, #tpu.memory_space<vmem>>, vector<1x8x256xf32>
    %875 = vector.shape_cast %874 : vector<1x8x256xf32> to vector<8x256xf32>
    %876 = vector.broadcast %110 : vector<1x256xf32> to vector<8x256xf32>
    %877 = arith.mulf %875, %876 : vector<8x256xf32>
    %878 = vector.broadcast %567 : vector<8x1xf32> to vector<8x256xf32>
    %879 = arith.mulf %878, %877 : vector<8x256xf32>
    %880 = arith.addf %867, %879 : vector<8x256xf32>
    %881 = vector.broadcast %576 : vector<8x1xf32> to vector<8x256xf32>
    %882 = arith.mulf %881, %877 : vector<8x256xf32>
    %883 = arith.addf %870, %882 : vector<8x256xf32>
    %884 = vector.broadcast %585 : vector<8x1xf32> to vector<8x256xf32>
    %885 = arith.mulf %884, %877 : vector<8x256xf32>
    %886 = arith.addf %873, %885 : vector<8x256xf32>
    %c3_333 = arith.constant 3 : index
    %c0_334 = arith.constant 0 : index
    %c111_335 = arith.constant 111 : index
    %887 = vector.load %arg12[%c3_333, %c0_334, %c111_335] : memref<4x8x512xf32, #tpu.memory_space<vmem>>, vector<1x8x256xf32>
    %888 = vector.shape_cast %887 : vector<1x8x256xf32> to vector<8x256xf32>
    %889 = vector.broadcast %83 : vector<1x256xf32> to vector<8x256xf32>
    %890 = arith.mulf %888, %889 : vector<8x256xf32>
    %891 = vector.broadcast %568 : vector<8x1xf32> to vector<8x256xf32>
    %892 = arith.mulf %891, %890 : vector<8x256xf32>
    %893 = vector.broadcast %577 : vector<8x1xf32> to vector<8x256xf32>
    %894 = arith.mulf %893, %890 : vector<8x256xf32>
    %c3_336 = arith.constant 3 : index
    %c0_337 = arith.constant 0 : index
    %c112_338 = arith.constant 112 : index
    %895 = vector.load %arg12[%c3_336, %c0_337, %c112_338] : memref<4x8x512xf32, #tpu.memory_space<vmem>>, vector<1x8x256xf32>
    %896 = vector.shape_cast %895 : vector<1x8x256xf32> to vector<8x256xf32>
    %897 = vector.broadcast %569 : vector<8x1xf32> to vector<8x256xf32>
    %898 = arith.mulf %897, %896 : vector<8x256xf32>
    %899 = arith.addf %892, %898 : vector<8x256xf32>
    %900 = vector.broadcast %578 : vector<8x1xf32> to vector<8x256xf32>
    %901 = arith.mulf %900, %896 : vector<8x256xf32>
    %902 = arith.addf %894, %901 : vector<8x256xf32>
    %c3_339 = arith.constant 3 : index
    %c0_340 = arith.constant 0 : index
    %c113_341 = arith.constant 113 : index
    %903 = vector.load %arg12[%c3_339, %c0_340, %c113_341] : memref<4x8x512xf32, #tpu.memory_space<vmem>>, vector<1x8x256xf32>
    %904 = vector.shape_cast %903 : vector<1x8x256xf32> to vector<8x256xf32>
    %905 = vector.broadcast %110 : vector<1x256xf32> to vector<8x256xf32>
    %906 = arith.mulf %904, %905 : vector<8x256xf32>
    %907 = vector.broadcast %570 : vector<8x1xf32> to vector<8x256xf32>
    %908 = arith.mulf %907, %906 : vector<8x256xf32>
    %909 = arith.addf %899, %908 : vector<8x256xf32>
    %910 = vector.broadcast %579 : vector<8x1xf32> to vector<8x256xf32>
    %911 = arith.mulf %910, %906 : vector<8x256xf32>
    %912 = arith.addf %902, %911 : vector<8x256xf32>
    %c3_342 = arith.constant 3 : index
    %c0_343 = arith.constant 0 : index
    %c127_344 = arith.constant 127 : index
    %913 = vector.load %arg12[%c3_342, %c0_343, %c127_344] : memref<4x8x512xf32, #tpu.memory_space<vmem>>, vector<1x8x256xf32>
    %914 = vector.shape_cast %913 : vector<1x8x256xf32> to vector<8x256xf32>
    %915 = vector.broadcast %83 : vector<1x256xf32> to vector<8x256xf32>
    %916 = arith.mulf %914, %915 : vector<8x256xf32>
    %917 = vector.broadcast %571 : vector<8x1xf32> to vector<8x256xf32>
    %918 = arith.mulf %917, %916 : vector<8x256xf32>
    %919 = arith.addf %909, %918 : vector<8x256xf32>
    %920 = vector.broadcast %580 : vector<8x1xf32> to vector<8x256xf32>
    %921 = arith.mulf %920, %916 : vector<8x256xf32>
    %922 = arith.addf %912, %921 : vector<8x256xf32>
    %c3_345 = arith.constant 3 : index
    %c0_346 = arith.constant 0 : index
    %c128_347 = arith.constant 128 : index
    %923 = vector.load %arg12[%c3_345, %c0_346, %c128_347] : memref<4x8x512xf32, #tpu.memory_space<vmem>>, vector<1x8x256xf32>
    %924 = vector.shape_cast %923 : vector<1x8x256xf32> to vector<8x256xf32>
    %925 = vector.broadcast %572 : vector<8x1xf32> to vector<8x256xf32>
    %926 = arith.mulf %925, %924 : vector<8x256xf32>
    %927 = arith.addf %919, %926 : vector<8x256xf32>
    %928 = vector.broadcast %581 : vector<8x1xf32> to vector<8x256xf32>
    %929 = arith.mulf %928, %924 : vector<8x256xf32>
    %930 = arith.addf %922, %929 : vector<8x256xf32>
    %c3_348 = arith.constant 3 : index
    %c0_349 = arith.constant 0 : index
    %c129_350 = arith.constant 129 : index
    %931 = vector.load %arg12[%c3_348, %c0_349, %c129_350] : memref<4x8x512xf32, #tpu.memory_space<vmem>>, vector<1x8x256xf32>
    %932 = vector.shape_cast %931 : vector<1x8x256xf32> to vector<8x256xf32>
    %933 = vector.broadcast %110 : vector<1x256xf32> to vector<8x256xf32>
    %934 = arith.mulf %932, %933 : vector<8x256xf32>
    %935 = vector.broadcast %573 : vector<8x1xf32> to vector<8x256xf32>
    %936 = arith.mulf %935, %934 : vector<8x256xf32>
    %937 = arith.addf %927, %936 : vector<8x256xf32>
    %938 = vector.broadcast %582 : vector<8x1xf32> to vector<8x256xf32>
    %939 = arith.mulf %938, %934 : vector<8x256xf32>
    %940 = arith.addf %930, %939 : vector<8x256xf32>
    %c3_351 = arith.constant 3 : index
    %c0_352 = arith.constant 0 : index
    %c143_353 = arith.constant 143 : index
    %941 = vector.load %arg12[%c3_351, %c0_352, %c143_353] : memref<4x8x512xf32, #tpu.memory_space<vmem>>, vector<1x8x256xf32>
    %942 = vector.shape_cast %941 : vector<1x8x256xf32> to vector<8x256xf32>
    %943 = vector.broadcast %83 : vector<1x256xf32> to vector<8x256xf32>
    %944 = arith.mulf %942, %943 : vector<8x256xf32>
    %945 = vector.broadcast %574 : vector<8x1xf32> to vector<8x256xf32>
    %946 = arith.mulf %945, %944 : vector<8x256xf32>
    %947 = arith.addf %937, %946 : vector<8x256xf32>
    %948 = vector.broadcast %583 : vector<8x1xf32> to vector<8x256xf32>
    %949 = arith.mulf %948, %944 : vector<8x256xf32>
    %950 = arith.addf %940, %949 : vector<8x256xf32>
    %c3_354 = arith.constant 3 : index
    %c0_355 = arith.constant 0 : index
    %c144_356 = arith.constant 144 : index
    %951 = vector.load %arg12[%c3_354, %c0_355, %c144_356] : memref<4x8x512xf32, #tpu.memory_space<vmem>>, vector<1x8x256xf32>
    %952 = vector.shape_cast %951 : vector<1x8x256xf32> to vector<8x256xf32>
    %953 = vector.broadcast %575 : vector<8x1xf32> to vector<8x256xf32>
    %954 = arith.mulf %953, %952 : vector<8x256xf32>
    %955 = arith.addf %947, %954 : vector<8x256xf32>
    %956 = vector.broadcast %584 : vector<8x1xf32> to vector<8x256xf32>
    %957 = arith.mulf %956, %952 : vector<8x256xf32>
    %958 = arith.addf %950, %957 : vector<8x256xf32>
    %c3_357 = arith.constant 3 : index
    %c0_358 = arith.constant 0 : index
    %c145_359 = arith.constant 145 : index
    %959 = vector.load %arg12[%c3_357, %c0_358, %c145_359] : memref<4x8x512xf32, #tpu.memory_space<vmem>>, vector<1x8x256xf32>
    %960 = vector.shape_cast %959 : vector<1x8x256xf32> to vector<8x256xf32>
    %961 = vector.broadcast %110 : vector<1x256xf32> to vector<8x256xf32>
    %962 = arith.mulf %960, %961 : vector<8x256xf32>
    %963 = vector.broadcast %576 : vector<8x1xf32> to vector<8x256xf32>
    %964 = arith.mulf %963, %962 : vector<8x256xf32>
    %965 = arith.addf %955, %964 : vector<8x256xf32>
    %966 = vector.broadcast %585 : vector<8x1xf32> to vector<8x256xf32>
    %967 = arith.mulf %966, %962 : vector<8x256xf32>
    %968 = arith.addf %958, %967 : vector<8x256xf32>
    %969 = arith.addf %588, %670 : vector<8x256xf32>
    %970 = arith.addf %969, %778 : vector<8x256xf32>
    %cst_360 = arith.constant 0.000000e+00 : f32
    %cst_361 = arith.constant 6.000000e+00 : f32
    %971 = vector.broadcast %cst_360 : f32 to vector<8x256xf32>
    %972 = arith.maximumf %971, %970 : vector<8x256xf32>
    %973 = vector.broadcast %cst_361 : f32 to vector<8x256xf32>
    %974 = arith.minimumf %973, %972 : vector<8x256xf32>
    %975 = arith.addf %588, %667 : vector<8x256xf32>
    %976 = arith.addf %975, %775 : vector<8x256xf32>
    %977 = arith.addf %976, %886 : vector<8x256xf32>
    %cst_362 = arith.constant 0.000000e+00 : f32
    %cst_363 = arith.constant 6.000000e+00 : f32
    %978 = vector.broadcast %cst_362 : f32 to vector<8x256xf32>
    %979 = arith.maximumf %978, %977 : vector<8x256xf32>
    %980 = vector.broadcast %cst_363 : f32 to vector<8x256xf32>
    %981 = arith.minimumf %980, %979 : vector<8x256xf32>
    %982 = arith.addf %588, %772 : vector<8x256xf32>
    %983 = arith.addf %982, %883 : vector<8x256xf32>
    %984 = arith.addf %983, %968 : vector<8x256xf32>
    %cst_364 = arith.constant 0.000000e+00 : f32
    %cst_365 = arith.constant 6.000000e+00 : f32
    %985 = vector.broadcast %cst_364 : f32 to vector<8x256xf32>
    %986 = arith.maximumf %985, %984 : vector<8x256xf32>
    %987 = vector.broadcast %cst_365 : f32 to vector<8x256xf32>
    %988 = arith.minimumf %987, %986 : vector<8x256xf32>
    %989 = arith.addf %588, %880 : vector<8x256xf32>
    %990 = arith.addf %989, %965 : vector<8x256xf32>
    %cst_366 = arith.constant 0.000000e+00 : f32
    %cst_367 = arith.constant 6.000000e+00 : f32
    %991 = vector.broadcast %cst_366 : f32 to vector<8x256xf32>
    %992 = arith.maximumf %991, %990 : vector<8x256xf32>
    %993 = vector.broadcast %cst_367 : f32 to vector<8x256xf32>
    %994 = arith.minimumf %993, %992 : vector<8x256xf32>
    %995 = tpu.concatenate %974, %981, %988, %994 in 1 : vector<8x256xf32>, vector<8x256xf32>, vector<8x256xf32>, vector<8x256xf32> -> vector<8x1024xf32>
    %c0_368 = arith.constant 0 : index
    %c0_369 = arith.constant 0 : index
    %996 = vector.load %arg8[%c0_368, %c0_369] : memref<24x8xf32, #tpu.memory_space<vmem>>, vector<24x1xf32>
    %997 = vector.extract_strided_slice %995 {offsets = [0, 0], sizes = [1, 1024], strides = [1, 1]} : vector<8x1024xf32> to vector<1x1024xf32>
    %998 = vector.broadcast %996 : vector<24x1xf32> to vector<24x1024xf32>
    %999 = vector.broadcast %997 : vector<1x1024xf32> to vector<24x1024xf32>
    %1000 = arith.mulf %998, %999 : vector<24x1024xf32>
    %c0_370 = arith.constant 0 : index
    %c1_371 = arith.constant 1 : index
    %1001 = vector.load %arg8[%c0_370, %c1_371] : memref<24x8xf32, #tpu.memory_space<vmem>>, vector<24x1xf32>
    %1002 = vector.extract_strided_slice %995 {offsets = [1, 0], sizes = [1, 1024], strides = [1, 1]} : vector<8x1024xf32> to vector<1x1024xf32>
    %1003 = vector.broadcast %1001 : vector<24x1xf32> to vector<24x1024xf32>
    %1004 = vector.broadcast %1002 : vector<1x1024xf32> to vector<24x1024xf32>
    %1005 = arith.mulf %1003, %1004 : vector<24x1024xf32>
    %1006 = arith.addf %1000, %1005 : vector<24x1024xf32>
    %c0_372 = arith.constant 0 : index
    %c2_373 = arith.constant 2 : index
    %1007 = vector.load %arg8[%c0_372, %c2_373] : memref<24x8xf32, #tpu.memory_space<vmem>>, vector<24x1xf32>
    %1008 = vector.extract_strided_slice %995 {offsets = [2, 0], sizes = [1, 1024], strides = [1, 1]} : vector<8x1024xf32> to vector<1x1024xf32>
    %1009 = vector.broadcast %1007 : vector<24x1xf32> to vector<24x1024xf32>
    %1010 = vector.broadcast %1008 : vector<1x1024xf32> to vector<24x1024xf32>
    %1011 = arith.mulf %1009, %1010 : vector<24x1024xf32>
    %1012 = arith.addf %1006, %1011 : vector<24x1024xf32>
    %c0_374 = arith.constant 0 : index
    %c3_375 = arith.constant 3 : index
    %1013 = vector.load %arg8[%c0_374, %c3_375] : memref<24x8xf32, #tpu.memory_space<vmem>>, vector<24x1xf32>
    %1014 = vector.extract_strided_slice %995 {offsets = [3, 0], sizes = [1, 1024], strides = [1, 1]} : vector<8x1024xf32> to vector<1x1024xf32>
    %1015 = vector.broadcast %1013 : vector<24x1xf32> to vector<24x1024xf32>
    %1016 = vector.broadcast %1014 : vector<1x1024xf32> to vector<24x1024xf32>
    %1017 = arith.mulf %1015, %1016 : vector<24x1024xf32>
    %1018 = arith.addf %1012, %1017 : vector<24x1024xf32>
    %c0_376 = arith.constant 0 : index
    %c4_377 = arith.constant 4 : index
    %1019 = vector.load %arg8[%c0_376, %c4_377] : memref<24x8xf32, #tpu.memory_space<vmem>>, vector<24x1xf32>
    %1020 = vector.extract_strided_slice %995 {offsets = [4, 0], sizes = [1, 1024], strides = [1, 1]} : vector<8x1024xf32> to vector<1x1024xf32>
    %1021 = vector.broadcast %1019 : vector<24x1xf32> to vector<24x1024xf32>
    %1022 = vector.broadcast %1020 : vector<1x1024xf32> to vector<24x1024xf32>
    %1023 = arith.mulf %1021, %1022 : vector<24x1024xf32>
    %1024 = arith.addf %1018, %1023 : vector<24x1024xf32>
    %c0_378 = arith.constant 0 : index
    %c5_379 = arith.constant 5 : index
    %1025 = vector.load %arg8[%c0_378, %c5_379] : memref<24x8xf32, #tpu.memory_space<vmem>>, vector<24x1xf32>
    %1026 = vector.extract_strided_slice %995 {offsets = [5, 0], sizes = [1, 1024], strides = [1, 1]} : vector<8x1024xf32> to vector<1x1024xf32>
    %1027 = vector.broadcast %1025 : vector<24x1xf32> to vector<24x1024xf32>
    %1028 = vector.broadcast %1026 : vector<1x1024xf32> to vector<24x1024xf32>
    %1029 = arith.mulf %1027, %1028 : vector<24x1024xf32>
    %1030 = arith.addf %1024, %1029 : vector<24x1024xf32>
    %c0_380 = arith.constant 0 : index
    %c6_381 = arith.constant 6 : index
    %1031 = vector.load %arg8[%c0_380, %c6_381] : memref<24x8xf32, #tpu.memory_space<vmem>>, vector<24x1xf32>
    %1032 = vector.extract_strided_slice %995 {offsets = [6, 0], sizes = [1, 1024], strides = [1, 1]} : vector<8x1024xf32> to vector<1x1024xf32>
    %1033 = vector.broadcast %1031 : vector<24x1xf32> to vector<24x1024xf32>
    %1034 = vector.broadcast %1032 : vector<1x1024xf32> to vector<24x1024xf32>
    %1035 = arith.mulf %1033, %1034 : vector<24x1024xf32>
    %1036 = arith.addf %1030, %1035 : vector<24x1024xf32>
    %c0_382 = arith.constant 0 : index
    %c7_383 = arith.constant 7 : index
    %1037 = vector.load %arg8[%c0_382, %c7_383] : memref<24x8xf32, #tpu.memory_space<vmem>>, vector<24x1xf32>
    %1038 = vector.extract_strided_slice %995 {offsets = [7, 0], sizes = [1, 1024], strides = [1, 1]} : vector<8x1024xf32> to vector<1x1024xf32>
    %1039 = vector.broadcast %1037 : vector<24x1xf32> to vector<24x1024xf32>
    %1040 = vector.broadcast %1038 : vector<1x1024xf32> to vector<24x1024xf32>
    %1041 = arith.mulf %1039, %1040 : vector<24x1024xf32>
    %1042 = arith.addf %1036, %1041 : vector<24x1024xf32>
    %c0_384 = arith.constant 0 : index
    %c0_385 = arith.constant 0 : index
    %1043 = vector.load %arg9[%c0_384, %c0_385] : memref<24x1xf32, #tpu.memory_space<vmem>>, vector<24x1xf32>
    %1044 = vector.broadcast %1043 : vector<24x1xf32> to vector<24x1024xf32>
    %1045 = arith.addf %1042, %1044 : vector<24x1024xf32>
    %1046 = vector.extract_strided_slice %1045 {offsets = [0, 0], sizes = [8, 1024], strides = [1, 1]} : vector<24x1024xf32> to vector<8x1024xf32>
    %1047 = arith.negf %1046 : vector<8x1024xf32>
    %1048 = math.exp %1047 : vector<8x1024xf32>
    %cst_386 = arith.constant 1.000000e+00 : f32
    %1049 = vector.broadcast %cst_386 : f32 to vector<8x1024xf32>
    %1050 = arith.addf %1049, %1048 : vector<8x1024xf32>
    %1051 = arith.divf %1049, %1050 : vector<8x1024xf32>
    %1052 = vector.extract_strided_slice %1045 {offsets = [8, 0], sizes = [8, 1024], strides = [1, 1]} : vector<24x1024xf32> to vector<8x1024xf32>
    %1053 = arith.negf %1052 : vector<8x1024xf32>
    %1054 = math.exp %1053 : vector<8x1024xf32>
    %cst_387 = arith.constant 1.000000e+00 : f32
    %1055 = vector.broadcast %cst_387 : f32 to vector<8x1024xf32>
    %1056 = arith.addf %1055, %1054 : vector<8x1024xf32>
    %1057 = arith.divf %1055, %1056 : vector<8x1024xf32>
    %1058 = vector.extract_strided_slice %1045 {offsets = [16, 0], sizes = [8, 1024], strides = [1, 1]} : vector<24x1024xf32> to vector<8x1024xf32>
    %1059 = math.tanh %1058 : vector<8x1024xf32>
    %1060 = arith.mulf %1051, %1059 : vector<8x1024xf32>
    %1061 = math.tanh %1060 : vector<8x1024xf32>
    %1062 = arith.mulf %1057, %1061 : vector<8x1024xf32>
    %c0_388 = arith.constant 0 : index
    %c0_389 = arith.constant 0 : index
    %c0_390 = arith.constant 0 : index
    %1063 = vector.load %arg10[%c0_388, %c0_389, %c0_390] : memref<1x8x1024xf32, #tpu.memory_space<vmem>>, vector<1x8x1024xf32>
    %1064 = vector.shape_cast %1063 : vector<1x8x1024xf32> to vector<8x1024xf32>
    %1065 = vector.shape_cast %1062 : vector<8x1024xf32> to vector<1x8x1024xf32>
    tpu.vector_store %arg10[%c0_388, %c0_389, %c0_390], %1065 {strides = array<i32>} : memref<1x8x1024xf32, #tpu.memory_space<vmem>>, vector<1x8x1024xf32>,
    %c0_391 = arith.constant 0 : index
    %c0_392 = arith.constant 0 : index
    %c0_393 = arith.constant 0 : index
    %1066 = vector.load %arg11[%c0_391, %c0_392, %c0_393] : memref<1x8x1024xf32, #tpu.memory_space<vmem>>, vector<1x8x1024xf32>
    %1067 = vector.shape_cast %1066 : vector<1x8x1024xf32> to vector<8x1024xf32>
    %1068 = vector.shape_cast %1060 : vector<8x1024xf32> to vector<1x8x1024xf32>
    tpu.vector_store %arg11[%c0_391, %c0_392, %c0_393], %1068 {strides = array<i32>} : memref<1x8x1024xf32, #tpu.memory_space<vmem>>, vector<1x8x1024xf32>,
    return
  }
  func.func @transform_0(%arg0: i32) -> (i32, i32, i32) {
    %c0_i32 = arith.constant 0 : i32
    %c0_i32_0 = arith.constant 0 : i32
    %c0_i32_1 = arith.constant 0 : i32
    return %arg0, %c0_i32, %c0_i32_0 : i32, i32, i32
  }
  func.func @transform_1(%arg0: i32) -> (i32, i32) {
    %c0_i32 = arith.constant 0 : i32
    %c0_i32_0 = arith.constant 0 : i32
    %c0_i32_1 = arith.constant 0 : i32
    return %c0_i32, %c0_i32_0 : i32, i32
  }
  func.func @transform_2(%arg0: i32) -> (i32, i32) {
    %c0_i32 = arith.constant 0 : i32
    %c0_i32_0 = arith.constant 0 : i32
    %c0_i32_1 = arith.constant 0 : i32
    return %c0_i32, %c0_i32_0 : i32, i32
  }
  func.func @transform_3(%arg0: i32) -> (i32, i32) {
    %c0_i32 = arith.constant 0 : i32
    %c0_i32_0 = arith.constant 0 : i32
    %c0_i32_1 = arith.constant 0 : i32
    return %c0_i32, %c0_i32_0 : i32, i32
  }
  func.func @transform_4(%arg0: i32) -> (i32, i32) {
    %c0_i32 = arith.constant 0 : i32
    %c0_i32_0 = arith.constant 0 : i32
    %c0_i32_1 = arith.constant 0 : i32
    return %c0_i32, %c0_i32_0 : i32, i32
  }
  func.func @transform_5(%arg0: i32) -> (i32, i32) {
    %c0_i32 = arith.constant 0 : i32
    %c0_i32_0 = arith.constant 0 : i32
    %c0_i32_1 = arith.constant 0 : i32
    return %c0_i32, %c0_i32_0 : i32, i32
  }
  func.func @transform_6(%arg0: i32) -> (i32, i32) {
    %c0_i32 = arith.constant 0 : i32
    %c0_i32_0 = arith.constant 0 : i32
    %c0_i32_1 = arith.constant 0 : i32
    return %c0_i32, %c0_i32_0 : i32, i32
  }
  func.func @transform_7(%arg0: i32) -> (i32, i32) {
    %c0_i32 = arith.constant 0 : i32
    %c0_i32_0 = arith.constant 0 : i32
    %c0_i32_1 = arith.constant 0 : i32
    return %c0_i32, %c0_i32_0 : i32, i32
  }
  func.func @transform_8(%arg0: i32) -> (i32, i32) {
    %c0_i32 = arith.constant 0 : i32
    %c0_i32_0 = arith.constant 0 : i32
    %c0_i32_1 = arith.constant 0 : i32
    return %c0_i32, %c0_i32_0 : i32, i32
  }
  func.func @transform_9(%arg0: i32) -> (i32, i32, i32) {
    %c0_i32 = arith.constant 0 : i32
    %c0_i32_0 = arith.constant 0 : i32
    %c0_i32_1 = arith.constant 0 : i32
    return %arg0, %c0_i32, %c0_i32_0 : i32, i32, i32
  }
  func.func @transform_10(%arg0: i32) -> (i32, i32, i32) {
    %c0_i32 = arith.constant 0 : i32
    %c0_i32_0 = arith.constant 0 : i32
    %c0_i32_1 = arith.constant 0 : i32
    return %arg0, %c0_i32, %c0_i32_0 : i32, i32, i32
  }
}

</mosaic_0001>

<bundles_post_ra>
// kernel: tpu_custom_call.1
= control target key start
LH: loop header
LB: loop body
LE: loop exit
PB: predicated region body
PF: predicated region fallthrough
CT: control target
= control target key end

     0   :  { %s11995_s0 = inlined_call_operand.vmem [shape: f32[2,4,1024], index: 0, kind: input, shape index: {}]   ;;  %s11996_s1 = inlined_call_operand.vmem [shape: f32[4,27], index: 1, kind: input, shape index: {}]   ;;  %s11997_s2 = inlined_call_operand.vmem [shape: f32[4,1], index: 2, kind: input, shape index: {}]   ;;  %s11998_s3 = inlined_call_operand.vmem [shape: f32[24,4], index: 3, kind: input, shape index: {}]   ;;  %s11999_s4 = inlined_call_operand.vmem [shape: f32[24,1], index: 4, kind: input, shape index: {}]   ;;  %s12000_s5 = inlined_call_operand.vmem [shape: f32[8,27], index: 5, kind: input, shape index: {}]   ;;  %s12001_s6 = inlined_call_operand.vmem [shape: f32[8,1], index: 6, kind: input, shape index: {}]   ;;  %s12002_s7 = inlined_call_operand.vmem [shape: f32[24,8], index: 7, kind: input, shape index: {}]   ;;  %s12003_s8 = inlined_call_operand.vmem [shape: f32[24,1], index: 8, kind: input, shape index: {}]   ;;  %s12004_s9 = inlined_call_operand.hbm [shape: f32[2,8,1024], index: 9, kind: output, shape index: {0}]   ;;  %s12005_s10 = inlined_call_operand.hbm [shape: f32[2,8,1024], index: 10, kind: output, shape index: {1}]  }
   0x1   :  { %12505 = sst [smem:[#allocation172_spill]] %s11995_s0 }
   0x2   :  { %12506 = sst [smem:[#allocation173_spill]] %s11996_s1 }
   0x3   :  { %16 = vsyncpa [#allocation4], 0 }
   0x4   :  { %18 = vsyncpa [#allocation4 + $0x1], 0 }
   0x5   :  { %19 = vsyncpa [#allocation6], 0 }
   0x6   :  { %21 = vsyncpa [#allocation6 + $0x1], 0  ;;  %s6517_s13 = smov 0   ;;  %s6519_s14 = smov 0  }
   0x7   :  { %s6521_s15 = smov 0   ;;  %s6523_s16 = smov 0  }
   0x8 LB: > { %s6538_s17 = sadd.s32 4294967295, %s6418_s16   ;;  %s5864_s18 = sadd.s32 4294967294, %s6418_s16   ;;  %s6418_s16 = sphi %s6523_s16, %s13546_s16   ;;  %s6414_s15 = sphi %s6521_s15, %s13545_s15   ;;  %s6410_s14 = sphi %s6519_s14, %s13544_s14   ;;  %s6406_s13 = sphi %s6517_s13, %s13543_s13  }
   0x9   : > { %s6542_s19 = sadd.s32 1, %s6418_s16   ;;  %s228_s20 = sadd.s32 1, %s6414_s15 }
   0xa   : > { %s225_s21 = ssub.s32 %s6418_s16, %s6542_s19  ;;  %p238_p0 = scmp.ne.s32.totalorder %s6414_s15, %s6410_s14 }
   0xb   : > { %p226_p1 = scmp.eq.s32.totalorder %s225_s21, 0  ;;  %p239_p2 = scmp.eq.s32.totalorder %s6538_s17, 1 }
   0xc   : > { %p244_p3 = scmp.ne.s32.totalorder %s6410_s14, %s6406_s13  ;;  %p245_p4 = scmp.eq.s32.totalorder %s5864_s18, 1 }
   0xd   : > { %s6553_s22 = scalar_select %p226_p1, %s6414_s15, %s228_s20  }
   0xe   : > { %p6555_p5 = por %p239_p2, %p238_p0  ;;  %p6559_p6 = por %p245_p4, %p244_p3 }
   0xf   : > { %p5867_p7 = scmp.ge.s32.totalorder %s6418_s16, 1  ;;  %p321_p8 = scmp.lt.s32.totalorder %s6418_s16, 3 }
  0x11   : > { %p322_p9 = pnand %p5867_p7, %p321_p8 }
  0x13   : > { %325 = sbr.rel (%p322_p9) target bundleno = 5906 (0x1712), region = 56 }
  0x18   : > { %v432_v0 = vld [vmem:[%s11997_s2] sm:$0xf]  ;;  %s12509_s1 = sld [smem:[#allocation173_spill]]  ;;  %v12022_v2 = vlaneseq  ;;  %v12029_v3 = vmov 0   ;;  %v6421_v5 = vmov 0.0   ;;  %p364_p10 = scmp.lt.s32.totalorder %s6538_s17, 1 }
  0x19   : > { %6004 = vset.pattern.permute.xlu1 %v12029_v3  ;;  %6003 = vset.pattern.permute.xlu0 %v12029_v3  ;;  %369 = vst [vmem:[#allocation2 + $0x58] sm:$0xff] %v6421_v5  ;;  %370 = vst [vmem:[#allocation2] sm:$0xff] %v6421_v5  ;;  %v12031_v8 = vmov 1   ;;  %v12024_v9 = vmov 9   ;;  %s12510_s0 = sld [smem:[#allocation172_spill]]  ;;  %v12023_v22 = vmov 10  }
  0x1a   : > { %435 = vperm.xlu0 %6003, %v432_v0   ;;  %v378_v4 = vand.u32 127, %v12022_v2  ;;  %371 = vst [vmem:[#allocation2 + $0x30] sm:$0xff] %v6421_v5  ;;  %372 = vst [vmem:[#allocation2 + $0x60] sm:$0xff] %v6421_v5  ;;  %s365_s29 = scalar_select %p364_p10, %s6538_s17, 1  ;;  %v12027_v25 = vmov 2   ;;  %v12020_v31 = vmov 11  }
  0x1b   : > { %373 = vst [vmem:[#allocation2 + $0x28] sm:$0xff] %v6421_v5  ;;  %374 = vst [vmem:[#allocation2 + $0x50] sm:$0xff] %v6421_v5  ;;  %s6426_s20 = smov 111   ;;  %s6427_s21 = smov 113   ;;  %v12025_v32 = vmov 3   ;;  %v12019_v33 = vmov 12  }
  0x1c   : > { %375 = vst [vmem:[#allocation2 + $0x20] sm:$0xff] %v6421_v5  ;;  %376 = vst [vmem:[#allocation2 + $0x10] sm:$0xff] %v6421_v5  ;;  %v379_v6 = vadd.s32 128, %v378_v4  ;;  %v384_v7 = vand.u32 15, %v378_v4  ;;  %s5916_s30 = sshll.u32 %s365_s29, 5  ;;  %s6430_s25 = smov 127  }
  0x1d   : > { %v12021_v34 = vmov 13   ;;  %v12017_v35 = vmov 4   ;;  %s6434_s26 = smov 1   ;;  %v12012_v36 = vmov 6   ;;  %v12014_v37 = vmov 5   ;;  %s6438_s27 = smov 15  }
  0x1e   : > { %v6571_v1 = vld [vmem:[%s12509_s1] sm:$0xf]  ;;  %6006 = vset.pattern.permute.xlu0 %v12031_v8  ;;  %v391_v10 = vand.u32 15, %v379_v6  ;;  %v441_v11 = vadd.s32 4294967295, %v384_v7  ;;  %v531_v12 = vadd.s32 1, %v384_v7  ;;  %v12016_v38 = vmov 14  }
  0x1f   : > { %469 = vperm.xlu1 %6004, %v6571_v1   ;;  %483 = vperm.xlu0 %6006, %v6571_v1   ;;  %s368_s18 = scalar_lea.vmem %s12510_s0, %s5916_s30  ;;  %v12011_v39 = vmov 15   ;;  %v12009_v40 = vmov 7   ;;  %v12008_v41 = vmov 16   ;;  %v12007_v42 = vmov 8   ;;  %s12208_s28 = smov 95  }
  0x20   : > { %v442_v13 = vadd.s32 4294967295, %v391_v10  ;;  %vm443_vm0 = vcmp.ge.s32.totalorder %v441_v11, 0  ;;  %v532_v14 = vadd.s32 1, %v391_v10  ;;  %vm535_vm1 = vcmp.le.s32.totalorder %v531_v12, 15  ;;  %v404_v16 = vld [vmem:[%s368_s18] sm:$0xff]  ;;  %v410_v19 = vld [vmem:[%s368_s18 + $0x8] sm:$0xff] }
  0x21   : > { %v5872_v15 = vsel %vm443_vm0, 1.0, %v6421_v5  ;;  %v5874_v17 = vsel %vm535_vm1, 1.0, %v6421_v5  ;;  %v406_v18 = vcombine.high %v404_v16, %v404_v16  ;;  %v417_v20 = vld [vmem:[%s368_s18 + $0x10] sm:$0xff]  ;;  %v424_v21 = vld [vmem:[%s368_s18 + $0x18] sm:$0xff]  ;;  %408 = vst [vmem:[#allocation2 + $0x8] sm:$0xf] %v404_v16  ;;  %v412_v30 = vcombine.high %v410_v19, %v410_v19 }
  0x22   : > { %vm444_vm2 = vcmp.ge.s32.totalorder %v442_v13, 0  ;;  %vm536_vm3 = vcmp.le.s32.totalorder %v532_v14, 15  ;;  %v419_v26 = vcombine.high %v417_v20, %v417_v20  ;;  %422 = vst [vmem:[#allocation2 + $0x48] sm:$0xf] %v417_v20  ;;  %v426_v27 = vcombine.high %v424_v21, %v424_v21  ;;  %429 = vst [vmem:[#allocation2 + $0x70] sm:$0xf] %v424_v21 }
  0x23   : > { %6005 = vset.pattern.permute.xlu1 %v12024_v9  ;;  %v5873_v23 = vsel %vm444_vm2, 1.0, %v6421_v5  ;;  %v5875_v24 = vsel %vm536_vm3, 1.0, %v6421_v5  ;;  %6013 = vset.pattern.permute.xlu0 %v12027_v25  ;;  %415 = vst [vmem:[#allocation2 + $0x40] sm:$0xf] %v410_v19  ;;  %409 = vst [vmem:[#allocation2 + $0x18] sm:$0xf] %v406_v18 }
  0x24   : > { %476 = vperm.xlu1 %6005, %v6571_v1   ;;  %v6008_v28 = vpack.i.bf16 %v5873_v23, %v5872_v15  ;;  %v6589_v29 = vpack.i.bf16 %v5875_v24, %v5874_v17  ;;  %423 = vst [vmem:[#allocation2 + $0x68] sm:$0xf] %v419_v26  ;;  %430 = vst [vmem:[#allocation2 + $0x38] sm:$0xf] %v426_v27  ;;  %v438_v45 = vld [vmem:[#allocation2 + $0x58] sm:$0xf] }
  0x25   : > { %416 = vst [vmem:[#allocation2 + $0x78] sm:$0xf] %v412_v30  ;;  %v6697_v21 = vld [vmem:[#allocation2 + $0x28] sm:$0xf]  ;;  %s6444_s29 = smov 126   ;;  %s6445_s30 = smov 112  }
  0x26   : > { %6009 = vrot.lane.b32.xlu0 %v6008_v28, %s6426_s20  ;;  %vm549_vm4 = vcmask 924672   ;;  %s12210_s11 = smov 96   ;;  %s12212_s12 = smov 110   ;;  %vm498_vm5 = vcmask 1039360   ;;  %vm711_vm6 = vcmask 7168   ;;  %vm772_vm7 = vcmask 121856  }
  0x27   : > { %s6448_s18 = smov 17   ;;  %vm882_vm8 = vcmask 138240   ;;  %vm459_vm9 = vcmask 908288   ;;  %vm573_vm10 = vcmask 1031168   ;;  %vm633_vm11 = vcmask 916480  }
  0x28   : > { %6007 = vset.pattern.permute.xlu1 %v12023_v22  ;;  %v6629_v49 = vld [vmem:[#allocation2 + $0x8] sm:$0xf]  ;;  %vm845_vm12 = vcmask 777216   ;;  %vm735_vm13 = vcmask 900096   ;;  %vm796_vm14 = vcmask 785408   ;;  %vm906_vm15 = vcmask 769024  }
  0x29   : > { %508 = vperm.xlu1 %6007, %v6571_v1   ;;  %v6687_v17 = vld [vmem:[#allocation2 + $0x8] sm:$0xf] }
  0x2a   : > { %558 = vperm.xlu0 %6013, %v6571_v1   ;;  %v6623_v46 = vld [vmem:[#allocation2 + $0x18] sm:$0xf] }
  0x2b   : > { %v6685_v16 = vld [vmem:[#allocation2 + $0x18] sm:$0xf] }
  0x2d   : > { %6015 = vrot.lane.b32.xlu1 %v6589_v29, %s6427_s21  ;;  %s12206_s21 = smov 94  }
  0x2e   : > { %6019 = vset.pattern.permute.xlu1 %v12020_v31  ;;  %6025 = vset.pattern.permute.xlu0 %v12025_v32 }
  0x2f   : > { %618 = vperm.xlu0 %6025, %v6571_v1  }
  0x31   : > { %583 = vperm.xlu1 %6019, %v6571_v1  }
  0x33   : > { %6028 = vset.pattern.permute.xlu0 %v12021_v34 }
  0x34   : > { %686 = vperm.xlu0 %6028, %v6571_v1  }
  0x35   : > { %6021 = vrot.lane.b32.xlu1 %v6008_v28, %s6430_s25 }
  0x36   : > { %6026 = vset.pattern.permute.xlu1 %v12019_v33 }
  0x38   : > { %6030 = vrot.lane.b32.xlu0 %v6589_v29, %s6434_s26 }
  0x39   : > { %643 = vperm.xlu1 %6026, %v6571_v1   ;;  %6041 = vset.pattern.permute.xlu0 %v12012_v36 }
  0x3c   : > { %781 = vperm.xlu0 %6041, %v6571_v1  }
  0x3d   : > { %6027 = vset.pattern.permute.xlu1 %v12017_v35 }
  0x3e   : > { %667 = vperm.xlu1 %6027, %v6571_v1  }
  0x40   : > { %6050 = vset.pattern.permute.xlu0 %v12007_v42 }
  0x42   : > { %6034 = vset.pattern.permute.xlu1 %v12014_v37 }
  0x43   : > { %720 = vperm.xlu1 %6034, %v6571_v1  }
  0x47   : > { %6035 = vset.pattern.permute.xlu1 %v12016_v38 }
  0x48   : > { %745 = vperm.xlu1 %6035, %v6571_v1  }
  0x4c   : > { %6037 = vrot.lane.b32.xlu1 %v6008_v28, %s6438_s27 }
  0x4d   : > { %6042 = vset.pattern.permute.xlu1 %v12011_v39 }
  0x50   : > { %806 = vperm.xlu1 %6042, %v6571_v1  }
  0x54   : > { %6043 = vset.pattern.permute.xlu1 %v12009_v40 }
  0x55   : > { %830 = vperm.xlu1 %6043, %v6571_v1  }
  0x59   : > { %6044 = vset.pattern.permute.xlu1 %v12008_v41 }
  0x5a   : > { %855 = vperm.xlu1 %6044, %v6571_v1  }
  0x95   : > { %v6621_v44 = vpop.permute.xlu0 %435 }
  0x96   : > { %12512 = vst [vmem:[#allocation10_spill] sm:$0xff] %v6621_v44 }
  0x9a   : > { %v6619_v43 = vpop.permute.xlu1 %469  ;;  %v6625_v47 = vpop.permute.xlu0 %483 }
  0x9b   : > { %12511 = vst [vmem:[#allocation9_spill] sm:$0xff] %v6619_v43  ;;  %v486_v50 = vmul.f32 %v6625_v47, %v438_v45  ;;  %v488_v51 = vmul.f32 %v6625_v47, %v6623_v46  ;;  %v487_v52 = vmul.f32 %v6625_v47, %v6629_v49 }
  0x9d   : > { %492 = vrot.lane.b32.xlu1 %v486_v50, %s6430_s25  ;;  %496 = vrot.lane.b32.xlu0 %v488_v51, %s6430_s25 }
  0x9e   : > { %v6648_v58 = vpop.permute.xlu0 %6009 }
  0x9f   : > { %v6627_v48 = vpop.permute.xlu1 %476 }
  0xa0   : > { %12513 = vst [vmem:[#allocation11_spill] sm:$0xff] %v6627_v48 }
  0xa1   : > { %494 = vrot.lane.b32.xlu1 %v487_v52, %s6430_s25 }
  0xa4   : > { %v6638_v53 = vpop.permute.xlu1 %508 }
  0xa5   : > { %v511_v54 = vmul.f32 %v6638_v53, %v438_v45  ;;  %v512_v56 = vmul.f32 %v6638_v53, %v6629_v49  ;;  %v513_v57 = vmul.f32 %v6638_v53, %v6623_v46  ;;  %v6653_v60 = vpop.permute.xlu0 %558 }
  0xa7   : > { %517 = vrot.lane.b32.xlu0 %v511_v54, %s6430_s25  ;;  %519 = vrot.lane.b32.xlu1 %v512_v56, %s6430_s25 }
  0xa8   : > { %v6016_v55 = vpop.permute.xlu1 %6015 }
  0xa9   : > { %v6693_v20 = vunpack.i.l.bf16 %v6016_v55 }
  0xaa   : > { %v6657_v63 = vpop.permute.xlu0 %618 }
  0xab   : > { %521 = vrot.lane.b32.xlu0 %v513_v57, %s6430_s25  ;;  %12514 = vst [vmem:[#allocation12_spill] sm:$0xff] %v6693_v20  ;;  %v554_v28 = vmul.f32 %v6693_v20, %v438_v45 }
  0xac   : > { %v6651_v59 = vpop.permute.xlu1 %583 }
  0xad   : > { %v561_v52 = vmul.f32 %v6653_v60, %v554_v28  ;;  %v586_v57 = vmul.f32 %v6651_v59, %v554_v28 }
  0xaf   : > { %v6665_v6 = vpop.permute.xlu0 %686 }
  0xb0   : > { %v6022_v61 = vpop.permute.xlu1 %6021  ;;  %v689_v7 = vmul.f32 %v6665_v6, %v6629_v49  ;;  %v690_v11 = vmul.f32 %v6665_v6, %v6623_v46 }
  0xb1   : > { %v6703_v26 = vunpack.i.l.bf16 %v6022_v61  ;;  %v6744_v28 = vunpack.i.h.bf16 %v6022_v61 }
  0xb3   : > { %12515 = vst [vmem:[#allocation13_spill] sm:$0xff] %v6703_v26  ;;  %v6031_v50 = vpop.permute.xlu0 %6030  ;;  %v614_v54 = vmul.f32 %v6703_v26, %v438_v45  ;;  %12520 = vst [vmem:[#allocation18_spill] sm:$0xff] %v6744_v28 }
  0xb4   : > { %v6655_v62 = vpop.permute.xlu1 %643  ;;  %v6719_v56 = vunpack.i.l.bf16 %v6031_v50 }
  0xb5   : > { %v646_v45 = vmul.f32 %v6655_v62, %v614_v54 }
  0xb6   : > { %12517 = vst [vmem:[#allocation15_spill] sm:$0xff] %v6719_v56 }
  0xb9   : > { %v6659_v0 = vpop.permute.xlu1 %667 }
  0xba   : > { %v671_v4 = vmul.f32 %v6659_v0, %v6623_v46  ;;  %v670_v5 = vmul.f32 %v6659_v0, %v6629_v49 }
  0xbc   : > { %676 = vrot.lane.b32.xlu1 %v671_v4, %s6426_s20  ;;  %674 = vrot.lane.b32.xlu0 %v670_v5, %s6426_s20  ;;  %v621_v4 = vmul.f32 %v6657_v63, %v614_v54  ;;  %v6755_v54 = vsel %vm498_vm5, %v6703_v26, %v6744_v28 }
  0xbd   : > { %12521 = vst [vmem:[#allocation19_spill] sm:$0xff] %v6755_v54 }
  0xbe   : > { %v6671_v10 = vpop.permute.xlu1 %720 }
  0xc0   : > { %693 = vrot.lane.b32.xlu1 %v689_v7, %s6426_s20  ;;  %v6725_v7 = vunpack.i.h.bf16 %v6016_v55 }
  0xc2   : > { %12518 = vst [vmem:[#allocation16_spill] sm:$0xff] %v6725_v7  ;;  %v6738_v55 = vsel %vm549_vm4, %v6693_v20, %v6725_v7 }
  0xc3   : > { %v6676_v12 = vpop.permute.xlu1 %745  ;;  %12519 = vst [vmem:[#allocation17_spill] sm:$0xff] %v6738_v55 }
  0xc4   : > { %695 = vrot.lane.b32.xlu1 %v690_v11, %s6426_s20  ;;  %v6727_v11 = vpop.permute.xlu0 %781 }
  0xc7   : > { %v6679_v13 = vpop.permute.xlu1 %6037 }
  0xc8   : > { %v6713_v51 = vunpack.i.l.bf16 %v6679_v13 }
  0xca   : > { %12516 = vst [vmem:[#allocation14_spill] sm:$0xff] %v6713_v51  ;;  %v777_v5 = vmul.f32 %v6713_v51, %v6687_v17 }
  0xcb   : > { %v6681_v14 = vpop.permute.xlu1 %806 }
  0xcc   : > { %v809_v61 = vmul.f32 %v6681_v14, %v777_v5 }
  0xd0   : > { %v6683_v15 = vpop.permute.xlu1 %830 }
  0xd1   : > { %v834_v18 = vmul.f32 %v6683_v15, %v6685_v16  ;;  %v833_v19 = vmul.f32 %v6683_v15, %v6687_v17  ;;  %v835_v24 = vmul.f32 %v6683_v15, %v6697_v21 }
  0xd3   : > { %841 = vrot.lane.b32.xlu1 %v834_v18, %s12208_s28  ;;  %839 = vrot.lane.b32.xlu0 %v833_v19, %s12208_s28  ;;  %v716_v18 = vmul.f32 %v6719_v56, %v6687_v17  ;;  %v784_v19 = vmul.f32 %v6727_v11, %v777_v5 }
  0xd5   : > { %v6699_v23 = vpop.permute.xlu1 %855 }
  0xd6   : > { %v859_v27 = vmul.f32 %v6699_v23, %v6685_v16  ;;  %v858_v30 = vmul.f32 %v6699_v23, %v6687_v17 }
  0xd7   : > { %843 = vrot.lane.b32.xlu0 %v835_v24, %s12208_s28  ;;  %v723_v24 = vmul.f32 %v6671_v10, %v716_v18 }
  0xd8   : > { %866 = vrot.lane.b32.xlu1 %v859_v27, %s12208_s28  ;;  %v555_v27 = vmul.f32 %v6738_v55, %v6629_v49 }
  0xdb   : > { %864 = vrot.lane.b32.xlu0 %v858_v30, %s12208_s28  ;;  %v748_v30 = vmul.f32 %v6676_v12, %v716_v18 }
  0xdc   : > { %567 = vrot.lane.b32.xlu1 %v561_v52, %s6444_s29  ;;  %v562_v52 = vmul.f32 %v6653_v60, %v555_v27 }
  0xdf   : > { %592 = vrot.lane.b32.xlu0 %v586_v57, %s6444_s29  ;;  %v556_v57 = vmul.f32 %v6725_v7, %v6623_v46 }
  0xe0   : > { %627 = vrot.lane.b32.xlu1 %v621_v4, %s6445_s30  ;;  %v615_v4 = vmul.f32 %v6755_v54, %v6629_v49 }
  0xe1   : > { %v563_v18 = vmul.f32 %v6653_v60, %v556_v57  ;;  %v588_v49 = vmul.f32 %v6651_v59, %v556_v57 }
  0xe3   : > { %652 = vrot.lane.b32.xlu0 %v646_v45, %s6445_s30  ;;  %v6764_v45 = vunpack.i.h.bf16 %v6031_v50  ;;  %v616_v50 = vmul.f32 %v6744_v28, %v6623_v46 }
  0xe4   : > { %790 = vrot.lane.b32.xlu1 %v784_v19, %s12210_s11  ;;  %v622_v19 = vmul.f32 %v6657_v63, %v615_v4 }
  0xe5   : > { %12522 = vst [vmem:[#allocation20_spill] sm:$0xff] %v6764_v45  ;;  %v6773_v5 = vsel %vm711_vm6, %v6719_v56, %v6764_v45  ;;  %v718_v57 = vmul.f32 %v6764_v45, %v6697_v21 }
  0xe6   : > { %12523 = vst [vmem:[#allocation21_spill] sm:$0xff] %v6773_v5 }
  0xe7   : > { %729 = vrot.lane.b32.xlu0 %v723_v24, %s12212_s12  ;;  %v647_v24 = vmul.f32 %v6655_v62, %v615_v4 }
  0xe8   : > { %6046 = vrot.lane.b32.xlu1 %v6589_v29, %s6448_s18  ;;  %v587_v29 = vmul.f32 %v6651_v59, %v555_v27  ;;  %v717_v27 = vmul.f32 %v6773_v5, %v6685_v16 }
  0xeb   : > { %754 = vrot.lane.b32.xlu0 %v748_v30, %s12212_s12  ;;  %v6783_v30 = vunpack.i.h.bf16 %v6679_v13  ;;  %v648_v13 = vmul.f32 %v6655_v62, %v616_v50 }
  0xec   : > { %569 = vrot.lane.b32.xlu1 %v562_v52, %s6444_s29  ;;  %v623_v52 = vmul.f32 %v6657_v63, %v616_v50 }
  0xed   : > { %12524 = vst [vmem:[#allocation22_spill] sm:$0xff] %v6783_v30  ;;  %v6792_v46 = vsel %vm772_vm7, %v6713_v51, %v6783_v30  ;;  %v779_v50 = vmul.f32 %v6783_v30, %v6697_v21 }
  0xee   : > { %12525 = vst [vmem:[#allocation23_spill] sm:$0xff] %v6792_v46  ;;  %v778_v4 = vmul.f32 %v6792_v46, %v6685_v16 }
  0xef   : > { %815 = vrot.lane.b32.xlu0 %v809_v61, %s12210_s11  ;;  %v724_v61 = vmul.f32 %v6671_v10, %v717_v27 }
  0xf0   : > { %594 = vrot.lane.b32.xlu1 %v587_v29, %s6444_s29  ;;  %v749_v29 = vmul.f32 %v6676_v12, %v717_v27  ;;  %v786_v27 = vmul.f32 %v6727_v11, %v779_v50 }
  0xf3   : > { %571 = vrot.lane.b32.xlu0 %v563_v18, %s6444_s29  ;;  %v725_v18 = vmul.f32 %v6671_v10, %v718_v57 }
  0xf4   : > { %629 = vrot.lane.b32.xlu1 %v622_v19, %s6445_s30  ;;  %v785_v19 = vmul.f32 %v6727_v11, %v778_v4 }
  0xf7   : > { %596 = vrot.lane.b32.xlu0 %v588_v49, %s6444_s29  ;;  %v750_v49 = vmul.f32 %v6676_v12, %v718_v57 }
  0xf8   : > { %654 = vrot.lane.b32.xlu1 %v647_v24, %s6445_s30  ;;  %v810_v24 = vmul.f32 %v6681_v14, %v778_v4 }
  0xfb   : > { %631 = vrot.lane.b32.xlu0 %v623_v52, %s6445_s30  ;;  %v811_v52 = vmul.f32 %v6681_v14, %v779_v50 }
  0xfc   : > { %731 = vrot.lane.b32.xlu1 %v724_v61, %s12212_s12  ;;  %v860_v61 = vmul.f32 %v6699_v23, %v6697_v21 }
  0xff   : > { %656 = vrot.lane.b32.xlu0 %v648_v13, %s6445_s30  ;;  %v12006_v13 = vmov 17  }
 0x100   : > { %756 = vrot.lane.b32.xlu1 %v749_v29, %s12212_s12 }
 0x101   : > { %6051 = vset.pattern.permute.xlu1 %v12006_v13 }
 0x103   : > { %733 = vrot.lane.b32.xlu0 %v725_v18, %s12212_s12 }
 0x104   : > { %792 = vrot.lane.b32.xlu1 %v785_v19, %s12210_s11 }
 0x107   : > { %758 = vrot.lane.b32.xlu0 %v750_v49, %s12212_s12 }
 0x108   : > { %817 = vrot.lane.b32.xlu1 %v810_v24, %s12210_s11 }
 0x10b   : > { %794 = vrot.lane.b32.xlu0 %v786_v27, %s12210_s11 }
 0x10f   : > { %819 = vrot.lane.b32.xlu0 %v811_v52, %s12210_s11  ;;  %v6822_v57 = vpop.permute.xlu0 %496  ;;  %v6834_v50 = vpop.permute.xlu1 %492 }
 0x110   : > { %12526 = vst [vmem:[#allocation24_spill] sm:$0xff] %v6822_v57 }
 0x113   : > { %868 = vrot.lane.b32.xlu0 %v860_v61, %s12208_s28  ;;  %v6840_v52 = vpop.permute.xlu1 %494 }
 0x117   : > { %891 = vperm.xlu0 %6050, %v6571_v1  }
 0x119   : > { %v6824_v29 = vpop.permute.xlu0 %517  ;;  %v6844_v13 = vpop.permute.xlu1 %519 }
 0x11d   : > { %v6826_v4 = vpop.permute.xlu0 %521 }
 0x11e   : > { %12527 = vst [vmem:[#allocation25_spill] sm:$0xff] %v6826_v4 }
 0x12e   : > { %v6828_v18 = vpop.permute.xlu0 %674  ;;  %v6848_v41 = vpop.permute.xlu1 %676 }
 0x12f   : > { %12528 = vst [vmem:[#allocation26_spill] sm:$0xff] %v6828_v18  ;;  %12534 = vst [vmem:[#allocation32_spill] sm:$0xff] %v6848_v41 }
 0x132   : > { %v6852_v39 = vpop.permute.xlu1 %693 }
 0x133   : > { %12536 = vst [vmem:[#allocation34_spill] sm:$0xff] %v6852_v39 }
 0x136   : > { %v6858_v38 = vpop.permute.xlu1 %695 }
 0x137   : > { %12539 = vst [vmem:[#allocation37_spill] sm:$0xff] %v6858_v38 }
 0x145   : > { %v6830_v19 = vpop.permute.xlu0 %839  ;;  %v6862_v33 = vpop.permute.xlu1 %841 }
 0x146   : > { %12529 = vst [vmem:[#allocation27_spill] sm:$0xff] %v6830_v19  ;;  %12541 = vst [vmem:[#allocation39_spill] sm:$0xff] %v6862_v33 }
 0x149   : > { %v6832_v49 = vpop.permute.xlu0 %843 }
 0x14a   : > { %12530 = vst [vmem:[#allocation28_spill] sm:$0xff] %v6832_v49  ;;  %v6868_v2 = vpop.permute.xlu1 %866 }
 0x14b   : > { %12544 = vst [vmem:[#allocation42_spill] sm:$0xff] %v6868_v2 }
 0x14d   : > { %v6836_v24 = vpop.permute.xlu0 %864 }
 0x14e   : > { %12531 = vst [vmem:[#allocation29_spill] sm:$0xff] %v6836_v24  ;;  %v6872_v9 = vpop.permute.xlu1 %567  ;;  %v12045_v24 = vmov 19  }
 0x14f   : > { %6053 = vset.pattern.permute.xlu0 %v12045_v24 }
 0x151   : > { %v6838_v27 = vpop.permute.xlu0 %592 }
 0x152   : > { %v6876_v25 = vpop.permute.xlu1 %627 }
 0x153   : > { %12547 = vst [vmem:[#allocation45_spill] sm:$0xff] %v6876_v25 }
 0x155   : > { %v6842_v61 = vpop.permute.xlu0 %652 }
 0x156   : > { %12532 = vst [vmem:[#allocation30_spill] sm:$0xff] %v6842_v61  ;;  %v6880_v8 = vpop.permute.xlu1 %790 }
 0x157   : > { %12549 = vst [vmem:[#allocation47_spill] sm:$0xff] %v6880_v8 }
 0x159   : > { %v6846_v42 = vpop.permute.xlu0 %729 }
 0x15a   : > { %12533 = vst [vmem:[#allocation31_spill] sm:$0xff] %v6846_v42  ;;  %v6047_v33 = vpop.permute.xlu1 %6046 }
 0x15b   : > { %v6884_v19 = vunpack.i.h.bf16 %v6047_v33  ;;  %v6886_v44 = vunpack.i.l.bf16 %v6047_v33 }
 0x15d   : > { %v6850_v40 = vpop.permute.xlu0 %754  ;;  %12551 = vst [vmem:[#allocation49_spill] sm:$0xff] %v6884_v19  ;;  %12552 = vst [vmem:[#allocation50_spill] sm:$0xff] %v6886_v44 }
 0x15e   : > { %12535 = vst [vmem:[#allocation33_spill] sm:$0xff] %v6850_v40  ;;  %v6912_v2 = vpop.permute.xlu1 %569 }
 0x161   : > { %v6854_v36 = vpop.permute.xlu0 %815 }
 0x162   : > { %12537 = vst [vmem:[#allocation35_spill] sm:$0xff] %v6854_v36 }
 0x165   : > { %v6856_v37 = vpop.permute.xlu0 %571 }
 0x166   : > { %12538 = vst [vmem:[#allocation36_spill] sm:$0xff] %v6856_v37 }
 0x169   : > { %v6860_v35 = vpop.permute.xlu0 %596 }
 0x16a   : > { %12540 = vst [vmem:[#allocation38_spill] sm:$0xff] %v6860_v35 }
 0x16d   : > { %v6864_v31 = vpop.permute.xlu0 %631 }
 0x16e   : > { %12542 = vst [vmem:[#allocation40_spill] sm:$0xff] %v6864_v31 }
 0x171   : > { %v6866_v34 = vpop.permute.xlu0 %656 }
 0x172   : > { %12543 = vst [vmem:[#allocation41_spill] sm:$0xff] %v6866_v34 }
 0x175   : > { %v6870_v22 = vpop.permute.xlu0 %733 }
 0x176   : > { %12545 = vst [vmem:[#allocation43_spill] sm:$0xff] %v6870_v22  ;;  %v889_v22 = vmul.f32 %v6884_v19, %v6697_v21  ;;  %v12043_v21 = vmov 18  }
 0x179   : > { %v6874_v32 = vpop.permute.xlu0 %758 }
 0x17a   : > { %12546 = vst [vmem:[#allocation44_spill] sm:$0xff] %v6874_v32  ;;  %v887_v32 = vmul.f32 %v6886_v44, %v6687_v17 }
 0x17d   : > { %v6878_v3 = vpop.permute.xlu0 %794 }
 0x17e   : > { %12548 = vst [vmem:[#allocation46_spill] sm:$0xff] %v6878_v3  ;;  %v6897_v3 = vsel %vm882_vm8, %v6886_v44, %v6884_v19 }
 0x17f   : > { %12554 = vst [vmem:[#allocation52_spill] sm:$0xff] %v6897_v3 }
 0x181   : > { %v6882_v49 = vpop.permute.xlu0 %819 }
 0x182   : > { %12550 = vst [vmem:[#allocation48_spill] sm:$0xff] %v6882_v49 }
 0x185   : > { %v6888_v36 = vpop.permute.xlu0 %868 }
 0x186   : > { %12553 = vst [vmem:[#allocation51_spill] sm:$0xff] %v6888_v36  ;;  %v888_v36 = vmul.f32 %v6897_v3, %v6685_v16  ;;  %v6914_v16 = vpop.permute.xlu1 %594 }
 0x18a   : > { %v6916_v40 = vpop.permute.xlu1 %629 }
 0x18b   : > { %12555 = vst [vmem:[#allocation53_spill] sm:$0xff] %v6916_v40 }
 0x192   : > { %v6899_v49 = vpop.permute.xlu0 %891 }
 0x193   : > { %v896_v8 = vmul.f32 %v6899_v49, %v889_v22  ;;  %v894_v33 = vmul.f32 %v6899_v49, %v887_v32  ;;  %v895_v17 = vmul.f32 %v6899_v49, %v888_v36 }
 0x195   : > { %904 = vrot.lane.b32.xlu0 %v896_v8, %s12206_s21  ;;  %900 = vrot.lane.b32.xlu1 %v894_v33, %s12206_s21  ;;  %v6918_v8 = vpop.permute.xlu1 %654 }
 0x196   : > { %12556 = vst [vmem:[#allocation54_spill] sm:$0xff] %v6918_v8 }
 0x199   : > { %902 = vrot.lane.b32.xlu1 %v895_v17, %s12206_s21  ;;  %v6920_v33 = vpop.permute.xlu1 %731 }
 0x19a   : > { %12557 = vst [vmem:[#allocation55_spill] sm:$0xff] %v6920_v33 }
 0x19d   : > { %916 = vperm.xlu1 %6051, %v6571_v1   ;;  %v6922_v38 = vpop.permute.xlu1 %756 }
 0x19e   : > { %12558 = vst [vmem:[#allocation56_spill] sm:$0xff] %v6922_v38 }
 0x1a1   : > { %6052 = vset.pattern.permute.xlu1 %v12043_v21  ;;  %v6924_v17 = vpop.permute.xlu1 %792 }
 0x1a2   : > { %12559 = vst [vmem:[#allocation57_spill] sm:$0xff] %v6924_v17  ;;  %v6941_v17 = vld [vmem:[#allocation2 + $0x40] sm:$0xf] }
 0x1a5   : > { %v6926_v41 = vpop.permute.xlu1 %817 }
 0x1a6   : > { %12560 = vst [vmem:[#allocation58_spill] sm:$0xff] %v6926_v41 }
 0x207   : > { %v6928_v21 = vpop.permute.xlu1 %900 }
 0x208   : > { %12561 = vst [vmem:[#allocation59_spill] sm:$0xff] %v6928_v21  ;;  %v939_v21 = vld [vmem:[#allocation2] sm:$0xf] }
 0x20b   : > { %v6930_v31 = vpop.permute.xlu1 %902 }
 0x20c   : > { %12562 = vst [vmem:[#allocation60_spill] sm:$0xff] %v6930_v31  ;;  %v959_v31 = vmul.f32 %v6941_v17, %v6625_v47 }
 0x218   : > { %v6932_v24 = vpop.permute.xlu1 %916 }
 0x219   : > { %v920_v42 = vmul.f32 %v6932_v24, %v888_v36  ;;  %v919_v37 = vmul.f32 %v6932_v24, %v887_v32  ;;  %v921_v38 = vmul.f32 %v6932_v24, %v889_v22  ;;  %v958_v36 = vmul.f32 %v939_v21, %v6625_v47  ;;  %v6948_v32 = vld [vmem:[#allocation2 + $0x78] sm:$0xf] }
 0x21a   : > { %v978_v22 = vmul.f32 %v939_v21, %v6638_v53 }
 0x21b   : > { %927 = vrot.lane.b32.xlu1 %v920_v42, %s12206_s21  ;;  %925 = vrot.lane.b32.xlu0 %v919_v37, %s12206_s21  ;;  %v960_v37 = vmul.f32 %v6948_v32, %v6625_v47  ;;  %v979_v42 = vmul.f32 %v6941_v17, %v6638_v53 }
 0x21f   : > { %952 = vperm.xlu1 %6052, %v6571_v1   ;;  %929 = vrot.lane.b32.xlu0 %v921_v38, %s12206_s21  ;;  %v980_v38 = vmul.f32 %v6948_v32, %v6638_v53 }
 0x223   : > { %966 = vrot.lane.b32.xlu1 %v959_v31, %s6430_s25  ;;  %964 = vrot.lane.b32.xlu0 %v958_v36, %s6430_s25  ;;  %v12056_v31 = vmov 20   ;;  %v6963_v36 = vpop.permute.xlu0 %904 }
 0x224   : > { %6054 = vset.pattern.permute.xlu1 %v12056_v31  ;;  %12563 = vst [vmem:[#allocation61_spill] sm:$0xff] %v6963_v36  ;;  %v1023_v31 = vmul.f32 %v6941_v17, %v6738_v55  ;;  %v1022_v36 = vmul.f32 %v6693_v20, %v939_v21 }
 0x227   : > { %984 = vrot.lane.b32.xlu1 %v978_v22, %s6430_s25  ;;  %968 = vrot.lane.b32.xlu0 %v960_v37, %s6430_s25 }
 0x22b   : > { %988 = vrot.lane.b32.xlu1 %v980_v38, %s6430_s25  ;;  %986 = vrot.lane.b32.xlu0 %v979_v42, %s6430_s25 }
 0x22f   : > { %999 = vperm.xlu0 %6053, %v6571_v1  }
 0x28d   : > { %v6965_v22 = vpop.permute.xlu0 %925 }
 0x28e   : > { %12564 = vst [vmem:[#allocation62_spill] sm:$0xff] %v6965_v22 }
 0x291   : > { %v6967_v37 = vpop.permute.xlu0 %929 }
 0x292   : > { %12565 = vst [vmem:[#allocation63_spill] sm:$0xff] %v6967_v37  ;;  %v1025_v37 = vmul.f32 %v1022_v36, %v6653_v60 }
 0x295   : > { %v6969_v41 = vpop.permute.xlu0 %964 }
 0x296   : > { %12566 = vst [vmem:[#allocation64_spill] sm:$0xff] %v6969_v41  ;;  %v1026_v41 = vmul.f32 %v1023_v31, %v6653_v60 }
 0x299   : > { %v6971_v33 = vpop.permute.xlu0 %968 }
 0x29a   : > { %12567 = vst [vmem:[#allocation65_spill] sm:$0xff] %v6971_v33 }
 0x29d   : > { %v6973_v34 = vpop.permute.xlu0 %986 }
 0x29e   : > { %12568 = vst [vmem:[#allocation66_spill] sm:$0xff] %v6973_v34  ;;  %v1045_v34 = vmul.f32 %v1022_v36, %v6651_v59 }
 0x2aa   : > { %v6975_v38 = vpop.permute.xlu0 %999 }
 0x2ab   : > { %v1004_v42 = vmul.f32 %v6975_v38, %v6948_v32  ;;  %v1002_v39 = vmul.f32 %v6975_v38, %v939_v21  ;;  %v1003_v33 = vmul.f32 %v6975_v38, %v6941_v17 }
 0x2ad   : > { %1012 = vrot.lane.b32.xlu0 %v1004_v42, %s6430_s25  ;;  %1008 = vrot.lane.b32.xlu1 %v1002_v39, %s6430_s25  ;;  %v1024_v42 = vmul.f32 %v6725_v7, %v6948_v32 }
 0x2af   : > { %v1047_v39 = vmul.f32 %v1024_v42, %v6651_v59  ;;  %v1027_v22 = vmul.f32 %v1024_v42, %v6653_v60 }
 0x2b1   : > { %1033 = vrot.lane.b32.xlu0 %v1026_v41, %s6444_s29  ;;  %1010 = vrot.lane.b32.xlu1 %v1003_v33, %s6430_s25  ;;  %v1046_v41 = vmul.f32 %v1023_v31, %v6651_v59  ;;  %v12064_v33 = vmov 21  }
 0x2b5   : > { %1051 = vrot.lane.b32.xlu0 %v1045_v34, %s6444_s29  ;;  %1031 = vrot.lane.b32.xlu1 %v1025_v37, %s6444_s29  ;;  %v7004_v34 = vpop.permute.xlu1 %927 }
 0x2b6   : > { %12569 = vst [vmem:[#allocation67_spill] sm:$0xff] %v7004_v34 }
 0x2b9   : > { %1055 = vrot.lane.b32.xlu0 %v1047_v39, %s6444_s29  ;;  %1035 = vrot.lane.b32.xlu1 %v1027_v22, %s6444_s29  ;;  %v7006_v37 = vpop.permute.xlu1 %952 }
 0x2ba   : > { %12570 = vst [vmem:[#allocation68_spill] sm:$0xff] %v7006_v37 }
 0x2bd   : > { %1053 = vrot.lane.b32.xlu1 %v1046_v41, %s6444_s29  ;;  %v7008_v57 = vpop.permute.xlu1 %966 }
 0x2be   : > { %12571 = vst [vmem:[#allocation69_spill] sm:$0xff] %v7008_v57 }
 0x2c1   : > { %1066 = vperm.xlu1 %6054, %v6571_v1   ;;  %v7010_v35 = vpop.permute.xlu1 %984 }
 0x2c2   : > { %12572 = vst [vmem:[#allocation70_spill] sm:$0xff] %v7010_v35  ;;  %v1089_v35 = vmul.f32 %v6703_v26, %v939_v21 }
 0x2c5   : > { %6055 = vset.pattern.permute.xlu1 %v12064_v33  ;;  %v7012_v39 = vpop.permute.xlu1 %988 }
 0x2c6   : > { %12573 = vst [vmem:[#allocation71_spill] sm:$0xff] %v7012_v39  ;;  %v1092_v39 = vmul.f32 %v1089_v35, %v6657_v63 }
 0x31f   : > { %v7014_v22 = vpop.permute.xlu1 %1008 }
 0x320   : > { %12574 = vst [vmem:[#allocation72_spill] sm:$0xff] %v7014_v22  ;;  %v7122_v22 = vpop.permute.xlu0 %1012 }
 0x321   : > { %12587 = vst [vmem:[#allocation84_spill] sm:$0xff] %v7122_v22 }
 0x323   : > { %v7016_v18 = vpop.permute.xlu1 %1010 }
 0x324   : > { %12575 = vst [vmem:[#allocation73_spill] sm:$0xff] %v7016_v18 }
 0x327   : > { %v7018_v41 = vpop.permute.xlu1 %1031 }
 0x328   : > { %12576 = vst [vmem:[#allocation74_spill] sm:$0xff] %v7018_v41 }
 0x32b   : > { %v7020_v4 = vpop.permute.xlu1 %1035 }
 0x32c   : > { %12577 = vst [vmem:[#allocation75_spill] sm:$0xff] %v7020_v4  ;;  %v1091_v4 = vmul.f32 %v6744_v28, %v6948_v32 }
 0x32e   : > { %v1094_v21 = vmul.f32 %v1091_v4, %v6657_v63 }
 0x32f   : > { %v7022_v61 = vpop.permute.xlu1 %1053 }
 0x330   : > { %12578 = vst [vmem:[#allocation76_spill] sm:$0xff] %v7022_v61  ;;  %v1090_v61 = vmul.f32 %v6941_v17, %v6755_v54 }
 0x33c   : > { %v7024_v33 = vpop.permute.xlu1 %1066 }
 0x33d   : > { %v1070_v34 = vmul.f32 %v7024_v33, %v1023_v31  ;;  %v1069_v57 = vmul.f32 %v7024_v33, %v1022_v36  ;;  %v1071_v41 = vmul.f32 %v7024_v33, %v1024_v42  ;;  %v1093_v31 = vmul.f32 %v1090_v61, %v6657_v63 }
 0x33e   : > { %v1112_v36 = vmul.f32 %v1089_v35, %v6655_v62  ;;  %v1114_v42 = vmul.f32 %v1091_v4, %v6655_v62 }
 0x33f   : > { %1077 = vrot.lane.b32.xlu1 %v1070_v34, %s6444_s29  ;;  %1075 = vrot.lane.b32.xlu0 %v1069_v57, %s6444_s29  ;;  %v1113_v57 = vmul.f32 %v1090_v61, %v6655_v62  ;;  %v12071_v34 = vmov 22  }
 0x343   : > { %1098 = vrot.lane.b32.xlu1 %v1092_v39, %s6445_s30  ;;  %1079 = vrot.lane.b32.xlu0 %v1071_v41, %s6444_s29 }
 0x347   : > { %1102 = vrot.lane.b32.xlu1 %v1094_v21, %s6445_s30  ;;  %1100 = vrot.lane.b32.xlu0 %v1093_v31, %s6445_s30 }
 0x34b   : > { %1120 = vrot.lane.b32.xlu1 %v1113_v57, %s6445_s30  ;;  %1118 = vrot.lane.b32.xlu0 %v1112_v36, %s6445_s30 }
 0x34f   : > { %1133 = vperm.xlu1 %6055, %v6571_v1   ;;  %1122 = vrot.lane.b32.xlu0 %v1114_v42, %s6445_s30  ;;  %v1156_v42 = vmul.f32 %v6941_v17, %v6659_v0 }
 0x353   : > { %6056 = vset.pattern.permute.xlu1 %v12071_v34 }
 0x3b1   : > { %v7051_v39 = vpop.permute.xlu1 %1077 }
 0x3b2   : > { %12579 = vst [vmem:[#allocation77_spill] sm:$0xff] %v7051_v39 }
 0x3b5   : > { %v7053_v41 = vpop.permute.xlu1 %1098 }
 0x3b6   : > { %12580 = vst [vmem:[#allocation78_spill] sm:$0xff] %v7053_v41 }
 0x3b9   : > { %v7055_v21 = vpop.permute.xlu1 %1102 }
 0x3ba   : > { %12581 = vst [vmem:[#allocation79_spill] sm:$0xff] %v7055_v21  ;;  %v1171_v21 = vmul.f32 %v6941_v17, %v6665_v6 }
 0x3bd   : > { %v7057_v31 = vpop.permute.xlu1 %1120 }
 0x3be   : > { %12582 = vst [vmem:[#allocation80_spill] sm:$0xff] %v7057_v31  ;;  %v7101_v31 = vld [vmem:[#allocation2 + $0x50] sm:$0xf] }
 0x3ca   : > { %v7059_v57 = vpop.permute.xlu1 %1133 }
 0x3cb   : > { %v1137_v36 = vmul.f32 %v7059_v57, %v1090_v61  ;;  %v1136_v37 = vmul.f32 %v7059_v57, %v1089_v35  ;;  %v1138_v34 = vmul.f32 %v7059_v57, %v1091_v4  ;;  %v1157_v61 = vmul.f32 %v6948_v32, %v6659_v0 }
 0x3cc   : > { %v1172_v35 = vmul.f32 %v6948_v32, %v6665_v6  ;;  %v12073_v4 = vmov 23  }
 0x3cd   : > { %1144 = vrot.lane.b32.xlu1 %v1137_v36, %s6445_s30  ;;  %1142 = vrot.lane.b32.xlu0 %v1136_v37, %s6445_s30 }
 0x3ce   : > { %6057 = vset.pattern.permute.xlu0 %v12073_v4 }
 0x3d1   : > { %1160 = vrot.lane.b32.xlu1 %v1156_v42, %s6426_s20  ;;  %1146 = vrot.lane.b32.xlu0 %v1138_v34, %s6445_s30  ;;  %v7087_v42 = vld [vmem:[#allocation2 + $0x78] sm:$0xf] }
 0x3d2   : > { %v1209_v4 = vmul.f32 %v7087_v42, %v6773_v5 }
 0x3d5   : > { %1175 = vrot.lane.b32.xlu1 %v1171_v21, %s6426_s20  ;;  %1162 = vrot.lane.b32.xlu0 %v1157_v61, %s6426_s20  ;;  %v7089_v21 = vld [vmem:[#allocation2 + $0x40] sm:$0xf] }
 0x3d9   : > { %1187 = vperm.xlu1 %6056, %v6571_v1   ;;  %1177 = vrot.lane.b32.xlu0 %v1172_v35, %s6426_s20 }
 0x43f   : > { %v7081_v37 = vpop.permute.xlu1 %1144 }
 0x440   : > { %12583 = vst [vmem:[#allocation81_spill] sm:$0xff] %v7081_v37 }
 0x443   : > { %v7083_v34 = vpop.permute.xlu1 %1160 }
 0x444   : > { %12584 = vst [vmem:[#allocation82_spill] sm:$0xff] %v7083_v34  ;;  %v1208_v34 = vmul.f32 %v6719_v56, %v7089_v21 }
 0x446   : > { %v1211_v37 = vmul.f32 %v1208_v34, %v6671_v10 }
 0x447   : > { %v7085_v36 = vpop.permute.xlu1 %1175 }
 0x448   : > { %12585 = vst [vmem:[#allocation83_spill] sm:$0xff] %v7085_v36  ;;  %v1212_v36 = vmul.f32 %v1209_v4, %v6671_v10 }
 0x454   : > { %v7091_v61 = vpop.permute.xlu1 %1187 }
 0x455   : > { %v1191_v41 = vmul.f32 %v7091_v61, %v6948_v32  ;;  %v1190_v35 = vmul.f32 %v7091_v61, %v6941_v17  ;;  %v1210_v32 = vmul.f32 %v6764_v45, %v7101_v31  ;;  %v1231_v17 = vmul.f32 %v1208_v34, %v6676_v12 }
 0x457   : > { %1196 = vrot.lane.b32.xlu1 %v1191_v41, %s6426_s20  ;;  %1194 = vrot.lane.b32.xlu0 %v1190_v35, %s6426_s20  ;;  %v1213_v39 = vmul.f32 %v1210_v32, %v6671_v10  ;;  %v1233_v41 = vmul.f32 %v1210_v32, %v6676_v12  ;;  %v1232_v35 = vmul.f32 %v1209_v4, %v6676_v12 }
 0x45b   : > { %1219 = vrot.lane.b32.xlu1 %v1212_v36, %s12212_s12  ;;  %1217 = vrot.lane.b32.xlu0 %v1211_v37, %s12212_s12  ;;  %v12586_v36 = vmov 1   ;;  %v12082_v37 = vmov 24  }
 0x45c   : > { %6058 = vset.pattern.permute.xlu1 %v12082_v37 }
 0x45f   : > { %1237 = vrot.lane.b32.xlu1 %v1231_v17, %s12212_s12  ;;  %1221 = vrot.lane.b32.xlu0 %v1213_v39, %s12212_s12  ;;  %v7124_v17 = vpop.permute.xlu0 %1033 }
 0x460   : > { %12588 = vst [vmem:[#allocation85_spill] sm:$0xff] %v7124_v17 }
 0x463   : > { %1241 = vrot.lane.b32.xlu1 %v1233_v41, %s12212_s12  ;;  %1239 = vrot.lane.b32.xlu0 %v1232_v35, %s12212_s12  ;;  %v7126_v39 = vpop.permute.xlu0 %1051 }
 0x464   : > { %12589 = vst [vmem:[#allocation86_spill] sm:$0xff] %v7126_v39 }
 0x467   : > { %1252 = vperm.xlu0 %6057, %v6571_v1   ;;  %v7128_v18 = vpop.permute.xlu0 %1055 }
 0x468   : > { %12590 = vst [vmem:[#allocation87_spill] sm:$0xff] %v7128_v18 }
 0x46b   : > { %6062 = vset.pattern.permute.xlu0 %v12586_v36  ;;  %v7130_v8 = vpop.permute.xlu0 %1075 }
 0x46c   : > { %12591 = vst [vmem:[#allocation88_spill] sm:$0xff] %v7130_v8 }
 0x46f   : > { %v7132_v41 = vpop.permute.xlu0 %1079 }
 0x470   : > { %12592 = vst [vmem:[#allocation89_spill] sm:$0xff] %v7132_v41 }
 0x473   : > { %v7134_v35 = vpop.permute.xlu0 %1100 }
 0x474   : > { %12593 = vst [vmem:[#allocation90_spill] sm:$0xff] %v7134_v35 }
 0x477   : > { %v7136_v25 = vpop.permute.xlu0 %1118 }
 0x478   : > { %12594 = vst [vmem:[#allocation91_spill] sm:$0xff] %v7136_v25 }
 0x47b   : > { %v7138_v36 = vpop.permute.xlu0 %1122 }
 0x47c   : > { %12595 = vst [vmem:[#allocation92_spill] sm:$0xff] %v7138_v36 }
 0x47f   : > { %v7140_v40 = vpop.permute.xlu0 %1142 }
 0x480   : > { %12596 = vst [vmem:[#allocation93_spill] sm:$0xff] %v7140_v40 }
 0x483   : > { %v7142_v37 = vpop.permute.xlu0 %1146 }
 0x484   : > { %12597 = vst [vmem:[#allocation94_spill] sm:$0xff] %v7142_v37  ;;  %v1276_v37 = vmul.f32 %v7087_v42, %v6792_v46 }
 0x487   : > { %v7144_v22 = vpop.permute.xlu0 %1162 }
 0x488   : > { %12598 = vst [vmem:[#allocation95_spill] sm:$0xff] %v7144_v22  ;;  %v1279_v22 = vmul.f32 %v1276_v37, %v6727_v11 }
 0x48b   : > { %v7146_v17 = vpop.permute.xlu0 %1177 }
 0x48c   : > { %12599 = vst [vmem:[#allocation96_spill] sm:$0xff] %v7146_v17 }
 0x4c9   : > { %v7148_v39 = vpop.permute.xlu0 %1194 }
 0x4ca   : > { %12600 = vst [vmem:[#allocation97_spill] sm:$0xff] %v7148_v39 }
 0x4cd   : > { %v7150_v18 = vpop.permute.xlu0 %1217 }
 0x4ce   : > { %12601 = vst [vmem:[#allocation98_spill] sm:$0xff] %v7150_v18 }
 0x4d1   : > { %v7152_v8 = vpop.permute.xlu0 %1221 }
 0x4d2   : > { %12602 = vst [vmem:[#allocation99_spill] sm:$0xff] %v7152_v8  ;;  %v1275_v8 = vmul.f32 %v6713_v51, %v7089_v21 }
 0x4d5   : > { %v7154_v41 = vpop.permute.xlu0 %1239 }
 0x4d6   : > { %12603 = vst [vmem:[#allocation100_spill] sm:$0xff] %v7154_v41 }
 0x4e2   : > { %v7156_v35 = vpop.permute.xlu0 %1252 }
 0x4e3   : > { %v1257_v36 = vmul.f32 %v7156_v35, %v1210_v32  ;;  %v1255_v25 = vmul.f32 %v7156_v35, %v1208_v34  ;;  %v1256_v18 = vmul.f32 %v7156_v35, %v1209_v4  ;;  %v1298_v34 = vmul.f32 %v1275_v8, %v6681_v14 }
 0x4e4   : > { %v1278_v32 = vmul.f32 %v1275_v8, %v6727_v11 }
 0x4e5   : > { %1265 = vrot.lane.b32.xlu0 %v1257_v36, %s12212_s12  ;;  %1261 = vrot.lane.b32.xlu1 %v1255_v25, %s12212_s12  ;;  %v1277_v36 = vmul.f32 %v6783_v30, %v7101_v31 }
 0x4e7   : > { %v1300_v25 = vmul.f32 %v1277_v36, %v6681_v14  ;;  %v1280_v4 = vmul.f32 %v1277_v36, %v6727_v11 }
 0x4e9   : > { %1286 = vrot.lane.b32.xlu0 %v1279_v22, %s12210_s11  ;;  %1263 = vrot.lane.b32.xlu1 %v1256_v18, %s12212_s12  ;;  %v1299_v18 = vmul.f32 %v1276_v37, %v6681_v14  ;;  %v12095_v22 = vmov 25  }
 0x4ed   : > { %1304 = vrot.lane.b32.xlu0 %v1298_v34, %s12210_s11  ;;  %1284 = vrot.lane.b32.xlu1 %v1278_v32, %s12210_s11  ;;  %v7184_v34 = vpop.permute.xlu1 %1196 }
 0x4f1   : > { %1308 = vrot.lane.b32.xlu0 %v1300_v25, %s12210_s11  ;;  %1288 = vrot.lane.b32.xlu1 %v1280_v4, %s12210_s11  ;;  %v7186_v32 = vpop.permute.xlu1 %1219 }
 0x4f2   : > { %12604 = vst [vmem:[#allocation101_spill] sm:$0xff] %v7186_v32 }
 0x4f5   : > { %1306 = vrot.lane.b32.xlu1 %v1299_v18, %s12210_s11  ;;  %v7188_v41 = vpop.permute.xlu1 %1237 }
 0x4f6   : > { %12605 = vst [vmem:[#allocation102_spill] sm:$0xff] %v7188_v41 }
 0x4f9   : > { %1319 = vperm.xlu1 %6058, %v6571_v1   ;;  %v7190_v17 = vpop.permute.xlu1 %1241 }
 0x4fa   : > { %12606 = vst [vmem:[#allocation103_spill] sm:$0xff] %v7190_v17  ;;  %v1342_v17 = vmul.f32 %v7089_v21, %v6683_v15 }
 0x4fd   : > { %6059 = vset.pattern.permute.xlu1 %v12095_v22 }
 0x557   : > { %v7192_v25 = vpop.permute.xlu1 %1261 }
 0x558   : > { %12607 = vst [vmem:[#allocation104_spill] sm:$0xff] %v7192_v25 }
 0x55b   : > { %v7194_v4 = vpop.permute.xlu1 %1263 }
 0x55f   : > { %v7196_v39 = vpop.permute.xlu1 %1284 }
 0x560   : > { %12608 = vst [vmem:[#allocation105_spill] sm:$0xff] %v7196_v39 }
 0x563   : > { %v7198_v18 = vpop.permute.xlu1 %1288 }
 0x564   : > { %12609 = vst [vmem:[#allocation106_spill] sm:$0xff] %v7198_v18  ;;  %v1344_v18 = vmul.f32 %v7101_v31, %v6683_v15 }
 0x567   : > { %v7200_v1 = vpop.permute.xlu1 %1306 }
 0x568   : > { %12610 = vst [vmem:[#allocation107_spill] sm:$0xff] %v7200_v1 }
 0x574   : > { %v7202_v40 = vpop.permute.xlu1 %1319 }
 0x575   : > { %v1323_v22 = vmul.f32 %v7202_v40, %v1276_v37  ;;  %v1322_v32 = vmul.f32 %v7202_v40, %v1275_v8  ;;  %v1324_v41 = vmul.f32 %v7202_v40, %v1277_v36  ;;  %v1343_v37 = vmul.f32 %v7087_v42, %v6683_v15 }
 0x576   : > { %v1363_v8 = vmul.f32 %v7087_v42, %v6699_v23  ;;  %v1362_v36 = vmul.f32 %v7089_v21, %v6699_v23 }
 0x577   : > { %1330 = vrot.lane.b32.xlu1 %v1323_v22, %s12210_s11  ;;  %1328 = vrot.lane.b32.xlu0 %v1322_v32, %s12210_s11  ;;  %v12100_v22 = vmov 26  }
 0x57b   : > { %1348 = vrot.lane.b32.xlu1 %v1342_v17, %s12208_s28  ;;  %1332 = vrot.lane.b32.xlu0 %v1324_v41, %s12210_s11  ;;  %v1364_v17 = vmul.f32 %v7101_v31, %v6699_v23  ;;  %v6314_v41 = vld [vmem:[%s12509_s1] sm:$0xf] }
 0x57f   : > { %1352 = vrot.lane.b32.xlu1 %v1344_v18, %s12208_s28  ;;  %1350 = vrot.lane.b32.xlu0 %v1343_v37, %s12208_s28 }
 0x583   : > { %1370 = vrot.lane.b32.xlu1 %v1363_v8, %s12208_s28  ;;  %1368 = vrot.lane.b32.xlu0 %v1362_v36, %s12208_s28 }
 0x587   : > { %1383 = vperm.xlu1 %6059, %v6314_v41   ;;  %1372 = vrot.lane.b32.xlu0 %v1364_v17, %s12208_s28  ;;  %v1406_v17 = vmul.f32 %v6886_v44, %v7089_v21 }
 0x58b   : > { %6060 = vset.pattern.permute.xlu1 %v12100_v22  ;;  %v1409_v22 = vmul.f32 %v1406_v17, %v6899_v49 }
 0x5e9   : > { %v7232_v32 = vpop.permute.xlu1 %1330 }
 0x5ea   : > { %12611 = vst [vmem:[#allocation108_spill] sm:$0xff] %v7232_v32  ;;  %v1429_v32 = vmul.f32 %v1406_v17, %v6932_v24 }
 0x5ed   : > { %v7234_v18 = vpop.permute.xlu1 %1348 }
 0x5ee   : > { %12612 = vst [vmem:[#allocation109_spill] sm:$0xff] %v7234_v18  ;;  %v1408_v18 = vmul.f32 %v6884_v19, %v7101_v31 }
 0x5f1   : > { %v7236_v37 = vpop.permute.xlu1 %1352 }
 0x5f2   : > { %12613 = vst [vmem:[#allocation110_spill] sm:$0xff] %v7236_v37 }
 0x5f5   : > { %v7238_v8 = vpop.permute.xlu1 %1370 }
 0x5f6   : > { %12614 = vst [vmem:[#allocation111_spill] sm:$0xff] %v7238_v8  ;;  %v1407_v8 = vmul.f32 %v7087_v42, %v6897_v3 }
 0x602   : > { %v7240_v36 = vpop.permute.xlu1 %1383 }
 0x603   : > { %v1387_v39 = vmul.f32 %v7240_v36, %v7087_v42  ;;  %v1386_v1 = vmul.f32 %v7240_v36, %v7089_v21  ;;  %v1388_v37 = vmul.f32 %v7240_v36, %v7101_v31  ;;  %v1411_v21 = vmul.f32 %v1408_v18, %v6899_v49 }
 0x604   : > { %v1431_v31 = vmul.f32 %v1408_v18, %v6932_v24  ;;  %v12615_v42 = vmov 0  }
 0x605   : > { %1394 = vrot.lane.b32.xlu1 %v1387_v39, %s12208_s28  ;;  %1392 = vrot.lane.b32.xlu0 %v1386_v1, %s12208_s28  ;;  %v1410_v39 = vmul.f32 %v1407_v8, %v6899_v49  ;;  %v1430_v1 = vmul.f32 %v1407_v8, %v6932_v24 }
 0x609   : > { %1415 = vrot.lane.b32.xlu1 %v1409_v22, %s12206_s21  ;;  %1396 = vrot.lane.b32.xlu0 %v1388_v37, %s12208_s28 }
 0x60d   : > { %1419 = vrot.lane.b32.xlu1 %v1411_v21, %s12206_s21  ;;  %1417 = vrot.lane.b32.xlu0 %v1410_v39, %s12206_s21 }
 0x611   : > { %1437 = vrot.lane.b32.xlu1 %v1430_v1, %s12206_s21  ;;  %1435 = vrot.lane.b32.xlu0 %v1429_v32, %s12206_s21 }
 0x615   : > { %1450 = vperm.xlu1 %6060, %v6314_v41   ;;  %1439 = vrot.lane.b32.xlu0 %v1431_v31, %s12206_s21  ;;  %v7284_v41 = vld [vmem:[#allocation2 + $0x30] sm:$0xf] }
 0x616   : > { %12620 = vst [vmem:[#allocation116_spill] sm:$0xff] %v7284_v41  ;;  %v1488_v31 = vmul.f32 %v7284_v41, %v6625_v47 }
 0x619   : > { %6061 = vset.pattern.permute.xlu1 %v12615_v42 }
 0x677   : > { %v7270_v22 = vpop.permute.xlu1 %1394 }
 0x678   : > { %12616 = vst [vmem:[#allocation112_spill] sm:$0xff] %v7270_v22  ;;  %v1611_v22 = vmul.f32 %v6703_v26, %v7284_v41 }
 0x67b   : > { %v7272_v37 = vpop.permute.xlu1 %1415 }
 0x67c   : > { %12617 = vst [vmem:[#allocation113_spill] sm:$0xff] %v7272_v37 }
 0x67f   : > { %v7274_v21 = vpop.permute.xlu1 %1419 }
 0x680   : > { %12618 = vst [vmem:[#allocation114_spill] sm:$0xff] %v7274_v21  ;;  %v7291_v21 = vld [vmem:[#allocation2 + $0x68] sm:$0xf] }
 0x683   : > { %v7276_v39 = vpop.permute.xlu1 %1437 }
 0x684   : > { %12619 = vst [vmem:[#allocation115_spill] sm:$0xff] %v7276_v39 }
 0x690   : > { %v7278_v25 = vpop.permute.xlu1 %1450 }
 0x691   : > { %v1454_v1 = vmul.f32 %v7278_v25, %v1407_v8  ;;  %v1453_v32 = vmul.f32 %v7278_v25, %v1406_v17  ;;  %v1455_v42 = vmul.f32 %v7278_v25, %v1408_v18  ;;  %v7293_v8 = vld [vmem:[#allocation2 + $0x48] sm:$0xf]  ;;  %v1490_v17 = vmul.f32 %v7291_v21, %v6625_v47 }
 0x692   : > { %12621 = vst [vmem:[#allocation117_spill] sm:$0xff] %v7293_v8  ;;  %v1509_v18 = vmul.f32 %v7293_v8, %v6638_v53 }
 0x693   : > { %1461 = vrot.lane.b32.xlu1 %v1454_v1, %s12206_s21  ;;  %1459 = vrot.lane.b32.xlu0 %v1453_v32, %s12206_s21  ;;  %v1489_v1 = vmul.f32 %v7293_v8, %v6625_v47  ;;  %v1528_v32 = vmul.f32 %v7284_v41, %v6975_v38  ;;  %v1510_v47 = vmul.f32 %v7291_v21, %v6638_v53 }
 0x697   : > { %1494 = vrot.lane.b32.xlu1 %v1488_v31, %s6430_s25  ;;  %1463 = vrot.lane.b32.xlu0 %v1455_v42, %s12206_s21  ;;  %v1508_v42 = vmul.f32 %v7284_v41, %v6638_v53  ;;  %v1530_v31 = vmul.f32 %v7291_v21, %v6975_v38 }
 0x69b   : > { %1498 = vrot.lane.b32.xlu1 %v1490_v17, %s6430_s25  ;;  %1496 = vrot.lane.b32.xlu0 %v1489_v1, %s6430_s25  ;;  %v1529_v17 = vmul.f32 %v7293_v8, %v6975_v38  ;;  %v1549_v1 = vmul.f32 %v7293_v8, %v6738_v55 }
 0x69f   : > { %1516 = vrot.lane.b32.xlu1 %v1509_v18, %s6430_s25  ;;  %1514 = vrot.lane.b32.xlu0 %v1508_v42, %s6430_s25  ;;  %v1548_v18 = vmul.f32 %v6693_v20, %v7284_v41  ;;  %v1552_v42 = vmul.f32 %v1549_v1, %v6653_v60 }
 0x6a1   : > { %v1571_v37 = vmul.f32 %v1548_v18, %v6651_v59 }
 0x6a3   : > { %1534 = vrot.lane.b32.xlu1 %v1528_v32, %s6430_s25  ;;  %1518 = vrot.lane.b32.xlu0 %v1510_v47, %s6430_s25  ;;  %v1551_v32 = vmul.f32 %v1548_v18, %v6653_v60  ;;  %v1550_v47 = vmul.f32 %v6725_v7, %v7291_v21 }
 0x6a5   : > { %v1553_v39 = vmul.f32 %v1550_v47, %v6653_v60  ;;  %v7341_v60 = vpop.permute.xlu0 %1265 }
 0x6a7   : > { %1538 = vrot.lane.b32.xlu1 %v1530_v31, %s6430_s25  ;;  %1536 = vrot.lane.b32.xlu0 %v1529_v17, %s6430_s25  ;;  %v1573_v31 = vmul.f32 %v1550_v47, %v6651_v59  ;;  %v1572_v17 = vmul.f32 %v1549_v1, %v6651_v59 }
 0x6ab   : > { %1559 = vrot.lane.b32.xlu1 %v1552_v42, %s6444_s29  ;;  %1557 = vrot.lane.b32.xlu0 %v1551_v32, %s6444_s29  ;;  %v1592_v42 = vmul.f32 %v1549_v1, %v7024_v33  ;;  %v1591_v32 = vmul.f32 %v1548_v18, %v7024_v33  ;;  %v1612_v1 = vmul.f32 %v7293_v8, %v6755_v54  ;;  %v7353_v18 = vpop.permute.xlu0 %1286 }
 0x6ac   : > { %12622 = vst [vmem:[#allocation118_spill] sm:$0xff] %v7353_v18 }
 0x6af   : > { %1577 = vrot.lane.b32.xlu1 %v1571_v37, %s6444_s29  ;;  %1561 = vrot.lane.b32.xlu0 %v1553_v39, %s6444_s29  ;;  %v1614_v37 = vmul.f32 %v1611_v22, %v6657_v63  ;;  %v1593_v39 = vmul.f32 %v1550_v47, %v7024_v33  ;;  %v1635_v47 = vmul.f32 %v1612_v1, %v6655_v62  ;;  %v7361_v41 = vpop.permute.xlu0 %1304 }
 0x6b0   : > { %12623 = vst [vmem:[#allocation119_spill] sm:$0xff] %v7361_v41 }
 0x6b3   : > { %1581 = vrot.lane.b32.xlu1 %v1573_v31, %s6444_s29  ;;  %1579 = vrot.lane.b32.xlu0 %v1572_v17, %s6444_s29  ;;  %v1613_v31 = vmul.f32 %v6744_v28, %v7291_v21 }
 0x6b5   : > { %v1616_v17 = vmul.f32 %v1613_v31, %v6657_v63 }
 0x6b7   : > { %1599 = vrot.lane.b32.xlu1 %v1592_v42, %s6444_s29  ;;  %1597 = vrot.lane.b32.xlu0 %v1591_v32, %s6444_s29  ;;  %v1615_v42 = vmul.f32 %v1612_v1, %v6657_v63  ;;  %v1634_v32 = vmul.f32 %v1611_v22, %v6655_v62  ;;  %v7369_v63 = vpop.permute.xlu0 %1308 }
 0x6b8   : > { %12624 = vst [vmem:[#allocation120_spill] sm:$0xff] %v7369_v63 }
 0x6bb   : > { %1620 = vrot.lane.b32.xlu1 %v1614_v37, %s6445_s30  ;;  %1601 = vrot.lane.b32.xlu0 %v1593_v39, %s6444_s29  ;;  %v1654_v37 = vmul.f32 %v1611_v22, %v7059_v57  ;;  %v1636_v39 = vmul.f32 %v1613_v31, %v6655_v62  ;;  %v1675_v22 = vmul.f32 %v7291_v21, %v6659_v0 }
 0x6bf   : > { %1624 = vrot.lane.b32.xlu1 %v1616_v17, %s6445_s30  ;;  %1622 = vrot.lane.b32.xlu0 %v1615_v42, %s6445_s30  ;;  %v1656_v17 = vmul.f32 %v1613_v31, %v7059_v57  ;;  %v1655_v42 = vmul.f32 %v1612_v1, %v7059_v57  ;;  %v1690_v31 = vmul.f32 %v7291_v21, %v6665_v6 }
 0x6c0   : > { %v1689_v1 = vmul.f32 %v7293_v8, %v6665_v6 }
 0x6c3   : > { %1642 = vrot.lane.b32.xlu1 %v1635_v47, %s6445_s30  ;;  %1640 = vrot.lane.b32.xlu0 %v1634_v32, %s6445_s30  ;;  %v7375_v47 = vpop.permute.xlu0 %1328  ;;  %v1674_v32 = vmul.f32 %v7293_v8, %v6659_v0  ;;  %v1704_v0 = vmul.f32 %v7293_v8, %v7091_v61 }
 0x6c7   : > { %1660 = vrot.lane.b32.xlu1 %v1654_v37, %s6445_s30  ;;  %1644 = vrot.lane.b32.xlu0 %v1636_v39, %s6445_s30  ;;  %v7387_v37 = vpop.permute.xlu0 %1332  ;;  %v1705_v39 = vmul.f32 %v7291_v21, %v7091_v61 }
 0x6cb   : > { %1664 = vrot.lane.b32.xlu1 %v1656_v17, %s6445_s30  ;;  %1662 = vrot.lane.b32.xlu0 %v1655_v42, %s6445_s30  ;;  %v1721_v17 = vmul.f32 %v7291_v21, %v6773_v5  ;;  %v1720_v42 = vmul.f32 %v6719_v56, %v7293_v8 }
 0x6cd   : > { %v1743_v63 = vmul.f32 %v1720_v42, %v6676_v12 }
 0x6cf   : > { %1680 = vrot.lane.b32.xlu1 %v1675_v22, %s6426_s20  ;;  %1678 = vrot.lane.b32.xlu0 %v1674_v32, %s6426_s20  ;;  %v7399_v22 = vld [vmem:[#allocation2 + $0x20] sm:$0xf]  ;;  %v7403_v32 = vpop.permute.xlu0 %1350 }
 0x6d0   : > { %12625 = vst [vmem:[#allocation121_spill] sm:$0xff] %v7403_v32  ;;  %v1722_v18 = vmul.f32 %v6764_v45, %v7399_v22  ;;  %v1744_v32 = vmul.f32 %v1721_v17, %v6676_v12 }
 0x6d2   : > { %v1725_v41 = vmul.f32 %v1722_v18, %v6671_v10 }
 0x6d3   : > { %1695 = vrot.lane.b32.xlu1 %v1690_v31, %s6426_s20  ;;  %1693 = vrot.lane.b32.xlu0 %v1689_v1, %s6426_s20  ;;  %v1724_v31 = vmul.f32 %v1721_v17, %v6671_v10  ;;  %v1723_v1 = vmul.f32 %v1720_v42, %v6671_v10  ;;  %v1763_v10 = vmul.f32 %v1720_v42, %v7156_v35 }
 0x6d7   : > { %1710 = vrot.lane.b32.xlu1 %v1705_v39, %s6426_s20  ;;  %1708 = vrot.lane.b32.xlu0 %v1704_v0, %s6426_s20  ;;  %v7413_v39 = vpop.permute.xlu0 %1368  ;;  %v1745_v0 = vmul.f32 %v1722_v18, %v6676_v12 }
 0x6d8   : > { %12626 = vst [vmem:[#allocation122_spill] sm:$0xff] %v7413_v39  ;;  %v1783_v39 = vmul.f32 %v6713_v51, %v7293_v8 }
 0x6db   : > { %1731 = vrot.lane.b32.xlu1 %v1724_v31, %s12212_s12  ;;  %1729 = vrot.lane.b32.xlu0 %v1723_v1, %s12212_s12  ;;  %v7421_v31 = vpop.permute.xlu0 %1372  ;;  %v1764_v1 = vmul.f32 %v1721_v17, %v7156_v35  ;;  %v1784_v17 = vmul.f32 %v7291_v21, %v6792_v46 }
 0x6dc   : > { %12627 = vst [vmem:[#allocation123_spill] sm:$0xff] %v7421_v31  ;;  %v1806_v31 = vmul.f32 %v1783_v39, %v6681_v14 }
 0x6df   : > { %1749 = vrot.lane.b32.xlu1 %v1743_v63, %s12212_s12  ;;  %1733 = vrot.lane.b32.xlu0 %v1725_v41, %s12212_s12  ;;  %v7429_v41 = vpop.permute.xlu0 %1392  ;;  %v1786_v63 = vmul.f32 %v1783_v39, %v6727_v11 }
 0x6e3   : > { %1753 = vrot.lane.b32.xlu1 %v1745_v0, %s12212_s12  ;;  %1751 = vrot.lane.b32.xlu0 %v1744_v32, %s12212_s12  ;;  %v1765_v0 = vmul.f32 %v1722_v18, %v7156_v35  ;;  %v1785_v32 = vmul.f32 %v6783_v30, %v7399_v22  ;;  %v1807_v18 = vmul.f32 %v1784_v17, %v6681_v14 }
 0x6e5   : > { %v1788_v42 = vmul.f32 %v1785_v32, %v6727_v11 }
 0x6e7   : > { %1771 = vrot.lane.b32.xlu1 %v1764_v1, %s12212_s12  ;;  %1769 = vrot.lane.b32.xlu0 %v1763_v10, %s12212_s12  ;;  %v1787_v1 = vmul.f32 %v1784_v17, %v6727_v11  ;;  %v7441_v10 = vpop.permute.xlu0 %1396  ;;  %v1808_v11 = vmul.f32 %v1785_v32, %v6681_v14 }
 0x6e8   : > { %12628 = vst [vmem:[#allocation124_spill] sm:$0xff] %v7441_v10 }
 0x6eb   : > { %1792 = vrot.lane.b32.xlu1 %v1786_v63, %s12210_s11  ;;  %1773 = vrot.lane.b32.xlu0 %v1765_v0, %s12212_s12  ;;  %v7449_v63 = vpop.permute.xlu0 %1417  ;;  %v1826_v0 = vmul.f32 %v1783_v39, %v7202_v40  ;;  %v1846_v39 = vmul.f32 %v7293_v8, %v6683_v15 }
 0x6ec   : > { %12629 = vst [vmem:[#allocation125_spill] sm:$0xff] %v7449_v63  ;;  %v1888_v63 = vmul.f32 %v7399_v22, %v7240_v36 }
 0x6ef   : > { %1796 = vrot.lane.b32.xlu1 %v1788_v42, %s12210_s11  ;;  %1794 = vrot.lane.b32.xlu0 %v1787_v1, %s12210_s11  ;;  %v1828_v42 = vmul.f32 %v1785_v32, %v7202_v40  ;;  %v1827_v1 = vmul.f32 %v1784_v17, %v7202_v40  ;;  %v7457_v10 = vpop.permute.xlu0 %1435  ;;  %v1866_v32 = vmul.f32 %v7293_v8, %v6699_v23 }
 0x6f0   : > { %12630 = vst [vmem:[#allocation126_spill] sm:$0xff] %v7457_v10  ;;  %v1848_v17 = vmul.f32 %v7399_v22, %v6683_v15  ;;  %v1907_v10 = vmul.f32 %v7291_v21, %v6897_v3 }
 0x6f3   : > { %1814 = vrot.lane.b32.xlu1 %v1807_v18, %s12210_s11  ;;  %1812 = vrot.lane.b32.xlu0 %v1806_v31, %s12210_s11  ;;  %v1847_v31 = vmul.f32 %v7291_v21, %v6683_v15  ;;  %v7467_v18 = vpop.permute.xlu0 %1439 }
 0x6f4   : > { %12631 = vst [vmem:[#allocation127_spill] sm:$0xff] %v7467_v18  ;;  %v1908_v18 = vmul.f32 %v6884_v19, %v7399_v22 }
 0x6f7   : > { %1832 = vrot.lane.b32.xlu1 %v1826_v0, %s12210_s11  ;;  %1816 = vrot.lane.b32.xlu0 %v1808_v11, %s12210_s11 }
 0x6fb   : > { %1836 = vrot.lane.b32.xlu1 %v1828_v42, %s12210_s11  ;;  %1834 = vrot.lane.b32.xlu0 %v1827_v1, %s12210_s11  ;;  %v1868_v42 = vmul.f32 %v7399_v22, %v6699_v23  ;;  %v1867_v1 = vmul.f32 %v7291_v21, %v6699_v23 }
 0x6ff   : > { %1854 = vrot.lane.b32.xlu1 %v1847_v31, %s12208_s28  ;;  %1852 = vrot.lane.b32.xlu0 %v1846_v39, %s12208_s28  ;;  %v1887_v39 = vmul.f32 %v7291_v21, %v7240_v36 }
 0x703   : > { %1872 = vrot.lane.b32.xlu1 %v1866_v32, %s12208_s28  ;;  %1856 = vrot.lane.b32.xlu0 %v1848_v17, %s12208_s28  ;;  %v1886_v32 = vmul.f32 %v7293_v8, %v7240_v36  ;;  %v1906_v17 = vmul.f32 %v6886_v44, %v7293_v8 }
 0x705   : > { %v7475_v0 = vpop.permute.xlu1 %1461  ;;  %v7477_v11 = vpop.permute.xlu0 %1459 }
 0x707   : > { %1876 = vrot.lane.b32.xlu1 %v1868_v42, %s12208_s28  ;;  %1874 = vrot.lane.b32.xlu0 %v1867_v1, %s12208_s28 }
 0x709   : > { %v7485_v31 = vpop.permute.xlu1 %1494  ;;  %v7487_v15 = vpop.permute.xlu0 %1463 }
 0x70a   : > { %12632 = vst [vmem:[#allocation128_spill] sm:$0xff] %v7485_v31  ;;  %v1909_v31 = vmul.f32 %v1906_v17, %v6899_v49 }
 0x70b   : > { %1894 = vrot.lane.b32.xlu1 %v1887_v39, %s12208_s28  ;;  %1892 = vrot.lane.b32.xlu0 %v1886_v32, %s12208_s28 }
 0x70d   : > { %v7497_v42 = vpop.permute.xlu1 %1498  ;;  %v7499_v1 = vpop.permute.xlu0 %1496 }
 0x70e   : > { %12633 = vst [vmem:[#allocation129_spill] sm:$0xff] %v7497_v42  ;;  %12634 = vst [vmem:[#allocation130_spill] sm:$0xff] %v7499_v1  ;;  %v1911_v42 = vmul.f32 %v1908_v18, %v6899_v49  ;;  %v1910_v1 = vmul.f32 %v1907_v10, %v6899_v49  ;;  %v1949_v49 = vmul.f32 %v1906_v17, %v7278_v25 }
 0x70f   : > { %1915 = vrot.lane.b32.xlu1 %v1909_v31, %s12206_s21  ;;  %1896 = vrot.lane.b32.xlu0 %v1888_v63, %s12208_s28  ;;  %v1930_v31 = vmul.f32 %v1907_v10, %v6932_v24  ;;  %v1929_v63 = vmul.f32 %v1906_v17, %v6932_v24 }
 0x711   : > { %v7510_v39 = vpop.permute.xlu1 %1516  ;;  %v7512_v32 = vpop.permute.xlu0 %1514 }
 0x712   : > { %12635 = vst [vmem:[#allocation131_spill] sm:$0xff] %v7510_v39  ;;  %12636 = vst [vmem:[#allocation132_spill] sm:$0xff] %v7512_v32 }
 0x713   : > { %1919 = vrot.lane.b32.xlu1 %v1911_v42, %s12206_s21  ;;  %1917 = vrot.lane.b32.xlu0 %v1910_v1, %s12206_s21  ;;  %v1931_v42 = vmul.f32 %v1908_v18, %v6932_v24 }
 0x715   : > { %v7518_v22 = vpop.permute.xlu1 %1534  ;;  %v7520_v8 = vpop.permute.xlu0 %1518 }
 0x716   : > { %12637 = vst [vmem:[#allocation133_spill] sm:$0xff] %v7518_v22  ;;  %12638 = vst [vmem:[#allocation134_spill] sm:$0xff] %v7520_v8  ;;  %v7540_v22 = vld [vmem:[#allocation2 + $0x70] sm:$0xf] }
 0x717   : > { %1937 = vrot.lane.b32.xlu1 %v1930_v31, %s12206_s21  ;;  %1935 = vrot.lane.b32.xlu0 %v1929_v63, %s12206_s21  ;;  %v1951_v31 = vmul.f32 %v1908_v18, %v7278_v25  ;;  %v1950_v63 = vmul.f32 %v1907_v10, %v7278_v25 }
 0x719   : > { %v7526_v32 = vpop.permute.xlu1 %1538  ;;  %v7528_v39 = vpop.permute.xlu0 %1536 }
 0x71a   : > { %12639 = vst [vmem:[#allocation135_spill] sm:$0xff] %v7526_v32  ;;  %12640 = vst [vmem:[#allocation136_spill] sm:$0xff] %v7528_v39  ;;  %v7542_v32 = vld [vmem:[#allocation2 + $0x60] sm:$0xf] }
 0x71b   : > { %1955 = vrot.lane.b32.xlu1 %v1949_v49, %s12206_s21  ;;  %1939 = vrot.lane.b32.xlu0 %v1931_v42, %s12206_s21  ;;  %12643 = vst [vmem:[#allocation139_spill] sm:$0xff] %v7542_v32  ;;  %v1982_v42 = vmul.f32 %v7540_v22, %v6638_v53  ;;  %v1981_v18 = vmul.f32 %v7542_v32, %v6638_v53 }
 0x71d   : > { %v7534_v1 = vpop.permute.xlu1 %1559  ;;  %v7536_v8 = vpop.permute.xlu0 %1557 }
 0x71e   : > { %12641 = vst [vmem:[#allocation137_spill] sm:$0xff] %v7534_v1  ;;  %12642 = vst [vmem:[#allocation138_spill] sm:$0xff] %v7536_v8  ;;  %v7554_v8 = vld [vmem:[#allocation2 + $0x38] sm:$0xf] }
 0x71f   : > { %1959 = vrot.lane.b32.xlu1 %v1951_v31, %s12206_s21  ;;  %1957 = vrot.lane.b32.xlu0 %v1950_v63, %s12206_s21  ;;  %v2001_v63 = vmul.f32 %v7542_v32, %v6975_v38 }
 0x721   : > { %v7546_v17 = vpop.permute.xlu1 %1577  ;;  %v7548_v49 = vpop.permute.xlu0 %1561 }
 0x722   : > { %12644 = vst [vmem:[#allocation140_spill] sm:$0xff] %v7546_v17  ;;  %12645 = vst [vmem:[#allocation141_spill] sm:$0xff] %v7548_v49  ;;  %v1983_v17 = vmul.f32 %v7554_v8, %v6638_v53  ;;  %v2021_v53 = vmul.f32 %v6693_v20, %v7542_v32 }
 0x723   : > { %1989 = vrot.lane.b32.xlu1 %v1982_v42, %s6430_s25  ;;  %1987 = vrot.lane.b32.xlu0 %v1981_v18, %s6430_s25  ;;  %v2003_v42 = vmul.f32 %v7554_v8, %v6975_v38  ;;  %v2002_v18 = vmul.f32 %v7540_v22, %v6975_v38  ;;  %v2023_v38 = vmul.f32 %v6725_v7, %v7554_v8 }
 0x724   : > { %v2065_v7 = vmul.f32 %v7540_v22, %v6755_v54 }
 0x725   : > { %v7558_v10 = vpop.permute.xlu1 %1581  ;;  %v7560_v31 = vpop.permute.xlu0 %1579 }
 0x726   : > { %12646 = vst [vmem:[#allocation142_spill] sm:$0xff] %v7558_v10  ;;  %12647 = vst [vmem:[#allocation143_spill] sm:$0xff] %v7560_v31  ;;  %v2022_v10 = vmul.f32 %v7540_v22, %v6738_v55  ;;  %v2026_v55 = vmul.f32 %v2023_v38, %v6651_v59 }
 0x727   : > { %2007 = vrot.lane.b32.xlu1 %v2001_v63, %s6430_s25  ;;  %1991 = vrot.lane.b32.xlu0 %v1983_v17, %s6430_s25 }
 0x728   : > { %v2025_v31 = vmul.f32 %v2022_v10, %v6651_v59 }
 0x729   : > { %v7568_v1 = vpop.permute.xlu1 %1599  ;;  %v7570_v49 = vpop.permute.xlu0 %1597 }
 0x72a   : > { %12648 = vst [vmem:[#allocation144_spill] sm:$0xff] %v7568_v1  ;;  %12649 = vst [vmem:[#allocation145_spill] sm:$0xff] %v7570_v49  ;;  %v2024_v49 = vmul.f32 %v2021_v53, %v6651_v59 }
 0x72b   : > { %2011 = vrot.lane.b32.xlu1 %v2003_v42, %s6430_s25  ;;  %2009 = vrot.lane.b32.xlu0 %v2002_v18, %s6430_s25  ;;  %v2044_v18 = vmul.f32 %v2021_v53, %v7024_v33  ;;  %v2064_v53 = vmul.f32 %v6703_v26, %v7542_v32  ;;  %v6318_v32 = vld [vmem:[#allocation2 + $0x78] sm:$0xf] }
 0x72d   : > { %v7582_v17 = vpop.permute.xlu1 %1620  ;;  %v7584_v63 = vpop.permute.xlu0 %1601 }
 0x72e   : > { %12650 = vst [vmem:[#allocation146_spill] sm:$0xff] %v7582_v17  ;;  %12651 = vst [vmem:[#allocation147_spill] sm:$0xff] %v7584_v63 }
 0x72f   : > { %2032 = vrot.lane.b32.xlu1 %v2025_v31, %s6444_s29  ;;  %2030 = vrot.lane.b32.xlu0 %v2024_v49, %s6444_s29  ;;  %v2046_v31 = vmul.f32 %v2023_v38, %v7024_v33  ;;  %v2045_v49 = vmul.f32 %v2022_v10, %v7024_v33  ;;  %v2067_v38 = vmul.f32 %v2064_v53, %v6655_v62 }
 0x730   : > { %v2066_v33 = vmul.f32 %v6744_v28, %v7554_v8  ;;  %v2107_v28 = vmul.f32 %v7540_v22, %v6665_v6 }
 0x731   : > { %v7592_v20 = vpop.permute.xlu1 %1624  ;;  %v7594_v42 = vpop.permute.xlu0 %1622 }
 0x732   : > { %12652 = vst [vmem:[#allocation148_spill] sm:$0xff] %v7592_v20  ;;  %12653 = vst [vmem:[#allocation149_spill] sm:$0xff] %v7594_v42  ;;  %v2069_v26 = vmul.f32 %v2066_v33, %v6655_v62 }
 0x733   : > { %2050 = vrot.lane.b32.xlu1 %v2044_v18, %s6444_s29  ;;  %2034 = vrot.lane.b32.xlu0 %v2026_v55, %s6444_s29  ;;  %v2068_v18 = vmul.f32 %v2065_v7, %v6655_v62 }
 0x735   : > { %v7600_v17 = vpop.permute.xlu1 %1642  ;;  %v7602_v63 = vpop.permute.xlu0 %1640 }
 0x736   : > { %12654 = vst [vmem:[#allocation150_spill] sm:$0xff] %v7600_v17  ;;  %12655 = vst [vmem:[#allocation151_spill] sm:$0xff] %v7602_v63  ;;  %v6317_v17 = vld [vmem:[#allocation2 + $0x8] sm:$0xf] }
 0x737   : > { %2054 = vrot.lane.b32.xlu1 %v2046_v31, %s6444_s29  ;;  %2052 = vrot.lane.b32.xlu0 %v2045_v49, %s6444_s29  ;;  %v2087_v49 = vmul.f32 %v2064_v53, %v7059_v57  ;;  %v7639_v53 = vunpack.i.l.bf16 %v6648_v58 }
 0x739   : > { %v7612_v59 = vpop.permute.xlu1 %1660  ;;  %v7614_v55 = vpop.permute.xlu0 %1644  ;;  %12662 = vst [vmem:[#allocation158_spill] sm:$0xff] %v7639_v53 }
 0x73a   : > { %12656 = vst [vmem:[#allocation152_spill] sm:$0xff] %v7612_v59  ;;  %12657 = vst [vmem:[#allocation153_spill] sm:$0xff] %v7614_v55  ;;  %v6320_v59 = vld [vmem:[#allocation2 + $0x40] sm:$0xf] }
 0x73b   : > { %2075 = vrot.lane.b32.xlu1 %v2068_v18, %s6445_s30  ;;  %2073 = vrot.lane.b32.xlu0 %v2067_v38, %s6445_s30  ;;  %v2089_v18 = vmul.f32 %v2066_v33, %v7059_v57  ;;  %v2088_v38 = vmul.f32 %v2065_v7, %v7059_v57  ;;  %v7650_v33 = vunpack.i.h.bf16 %v6648_v58  ;;  %v6315_v7 = vld [vmem:[#allocation2 + $0x58] sm:$0xf]  ;;  %v2139_v58 = vmul.f32 %v7554_v8, %v6773_v5 }
 0x73c   : > { %v464_v57 = vmul.f32 %v6315_v7, %v7639_v53 }
 0x73d   : > { %v7622_v10 = vpop.permute.xlu1 %1664  ;;  %v7624_v31 = vpop.permute.xlu0 %1662  ;;  %12665 = vst [vmem:[#allocation161_spill] sm:$0xff] %v7650_v33  ;;  %v7672_v7 = vsel %vm459_vm9, %v7639_v53, %v7650_v33 }
 0x73e   : > { %12658 = vst [vmem:[#allocation154_spill] sm:$0xff] %v7622_v10  ;;  %12659 = vst [vmem:[#allocation155_spill] sm:$0xff] %v7624_v31  ;;  %v465_v42 = vmul.f32 %v6317_v17, %v7672_v7  ;;  %v479_v20 = vmul.f32 %v6627_v48, %v464_v57  ;;  %v7716_v31 = vmul.f32 %v6320_v59, %v7672_v7 }
 0x73f   : > { %2093 = vrot.lane.b32.xlu1 %v2087_v49, %s6445_s30  ;;  %2077 = vrot.lane.b32.xlu0 %v2069_v26, %s6445_s30  ;;  %v2108_v26 = vmul.f32 %v7554_v8, %v6665_v6  ;;  %v2122_v6 = vmul.f32 %v7540_v22, %v7091_v61  ;;  %12668 = vst [vmem:[#allocation164_spill] sm:$0xff] %v7672_v7  ;;  %v12719_v7 = vld [vmem:[#allocation94_spill] sm:$0xff] }
 0x740   : > { %v473_v1 = vmul.f32 %v6619_v43, %v465_v42 }
 0x741   : > { %v7630_v54 = vpop.permute.xlu1 %1680  ;;  %v7632_v55 = vpop.permute.xlu0 %1678 }
 0x742   : > { %12660 = vst [vmem:[#allocation156_spill] sm:$0xff] %v7630_v54  ;;  %12661 = vst [vmem:[#allocation157_spill] sm:$0xff] %v7632_v55  ;;  %v523_v54 = vsel %vm498_vm5, %v6824_v29, %v6844_v13  ;;  %v7698_v29 = vmul.f32 %v6318_v32, %v7650_v33 }
 0x743   : > { %2097 = vrot.lane.b32.xlu1 %v2089_v18, %s6445_s30  ;;  %2095 = vrot.lane.b32.xlu0 %v2088_v38, %s6445_s30  ;;  %v528_v32 = vadd.f32 %v523_v54, %v479_v20 }
 0x744   : > { %12671 = vst [vmem:[#allocation167_spill] sm:$0xff] %v7698_v29 }
 0x745   : > { %v7641_v62 = vpop.permute.xlu1 %1695  ;;  %v7643_v49 = vpop.permute.xlu0 %1693 }
 0x746   : > { %12663 = vst [vmem:[#allocation159_spill] sm:$0xff] %v7641_v62  ;;  %12664 = vst [vmem:[#allocation160_spill] sm:$0xff] %v7643_v49  ;;  %v2123_v49 = vmul.f32 %v7554_v8, %v7091_v61  ;;  %v499_v62 = vsel %vm498_vm5, %v6834_v50, %v6840_v52  ;;  %v6316_v61 = vld [vmem:[#allocation2 + $0x18] sm:$0xf]  ;;  %v574_v50 = vsel %vm573_vm10, %v6872_v9, %v6912_v2 }
 0x747   : > { %2113 = vrot.lane.b32.xlu1 %v2108_v26, %s6426_s20  ;;  %2111 = vrot.lane.b32.xlu0 %v2107_v28, %s6426_s20  ;;  %v2138_v28 = vmul.f32 %v6719_v56, %v7540_v22  ;;  %v7667_v26 = vld [vmem:[#allocation2 + $0x10] sm:$0xf]  ;;  %v466_v5 = vmul.f32 %v6316_v61, %v7650_v33  ;;  %v472_v56 = vmul.f32 %v6619_v43, %v464_v57  ;;  %v12676_v57 = vld [vmem:[#allocation30_spill] sm:$0xff] }
 0x748   : > { %v2140_v55 = vmul.f32 %v6764_v45, %v7667_v26  ;;  %v2142_v61 = vmul.f32 %v2139_v58, %v6676_v12  ;;  %v598_v9 = vsel %vm573_vm10, %v6838_v27, %v6914_v16 }
 0x749   : > { %v7655_v18 = vpop.permute.xlu1 %1710  ;;  %v7657_v38 = vpop.permute.xlu0 %1708  ;;  %v2141_v63 = vmul.f32 %v2138_v28, %v6676_v12  ;;  %v504_v45 = vadd.f32 %v499_v62, %v472_v56  ;;  %v474_v56 = vmul.f32 %v6619_v43, %v466_v5  ;;  %v12675_v62 = vld [vmem:[#allocation54_spill] sm:$0xff]  ;;  %v481_v20 = vmul.f32 %v6627_v48, %v466_v5  ;;  %v12691_v43 = vld [vmem:[#allocation36_spill] sm:$0xff] }
 0x74a   : > { %12666 = vst [vmem:[#allocation162_spill] sm:$0xff] %v7655_v18  ;;  %12667 = vst [vmem:[#allocation163_spill] sm:$0xff] %v7657_v38  ;;  %v6319_v38 = vld [vmem:[#allocation2] sm:$0xf]  ;;  %v658_v27 = vsel %vm633_vm11, %v12676_v57, %v12675_v62  ;;  %v603_v54 = vadd.f32 %v598_v9, %v528_v32  ;;  %v7733_v57 = vmul.f32 %v7698_v29, %v6627_v48 }
 0x74b   : > { %2128 = vrot.lane.b32.xlu1 %v2123_v49, %s6426_s20  ;;  %2126 = vrot.lane.b32.xlu0 %v2122_v6, %s6426_s20  ;;  %v7707_v10 = vmul.f32 %v6319_v38, %v7639_v53  ;;  %v579_v17 = vadd.f32 %v574_v50, %v504_v45  ;;  %v480_v50 = vmul.f32 %v6627_v48, %v465_v42 }
 0x74c   : > { %12681 = vst [vmem:[#allocation169_spill] sm:$0xff] %v7733_v57  ;;  %v7742_v42 = vmul.f32 %v7554_v8, %v6792_v46  ;;  %v7748_v9 = vmul.f32 %v7716_v31, %v6627_v48  ;;  %v12687_v46 = vld [vmem:[#allocation38_spill] sm:$0xff]  ;;  %v12694_v57 = vld [vmem:[#allocation31_spill] sm:$0xff] }
 0x74d   : > { %v7689_v49 = vpop.permute.xlu1 %1731  ;;  %v7691_v6 = vpop.permute.xlu0 %1729  ;;  %v7729_v59 = vmul.f32 %v7707_v10, %v6627_v48 }
 0x74e   : > { %12669 = vst [vmem:[#allocation165_spill] sm:$0xff] %v7689_v49  ;;  %12670 = vst [vmem:[#allocation166_spill] sm:$0xff] %v7691_v6  ;;  %v12672_v49 = vld [vmem:[#allocation53_spill] sm:$0xff]  ;;  %v2185_v48 = vmul.f32 %v7742_v42, %v6681_v14 }
 0x74f   : > { %v12673_v6 = vld [vmem:[#allocation45_spill] sm:$0xff]  ;;  %12674 = vst [vmem:[#allocation53_spill] sm:$0xff] %v7707_v10  ;;  %2149 = vrot.lane.b32.xlu1 %v2142_v61, %s12212_s12  ;;  %2147 = vrot.lane.b32.xlu0 %v2141_v63, %s12212_s12  ;;  %v2161_v61 = vmul.f32 %v2138_v28, %v7156_v35  ;;  %v2143_v63 = vmul.f32 %v2140_v55, %v6676_v12  ;;  %12680 = vst [vmem:[#allocation168_spill] sm:$0xff] %v7729_v59  ;;  %v12695_v59 = vld [vmem:[#allocation40_spill] sm:$0xff] }
 0x750   : > { %v634_v18 = vsel %vm633_vm11, %v12673_v6, %v12672_v49  ;;  %12677 = vst [vmem:[#allocation45_spill] sm:$0xff] %v7716_v31  ;;  %v12682_v12 = vld [vmem:[#allocation25_spill] sm:$0xff]  ;;  %v663_v28 = vadd.f32 %v658_v27, %v603_v54  ;;  %v2183_v27 = vmul.f32 %v6783_v30, %v7667_v26 }
 0x751   : > { %v7718_v6 = vpop.permute.xlu1 %1749  ;;  %v7720_v38 = vpop.permute.xlu0 %1733  ;;  %v639_v45 = vadd.f32 %v634_v18, %v579_v17  ;;  %v524_v5 = vsel %vm498_vm5, %v6844_v13, %v12682_v12  ;;  %v2181_v18 = vmul.f32 %v6713_v51, %v7540_v22  ;;  %12683 = vst [vmem:[#allocation25_spill] sm:$0xff] %v7748_v9  ;;  %v2162_v13 = vmul.f32 %v2139_v58, %v7156_v35  ;;  %v12690_v30 = vld [vmem:[#allocation41_spill] sm:$0xff] }
 0x752   : > { %12678 = vst [vmem:[#allocation54_spill] sm:$0xff] %v7718_v6  ;;  %12679 = vst [vmem:[#allocation30_spill] sm:$0xff] %v7720_v38  ;;  %v599_v51 = vsel %vm573_vm10, %v6914_v16, %v12687_v46  ;;  %v7764_v6 = vmul.f32 %v7554_v8, %v6699_v23  ;;  %v529_v58 = vadd.f32 %v524_v5, %v480_v50  ;;  %v12689_v16 = vld [vmem:[#allocation34_spill] sm:$0xff] }
 0x753   : > { %2167 = vrot.lane.b32.xlu1 %v2161_v61, %s12212_s12  ;;  %2151 = vrot.lane.b32.xlu0 %v2143_v63, %s12212_s12  ;;  %v2163_v61 = vmul.f32 %v2140_v55, %v7156_v35  ;;  %v12686_v63 = vld [vmem:[#allocation26_spill] sm:$0xff]  ;;  %v12688_v55 = vld [vmem:[#allocation24_spill] sm:$0xff]  ;;  %v659_v38 = vsel %vm633_vm11, %v12675_v62, %v12690_v30  ;;  %v530_v62 = vadd.f32 %v12682_v12, %v481_v20  ;;  %v12697_v20 = vld [vmem:[#allocation37_spill] sm:$0xff] }
 0x754   : > { %v682_v54 = vadd.f32 %v12686_v63, %v639_v45  ;;  %v500_v35 = vsel %vm498_vm5, %v6840_v52, %v12688_v55  ;;  %v701_v45 = vadd.f32 %v12689_v16, %v663_v28  ;;  %v575_v52 = vsel %vm573_vm10, %v6912_v2, %v12691_v43 }
 0x755   : > { %v7750_v32 = vpop.permute.xlu1 %1753  ;;  %v7752_v17 = vpop.permute.xlu0 %1751  ;;  %v604_v5 = vadd.f32 %v599_v51, %v529_v58  ;;  %v2186_v28 = vmul.f32 %v2183_v27, %v6681_v14  ;;  %v7796_v9 = vmul.f32 %v7667_v26, %v6699_v23  ;;  %v635_v2 = vsel %vm633_vm11, %v12672_v49, %v12695_v59  ;;  %v12699_v49 = vld [vmem:[#allocation42_spill] sm:$0xff] }
 0x756   : > { %12684 = vst [vmem:[#allocation170_spill] sm:$0xff] %v7750_v32  ;;  %12685 = vst [vmem:[#allocation171_spill] sm:$0xff] %v7752_v17  ;;  %v7768_v32 = vmul.f32 %v7540_v22, %v6699_v23  ;;  %v506_v17 = vadd.f32 %v12688_v55, %v474_v56  ;;  %v2184_v56 = vmul.f32 %v2181_v18, %v6681_v14  ;;  %v12696_v14 = vld [vmem:[#allocation32_spill] sm:$0xff] }
 0x757   : > { %2171 = vrot.lane.b32.xlu1 %v2163_v61, %s12212_s12  ;;  %2169 = vrot.lane.b32.xlu0 %v2162_v13, %s12212_s12  ;;  %v505_v55 = vadd.f32 %v500_v35, %v473_v1  ;;  %v741_v39 = vadd.f32 %v12694_v57, %v682_v54  ;;  %v664_v51 = vadd.f32 %v659_v38, %v604_v5  ;;  %v12700_v35 = vld [vmem:[#allocation29_spill] sm:$0xff]  ;;  %s13005_s12 = smov 96  }
 0x758   : > { %v581_v50 = vadd.f32 %v12691_v43, %v506_v17  ;;  %v678_v1 = vsel %vm459_vm9, %v12686_v63, %v12696_v14  ;;  %v697_v23 = vsel %vm459_vm9, %v12689_v16, %v12697_v20  ;;  %v12698_v17 = vld [vmem:[#allocation33_spill] sm:$0xff]  ;;  %v2204_v58 = vmul.f32 %v2181_v18, %v7202_v40 }
 0x759   : > { %v7787_v61 = vpop.permute.xlu1 %1771  ;;  %v7789_v13 = vpop.permute.xlu0 %1769  ;;  %v580_v12 = vadd.f32 %v575_v52, %v505_v55  ;;  %v765_v54 = vadd.f32 %v12698_v17, %v701_v45  ;;  %v7821_v63 = vmul.f32 %v7554_v8, %v6897_v3  ;;  %v7825_v16 = vmul.f32 %v6886_v44, %v7540_v22  ;;  %v12703_v52 = vld [vmem:[#allocation47_spill] sm:$0xff]  ;;  %v12708_v44 = vld [vmem:[#allocation84_spill] sm:$0xff] }
 0x75a   : > { %12692 = vst [vmem:[#allocation26_spill] sm:$0xff] %v7787_v61  ;;  %12693 = vst [vmem:[#allocation38_spill] sm:$0xff] %v7789_v13  ;;  %v641_v43 = vadd.f32 %v12695_v59, %v581_v50  ;;  %v870_v59 = vsel %vm845_vm12, %v12700_v35, %v12699_v49  ;;  %v605_v45 = vadd.f32 %v12687_v46, %v530_v62  ;;  %v12704_v55 = vld [vmem:[#allocation55_spill] sm:$0xff] }
 0x75b   : > { %2192 = vrot.lane.b32.xlu1 %v2185_v48, %s12210_s11  ;;  %2190 = vrot.lane.b32.xlu0 %v2184_v56, %s12210_s11  ;;  %v640_v56 = vadd.f32 %v635_v2, %v580_v12  ;;  %v7829_v50 = vadd.f32 %v12703_v52, %v741_v39  ;;  %v7833_v5 = vmul.f32 %v6884_v19, %v7667_v26  ;;  %v12705_v39 = vld [vmem:[#allocation35_spill] sm:$0xff]  ;;  %v12706_v2 = vld [vmem:[#allocation73_spill] sm:$0xff]  ;;  %v12707_v12 = vld [vmem:[#allocation72_spill] sm:$0xff] }
 0x75c   : > { %v7838_v18 = vsel %vm735_vm13, %v12694_v57, %v12704_v55  ;;  %v702_v3 = vadd.f32 %v697_v23, %v664_v51  ;;  %v665_v46 = vadd.f32 %v12690_v30, %v605_v45  ;;  %v826_v62 = vadd.f32 %v12705_v39, %v765_v54 }
 0x75d   : > { %v7814_v38 = vpop.permute.xlu1 %1792  ;;  %v7816_v48 = vpop.permute.xlu0 %1773  ;;  %v1014_v19 = vsel %vm498_vm5, %v12707_v12, %v12706_v2  ;;  %v1015_v57 = vsel %vm498_vm5, %v12706_v2, %v12708_v44  ;;  %v2206_v30 = vmul.f32 %v2183_v27, %v7202_v40  ;;  %v2205_v54 = vmul.f32 %v7742_v42, %v7202_v40  ;;  %v12713_v2 = vld [vmem:[#allocation58_spill] sm:$0xff] }
 0x75e   : > { %12701 = vst [vmem:[#allocation24_spill] sm:$0xff] %v7814_v38  ;;  %12702 = vst [vmem:[#allocation34_spill] sm:$0xff] %v7816_v48  ;;  %v7841_v38 = vadd.f32 %v12696_v14, %v641_v43  ;;  %v12709_v43 = vld [vmem:[#allocation68_spill] sm:$0xff]  ;;  %v821_v12 = vsel %vm796_vm14, %v12705_v39, %v12713_v2  ;;  %v7878_v40 = vadd.f32 %v678_v1, %v640_v56  ;;  %v12718_v39 = vld [vmem:[#allocation93_spill] sm:$0xff] }
 0x75f   : > { %2210 = vrot.lane.b32.xlu1 %v2204_v58, %s12210_s11  ;;  %2194 = vrot.lane.b32.xlu0 %v2186_v28, %s12210_s11  ;;  %v955_v51 = vmul.f32 %v12709_v43, %v7707_v10  ;;  %v956_v14 = vmul.f32 %v12709_v43, %v7716_v31  ;;  %v12712_v58 = vld [vmem:[#allocation56_spill] sm:$0xff]  ;;  %v12714_v10 = vld [vmem:[#allocation77_spill] sm:$0xff]  ;;  %v957_v42 = vmul.f32 %v12709_v43, %v7698_v29 }
 0x760   : > { %v760_v45 = vsel %vm735_vm13, %v12698_v17, %v12712_v58  ;;  %v12715_v48 = vld [vmem:[#allocation88_spill] sm:$0xff]  ;;  %v12717_v17 = vld [vmem:[#allocation81_spill] sm:$0xff] }
 0x761   : > { %v7857_v23 = vpop.permute.xlu1 %1796  ;;  %v7859_v28 = vpop.permute.xlu0 %1794  ;;  %v1081_v31 = vsel %vm573_vm10, %v12715_v48, %v12714_v10  ;;  %v766_v27 = vadd.f32 %v760_v45, %v702_v3  ;;  %v1019_v61 = vadd.f32 %v1014_v19, %v955_v51  ;;  %v1020_v13 = vadd.f32 %v1015_v57, %v956_v14  ;;  %v12720_v3 = vld [vmem:[#allocation44_spill] sm:$0xff] }
 0x762   : > { %12710 = vst [vmem:[#allocation41_spill] sm:$0xff] %v7857_v23  ;;  %12711 = vst [vmem:[#allocation36_spill] sm:$0xff] %v7859_v28  ;;  %v12716_v23 = vld [vmem:[#allocation89_spill] sm:$0xff]  ;;  %v1148_v48 = vsel %vm633_vm11, %v12718_v39, %v12717_v17  ;;  %v761_v19 = vsel %vm735_vm13, %v12712_v58, %v12720_v3  ;;  %v1021_v45 = vadd.f32 %v12708_v44, %v957_v42  ;;  %v12722_v29 = vld [vmem:[#allocation48_spill] sm:$0xff] }
 0x763   : > { %v1082_v28 = vsel %vm573_vm10, %v12714_v10, %v12716_v23  ;;  %2214 = vrot.lane.b32.xlu1 %v2206_v30, %s12210_s11  ;;  %2212 = vrot.lane.b32.xlu0 %v2205_v54, %s12210_s11  ;;  %v1149_v10 = vsel %vm633_vm11, %v12717_v17, %v12719_v7  ;;  %v827_v57 = vadd.f32 %v821_v12, %v766_v27  ;;  %v12721_v39 = vld [vmem:[#allocation97_spill] sm:$0xff]  ;;  %s12993_s11 = smov 110  }
 0x764   : > { %v1086_v51 = vadd.f32 %v1081_v31, %v1019_v61  ;;  %v1087_v14 = vadd.f32 %v1082_v28, %v1020_v13  ;;  %v703_v30 = vadd.f32 %v12697_v20, %v665_v46  ;;  %v875_v54 = vadd.f32 %v12700_v35, %v826_v62  ;;  %v12723_v13 = vld [vmem:[#allocation43_spill] sm:$0xff]  ;;  %v12724_v46 = vld [vmem:[#allocation104_spill] sm:$0xff] }
 0x765   : > { %v7891_v1 = vpop.permute.xlu1 %1814  ;;  %v7893_v56 = vpop.permute.xlu0 %1812  ;;  %v1198_v17 = vsel %vm459_vm9, %v12721_v39, %v7184_v34  ;;  %v822_v58 = vsel %vm796_vm14, %v12713_v2, %v12722_v29  ;;  %v737_v44 = vsel %vm735_vm13, %v12704_v55, %v12723_v13  ;;  %v1088_v35 = vadd.f32 %v12716_v23, %v1021_v45  ;;  %v12725_v23 = vld [vmem:[#allocation108_spill] sm:$0xff] }
 0x766   : > { %v1153_v31 = vadd.f32 %v1148_v48, %v1086_v51  ;;  %v1154_v61 = vadd.f32 %v1149_v10, %v1087_v14  ;;  %v767_v20 = vadd.f32 %v761_v19, %v703_v30  ;;  %v1267_v62 = vsel %vm735_vm13, %v12724_v46, %v7194_v4  ;;  %v12726_v48 = vld [vmem:[#allocation67_spill] sm:$0xff]  ;;  %v12729_v30 = vld [vmem:[#allocation112_spill] sm:$0xff] }
 0x767   : > { %2232 = vrot.lane.b32.xlu1 %v7764_v6, %s12208_s28  ;;  %2230 = vrot.lane.b32.xlu0 %v7768_v32, %s12208_s28  ;;  %v876_v29 = vadd.f32 %v870_v59, %v827_v57  ;;  %v2244_v32 = vmul.f32 %v7540_v22, %v7240_v36  ;;  %v1155_v55 = vadd.f32 %v12719_v7, %v1088_v35  ;;  %v12727_v59 = vld [vmem:[#allocation62_spill] sm:$0xff]  ;;  %v12728_v57 = vld [vmem:[#allocation51_spill] sm:$0xff]  ;;  %v12731_v35 = vld [vmem:[#allocation124_spill] sm:$0xff] }
 0x768   : > { %v1202_v28 = vadd.f32 %v12721_v39, %v1153_v31  ;;  %v1203_v2 = vadd.f32 %v1198_v17, %v1154_v61  ;;  %v828_v27 = vadd.f32 %v822_v58, %v767_v20  ;;  %v1334_v42 = vsel %vm796_vm14, %v7375_v47, %v12725_v23 }
 0x769   : > { %v7916_v12 = vpop.permute.xlu1 %1832  ;;  %v7918_v6 = vpop.permute.xlu0 %1816  ;;  %v931_v10 = vsel %vm906_vm15, %v12727_v59, %v12726_v48  ;;  %v871_v7 = vsel %vm845_vm12, %v12699_v49, %v12728_v57  ;;  %v1204_v51 = vadd.f32 %v7184_v34, %v1155_v55  ;;  %v1268_v14 = vsel %vm735_vm13, %v7194_v4, %v7341_v60 }
 0x76a   : > { %v1272_v3 = vadd.f32 %v12724_v46, %v1202_v28  ;;  %v1273_v19 = vadd.f32 %v1267_v62, %v1203_v2  ;;  %v1398_v45 = vsel %vm845_vm12, %v7429_v41, %v12729_v30  ;;  %v2246_v49 = vmul.f32 %v7667_v26, %v7240_v36  ;;  %v12730_v26 = vld [vmem:[#allocation63_spill] sm:$0xff] }
 0x76b   : > { %2250 = vrot.lane.b32.xlu1 %v2244_v32, %s12208_s28  ;;  %2234 = vrot.lane.b32.xlu0 %v7796_v9, %s12208_s28  ;;  %v2245_v34 = vmul.f32 %v7554_v8, %v7240_v36  ;;  %v936_v31 = vadd.f32 %v12727_v59, %v875_v54  ;;  %v937_v4 = vadd.f32 %v931_v10, %v876_v29 }
 0x76c   : > { %v1339_v39 = vadd.f32 %v7375_v47, %v1272_v3  ;;  %v1340_v17 = vadd.f32 %v1334_v42, %v1273_v19  ;;  %v1335_v60 = vsel %vm796_vm14, %v12725_v23, %v7387_v37  ;;  %v1465_v47 = vsel %vm906_vm15, %v7477_v11, %v7475_v0  ;;  %v12733_v23 = vld [vmem:[#allocation46_spill] sm:$0xff] }
 0x76d   : > { %v7944_v58 = vpop.permute.xlu1 %1836  ;;  %v7946_v9 = vpop.permute.xlu0 %1834  ;;  %v1274_v61 = vadd.f32 %v1268_v14, %v1204_v51  ;;  %v877_v36 = vadd.f32 %v871_v7, %v828_v27  ;;  %v932_v54 = vsel %vm906_vm15, %v12726_v48, %v12730_v26  ;;  %v1399_v37 = vsel %vm845_vm12, %v12729_v30, %v12731_v35  ;;  %v12732_v27 = vld [vmem:[#allocation57_spill] sm:$0xff]  ;;  %v12734_v48 = vld [vmem:[#allocation10_spill] sm:$0xff]  ;;  %v12735_v7 = vld [vmem:[#allocation27_spill] sm:$0xff] }
 0x76e   : > { %v1403_v13 = vadd.f32 %v7429_v41, %v1339_v39  ;;  %v1404_v20 = vadd.f32 %v1398_v45, %v1340_v17  ;;  %v2268_v46 = vmul.f32 %v7821_v63, %v6932_v24  ;;  %v2267_v32 = vmul.f32 %v7825_v16, %v6932_v24 }
 0x76f   : > { %2254 = vrot.lane.b32.xlu1 %v2246_v49, %s12208_s28  ;;  %2252 = vrot.lane.b32.xlu0 %v2245_v34, %s12208_s28  ;;  %v1341_v62 = vadd.f32 %v1335_v60, %v1274_v61  ;;  %v797_v55 = vsel %vm796_vm14, %v12703_v52, %v12732_v27  ;;  %v798_v42 = vsel %vm796_vm14, %v12732_v27, %v12733_v23  ;;  %v12743_v27 = vld [vmem:[#allocation164_spill] sm:$0xff]  ;;  %s13011_s28 = smov 95  }
 0x770   : > { %v1470_v41 = vadd.f32 %v7477_v11, %v1403_v13  ;;  %v1471_v29 = vadd.f32 %v1465_v47, %v1404_v20  ;;  %v2307_v59 = vadd.f32 %v936_v31, %v12734_v48  ;;  %v1466_v11 = vsel %vm906_vm15, %v7475_v0, %v7487_v15  ;;  %v12738_v31 = vld [vmem:[#allocation116_spill] sm:$0xff]  ;;  %v12741_v47 = vld [vmem:[#allocation70_spill] sm:$0xff]  ;;  %v12742_v13 = vld [vmem:[#allocation71_spill] sm:$0xff] }
 0x771   : > { %v7971_v28 = vpop.permute.xlu1 %1854  ;;  %v7973_v2 = vpop.permute.xlu0 %1852  ;;  %v2308_v10 = vadd.f32 %v937_v4, %v12734_v48  ;;  %v938_v3 = vadd.f32 %v932_v54, %v877_v36  ;;  %v1405_v19 = vadd.f32 %v1399_v37, %v1341_v62  ;;  %v742_v52 = vadd.f32 %v7838_v18, %v7878_v40  ;;  %v12736_v40 = vld [vmem:[#allocation59_spill] sm:$0xff] }
 0x772   : > { %v743_v57 = vadd.f32 %v737_v44, %v7841_v38  ;;  %v851_v51 = vadd.f32 %v12735_v7, %v7829_v50  ;;  %v2269_v14 = vmul.f32 %v7833_v5, %v6932_v24  ;;  %v2310_v0 = vadd.f32 %v2307_v59, %v1470_v41  ;;  %v12737_v44 = vld [vmem:[#allocation39_spill] sm:$0xff]  ;;  %v12746_v59 = vld [vmem:[#allocation61_spill] sm:$0xff] }
 0x773   : > { %2275 = vrot.lane.b32.xlu1 %v2268_v46, %s12206_s21  ;;  %2273 = vrot.lane.b32.xlu0 %v2267_v32, %s12206_s21  ;;  %v2311_v15 = vadd.f32 %v2308_v10, %v1471_v29  ;;  %v1472_v30 = vadd.f32 %v1466_v11, %v1405_v19  ;;  %v2287_v17 = vmul.f32 %v7825_v16, %v7278_v25  ;;  %v12739_v16 = vld [vmem:[#allocation28_spill] sm:$0xff] }
 0x774   : > { %v803_v49 = vadd.f32 %v797_v55, %v742_v52  ;;  %v804_v18 = vadd.f32 %v798_v42, %v743_v57  ;;  %v912_v38 = vadd.f32 %v12736_v40, %v851_v51  ;;  %v8006_v50 = vmul.f32 %v7650_v33, %v7291_v21  ;;  %v12740_v21 = vld [vmem:[#allocation66_spill] sm:$0xff]  ;;  %v12744_v55 = vld [vmem:[#allocation117_spill] sm:$0xff]  ;;  %v12747_v10 = vld [vmem:[#allocation76_spill] sm:$0xff] }
 0x775   : > { %v7997_v45 = vpop.permute.xlu1 %1872  ;;  %v7999_v39 = vpop.permute.xlu0 %1856  ;;  %v846_v24 = vsel %vm845_vm12, %v12735_v7, %v12737_v44  ;;  %v2309_v34 = vadd.f32 %v938_v3, %v12734_v48  ;;  %v8014_v4 = vmul.f32 %v7639_v53, %v12738_v31  ;;  %v847_v60 = vsel %vm845_vm12, %v12737_v44, %v12739_v16  ;;  %v12748_v3 = vld [vmem:[#allocation86_spill] sm:$0xff]  ;;  %v12750_v52 = vld [vmem:[#allocation25_spill] sm:$0xff]  ;;  %v12751_v7 = vld [vmem:[#allocation87_spill] sm:$0xff] }
 0x776   : > { %v990_v61 = vsel %vm498_vm5, %v12741_v47, %v12740_v21  ;;  %v991_v20 = vsel %vm498_vm5, %v12740_v21, %v12742_v13  ;;  %v2289_v36 = vmul.f32 %v7833_v5, %v7278_v25  ;;  %v2313_v26 = vmax.f32 %v2310_v0, 0.0  ;;  %v12745_v5 = vld [vmem:[#allocation60_spill] sm:$0xff]  ;;  %v12753_v0 = vld [vmem:[#allocation91_spill] sm:$0xff]  ;;  %v12757_v47 = vld [vmem:[#allocation169_spill] sm:$0xff] }
 0x777   : > { %2293 = vrot.lane.b32.xlu1 %v2287_v17, %s12206_s21  ;;  %2277 = vrot.lane.b32.xlu0 %v2269_v14, %s12206_s21  ;;  %v2314_v54 = vmax.f32 %v2311_v15, 0.0  ;;  %v2312_v35 = vadd.f32 %v2309_v34, %v1472_v30  ;;  %v2288_v62 = vmul.f32 %v7821_v63, %v7278_v25  ;;  %v853_v41 = vadd.f32 %v847_v60, %v804_v18  ;;  %v12749_v63 = vld [vmem:[#allocation168_spill] sm:$0xff]  ;;  %v12755_v18 = vld [vmem:[#allocation133_spill] sm:$0xff] }
 0x778   : > { %v8036_v29 = vadd.f32 %v912_v38, %v12734_v48  ;;  %v852_v32 = vadd.f32 %v846_v24, %v803_v49  ;;  %v8040_v23 = vmul.f32 %v12744_v55, %v12743_v27  ;;  %v907_v42 = vsel %vm906_vm15, %v12736_v40, %v12745_v5  ;;  %v12752_v14 = vld [vmem:[#allocation80_spill] sm:$0xff]  ;;  %v12761_v55 = vld [vmem:[#allocation83_spill] sm:$0xff] }
 0x779   : > { %v8029_v37 = vpop.permute.xlu1 %1876  ;;  %v8031_v46 = vpop.permute.xlu0 %1874  ;;  %v908_v11 = vsel %vm906_vm15, %v12745_v5, %v12746_v59  ;;  %v1057_v25 = vsel %vm573_vm10, %v12748_v3, %v12747_v10  ;;  %v995_v19 = vadd.f32 %v990_v61, %v12749_v63  ;;  %v996_v57 = vadd.f32 %v991_v20, %v12750_v52  ;;  %v12754_v49 = vld [vmem:[#allocation136_spill] sm:$0xff]  ;;  %v12762_v3 = vld [vmem:[#allocation155_spill] sm:$0xff] }
 0x77a   : > { %v1058_v51 = vsel %vm573_vm10, %v12747_v10, %v12751_v7  ;;  %v1124_v15 = vsel %vm633_vm11, %v12753_v0, %v12752_v14  ;;  %v2316_v30 = vmin.f32 %v2313_v26, 6.0  ;;  %v2315_v17 = vmax.f32 %v2312_v35, 0.0  ;;  %v12756_v16 = vld [vmem:[#allocation92_spill] sm:$0xff]  ;;  %v12759_v26 = vld [vmem:[#allocation145_spill] sm:$0xff] }
 0x77b   : > { %2297 = vrot.lane.b32.xlu1 %v2289_v36, %s12206_s21  ;;  %2295 = vrot.lane.b32.xlu0 %v2288_v62, %s12206_s21  ;;  %v1540_v40 = vsel %vm498_vm5, %v12755_v18, %v12754_v49  ;;  %v2317_v24 = vmin.f32 %v2314_v54, 6.0  ;;  %v8068_v34 = vadd.f32 %v907_v42, %v852_v32  ;;  %v1062_v31 = vadd.f32 %v1057_v25, %v995_v19  ;;  %v12758_v36 = vld [vmem:[#allocation144_spill] sm:$0xff]  ;;  %s13019_s21 = smov 94  }
 0x77c   : > { %v1125_v60 = vsel %vm633_vm11, %v12752_v14, %v12756_v16  ;;  %v1485_v21 = vmul.f32 %v8014_v4, %v12709_v43  ;;  %v997_v61 = vadd.f32 %v12742_v13, %v12757_v47  ;;  %v1063_v20 = vadd.f32 %v1058_v51, %v996_v57  ;;  %v12760_v32 = vld [vmem:[#allocation96_spill] sm:$0xff]  ;;  %v12764_v57 = vld [vmem:[#allocation135_spill] sm:$0xff] }
 0x77d   : > { %v8064_v38 = vpop.permute.xlu1 %1894  ;;  %v8066_v44 = vpop.permute.xlu0 %1892  ;;  %v1603_v35 = vsel %vm573_vm10, %v12759_v26, %v12758_v36  ;;  %v8082_v54 = vadd.f32 %v908_v11, %v853_v41  ;;  %v1129_v62 = vadd.f32 %v1124_v15, %v1062_v31  ;;  %v1179_v5 = vsel %vm459_vm9, %v12761_v55, %v12760_v32  ;;  %v12763_v25 = vld [vmem:[#allocation152_spill] sm:$0xff]  ;;  %v12769_v47 = vld [vmem:[#allocation107_spill] sm:$0xff] }
 0x77e   : > { %v1545_v42 = vadd.f32 %v1540_v40, %v1485_v21  ;;  %v1064_v59 = vadd.f32 %v12751_v7, %v997_v61  ;;  %v1130_v13 = vadd.f32 %v1125_v60, %v1063_v20  ;;  %v2318_v10 = vmin.f32 %v2315_v17, 6.0  ;;  %v12765_v15 = vld [vmem:[#allocation100_spill] sm:$0xff]  ;;  %v12770_v61 = vld [vmem:[#allocation119_spill] sm:$0xff] }
 0x77f   : > { %2366 = vrot.lane.b32.xlu1 %v2317_v24, %s6448_s18  ;;  %2364 = vrot.lane.b32.xlu0 %v2316_v30, %s6448_s18  ;;  %v1666_v63 = vsel %vm633_vm11, %v12763_v25, %v12762_v3  ;;  %v1183_v41 = vadd.f32 %v12761_v55, %v1129_v62  ;;  %v1487_v11 = vmul.f32 %v8006_v50, %v12709_v43  ;;  %v12766_v30 = vld [vmem:[#allocation102_spill] sm:$0xff]  ;;  %v12767_v24 = vld [vmem:[#allocation103_spill] sm:$0xff]  ;;  %v12773_v25 = vld [vmem:[#allocation120_spill] sm:$0xff] }
 0x780   : > { %v1541_v51 = vsel %vm498_vm5, %v12754_v49, %v12764_v57  ;;  %v1608_v14 = vadd.f32 %v1603_v35, %v1545_v42  ;;  %v1131_v7 = vadd.f32 %v12756_v16, %v1064_v59  ;;  %v1184_v0 = vadd.f32 %v1179_v5, %v1130_v13  ;;  %v12768_v49 = vld [vmem:[#allocation147_spill] sm:$0xff]  ;;  %v12771_v59 = vld [vmem:[#allocation154_spill] sm:$0xff] }
 0x781   : > { %v8091_v19 = vpop.permute.xlu1 %1915  ;;  %v1897_v52 = vpop.permute.xlu0 %1896  ;;  %v1243_v17 = vsel %vm735_vm13, %v12766_v30, %v12765_v15  ;;  %v1486_v18 = vmul.f32 %v8040_v23, %v12709_v43  ;;  %v1248_v40 = vadd.f32 %v12766_v30, %v1183_v41  ;;  %v1244_v31 = vsel %vm735_vm13, %v12765_v15, %v12767_v24  ;;  %v12772_v13 = vld [vmem:[#allocation163_spill] sm:$0xff]  ;;  %v12776_v15 = vld [vmem:[#allocation38_spill] sm:$0xff] }
 0x782   : > { %v1604_v16 = vsel %vm573_vm10, %v12758_v36, %v12768_v49  ;;  %v1671_v60 = vadd.f32 %v1666_v63, %v1608_v14  ;;  %v1185_v21 = vadd.f32 %v12760_v32, %v1131_v7  ;;  %v1310_v20 = vsel %vm796_vm14, %v12770_v61, %v12769_v47  ;;  %v12775_v7 = vld [vmem:[#allocation162_spill] sm:$0xff] }
 0x783   : > { %2368 = vrot.lane.b32.xlu0 %v2318_v10, %s6448_s18  ;;  %v1547_v26 = vadd.f32 %v12764_v57, %v1487_v11  ;;  %v1546_v35 = vadd.f32 %v1541_v51, %v1486_v18  ;;  %v1249_v5 = vadd.f32 %v1243_v17, %v1184_v0  ;;  %v1315_v42 = vadd.f32 %v12770_v61, %v1248_v40  ;;  %v12774_v51 = vld [vmem:[#allocation122_spill] sm:$0xff]  ;;  %v12778_v18 = vld [vmem:[#allocation123_spill] sm:$0xff] }
 0x784   : > { %v1667_v36 = vsel %vm633_vm11, %v12762_v3, %v12771_v59  ;;  %v1716_v32 = vadd.f32 %v12772_v13, %v1671_v60  ;;  %v1250_v10 = vadd.f32 %v1244_v31, %v1185_v21  ;;  %v1311_v63 = vsel %vm796_vm14, %v12769_v47, %v12773_v25  ;;  %v12777_v3 = vld [vmem:[#allocation111_spill] sm:$0xff]  ;;  %v12779_v60 = vld [vmem:[#allocation126_spill] sm:$0xff] }
 0x785   : > { %v8118_v62 = vpop.permute.xlu1 %1919  ;;  %v8120_v55 = vpop.permute.xlu0 %1917  ;;  %v1609_v41 = vadd.f32 %v1604_v16, %v1546_v35  ;;  %v1610_v11 = vadd.f32 %v12768_v49, %v1547_v26  ;;  %v1316_v57 = vadd.f32 %v1310_v20, %v1249_v5  ;;  %v1379_v14 = vadd.f32 %v12774_v51, %v1315_v42  ;;  %v12780_v47 = vld [vmem:[#allocation26_spill] sm:$0xff]  ;;  %v12782_v42 = vld [vmem:[#allocation115_spill] sm:$0xff] }
 0x786   : > { %v1712_v0 = vsel %vm459_vm9, %v12772_v13, %v12775_v7  ;;  %v1780_v30 = vadd.f32 %v12776_v15, %v1716_v32  ;;  %v1374_v17 = vsel %vm845_vm12, %v12774_v51, %v12777_v3  ;;  %v1375_v40 = vsel %vm845_vm12, %v12777_v3, %v12778_v18  ;;  %v12781_v20 = vld [vmem:[#allocation34_spill] sm:$0xff]  ;;  %v12783_v32 = vld [vmem:[#allocation127_spill] sm:$0xff] }
 0x787   : > { %v1673_v24 = vadd.f32 %v12771_v59, %v1610_v11  ;;  %v1672_v31 = vadd.f32 %v1667_v36, %v1609_v41  ;;  %v1446_v21 = vadd.f32 %v12779_v60, %v1379_v14  ;;  %v1775_v61 = vsel %vm735_vm13, %v12776_v15, %v12780_v47 }
 0x788   : > { %v1776_v26 = vsel %vm735_vm13, %v12780_v47, %v12781_v20  ;;  %v1843_v35 = vadd.f32 %v7916_v12, %v1780_v30  ;;  %v1317_v5 = vadd.f32 %v1311_v63, %v1250_v10  ;;  %v1441_v59 = vsel %vm906_vm15, %v12779_v60, %v12782_v42 }
 0x789   : > { %v8143_v49 = vpop.permute.xlu1 %1937  ;;  %v8145_v16 = vpop.permute.xlu0 %1935  ;;  %v1718_v36 = vadd.f32 %v12775_v7, %v1673_v24  ;;  %v1717_v13 = vadd.f32 %v1712_v0, %v1672_v31  ;;  %v1442_v25 = vsel %vm906_vm15, %v12782_v42, %v12783_v32  ;;  %v1838_v41 = vsel %vm796_vm14, %v7916_v12, %v7946_v9 }
 0x78a   : > { %v1839_v11 = vsel %vm796_vm14, %v7946_v9, %v7944_v58  ;;  %v1903_v10 = vadd.f32 %v8066_v44, %v1843_v35  ;;  %v1380_v63 = vadd.f32 %v1374_v17, %v1316_v57  ;;  %v1381_v51 = vadd.f32 %v1375_v40, %v1317_v5 }
 0x78b   : > { %v1781_v14 = vadd.f32 %v1775_v61, %v1717_v13  ;;  %v1782_v15 = vadd.f32 %v1776_v26, %v1718_v36  ;;  %v2322_v30 = vadd.f32 %v8036_v29, %v1446_v21  ;;  %v1898_v3 = vsel %vm845_vm12, %v8066_v44, %v8064_v38 }
 0x78c   : > { %v1899_v12 = vsel %vm845_vm12, %v8064_v38, %v1897_v52  ;;  %v1447_v58 = vadd.f32 %v1441_v59, %v1380_v63  ;;  %v1448_v9 = vadd.f32 %v1442_v25, %v1381_v51  ;;  %v2320_v40 = vadd.f32 %v8068_v34, %v12734_v48 }
 0x78d   : > { %v1956_v7 = vpop.permute.xlu1 %1955  ;;  %v8169_v0 = vpop.permute.xlu0 %1939  ;;  %v1844_v24 = vadd.f32 %v1838_v41, %v1781_v14  ;;  %v1845_v57 = vadd.f32 %v1839_v11, %v1782_v15  ;;  %v2321_v31 = vadd.f32 %v8082_v54, %v12734_v48 }
 0x78e   : > { %v1966_v18 = vadd.f32 %v1956_v7, %v1903_v10  ;;  %v2323_v52 = vadd.f32 %v2320_v40, %v1447_v58  ;;  %v12792_v40 = vld [vmem:[#allocation9_spill] sm:$0xff] }
 0x78f   : > { %v1904_v29 = vadd.f32 %v1898_v3, %v1844_v24  ;;  %v1905_v60 = vadd.f32 %v1899_v12, %v1845_v57  ;;  %v2324_v20 = vadd.f32 %v2321_v31, %v1448_v9  ;;  %v12790_v24 = vld [vmem:[#allocation69_spill] sm:$0xff]  ;;  %v12791_v57 = vld [vmem:[#allocation64_spill] sm:$0xff] }
 0x790   : > { %v2325_v17 = vadd.f32 %v2322_v30, %v1966_v18  ;;  %v12793_v31 = vld [vmem:[#allocation53_spill] sm:$0xff] }
 0x791   : > { %v1960_v21 = vpop.permute.xlu1 %1959  ;;  %v1958_v47 = vpop.permute.xlu0 %1957 }
 0x792   : > { %v2328_v44 = vmax.f32 %v2325_v17, 0.0  ;;  %v1961_v61 = vsel %vm906_vm15, %v1956_v7, %v1958_v47  ;;  %v1962_v38 = vsel %vm906_vm15, %v1958_v47, %v1960_v21  ;;  %v970_v17 = vsel %vm498_vm5, %v12791_v57, %v12790_v24  ;;  %v12795_v21 = vld [vmem:[#allocation74_spill] sm:$0xff] }
 0x793   : > { %v1967_v26 = vadd.f32 %v1961_v61, %v1904_v29  ;;  %v1968_v35 = vadd.f32 %v1962_v38, %v1905_v60  ;;  %v945_v29 = vmul.f32 %v12793_v31, %v12792_v40  ;;  %v12794_v60 = vld [vmem:[#allocation85_spill] sm:$0xff] }
 0x794   : > { %v2331_v5 = vmin.f32 %v2328_v44, 6.0  ;;  %v1037_v47 = vsel %vm573_vm10, %v12795_v21, %v12794_v60 }
 0x795   : > { %v2326_v42 = vadd.f32 %v2323_v52, %v1967_v26  ;;  %v2327_v59 = vadd.f32 %v2324_v20, %v1968_v35  ;;  %v8183_v34 = vpop.permute.xlu1 %1989  ;;  %v8185_v36 = vpop.permute.xlu0 %1987  ;;  %v975_v44 = vadd.f32 %v970_v17, %v945_v29  ;;  %v12798_v52 = vld [vmem:[#allocation90_spill] sm:$0xff]  ;;  %v12800_v35 = vld [vmem:[#allocation65_spill] sm:$0xff] }
 0x796   : > { %2377 = vrot.lane.b32.xlu1 %v2331_v5, %s6448_s18  ;;  %v12799_v20 = vld [vmem:[#allocation78_spill] sm:$0xff]  ;;  %v971_v5 = vsel %vm498_vm5, %v12790_v24, %v12800_v35  ;;  %v12806_v24 = vld [vmem:[#allocation79_spill] sm:$0xff] }
 0x797   : > { %v2329_v54 = vmax.f32 %v2326_v42, 0.0  ;;  %v2330_v13 = vmax.f32 %v2327_v59, 0.0  ;;  %v1104_v26 = vsel %vm633_vm11, %v12799_v20, %v12798_v52  ;;  %v1042_v42 = vadd.f32 %v1037_v47, %v975_v44  ;;  %v12801_v59 = vld [vmem:[#allocation45_spill] sm:$0xff]  ;;  %v12807_v44 = vld [vmem:[#allocation82_spill] sm:$0xff] }
 0x798   : > { %v1105_v47 = vsel %vm633_vm11, %v12798_v52, %v12806_v24  ;;  %v1479_v52 = vmul.f32 %v8014_v4, %v12792_v40 }
 0x799   : > { %v8188_v32 = vpop.permute.xlu1 %2007  ;;  %v8190_v25 = vpop.permute.xlu0 %1991  ;;  %v2332_v41 = vmin.f32 %v2329_v54, 6.0  ;;  %v2333_v11 = vmin.f32 %v2330_v13, 6.0  ;;  %v946_v54 = vmul.f32 %v12801_v59, %v12792_v40  ;;  %v12802_v13 = vld [vmem:[#allocation167_spill] sm:$0xff]  ;;  %v1109_v17 = vadd.f32 %v1104_v26, %v1042_v42  ;;  %v12809_v26 = vld [vmem:[#allocation98_spill] sm:$0xff] }
 0x79b   : > { %2379 = vrot.lane.b32.xlu0 %v2332_v41, %s6448_s18  ;;  %2381 = vrot.lane.b32.xlu1 %v2333_v11, %s6448_s18  ;;  %v947_v41 = vmul.f32 %v12802_v13, %v12792_v40  ;;  %v12803_v11 = vld [vmem:[#allocation75_spill] sm:$0xff]  ;;  %v976_v21 = vadd.f32 %v971_v5, %v946_v54  ;;  %v1168_v59 = vadd.f32 %v12807_v44, %v1109_v17 }
 0x79c   : > { %v1038_v57 = vsel %vm573_vm10, %v12794_v60, %v12803_v11  ;;  %v1481_v54 = vmul.f32 %v8006_v50, %v12792_v40 }
 0x79d   : > { %v8194_v10 = vpop.permute.xlu1 %2011  ;;  %v8196_v63 = vpop.permute.xlu0 %2009  ;;  %v977_v20 = vadd.f32 %v12800_v35, %v947_v41  ;;  %v1228_v42 = vadd.f32 %v12809_v26, %v1168_v59  ;;  %v1480_v41 = vmul.f32 %v8040_v23, %v12792_v40  ;;  %v12815_v59 = vld [vmem:[#allocation99_spill] sm:$0xff]  ;;  %v1974_v40 = vmul.f32 %v7650_v33, %v7554_v8 }
 0x79f   : > { %v1044_v13 = vadd.f32 %v12803_v11, %v977_v20 }
 0x7a1   : > { %v8198_v51 = vpop.permute.xlu1 %2032  ;;  %v8200_v14 = vpop.permute.xlu0 %2030  ;;  %v1111_v11 = vadd.f32 %v12806_v24, %v1044_v13  ;;  %v12816_v13 = vld [vmem:[#allocation118_spill] sm:$0xff] }
 0x7a5   : > { %v8202_v15 = vpop.permute.xlu1 %2050  ;;  %v8204_v7 = vpop.permute.xlu0 %2034 }
 0x7a6   : > { %12784 = vst [vmem:[#allocation31_spill] sm:$0xff] %v8204_v7  ;;  %v12854_v7 = vld [vmem:[#allocation157_spill] sm:$0xff] }
 0x7a9   : > { %v8206_v30 = vpop.permute.xlu1 %2054  ;;  %v8208_v3 = vpop.permute.xlu0 %2052 }
 0x7aa   : > { %12785 = vst [vmem:[#allocation40_spill] sm:$0xff] %v8206_v30  ;;  %v12841_v30 = vld [vmem:[#allocation143_spill] sm:$0xff] }
 0x7ad   : > { %v8210_v12 = vpop.permute.xlu1 %2075  ;;  %v8212_v18 = vpop.permute.xlu0 %2073 }
 0x7ae   : > { %12786 = vst [vmem:[#allocation32_spill] sm:$0xff] %v8210_v12  ;;  %12787 = vst [vmem:[#allocation37_spill] sm:$0xff] %v8212_v18 }
 0x7b1   : > { %v8214_v58 = vpop.permute.xlu1 %2093  ;;  %v8216_v9 = vpop.permute.xlu0 %2077 }
 0x7b2   : > { %12788 = vst [vmem:[#allocation33_spill] sm:$0xff] %v8214_v58  ;;  %12789 = vst [vmem:[#allocation42_spill] sm:$0xff] %v8216_v9  ;;  %v12808_v9 = vld [vmem:[#allocation95_spill] sm:$0xff] }
 0x7b3   : > { %v1164_v60 = vsel %vm459_vm9, %v12807_v44, %v12808_v9  ;;  %v12814_v44 = vld [vmem:[#allocation139_spill] sm:$0xff]  ;;  %v1170_v24 = vadd.f32 %v12808_v9, %v1111_v11 }
 0x7b5   : > { %v8226_v61 = vpop.permute.xlu1 %2097  ;;  %v8228_v38 = vpop.permute.xlu0 %2095 }
 0x7b6   : > { %12796 = vst [vmem:[#allocation29_spill] sm:$0xff] %v8226_v61  ;;  %12797 = vst [vmem:[#allocation47_spill] sm:$0xff] %v8228_v38  ;;  %v1043_v61 = vadd.f32 %v1038_v57, %v976_v21  ;;  %v12812_v57 = vld [vmem:[#allocation101_spill] sm:$0xff] }
 0x7b7   : > { %v1223_v17 = vsel %vm735_vm13, %v12809_v26, %v12812_v57  ;;  %v12813_v21 = vld [vmem:[#allocation105_spill] sm:$0xff] }
 0x7b8   : > { %v1110_v35 = vadd.f32 %v1105_v47, %v1043_v61  ;;  %v1295_v20 = vadd.f32 %v12813_v21, %v1228_v42  ;;  %v1972_v61 = vmul.f32 %v7639_v53, %v12814_v44  ;;  %v1290_v26 = vsel %vm796_vm14, %v12813_v21, %v12816_v13  ;;  %v12817_v42 = vld [vmem:[#allocation109_spill] sm:$0xff]  ;;  %v12818_v44 = vld [vmem:[#allocation11_spill] sm:$0xff] }
 0x7b9   : > { %v8243_v31 = vpop.permute.xlu1 %2113  ;;  %v8245_v29 = vpop.permute.xlu0 %2111  ;;  %v1483_v9 = vmul.f32 %v8040_v23, %v12818_v44  ;;  %v1484_v11 = vmul.f32 %v8006_v50, %v12818_v44  ;;  %v12823_v53 = vld [vmem:[#allocation113_spill] sm:$0xff]  ;;  %v8313_v50 = vmul.f32 %v1974_v40, %v12818_v44 }
 0x7ba   : > { %12804 = vst [vmem:[#allocation55_spill] sm:$0xff] %v8243_v31  ;;  %12805 = vst [vmem:[#allocation35_spill] sm:$0xff] %v8245_v29  ;;  %v1169_v47 = vadd.f32 %v1164_v60, %v1110_v35  ;;  %v1359_v29 = vadd.f32 %v12817_v42, %v1295_v20  ;;  %v1482_v60 = vmul.f32 %v8014_v4, %v12818_v44  ;;  %v12822_v20 = vld [vmem:[#allocation121_spill] sm:$0xff] }
 0x7bb   : > { %v1354_v4 = vsel %vm845_vm12, %v12817_v42, %v12822_v20  ;;  %12826 = vst [vmem:[#allocation58_spill] sm:$0xff] %v8313_v50  ;;  %v12856_v50 = vld [vmem:[#allocation166_spill] sm:$0xff] }
 0x7bc   : > { %v1426_v33 = vadd.f32 %v12823_v53, %v1359_v29  ;;  %v8319_v29 = vmul.f32 %v1974_v40, %v12709_v43 }
 0x7bd   : > { %v8257_v31 = vpop.permute.xlu1 %2128  ;;  %v8259_v5 = vpop.permute.xlu0 %2126 }
 0x7be   : > { %12810 = vst [vmem:[#allocation73_spill] sm:$0xff] %v8257_v31  ;;  %12811 = vst [vmem:[#allocation72_spill] sm:$0xff] %v8259_v5  ;;  %v1224_v5 = vsel %vm735_vm13, %v12812_v57, %v12815_v59  ;;  %v1973_v31 = vmul.f32 %v7540_v22, %v12743_v27  ;;  %v1229_v59 = vadd.f32 %v1223_v17, %v1169_v47  ;;  %v12821_v22 = vld [vmem:[#allocation106_spill] sm:$0xff] }
 0x7bf   : > { %v1291_v8 = vsel %vm796_vm14, %v12816_v13, %v12821_v22  ;;  %v1230_v21 = vadd.f32 %v1224_v5, %v1170_v24  ;;  %v8304_v27 = vmul.f32 %v1972_v61, %v12818_v44  ;;  %v12824_v47 = vld [vmem:[#allocation110_spill] sm:$0xff]  ;;  %v12827_v24 = vld [vmem:[#allocation125_spill] sm:$0xff]  ;;  %12828 = vst [vmem:[#allocation77_spill] sm:$0xff] %v8319_v29 }
 0x7c0   : > { %v1296_v17 = vadd.f32 %v1290_v26, %v1229_v59  ;;  %v1355_v13 = vsel %vm845_vm12, %v12822_v20, %v12824_v47  ;;  %v8310_v23 = vmul.f32 %v1973_v31, %v12818_v44  ;;  %v1421_v42 = vsel %vm906_vm15, %v12823_v53, %v12827_v24  ;;  %v12831_v47 = vld [vmem:[#allocation130_spill] sm:$0xff]  ;;  %v12834_v53 = vld [vmem:[#allocation131_spill] sm:$0xff] }
 0x7c1   : > { %v8288_v35 = vpop.permute.xlu1 %2149  ;;  %v8290_v57 = vpop.permute.xlu0 %2147  ;;  %v1297_v5 = vadd.f32 %v1291_v8, %v1230_v21  ;;  %v8322_v26 = vmul.f32 %v1972_v61, %v12709_v43  ;;  %v12833_v8 = vld [vmem:[#allocation129_spill] sm:$0xff]  ;;  %v8338_v61 = vadd.f32 %v1426_v33, %v12734_v48 }
 0x7c2   : > { %12819 = vst [vmem:[#allocation84_spill] sm:$0xff] %v8288_v35  ;;  %12820 = vst [vmem:[#allocation68_spill] sm:$0xff] %v8290_v57  ;;  %v1360_v20 = vadd.f32 %v1354_v4, %v1296_v17  ;;  %v12832_v57 = vld [vmem:[#allocation128_spill] sm:$0xff]  ;;  %v1501_v21 = vsel %vm498_vm5, %v12831_v47, %v12833_v8  ;;  %v8344_v17 = vmul.f32 %v1973_v31, %v12709_v43 }
 0x7c3   : > { %12825 = vst [vmem:[#allocation56_spill] sm:$0xff] %v8310_v23  ;;  %v1500_v44 = vsel %vm498_vm5, %v12832_v57, %v12831_v47  ;;  %v12835_v35 = vld [vmem:[#allocation132_spill] sm:$0xff]  ;;  %v1361_v18 = vadd.f32 %v1355_v13, %v1297_v5  ;;  %v12838_v47 = vld [vmem:[#allocation134_spill] sm:$0xff]  ;;  %v12840_v13 = vld [vmem:[#allocation137_spill] sm:$0xff]  ;;  %v1506_v29 = vadd.f32 %v1501_v21, %v1480_v41 }
 0x7c4   : > { %v1520_v40 = vsel %vm498_vm5, %v12835_v35, %v12834_v53  ;;  %12837 = vst [vmem:[#allocation81_spill] sm:$0xff] %v8344_v17  ;;  %v8346_v57 = vadd.f32 %v1421_v42, %v1360_v20  ;;  %v1521_v12 = vsel %vm498_vm5, %v12834_v53, %v12838_v47  ;;  %v12839_v35 = vld [vmem:[#allocation141_spill] sm:$0xff]  ;;  %v1505_v5 = vadd.f32 %v1500_v44, %v1479_v52  ;;  %v12847_v41 = vld [vmem:[#allocation148_spill] sm:$0xff] }
 0x7c5   : > { %v8324_v59 = vpop.permute.xlu1 %2167  ;;  %v8326_v22 = vpop.permute.xlu0 %2151  ;;  %v1564_v33 = vsel %vm573_vm10, %v12840_v13, %v12839_v35  ;;  %v1525_v23 = vadd.f32 %v1520_v40, %v1482_v60  ;;  %v12848_v60 = vld [vmem:[#allocation149_spill] sm:$0xff]  ;;  %v1526_v21 = vadd.f32 %v1521_v12, %v1483_v9  ;;  %v12853_v17 = vld [vmem:[#allocation156_spill] sm:$0xff] }
 0x7c6   : > { %12829 = vst [vmem:[#allocation88_spill] sm:$0xff] %v8324_v59  ;;  %12830 = vst [vmem:[#allocation89_spill] sm:$0xff] %v8326_v22  ;;  %v12836_v59 = vld [vmem:[#allocation114_spill] sm:$0xff]  ;;  %v1507_v22 = vadd.f32 %v12833_v8, %v1481_v54  ;;  %v1527_v54 = vadd.f32 %v12838_v47, %v1484_v11  ;;  %v1627_v44 = vsel %vm633_vm11, %v12848_v60, %v12847_v41 }
 0x7c7   : > { %v1422_v4 = vsel %vm906_vm15, %v12827_v24, %v12836_v59  ;;  %v12842_v24 = vld [vmem:[#allocation140_spill] sm:$0xff]  ;;  %v12845_v59 = vld [vmem:[#allocation138_spill] sm:$0xff]  ;;  %v1569_v53 = vadd.f32 %v1564_v33, %v1506_v29  ;;  %v1682_v12 = vsel %vm459_vm9, %v12854_v7, %v12853_v17 }
 0x7c8   : > { %v1583_v43 = vsel %vm573_vm10, %v12842_v24, %v12841_v30  ;;  %v1563_v20 = vsel %vm573_vm10, %v12845_v59, %v12840_v13  ;;  %v12846_v8 = vld [vmem:[#allocation142_spill] sm:$0xff]  ;;  %v1570_v40 = vadd.f32 %v12839_v35, %v1507_v22  ;;  %v12852_v59 = vld [vmem:[#allocation153_spill] sm:$0xff] }
 0x7c9   : > { %v8358_v31 = vpop.permute.xlu1 %2171  ;;  %v8360_v42 = vpop.permute.xlu0 %2169  ;;  %v1584_v52 = vsel %vm573_vm10, %v12841_v30, %v12846_v8  ;;  %v12849_v24 = vld [vmem:[#allocation150_spill] sm:$0xff]  ;;  %v1588_v47 = vadd.f32 %v1583_v43, %v1525_v23  ;;  %v1568_v9 = vadd.f32 %v1563_v20, %v1505_v5  ;;  %v1590_v29 = vadd.f32 %v12846_v8, %v1527_v54  ;;  %v12857_v8 = vld [vmem:[#allocation159_spill] sm:$0xff] }
 0x7ca   : > { %12843 = vst [vmem:[#allocation93_spill] sm:$0xff] %v8358_v31  ;;  %12844 = vst [vmem:[#allocation94_spill] sm:$0xff] %v8360_v42  ;;  %v12850_v31 = vld [vmem:[#allocation151_spill] sm:$0xff]  ;;  %v12851_v42 = vld [vmem:[#allocation146_spill] sm:$0xff]  ;;  %v1647_v30 = vsel %vm633_vm11, %v12849_v24, %v12852_v59  ;;  %v1589_v22 = vadd.f32 %v1584_v52, %v1526_v21  ;;  %v1632_v35 = vadd.f32 %v1627_v44, %v1569_v53 }
 0x7cb   : > { %v1646_v11 = vsel %vm633_vm11, %v12850_v31, %v12849_v24  ;;  %v1626_v13 = vsel %vm633_vm11, %v12851_v42, %v12848_v60  ;;  %v1428_v43 = vadd.f32 %v1422_v4, %v1361_v18  ;;  %v1633_v31 = vadd.f32 %v12847_v41, %v1570_v40  ;;  %v12855_v60 = vld [vmem:[#allocation165_spill] sm:$0xff]  ;;  %v12858_v52 = vld [vmem:[#allocation160_spill] sm:$0xff] }
 0x7cc   : > { %v1651_v42 = vadd.f32 %v1646_v11, %v1588_v47  ;;  %v1735_v24 = vsel %vm735_vm13, %v12856_v50, %v12855_v60  ;;  %v1631_v58 = vadd.f32 %v1626_v13, %v1568_v9  ;;  %v1652_v38 = vadd.f32 %v1647_v30, %v1589_v22  ;;  %v12859_v4 = vld [vmem:[#allocation36_spill] sm:$0xff]  ;;  %v12861_v47 = vld [vmem:[#allocation30_spill] sm:$0xff]  ;;  %v12863_v9 = vld [vmem:[#allocation171_spill] sm:$0xff] }
 0x7cd   : > { %v8386_v33 = vpop.permute.xlu1 %2192  ;;  %v8388_v23 = vpop.permute.xlu0 %2190  ;;  %v1653_v5 = vadd.f32 %v12852_v59, %v1590_v29  ;;  %v1687_v20 = vadd.f32 %v1682_v12, %v1632_v35  ;;  %v1688_v54 = vadd.f32 %v12853_v17, %v1633_v31  ;;  %v1697_v44 = vsel %vm459_vm9, %v12858_v52, %v12857_v8  ;;  %v12860_v41 = vld [vmem:[#allocation24_spill] sm:$0xff]  ;;  %v12862_v30 = vld [vmem:[#allocation54_spill] sm:$0xff] }
 0x7ce   : > { %v1701_v18 = vadd.f32 %v12858_v52, %v1651_v42  ;;  %v1798_v21 = vsel %vm796_vm14, %v12860_v41, %v12859_v4  ;;  %v1686_v53 = vadd.f32 %v12854_v7, %v1631_v58  ;;  %v1736_v13 = vsel %vm735_vm13, %v12855_v60, %v12861_v47  ;;  %v12864_v22 = vld [vmem:[#allocation170_spill] sm:$0xff]  ;;  %v12865_v42 = vld [vmem:[#allocation41_spill] sm:$0xff] }
 0x7cf   : > { %v1703_v40 = vadd.f32 %v12857_v8, %v1653_v5  ;;  %v1741_v11 = vadd.f32 %v1735_v24, %v1687_v20  ;;  %v1755_v29 = vsel %vm735_vm13, %v12862_v30, %v12863_v9  ;;  %v1756_v7 = vsel %vm735_vm13, %v12863_v9, %v12864_v22 }
 0x7d0   : > { %v1760_v12 = vadd.f32 %v12862_v30, %v1701_v18  ;;  %v1858_v58 = vsel %vm845_vm12, %v7973_v2, %v7971_v28  ;;  %v1702_v35 = vadd.f32 %v1697_v44, %v1652_v38  ;;  %v1740_v31 = vadd.f32 %v12856_v50, %v1686_v53 }
 0x7d1   : > { %v8408_v17 = vpop.permute.xlu1 %2210  ;;  %v8410_v59 = vpop.permute.xlu0 %2194  ;;  %v1799_v60 = vsel %vm796_vm14, %v12859_v4, %v12865_v42  ;;  %v1804_v24 = vadd.f32 %v1798_v21, %v1741_v11  ;;  %v1742_v5 = vadd.f32 %v1736_v13, %v1688_v54  ;;  %v1818_v20 = vsel %vm796_vm14, %v7893_v56, %v7891_v1 }
 0x7d2   : > { %v1823_v8 = vadd.f32 %v7893_v56, %v1760_v12  ;;  %v1921_v52 = vsel %vm906_vm15, %v8091_v19, %v8120_v55  ;;  %v1761_v18 = vadd.f32 %v1755_v29, %v1702_v35  ;;  %v1762_v38 = vadd.f32 %v1756_v7, %v1703_v40  ;;  %v12866_v35 = vld [vmem:[#allocation47_spill] sm:$0xff] }
 0x7d3   : > { %v1819_v50 = vsel %vm796_vm14, %v7891_v1, %v7918_v6  ;;  %v1864_v44 = vadd.f32 %v1858_v58, %v1804_v24  ;;  %v1803_v21 = vadd.f32 %v12860_v41, %v1740_v31  ;;  %v1805_v53 = vadd.f32 %v1799_v60, %v1742_v5  ;;  %v12867_v31 = vld [vmem:[#allocation33_spill] sm:$0xff]  ;;  %v12869_v24 = vld [vmem:[#allocation31_spill] sm:$0xff] }
 0x7d4   : > { %v1883_v56 = vadd.f32 %v7997_v45, %v1823_v8  ;;  %v1878_v11 = vsel %vm845_vm12, %v7997_v45, %v8031_v46  ;;  %v1824_v47 = vadd.f32 %v1818_v20, %v1761_v18  ;;  %v1859_v40 = vsel %vm845_vm12, %v7971_v28, %v7999_v39  ;;  %v12872_v8 = vld [vmem:[#allocation77_spill] sm:$0xff] }
 0x7d5   : > { %v8436_v4 = vpop.permute.xlu1 %2214  ;;  %v8438_v54 = vpop.permute.xlu0 %2212  ;;  %v1879_v1 = vsel %vm845_vm12, %v8031_v46, %v8029_v37  ;;  %v1927_v6 = vadd.f32 %v1921_v52, %v1864_v44  ;;  %v1825_v13 = vadd.f32 %v1819_v50, %v1762_v38  ;;  %v1863_v41 = vadd.f32 %v7973_v2, %v1803_v21  ;;  %v12873_v18 = vld [vmem:[#allocation81_spill] sm:$0xff]  ;;  %v12874_v50 = vld [vmem:[#allocation32_spill] sm:$0xff] }
 0x7d6   : > { %v1941_v30 = vsel %vm906_vm15, %v8145_v16, %v8143_v49  ;;  %v1946_v12 = vadd.f32 %v8145_v16, %v1883_v56  ;;  %v8458_v45 = vadd.f32 %v8346_v57, %v12734_v48  ;;  %v8461_v28 = vadd.f32 %v1428_v43, %v12734_v48  ;;  %v12875_v44 = vld [vmem:[#allocation37_spill] sm:$0xff] }
 0x7d7   : > { %v1884_v39 = vadd.f32 %v1878_v11, %v1824_v47  ;;  %v2013_v37 = vsel %vm498_vm5, %v8188_v32, %v8196_v63  ;;  %v8470_v9 = vadd.f32 %v1859_v40, %v1805_v53  ;;  %v8472_v29 = vadd.f32 %v1879_v1, %v1825_v13  ;;  %v12876_v53 = vld [vmem:[#allocation42_spill] sm:$0xff]  ;;  %v12877_v56 = vld [vmem:[#allocation29_spill] sm:$0xff] }
 0x7d8   : > { %v8475_v16 = vadd.f32 %v8091_v19, %v1863_v41  ;;  %v1993_v57 = vsel %vm498_vm5, %v8185_v36, %v8183_v34  ;;  %v8483_v43 = vsel %vm906_vm15, %v8120_v55, %v8118_v62  ;;  %v8486_v32 = vadd.f32 %v1927_v6, %v12734_v48 }
 0x7d9   : > { %v8466_v46 = vpop.permute.xlu1 %2232  ;;  %v8468_v2 = vpop.permute.xlu0 %2230  ;;  %v8488_v22 = vadd.f32 %v1941_v30, %v1884_v39  ;;  %v2056_v7 = vsel %vm573_vm10, %v8202_v15, %v8208_v3  ;;  %v8494_v19 = vadd.f32 %v8338_v61, %v1946_v12  ;;  %v1994_v36 = vsel %vm498_vm5, %v8183_v34, %v8190_v25  ;;  %v12878_v30 = vld [vmem:[#allocation55_spill] sm:$0xff] }
 0x7da   : > { %v2014_v62 = vsel %vm498_vm5, %v8196_v63, %v8194_v10  ;;  %v2018_v55 = vadd.f32 %v2013_v37, %v8322_v26  ;;  %v8506_v58 = vsel %vm906_vm15, %v8143_v49, %v8169_v0  ;;  %v1998_v15 = vadd.f32 %v1993_v57, %v8304_v27  ;;  %v12868_v63 = vld [vmem:[#allocation58_spill] sm:$0xff]  ;;  %v12870_v0 = vld [vmem:[#allocation40_spill] sm:$0xff]  ;;  %v12879_v12 = vld [vmem:[#allocation35_spill] sm:$0xff] }
 0x7db   : > { %v2036_v61 = vsel %vm573_vm10, %v8200_v14, %v8198_v51  ;;  %v2099_v34 = vsel %vm633_vm11, %v12867_v31, %v12866_v35  ;;  %v2000_v26 = vadd.f32 %v8190_v25, %v12868_v63  ;;  %v2037_v49 = vsel %vm573_vm10, %v8198_v51, %v12869_v24  ;;  %v12871_v14 = vld [vmem:[#allocation56_spill] sm:$0xff]  ;;  %v12880_v37 = vld [vmem:[#allocation73_spill] sm:$0xff] }
 0x7dc   : > { %v2057_v27 = vsel %vm573_vm10, %v8208_v3, %v12870_v0  ;;  %v2061_v5 = vadd.f32 %v2056_v7, %v2018_v55  ;;  %v1999_v20 = vadd.f32 %v1994_v36, %v12871_v14  ;;  %v2020_v52 = vadd.f32 %v8194_v10, %v12872_v8  ;;  %v12881_v57 = vld [vmem:[#allocation72_spill] sm:$0xff] }
 0x7dd   : > { %v2251_v42 = vpop.permute.xlu1 %2250  ;;  %v8515_v60 = vpop.permute.xlu0 %2234  ;;  %v2019_v38 = vadd.f32 %v2014_v62, %v12873_v18  ;;  %v2079_v25 = vsel %vm633_vm11, %v12875_v44, %v12874_v50  ;;  %v2041_v21 = vadd.f32 %v2036_v61, %v1998_v15  ;;  %v2080_v51 = vsel %vm633_vm11, %v12874_v50, %v12876_v53  ;;  %v12883_v31 = vld [vmem:[#allocation68_spill] sm:$0xff]  ;;  %v12887_v50 = vld [vmem:[#allocation93_spill] sm:$0xff] }
 0x7de   : > { %v2100_v3 = vsel %vm633_vm11, %v12866_v35, %v12877_v56  ;;  %v2104_v11 = vadd.f32 %v2099_v34, %v2061_v5  ;;  %v2042_v47 = vadd.f32 %v2037_v49, %v1999_v20  ;;  %v2043_v40 = vadd.f32 %v12869_v24, %v2000_v26  ;;  %v12882_v35 = vld [vmem:[#allocation84_spill] sm:$0xff]  ;;  %v12885_v24 = vld [vmem:[#allocation89_spill] sm:$0xff] }
 0x7df   : > { %v2063_v10 = vadd.f32 %v12870_v0, %v2020_v52  ;;  %v2062_v1 = vadd.f32 %v2057_v27, %v2019_v38  ;;  %v2084_v41 = vadd.f32 %v2079_v25, %v2041_v21  ;;  %v2115_v39 = vsel %vm459_vm9, %v12879_v12, %v12878_v30  ;;  %v12884_v63 = vld [vmem:[#allocation88_spill] sm:$0xff]  ;;  %v12886_v0 = vld [vmem:[#allocation94_spill] sm:$0xff] }
 0x7e0   : > { %v2130_v7 = vsel %vm459_vm9, %v12881_v57, %v12880_v37  ;;  %v2134_v36 = vadd.f32 %v12881_v57, %v2104_v11  ;;  %v2085_v62 = vadd.f32 %v2080_v51, %v2042_v47  ;;  %v2086_v55 = vadd.f32 %v12876_v53, %v2043_v40 }
 0x7e1   : > { %v2255_v6 = vpop.permute.xlu1 %2254  ;;  %v2253_v13 = vpop.permute.xlu0 %2252  ;;  %v2106_v15 = vadd.f32 %v12877_v56, %v2063_v10  ;;  %v2105_v61 = vadd.f32 %v2100_v3, %v2062_v1  ;;  %v2153_v34 = vsel %vm735_vm13, %v12883_v31, %v12882_v35  ;;  %v2154_v49 = vsel %vm735_vm13, %v12882_v35, %v12885_v24 }
 0x7e2   : > { %v2178_v26 = vadd.f32 %v12884_v63, %v2134_v36  ;;  %v2173_v27 = vsel %vm735_vm13, %v12884_v63, %v12886_v0  ;;  %v2121_v5 = vadd.f32 %v12878_v30, %v2086_v55  ;;  %v2119_v14 = vadd.f32 %v12879_v12, %v2084_v41 }
 0x7e3   : > { %v2120_v20 = vadd.f32 %v2115_v39, %v2085_v62  ;;  %v2135_v8 = vadd.f32 %v2130_v7, %v2105_v61  ;;  %v2136_v38 = vadd.f32 %v12880_v37, %v2106_v15  ;;  %v2174_v44 = vsel %vm735_vm13, %v12886_v0, %v12887_v50 }
 0x7e4   : > { %v2196_v25 = vsel %vm796_vm14, %v8388_v23, %v8386_v33  ;;  %v2221_v21 = vadd.f32 %v8408_v17, %v2178_v26  ;;  %v2158_v53 = vadd.f32 %v12883_v31, %v2119_v14  ;;  %v2160_v56 = vadd.f32 %v2154_v49, %v2121_v5 }
 0x7e5   : > { %v2276_v52 = vpop.permute.xlu1 %2275  ;;  %v2274_v18 = vpop.permute.xlu0 %2273  ;;  %v2159_v51 = vadd.f32 %v2153_v34, %v2120_v20  ;;  %v2179_v3 = vadd.f32 %v2173_v27, %v2135_v8  ;;  %v2216_v11 = vsel %vm796_vm14, %v8408_v17, %v8438_v54  ;;  %v2217_v47 = vsel %vm796_vm14, %v8438_v54, %v8436_v4 }
 0x7e6   : > { %v2236_v40 = vsel %vm845_vm12, %v8468_v2, %v8466_v46  ;;  %v2261_v10 = vadd.f32 %v2251_v42, %v2221_v21  ;;  %v2180_v1 = vadd.f32 %v2174_v44, %v2136_v38  ;;  %v2201_v41 = vadd.f32 %v8388_v23, %v2158_v53  ;;  %v2415_v53 = vld [vmem:[%s11998_s3 + $0x10] sm:$0xff] }
 0x7e7   : > { %v2202_v30 = vadd.f32 %v2196_v25, %v2159_v51  ;;  %v2197_v12 = vsel %vm796_vm14, %v8386_v33, %v8410_v59  ;;  %v2256_v17 = vsel %vm845_vm12, %v2251_v42, %v2253_v13  ;;  %v2257_v57 = vsel %vm845_vm12, %v2253_v13, %v2255_v6  ;;  %v2414_v25 = vld [vmem:[%s11998_s3 + $0x8] sm:$0xff] }
 0x7e8   : > { %v2279_v4 = vsel %vm906_vm15, %v2274_v18, %v2276_v52  ;;  %v1948_v7 = vadd.f32 %v8506_v58, %v8472_v29  ;;  %v2222_v36 = vadd.f32 %v2216_v11, %v2179_v3  ;;  %v2223_v62 = vadd.f32 %v2217_v47, %v2180_v1  ;;  %v2763_v11 = vld [vmem:[%s11999_s4] sm:$0xff]  ;;  %v2764_v1 = vld [vmem:[%s11999_s4 + $0x8] sm:$0xff] }
 0x7e9   : > { %v2294_v39 = vpop.permute.xlu1 %2293  ;;  %v2278_v37 = vpop.permute.xlu0 %2277  ;;  %v2242_v23 = vadd.f32 %v2236_v40, %v2202_v30  ;;  %v2338_v55 = vadd.f32 %v8458_v45, %v8488_v22  ;;  %v2203_v15 = vadd.f32 %v2197_v12, %v2160_v56  ;;  %v2241_v33 = vadd.f32 %v8468_v2, %v2201_v41  ;;  %v8630_v47 = vld [vmem:[%s12000_s5] sm:$0xff]  ;;  %v2765_v41 = vld [vmem:[%s11999_s4 + $0x10] sm:$0xff] }
 0x7ea   : > { %v2304_v54 = vadd.f32 %v2294_v39, %v2261_v10  ;;  %v2237_v42 = vsel %vm845_vm12, %v8466_v46, %v8515_v60  ;;  %v2262_v6 = vadd.f32 %v2256_v17, %v2222_v36  ;;  %v2263_v13 = vadd.f32 %v2257_v57, %v2223_v62  ;;  %12892 = vst [vmem:[#allocation44_spill] sm:$0xff] %v8630_v47 }
 0x7eb   : > { %v2285_v61 = vadd.f32 %v2279_v4, %v2242_v23  ;;  %v2284_v58 = vadd.f32 %v2274_v18, %v2241_v33  ;;  %v2339_v22 = vadd.f32 %v8461_v28, %v1948_v7  ;;  %v2280_v2 = vsel %vm906_vm15, %v2276_v52, %v2278_v37 }
 0x7ec   : > { %v2340_v59 = vadd.f32 %v8494_v19, %v2304_v54  ;;  %v2349_v46 = vadd.f32 %v8475_v16, %v12734_v48  ;;  %v1928_v60 = vadd.f32 %v8483_v43, %v8470_v9  ;;  %v2243_v26 = vadd.f32 %v2237_v42, %v2203_v15 }
 0x7ed   : > { %v2298_v35 = vpop.permute.xlu1 %2297  ;;  %v2296_v29 = vpop.permute.xlu0 %2295  ;;  %v2353_v49 = vadd.f32 %v8486_v32, %v2285_v61  ;;  %v12888_v21 = vmov 2   ;;  %v12889_v51 = vmov 3   ;;  %v12890_v56 = vmov 1  }
 0x7ee   : > { %v2343_v31 = vmax.f32 %v2340_v59, 0.0  ;;  %v2299_v34 = vsel %vm906_vm15, %v2294_v39, %v2296_v29  ;;  %v2300_v45 = vsel %vm906_vm15, %v2296_v29, %v2298_v35  ;;  %v2352_v5 = vadd.f32 %v2349_v46, %v2284_v58 }
 0x7ef   : > { %v2305_v19 = vadd.f32 %v2299_v34, %v2262_v6  ;;  %v2306_v63 = vadd.f32 %v2300_v45, %v2263_v13  ;;  %v2286_v14 = vadd.f32 %v2280_v2, %v2243_v26  ;;  %v2351_v8 = vadd.f32 %v1928_v60, %v12734_v48  ;;  %v2413_v48 = vld [vmem:[%s11998_s3] sm:$0xff] }
 0x7f0   : > { %v2346_v24 = vmin.f32 %v2343_v31, 6.0  ;;  %v2356_v52 = vmax.f32 %v2353_v49, 0.0  ;;  %v2355_v38 = vmax.f32 %v2352_v5, 0.0  ;;  %v12891_v3 = vmov 0  }
 0x7f1   : > { %v2341_v0 = vadd.f32 %v2338_v55, %v2305_v19  ;;  %v2342_v27 = vadd.f32 %v2339_v22, %v2306_v63  ;;  %v2354_v50 = vadd.f32 %v2351_v8, %v2286_v14  ;;  %v12893_v40 = vmov 9   ;;  %v2365_v30 = vpop.permute.xlu0 %2364  ;;  %v2367_v12 = vpop.permute.xlu1 %2366 }
 0x7f2   : > { %2390 = vrot.lane.b32.xlu0 %v2346_v24, %s6448_s18  ;;  %v2359_v9 = vmin.f32 %v2356_v52, 6.0  ;;  %v2358_v43 = vmin.f32 %v2355_v38, 6.0  ;;  %v12894_v10 = vmov 10   ;;  %v12895_v36 = vlaneseq }
 0x7f3   : > { %v2344_v28 = vmax.f32 %v2341_v0, 0.0  ;;  %v2345_v20 = vmax.f32 %v2342_v27, 0.0  ;;  %v2357_v32 = vmax.f32 %v2354_v50, 0.0  ;;  %v2370_v42 = vsel %vm882_vm8, %v2365_v30, %v2367_v12 }
 0x7f4   : > { %v8649_v62 = vshrl.u32 %v12895_v36, 7 }
 0x7f5   : > { %v2348_v18 = vmin.f32 %v2345_v20, 6.0  ;;  %v2347_v16 = vmin.f32 %v2344_v28, 6.0  ;;  %v2360_v44 = vmin.f32 %v2357_v32, 6.0  ;;  %v2369_v39 = vpop.permute.xlu0 %2368 }
 0x7f6   : > { %12896 = vst [vmem:[#allocation97_spill] sm:$0xff] %v8649_v62  ;;  %v8652_v23 = vsub.s32 0, %v8649_v62  ;;  %v8655_v55 = vsub.s32 1, %v8649_v62  ;;  %v8658_v15 = vsub.s32 2, %v8649_v62  ;;  %v8661_v59 = vsub.s32 3, %v8649_v62 }
 0x7f7   : > { %2394 = vrot.lane.b32.xlu0 %v2348_v18, %s6448_s18  ;;  %2392 = vrot.lane.b32.xlu1 %v2347_v16, %s6448_s18  ;;  %v2371_v13 = vsel %vm882_vm8, %v2367_v12, %v2369_v39 }
 0x7f8   : > { %12897 = vst [vmem:[#allocation48_spill] sm:$0xff] %v8652_v23  ;;  %12898 = vst [vmem:[#allocation43_spill] sm:$0xff] %v8655_v55  ;;  %v8667_v35 = vrot.slane %v2370_v42, %v8652_v23  ;;  %v8670_v29 = vrot.slane %v2370_v42, %v8655_v55  ;;  %v8673_v58 = vrot.slane %v2370_v42, %v8658_v15 }
 0x7f9   : > { %12899 = vst [vmem:[#allocation104_spill] sm:$0xff] %v8658_v15  ;;  %12900 = vst [vmem:[#allocation108_spill] sm:$0xff] %v8661_v59  ;;  %v8677_v34 = vrot.slane %v2370_v42, %v8661_v59  ;;  %v8680_v45 = vrot.slane %v2371_v13, %v8652_v23  ;;  %v8683_v22 = vrot.slane %v2371_v13, %v8655_v55 }
 0x7fa   : > { %12901 = vst [vmem:[#allocation67_spill] sm:$0xff] %v8673_v58  ;;  %v8686_v2 = vrot.slane %v2371_v13, %v8658_v15  ;;  %v8689_v63 = vrot.slane %v2371_v13, %v8661_v59 }
 0x7fb   : > { %2405 = vrot.lane.b32.xlu0 %v2359_v9, %s6448_s18  ;;  %2403 = vrot.lane.b32.xlu1 %v2358_v43, %s6448_s18  ;;  %12902 = vst [vmem:[#allocation62_spill] sm:$0xff] %v8677_v34 }
 0x7fc   : > { %12903 = vst [vmem:[#allocation51_spill] sm:$0xff] %v8686_v2  ;;  %12904 = vst [vmem:[#allocation112_spill] sm:$0xff] %v8689_v63 }
 0x7ff   : > { %2488 = vperm.xlu0 %6062, %v2413_v48   ;;  %2407 = vrot.lane.b32.xlu1 %v2360_v44, %s6448_s18 }
 0x803   : > { %6064 = vset.pattern.permute.xlu0 %v12888_v21  ;;  %2423 = vperm.xlu1 %6061, %v2414_v25  }
 0x804   : > { %2580 = vperm.xlu0 %6064, %v2413_v48  }
 0x807   : > { %2428 = vperm.xlu1 %6061, %v2415_v53  }
 0x808   : > { %6066 = vset.pattern.permute.xlu0 %v12889_v51  ;;  %v2378_v37 = vpop.permute.xlu1 %2377 }
 0x809   : > { %2672 = vperm.xlu0 %6066, %v2413_v48  }
 0x80b   : > { %6063 = vset.pattern.permute.xlu1 %v12890_v56 }
 0x80c   : > { %2492 = vperm.xlu1 %6063, %v2414_v25  }
 0x80d   : > { %6067 = vset.pattern.permute.xlu0 %v12891_v3  ;;  %v2380_v17 = vpop.permute.xlu0 %2379  ;;  %v2382_v4 = vpop.permute.xlu1 %2381 }
 0x80e   : > { %2418 = vperm.xlu0 %6067, %v2413_v48   ;;  %v2383_v61 = vsel %vm882_vm8, %v2378_v37, %v2380_v17  ;;  %v2384_v31 = vsel %vm882_vm8, %v2380_v17, %v2382_v4 }
 0x80f   : > { %v8692_v46 = vrot.slane %v2383_v61, %v8652_v23  ;;  %v8697_v49 = vrot.slane %v2383_v61, %v8655_v55  ;;  %v8700_v0 = vrot.slane %v2383_v61, %v8658_v15  ;;  %v8703_v27 = vrot.slane %v2383_v61, %v8661_v59 }
 0x810   : > { %2496 = vperm.xlu1 %6063, %v2415_v53   ;;  %v8706_v5 = vrot.slane %v2384_v31, %v8652_v23  ;;  %v8709_v14 = vrot.slane %v2384_v31, %v8655_v55  ;;  %v8712_v28 = vrot.slane %v2384_v31, %v8658_v15  ;;  %v8715_v20 = vrot.slane %v2384_v31, %v8661_v59 }
 0x811   : > { %12905 = vst [vmem:[#allocation63_spill] sm:$0xff] %v8700_v0  ;;  %12906 = vst [vmem:[#allocation124_spill] sm:$0xff] %v8703_v27 }
 0x812   : > { %2768 = vperm.xlu0 %6067, %v2763_v11   ;;  %12907 = vst [vmem:[#allocation57_spill] sm:$0xff] %v8712_v28  ;;  %12908 = vst [vmem:[#allocation46_spill] sm:$0xff] %v8715_v20 }
 0x814   : > { %6065 = vset.pattern.permute.xlu1 %v12888_v21 }
 0x815   : > { %2584 = vperm.xlu1 %6065, %v2414_v25  }
 0x816   : > { %6070 = vset.pattern.permute.xlu0 %v12893_v40 }
 0x817   : > { %2963 = vperm.xlu0 %6070, %v8630_v47  }
 0x819   : > { %2588 = vperm.xlu1 %6065, %v2415_v53  }
 0x81b   : > { %6072 = vset.pattern.permute.xlu0 %v12894_v10 }
 0x81d   : > { %6068 = vset.pattern.permute.xlu1 %v12889_v51 }
 0x81e   : > { %2676 = vperm.xlu1 %6068, %v2414_v25  }
 0x822   : > { %2680 = vperm.xlu1 %6068, %v2415_v53  }
 0x826   : > { %6069 = vset.pattern.permute.xlu1 %v12891_v3 }
 0x827   : > { %2773 = vperm.xlu1 %6069, %v2764_v1  }
 0x82b   : > { %2778 = vperm.xlu1 %6069, %v2765_v41  }
 0x82f   : > { %2956 = vperm.xlu1 %6069, %v8630_v47  }
 0x833   : > { %6071 = vset.pattern.permute.xlu1 %v12890_v56 }
 0x834   : > { %2970 = vperm.xlu1 %6071, %v8630_v47  }
 0x838   : > { %6073 = vset.pattern.permute.xlu1 %v12888_v21 }
 0x864   : > { %v2391_v57 = vpop.permute.xlu0 %2390 }
 0x869   : > { %v2393_v54 = vpop.permute.xlu1 %2392  ;;  %v2395_v7 = vpop.permute.xlu0 %2394 }
 0x86a   : > { %v2396_v60 = vsel %vm882_vm8, %v2391_v57, %v2393_v54  ;;  %v2397_v26 = vsel %vm882_vm8, %v2393_v54, %v2395_v7 }
 0x86b   : > { %v8719_v52 = vrot.slane %v2396_v60, %v8652_v23  ;;  %v8722_v18 = vrot.slane %v2397_v26, %v8652_v23  ;;  %v8725_v16 = vrot.slane %v2396_v60, %v8655_v55  ;;  %v8729_v50 = vrot.slane %v2397_v26, %v8655_v55 }
 0x86c   : > { %v8732_v9 = vrot.slane %v2396_v60, %v8658_v15  ;;  %v8735_v43 = vrot.slane %v2397_v26, %v8658_v15  ;;  %v8738_v32 = vrot.slane %v2396_v60, %v8661_v59  ;;  %v8741_v25 = vrot.slane %v2397_v26, %v8661_v59 }
 0x86d   : > { %v2404_v33 = vpop.permute.xlu1 %2403  ;;  %v2406_v6 = vpop.permute.xlu0 %2405 }
 0x86e   : > { %v2409_v8 = vsel %vm882_vm8, %v2404_v33, %v2406_v6  ;;  %12909 = vst [vmem:[#allocation10_spill] sm:$0xff] %v8732_v9  ;;  %12910 = vst [vmem:[#allocation27_spill] sm:$0xff] %v8735_v43 }
 0x86f   : > { %12911 = vst [vmem:[#allocation59_spill] sm:$0xff] %v8738_v32  ;;  %12912 = vst [vmem:[#allocation39_spill] sm:$0xff] %v8741_v25  ;;  %v2458_v53 = vrot.slane %v2409_v8, %v8652_v23  ;;  %v8745_v11 = vrot.slane %v2409_v8, %v8655_v55  ;;  %v8748_v40 = vrot.slane %v2409_v8, %v8658_v15 }
 0x870   : > { %v8751_v10 = vrot.slane %v2409_v8, %v8661_v59 }
 0x871   : > { %v2408_v24 = vpop.permute.xlu1 %2407  ;;  %12913 = vst [vmem:[#allocation116_spill] sm:$0xff] %v8745_v11  ;;  %12914 = vst [vmem:[#allocation28_spill] sm:$0xff] %v8748_v40 }
 0x872   : > { %v2410_v38 = vsel %vm882_vm8, %v2406_v6, %v2408_v24  ;;  %12915 = vst [vmem:[#allocation66_spill] sm:$0xff] %v8751_v10 }
 0x873   : > { %v2462_v1 = vrot.slane %v2410_v38, %v8652_v23  ;;  %v8755_v41 = vrot.slane %v2410_v38, %v8655_v55  ;;  %v8758_v30 = vrot.slane %v2410_v38, %v8658_v15  ;;  %v8761_v12 = vrot.slane %v2410_v38, %v8661_v59 }
 0x875   : > { %12916 = vst [vmem:[#allocation70_spill] sm:$0xff] %v8758_v30  ;;  %12917 = vst [vmem:[#allocation71_spill] sm:$0xff] %v8761_v12 }
 0x87a   : > { %v2489_v19 = vpop.permute.xlu0 %2488 }
 0x87b   : > { %v8764_v39 = vmul.f32 %v8670_v29, %v2489_v19  ;;  %v8767_v37 = vmul.f32 %v8683_v22, %v2489_v19  ;;  %v8770_v17 = vmul.f32 %v8697_v49, %v2489_v19  ;;  %v8773_v57 = vmul.f32 %v8709_v14, %v2489_v19 }
 0x87c   : > { %v8776_v4 = vmul.f32 %v8725_v16, %v2489_v19  ;;  %v8779_v54 = vmul.f32 %v8729_v50, %v2489_v19  ;;  %v8782_v7 = vmul.f32 %v8745_v11, %v2489_v19  ;;  %v8785_v33 = vmul.f32 %v8755_v41, %v2489_v19 }
 0x87e   : > { %v2424_v48 = vpop.permute.xlu1 %2423 }
 0x87f   : > { %v2581_v44 = vpop.permute.xlu0 %2580  ;;  %v2471_v42 = vmul.f32 %v8667_v35, %v2424_v48  ;;  %v2472_v6 = vmul.f32 %v8680_v45, %v2424_v48  ;;  %v2473_v13 = vmul.f32 %v8692_v46, %v2424_v48  ;;  %v2474_v31 = vmul.f32 %v8706_v5, %v2424_v48 }
 0x880   : > { %v2475_v60 = vmul.f32 %v8719_v52, %v2424_v48  ;;  %v2476_v26 = vmul.f32 %v8722_v18, %v2424_v48  ;;  %v2477_v24 = vmul.f32 %v2458_v53, %v2424_v48  ;;  %v2478_v8 = vmul.f32 %v2462_v1, %v2424_v48 }
 0x881   : > { %v8794_v38 = vmul.f32 %v8673_v58, %v2581_v44  ;;  %v8797_v19 = vmul.f32 %v8686_v2, %v2581_v44  ;;  %v8800_v59 = vmul.f32 %v8700_v0, %v2581_v44  ;;  %v8803_v15 = vmul.f32 %v8712_v28, %v2581_v44 }
 0x882   : > { %v2429_v36 = vpop.permute.xlu1 %2428  ;;  %v8806_v55 = vmul.f32 %v8732_v9, %v2581_v44  ;;  %v8809_v23 = vmul.f32 %v8735_v43, %v2581_v44  ;;  %v8812_v48 = vmul.f32 %v8748_v40, %v2581_v44  ;;  %v8815_v62 = vmul.f32 %v8758_v30, %v2581_v44 }
 0x883   : > { %v8818_v21 = vmul.f32 %v8667_v35, %v2429_v36  ;;  %v8821_v56 = vmul.f32 %v8680_v45, %v2429_v36  ;;  %v8824_v3 = vmul.f32 %v8692_v46, %v2429_v36  ;;  %v8827_v47 = vmul.f32 %v8706_v5, %v2429_v36 }
 0x884   : > { %v2673_v61 = vpop.permute.xlu0 %2672  ;;  %12918 = vst [vmem:[#allocation117_spill] sm:$0xff] %v8812_v48  ;;  %12919 = vst [vmem:[#allocation60_spill] sm:$0xff] %v8815_v62  ;;  %v8830_v43 = vmul.f32 %v8719_v52, %v2429_v36  ;;  %v8833_v40 = vmul.f32 %v8722_v18, %v2429_v36  ;;  %v8835_v44 = vmul.f32 %v2458_v53, %v2429_v36 }
 0x885   : > { %12920 = vst [vmem:[#allocation61_spill] sm:$0xff] %v8818_v21  ;;  %12921 = vst [vmem:[#allocation76_spill] sm:$0xff] %v8821_v56  ;;  %v8837_v30 = vmul.f32 %v2462_v1, %v2429_v36  ;;  %v2715_v9 = vmul.f32 %v8677_v34, %v2673_v61  ;;  %v2716_v28 = vmul.f32 %v8689_v63, %v2673_v61 }
 0x886   : > { %12922 = vst [vmem:[#allocation86_spill] sm:$0xff] %v8824_v3  ;;  %12923 = vst [vmem:[#allocation168_spill] sm:$0xff] %v8827_v47  ;;  %v2717_v0 = vmul.f32 %v8703_v27, %v2673_v61  ;;  %v2718_v58 = vmul.f32 %v8715_v20, %v2673_v61  ;;  %v2719_v47 = vmul.f32 %v8738_v32, %v2673_v61 }
 0x887   : > { %v2493_v51 = vpop.permute.xlu1 %2492  ;;  %12924 = vst [vmem:[#allocation25_spill] sm:$0xff] %v8830_v43  ;;  %12925 = vst [vmem:[#allocation87_spill] sm:$0xff] %v8833_v40  ;;  %v2720_v43 = vmul.f32 %v8741_v25, %v2673_v61  ;;  %v2721_v3 = vmul.f32 %v8751_v10, %v2673_v61  ;;  %v2722_v40 = vmul.f32 %v8761_v12, %v2673_v61 }
 0x888   : > { %12926 = vst [vmem:[#allocation80_spill] sm:$0xff] %v8835_v44  ;;  %12927 = vst [vmem:[#allocation91_spill] sm:$0xff] %v8837_v30  ;;  %v2539_v36 = vmul.f32 %v8670_v29, %v2493_v51  ;;  %v2540_v30 = vmul.f32 %v8683_v22, %v2493_v51  ;;  %v2541_v34 = vmul.f32 %v8697_v49, %v2493_v51 }
 0x889   : > { %v2419_v2 = vpop.permute.xlu0 %2418  ;;  %v2542_v56 = vmul.f32 %v8709_v14, %v2493_v51  ;;  %v2543_v21 = vmul.f32 %v8725_v16, %v2493_v51  ;;  %v2544_v62 = vmul.f32 %v8729_v50, %v2493_v51 }
 0x88a   : > { %v2463_v27 = vmul.f32 %v8667_v35, %v2419_v2  ;;  %v2464_v20 = vmul.f32 %v8680_v45, %v2419_v2  ;;  %v2465_v32 = vmul.f32 %v8692_v46, %v2419_v2  ;;  %v2466_v25 = vmul.f32 %v8706_v5, %v2419_v2 }
 0x88b   : > { %v8850_v63 = vpop.permute.xlu1 %2496  ;;  %v2467_v10 = vmul.f32 %v8719_v52, %v2419_v2  ;;  %v2468_v61 = vmul.f32 %v8722_v18, %v2419_v2  ;;  %v2469_v12 = vmul.f32 %v2458_v53, %v2419_v2  ;;  %v2470_v44 = vmul.f32 %v2462_v1, %v2419_v2 }
 0x88c   : > { %v2545_v35 = vmul.f32 %v8745_v11, %v2493_v51  ;;  %v2546_v45 = vmul.f32 %v8755_v41, %v2493_v51  ;;  %v8863_v48 = vadd.f32 %v2539_v36, %v2471_v42  ;;  %v8865_v46 = vadd.f32 %v2540_v30, %v2472_v6 }
 0x88d   : > { %v8867_v5 = vadd.f32 %v2541_v34, %v2473_v13  ;;  %v2555_v52 = vadd.f32 %v8764_v39, %v2463_v27  ;;  %v2556_v2 = vadd.f32 %v8767_v37, %v2464_v20  ;;  %v2557_v18 = vadd.f32 %v8770_v17, %v2465_v32 }
 0x88e   : > { %v2558_v53 = vadd.f32 %v8773_v57, %v2466_v25  ;;  %v2559_v11 = vadd.f32 %v8776_v4, %v2467_v10  ;;  %v2560_v51 = vadd.f32 %v8779_v54, %v2468_v61  ;;  %v2561_v42 = vadd.f32 %v8782_v7, %v2469_v12  ;;  %v12928_v57 = vld [vmem:[#allocation117_spill] sm:$0xff] }
 0x88f   : > { %v2562_v30 = vadd.f32 %v8785_v33, %v2470_v44  ;;  %v8879_v34 = vadd.f32 %v2542_v56, %v2474_v31  ;;  %v8881_v6 = vadd.f32 %v2543_v21, %v2475_v60  ;;  %v8883_v27 = vadd.f32 %v2544_v62, %v2476_v26  ;;  %v2769_v31 = vpop.permute.xlu0 %2768 }
 0x890   : > { %v8873_v1 = vpop.permute.xlu1 %2584  ;;  %v8885_v20 = vadd.f32 %v2545_v35, %v2477_v24  ;;  %v8887_v32 = vadd.f32 %v2546_v45, %v2478_v8  ;;  %v2547_v25 = vmul.f32 %v8670_v29, %v8850_v63  ;;  %v2548_v10 = vmul.f32 %v8683_v22, %v8850_v63  ;;  %v12929_v22 = vld [vmem:[#allocation60_spill] sm:$0xff] }
 0x891   : > { %v2549_v12 = vmul.f32 %v8697_v49, %v8850_v63  ;;  %v2647_v56 = vadd.f32 %v8794_v38, %v2555_v52  ;;  %v2648_v21 = vadd.f32 %v8797_v19, %v2556_v2  ;;  %v2649_v62 = vadd.f32 %v8800_v59, %v2557_v18  ;;  %v12932_v52 = vld [vmem:[#allocation76_spill] sm:$0xff]  ;;  %v12933_v18 = vld [vmem:[#allocation86_spill] sm:$0xff] }
 0x892   : > { %v2650_v39 = vadd.f32 %v8803_v15, %v2558_v53  ;;  %v2651_v17 = vadd.f32 %v8806_v55, %v2559_v11  ;;  %v2652_v29 = vadd.f32 %v8809_v23, %v2560_v51  ;;  %v2653_v4 = vadd.f32 %v12928_v57, %v2561_v42  ;;  %v12934_v42 = vld [vmem:[#allocation168_spill] sm:$0xff]  ;;  %v12940_v57 = vld [vmem:[#allocation27_spill] sm:$0xff] }
 0x893   : > { %v2654_v54 = vadd.f32 %v12929_v22, %v2562_v30  ;;  %v2739_v7 = vadd.f32 %v2715_v9, %v2647_v56  ;;  %v2740_v49 = vadd.f32 %v2716_v28, %v2648_v21  ;;  %v2741_v33 = vadd.f32 %v2717_v0, %v2649_v62  ;;  %v12935_v56 = vld [vmem:[#allocation67_spill] sm:$0xff] }
 0x894   : > { %v8899_v37 = vpop.permute.xlu1 %2588  ;;  %v2742_v13 = vadd.f32 %v2718_v58, %v2650_v39  ;;  %v2743_v60 = vadd.f32 %v2719_v47, %v2651_v17  ;;  %v2744_v26 = vadd.f32 %v2720_v43, %v2652_v29  ;;  %v2745_v59 = vadd.f32 %v2721_v3, %v2653_v4  ;;  %v12930_v43 = vld [vmem:[#allocation116_spill] sm:$0xff]  ;;  %v12939_v17 = vld [vmem:[#allocation10_spill] sm:$0xff] }
 0x895   : > { %v2746_v24 = vadd.f32 %v2722_v40, %v2654_v54  ;;  %v2781_v15 = vadd.f32 %v2769_v31, %v2739_v7  ;;  %v2782_v8 = vadd.f32 %v2769_v31, %v2740_v49  ;;  %v2783_v38 = vadd.f32 %v2769_v31, %v2741_v33  ;;  %v12941_v54 = vld [vmem:[#allocation25_spill] sm:$0xff]  ;;  %v12942_v49 = vld [vmem:[#allocation87_spill] sm:$0xff] }
 0x896   : > { %v2784_v19 = vadd.f32 %v2769_v31, %v2742_v13  ;;  %v2550_v23 = vmul.f32 %v8709_v14, %v8850_v63  ;;  %v2551_v55 = vmul.f32 %v8725_v16, %v8850_v63  ;;  %v2785_v11 = vadd.f32 %v2769_v31, %v2743_v60  ;;  %v12931_v16 = vld [vmem:[#allocation61_spill] sm:$0xff]  ;;  %v12943_v13 = vld [vmem:[#allocation80_spill] sm:$0xff]  ;;  %v12944_v60 = vld [vmem:[#allocation91_spill] sm:$0xff] }
 0x897   : > { %v2786_v9 = vadd.f32 %v2769_v31, %v2744_v26  ;;  %v2787_v28 = vadd.f32 %v2769_v31, %v2745_v59  ;;  %v5876_v0 = vmul.f32 -1.442695, %v2781_v15  ;;  %v5877_v58 = vmul.f32 -1.442695, %v2782_v8  ;;  %v12945_v59 = vld [vmem:[#allocation28_spill] sm:$0xff]  ;;  %v12946_v15 = vld [vmem:[#allocation70_spill] sm:$0xff] }
 0x898   : > { %v5878_v44 = vmul.f32 -1.442695, %v2783_v38  ;;  %v2552_v3 = vmul.f32 %v8729_v50, %v8850_v63  ;;  %v2553_v40 = vmul.f32 %v12930_v43, %v8850_v63  ;;  %v2788_v36 = vadd.f32 %v2769_v31, %v2746_v24  ;;  %v12948_v43 = vld [vmem:[#allocation112_spill] sm:$0xff] }
 0x899   : > { %v8909_v47 = vpop.permute.xlu1 %2676  ;;  %v5879_v61 = vmul.f32 -1.442695, %v2784_v19  ;;  %v2554_v14 = vmul.f32 %v8755_v41, %v8850_v63  ;;  %v2571_v35 = vadd.f32 %v2547_v25, %v12931_v16  ;;  %6122 = vpow2.f32 %v5876_v0  ;;  %v12936_v63 = vld [vmem:[#allocation51_spill] sm:$0xff] }
 0x89a   : > { %v5880_v45 = vmul.f32 -1.442695, %v2785_v11  ;;  %v2572_v2 = vadd.f32 %v2548_v10, %v12932_v52  ;;  %v2573_v53 = vadd.f32 %v2549_v12, %v12933_v18  ;;  %6124 = vpow2.f32 %v5877_v58  ;;  %v12937_v25 = vld [vmem:[#allocation63_spill] sm:$0xff]  ;;  %v12938_v10 = vld [vmem:[#allocation57_spill] sm:$0xff] }
 0x89b   : > { %v5881_v51 = vmul.f32 -1.442695, %v2786_v9  ;;  %v2574_v50 = vadd.f32 %v2550_v23, %v12934_v42  ;;  %6126 = vpow2.f32 %v5878_v44  ;;  %v5882_v30 = vmul.f32 -1.442695, %v2787_v28  ;;  %v12952_v18 = vld [vmem:[#allocation39_spill] sm:$0xff] }
 0x89c   : > { %v2631_v21 = vmul.f32 %v12935_v56, %v8873_v1  ;;  %6128 = vpow2.f32 %v5879_v61  ;;  %v5883_v62 = vmul.f32 -1.442695, %v2788_v36  ;;  %v2632_v41 = vmul.f32 %v12936_v63, %v8873_v1  ;;  %v12949_v36 = vld [vmem:[#allocation124_spill] sm:$0xff] }
 0x89d   : > { %v2633_v39 = vmul.f32 %v12937_v25, %v8873_v1  ;;  %6130 = vpow2.f32 %v5880_v45  ;;  %v2634_v12 = vmul.f32 %v12938_v10, %v8873_v1  ;;  %v2635_v29 = vmul.f32 %v12939_v17, %v8873_v1  ;;  %v8933_v22 = vpop.permute.xlu1 %2680  ;;  %v12951_v45 = vld [vmem:[#allocation59_spill] sm:$0xff] }
 0x89e   : > { %v2636_v4 = vmul.f32 %v12940_v57, %v8873_v1  ;;  %v2575_v7 = vadd.f32 %v2551_v55, %v12941_v54  ;;  %v8937_v33 = vadd.f32 %v2552_v3, %v12942_v49  ;;  %v8940_v31 = vadd.f32 %v2553_v40, %v12943_v13 }
 0x89f   : > { %6132 = vpow2.f32 %v5881_v51  ;;  %v8943_v26 = vadd.f32 %v2554_v14, %v12944_v60  ;;  %v2637_v24 = vmul.f32 %v12945_v59, %v8873_v1  ;;  %v2638_v8 = vmul.f32 %v12946_v15, %v8873_v1 }
 0x8a0   : > { %6134 = vpow2.f32 %v5882_v30  ;;  %v2655_v38 = vadd.f32 %v2631_v21, %v8863_v48  ;;  %v2656_v19 = vadd.f32 %v2632_v41, %v8865_v46  ;;  %v2657_v23 = vadd.f32 %v2633_v39, %v8867_v5 }
 0x8a1   : > { %6136 = vpow2.f32 %v5883_v62  ;;  %v2658_v55 = vadd.f32 %v2634_v12, %v8879_v34  ;;  %v2659_v11 = vadd.f32 %v2635_v29, %v8881_v6  ;;  %v2660_v9 = vadd.f32 %v2636_v4, %v8883_v27  ;;  %v12947_v27 = vld [vmem:[#allocation62_spill] sm:$0xff] }
 0x8a2   : > { %v2639_v28 = vmul.f32 %v12935_v56, %v8899_v37  ;;  %v2640_v0 = vmul.f32 %v12936_v63, %v8899_v37  ;;  %v2641_v1 = vmul.f32 %v12937_v25, %v8899_v37  ;;  %v2642_v48 = vmul.f32 %v12938_v10, %v8899_v37  ;;  %v2774_v44 = vpop.permute.xlu1 %2773  ;;  %v12954_v25 = vld [vmem:[#allocation71_spill] sm:$0xff] }
 0x8a3   : > { %v2643_v46 = vmul.f32 %v12939_v17, %v8899_v37  ;;  %v2661_v5 = vadd.f32 %v2637_v24, %v8885_v20  ;;  %v2662_v34 = vadd.f32 %v2638_v8, %v8887_v32  ;;  %v8969_v6 = vmul.f32 %v12940_v57, %v8899_v37  ;;  %v12950_v32 = vld [vmem:[#allocation46_spill] sm:$0xff] }
 0x8a4   : > { %v2723_v58 = vmul.f32 %v12947_v27, %v8909_v47  ;;  %v8975_v3 = vmul.f32 %v12945_v59, %v8899_v37  ;;  %v2724_v40 = vmul.f32 %v12948_v43, %v8909_v47  ;;  %v2725_v20 = vmul.f32 %v12949_v36, %v8909_v47 }
 0x8a5   : > { %v2726_v61 = vmul.f32 %v12950_v32, %v8909_v47  ;;  %v8985_v14 = vmul.f32 %v12946_v15, %v8899_v37  ;;  %v8987_v16 = vadd.f32 %v2639_v28, %v2571_v35  ;;  %v2727_v52 = vmul.f32 %v12951_v45, %v8909_v47  ;;  %v12953_v35 = vld [vmem:[#allocation66_spill] sm:$0xff] }
 0x8a6   : > { %v2728_v51 = vmul.f32 %v12952_v18, %v8909_v47  ;;  %v6123_v42 = vpop.eup %6122  ;;  %v8993_v30 = vadd.f32 %v2640_v0, %v2572_v2  ;;  %v8995_v56 = vadd.f32 %v2641_v1, %v2573_v53  ;;  %v8997_v21 = vadd.f32 %v2642_v48, %v2574_v50 }
 0x8a7   : > { %v8999_v62 = vadd.f32 %v2643_v46, %v2575_v7  ;;  %v6125_v63 = vpop.eup %6124  ;;  %v2829_v37 = vadd.f32 1.0, %v6123_v42  ;;  %v2729_v41 = vmul.f32 %v12953_v35, %v8909_v47  ;;  %v2730_v39 = vmul.f32 %v12954_v25, %v8909_v47  ;;  %v9005_v7 = vpop.permute.xlu1 %2778 }
 0x8a8   : > { %v2747_v10 = vadd.f32 %v2723_v58, %v2655_v38  ;;  %v6127_v12 = vpop.eup %6126  ;;  %v2830_v17 = vadd.f32 1.0, %v6125_v63  ;;  %v2748_v29 = vadd.f32 %v2724_v40, %v2656_v19  ;;  %v2749_v2 = vadd.f32 %v2725_v20, %v2657_v23 }
 0x8a9   : > { %v2750_v57 = vadd.f32 %v2726_v61, %v2658_v55  ;;  %v6129_v53 = vpop.eup %6128  ;;  %v2831_v4 = vadd.f32 1.0, %v6127_v12  ;;  %6138 = vrcp.f32 %v2829_v37  ;;  %v2751_v50 = vadd.f32 %v2727_v52, %v2659_v11 }
 0x8aa   : > { %v2752_v54 = vadd.f32 %v2728_v51, %v2660_v9  ;;  %v6131_v49 = vpop.eup %6130  ;;  %v2832_v13 = vadd.f32 1.0, %v6129_v53  ;;  %6140 = vrcp.f32 %v2830_v17  ;;  %v2789_v60 = vadd.f32 %v2774_v44, %v2747_v10 }
 0x8ab   : > { %v2790_v59 = vadd.f32 %v2774_v44, %v2748_v29  ;;  %v2833_v47 = vadd.f32 1.0, %v6131_v49  ;;  %6142 = vrcp.f32 %v2831_v4  ;;  %v2753_v15 = vadd.f32 %v2729_v41, %v2661_v5  ;;  %v9009_v20 = vpop.permute.xlu1 %2956  ;;  %v9035_v29 = vld [vmem:[#allocation2 + $0x58] sm:$0xff] }
 0x8ac   : > { %v6133_v24 = vpop.eup %6132  ;;  %v2791_v8 = vadd.f32 %v2774_v44, %v2749_v2  ;;  %6144 = vrcp.f32 %v2832_v13  ;;  %v2754_v23 = vadd.f32 %v2730_v39, %v2662_v34  ;;  %v2792_v55 = vadd.f32 %v2774_v44, %v2750_v57  ;;  %12955 = vst [vmem:[#allocation136_spill] sm:$0xff] %v9009_v20 }
 0x8ad   : > { %v6135_v38 = vpop.eup %6134  ;;  %v2834_v19 = vadd.f32 1.0, %v6133_v24  ;;  %6146 = vrcp.f32 %v2833_v47  ;;  %v2793_v9 = vadd.f32 %v2774_v44, %v2751_v50  ;;  %v2794_v0 = vadd.f32 %v2774_v44, %v2752_v54 }
 0x8ae   : > { %v6137_v28 = vpop.eup %6136  ;;  %v2835_v11 = vadd.f32 1.0, %v6135_v38  ;;  %v5884_v48 = vmul.f32 -1.442695, %v2789_v60  ;;  %v5885_v46 = vmul.f32 -1.442695, %v2790_v59  ;;  %v2731_v58 = vmul.f32 %v12947_v27, %v8933_v22 }
 0x8af   : > { %v2836_v1 = vadd.f32 1.0, %v6137_v28  ;;  %6148 = vrcp.f32 %v2834_v19  ;;  %v2795_v5 = vadd.f32 %v2774_v44, %v2753_v15  ;;  %v5886_v40 = vmul.f32 -1.442695, %v2791_v8 }
 0x8b0   : > { %6150 = vrcp.f32 %v2835_v11  ;;  %v2732_v34 = vmul.f32 %v12948_v43, %v8933_v22  ;;  %v2796_v61 = vadd.f32 %v2774_v44, %v2754_v23  ;;  %v5887_v52 = vmul.f32 -1.442695, %v2792_v55 }
 0x8b1   : > { %6152 = vrcp.f32 %v2836_v1  ;;  %v2668_v51 = vadd.f32 %v8969_v6, %v8937_v33  ;;  %v2733_v42 = vmul.f32 %v12949_v36, %v8933_v22  ;;  %v5888_v63 = vmul.f32 -1.442695, %v2793_v9  ;;  %v9024_v6 = vpop.permute.xlu1 %2970 }
 0x8b2   : > { %6154 = vpow2.f32 %v5884_v48  ;;  %v2734_v27 = vmul.f32 %v12950_v32, %v8933_v22  ;;  %v2735_v37 = vmul.f32 %v12951_v45, %v8933_v22  ;;  %v5889_v41 = vmul.f32 -1.442695, %v2794_v0 }
 0x8b3   : > { %6156 = vpow2.f32 %v5885_v46  ;;  %v2736_v44 = vmul.f32 %v12952_v18, %v8933_v22  ;;  %v5890_v43 = vmul.f32 -1.442695, %v2795_v5  ;;  %v2755_v33 = vadd.f32 %v2731_v58, %v8987_v16 }
 0x8b4   : > { %6158 = vpow2.f32 %v5886_v40  ;;  %v2737_v36 = vmul.f32 %v12953_v35, %v8933_v22  ;;  %v5891_v39 = vmul.f32 -1.442695, %v2796_v61  ;;  %v2756_v32 = vadd.f32 %v2732_v34, %v8993_v30 }
 0x8b5   : > { %6160 = vpow2.f32 %v5887_v52  ;;  %v2738_v45 = vmul.f32 %v12954_v25, %v8933_v22  ;;  %v2757_v10 = vadd.f32 %v2733_v42, %v8995_v56  ;;  %v2797_v18 = vadd.f32 %v9005_v7, %v2755_v33 }
 0x8b6   : > { %6162 = vpow2.f32 %v5888_v63  ;;  %v6139_v12 = vpop.eup %6138  ;;  %v2758_v16 = vadd.f32 %v2734_v27, %v8997_v21  ;;  %v2798_v17 = vadd.f32 %v9005_v7, %v2756_v32  ;;  %v9039_v35 = vmul.f32 %v9035_v29, %v9024_v6 }
 0x8b7   : > { %6164 = vpow2.f32 %v5889_v41  ;;  %v6141_v30 = vpop.eup %6140  ;;  %v2669_v22 = vadd.f32 %v8975_v3, %v8940_v31  ;;  %v2759_v56 = vadd.f32 %v2735_v37, %v8999_v62  ;;  %v2799_v25 = vadd.f32 %v9005_v7, %v2757_v10 }
 0x8b8   : > { %6166 = vpow2.f32 %v5890_v43  ;;  %v6143_v2 = vpop.eup %6142  ;;  %v2670_v21 = vadd.f32 %v8985_v14, %v8943_v26  ;;  %v2760_v57 = vadd.f32 %v2736_v44, %v2668_v51  ;;  %v2800_v53 = vadd.f32 %v9005_v7, %v2758_v16  ;;  %2979 = vrot.lane.b32.xlu1 %v9039_v35, %s6430_s25 }
 0x8b9   : > { %6168 = vpow2.f32 %v5891_v39  ;;  %v6145_v4 = vpop.eup %6144  ;;  %v2761_v50 = vadd.f32 %v2737_v36, %v2669_v22  ;;  %v2801_v31 = vadd.f32 %v9005_v7, %v2759_v56 }
 0x8ba   : > { %6170 = vtanh.f32 %v2797_v18  ;;  %v6147_v3 = vpop.eup %6146  ;;  %v2762_v62 = vadd.f32 %v2738_v45, %v2670_v21  ;;  %v2802_v54 = vadd.f32 %v9005_v7, %v2760_v57 }
 0x8bb   : > { %6172 = vtanh.f32 %v2798_v17  ;;  %v2803_v26 = vadd.f32 %v9005_v7, %v2761_v50 }
 0x8bc   : > { %v6149_v49 = vpop.eup %6148  ;;  %6174 = vtanh.f32 %v2799_v25  ;;  %v2804_v13 = vadd.f32 %v9005_v7, %v2762_v62 }
 0x8bd   : > { %v6151_v14 = vpop.eup %6150  ;;  %6176 = vtanh.f32 %v2800_v53 }
 0x8be   : > { %v6153_v60 = vpop.eup %6152  ;;  %6178 = vtanh.f32 %v2801_v31 }
 0x8bf   : > { %v6155_v59 = vpop.eup %6154  ;;  %6180 = vtanh.f32 %v2802_v54 }
 0x8c0   : > { %v6157_v24 = vpop.eup %6156  ;;  %v2877_v47 = vadd.f32 1.0, %v6155_v59  ;;  %6182 = vtanh.f32 %v2803_v26  ;;  %v9074_v59 = vpop.permute.xlu0 %2963 }
 0x8c1   : > { %v6159_v15 = vpop.eup %6158  ;;  %v2878_v8 = vadd.f32 1.0, %v6157_v24  ;;  %6184 = vtanh.f32 %v2804_v13  ;;  %v12956_v13 = vld [vmem:[#allocation44_spill] sm:$0xff]  ;;  %12958 = vst [vmem:[#allocation133_spill] sm:$0xff] %v9074_v59 }
 0x8c2   : > { %v6161_v38 = vpop.eup %6160  ;;  %v2879_v19 = vadd.f32 1.0, %v6159_v15  ;;  %6186 = vrcp.f32 %v2877_v47 }
 0x8c3   : > { %v6163_v23 = vpop.eup %6162  ;;  %v2880_v55 = vadd.f32 1.0, %v6161_v38  ;;  %6188 = vrcp.f32 %v2878_v8 }
 0x8c4   : > { %v6165_v28 = vpop.eup %6164  ;;  %v2881_v11 = vadd.f32 1.0, %v6163_v23  ;;  %6190 = vrcp.f32 %v2879_v19  ;;  %v12960_v19 = vmov 11  }
 0x8c5   : > { %v6167_v7 = vpop.eup %6166  ;;  %v2882_v9 = vadd.f32 1.0, %v6165_v28  ;;  %6192 = vrcp.f32 %v2880_v55 }
 0x8c6   : > { %v6169_v0 = vpop.eup %6168  ;;  %v2883_v1 = vadd.f32 1.0, %v6167_v7  ;;  %6194 = vrcp.f32 %v2881_v11  ;;  %v12965_v7 = vld [vmem:[#allocation17_spill] sm:$0xff] }
 0x8c7   : > { %v6171_v48 = vpop.eup %6170  ;;  %v2884_v46 = vadd.f32 1.0, %v6169_v0  ;;  %6196 = vrcp.f32 %v2882_v9  ;;  %v12966_v0 = vld [vmem:[#allocation12_spill] sm:$0xff] }
 0x8c8   : > { %v6173_v58 = vpop.eup %6172  ;;  %6198 = vrcp.f32 %v2883_v1  ;;  %v2909_v5 = vmul.f32 %v6171_v48, %v6139_v12  ;;  %v9106_v1 = vmul.f32 %v9035_v29, %v12966_v0 }
 0x8c9   : > { %v6175_v40 = vpop.eup %6174  ;;  %6200 = vrcp.f32 %v2884_v46  ;;  %v2910_v34 = vmul.f32 %v6173_v58, %v6141_v30 }
 0x8ca   : > { %v6177_v61 = vpop.eup %6176  ;;  %v2911_v52 = vmul.f32 %v6175_v40, %v6143_v2  ;;  %6202 = vtanh.f32 %v2909_v5  ;;  %v12967_v5 = vld [vmem:[#allocation16_spill] sm:$0xff] }
 0x8cb   : > { %v6179_v51 = vpop.eup %6178  ;;  %v2912_v42 = vmul.f32 %v6177_v61, %v6145_v4  ;;  %6204 = vtanh.f32 %v2910_v34  ;;  %v12968_v61 = vmov 3  }
 0x8cc   : > { %v6181_v63 = vpop.eup %6180  ;;  %v2913_v27 = vmul.f32 %v6179_v51, %v6147_v3  ;;  %6206 = vtanh.f32 %v2911_v52 }
 0x8cd   : > { %v6183_v37 = vpop.eup %6182  ;;  %v2914_v41 = vmul.f32 %v6181_v63, %v6149_v49  ;;  %6208 = vtanh.f32 %v2912_v42 }
 0x8ce   : > { %v6185_v44 = vpop.eup %6184  ;;  %v2915_v43 = vmul.f32 %v6183_v37, %v6151_v14  ;;  %6210 = vtanh.f32 %v2913_v27  ;;  %v12970_v37 = vmov 12  }
 0x8cf   : > { %v6187_v33 = vpop.eup %6186  ;;  %v2916_v36 = vmul.f32 %v6185_v44, %v6153_v60  ;;  %6212 = vtanh.f32 %v2914_v41  ;;  %v12957_v60 = vmov 13   ;;  %v12972_v44 = vld [vmem:[#allocation19_spill] sm:$0xff] }
 0x8d0   : > { %v6189_v39 = vpop.eup %6188  ;;  %6214 = vtanh.f32 %v2915_v43 }
 0x8d1   : > { %v6191_v32 = vpop.eup %6190  ;;  %6216 = vtanh.f32 %v2916_v36 }
 0x8d2   : > { %v6193_v45 = vpop.eup %6192 }
 0x8d3   : > { %v6195_v10 = vpop.eup %6194 }
 0x8d4   : > { %v6197_v18 = vpop.eup %6196 }
 0x8d5   : > { %v6199_v12 = vpop.eup %6198 }
 0x8d6   : > { %v6201_v16 = vpop.eup %6200 }
 0x8d7   : > { %v6203_v17 = vpop.eup %6202 }
 0x8d8   : > { %v6205_v30 = vpop.eup %6204  ;;  %v9054_v22 = vmul.f32 %v6203_v17, %v6187_v33  ;;  %v12973_v33 = vld [vmem:[#allocation13_spill] sm:$0xff] }
 0x8d9   : > { %v6207_v56 = vpop.eup %6206  ;;  %v9056_v25 = vmul.f32 %v6205_v30, %v6189_v39  ;;  %v9146_v36 = vmul.f32 %v9035_v29, %v12973_v33 }
 0x8da   : > { %v6209_v2 = vpop.eup %6208  ;;  %v9058_v21 = vmul.f32 %v6207_v56, %v6191_v32  ;;  %2933 = vst [vmem:[#allocation2 + $0x8] sm:$0xff] %v9054_v22  ;;  %v2974_v57 = vmul.f32 %v9024_v6, %v9054_v22  ;;  %v3018_v9 = vmul.f32 %v9054_v22, %v12965_v7  ;;  %v3069_v43 = vmul.f32 %v9054_v22, %v12972_v44 }
 0x8db   : > { %v6211_v53 = vpop.eup %6210  ;;  %v9063_v4 = vmul.f32 %v6209_v2, %v6193_v45  ;;  %2934 = vst [vmem:[#allocation2 + $0x18] sm:$0xff] %v9056_v25  ;;  %v2975_v50 = vmul.f32 %v9024_v6, %v9056_v25  ;;  %v3019_v40 = vmul.f32 %v12967_v5, %v9056_v25 }
 0x8dc   : > { %v6213_v31 = vpop.eup %6212  ;;  %v2929_v3 = vmul.f32 %v6211_v53, %v6195_v10  ;;  %2935 = vst [vmem:[#allocation2 + $0x40] sm:$0xff] %v9058_v21  ;;  %2981 = vrot.lane.b32.xlu0 %v2974_v57, %s6430_s25  ;;  %v12974_v10 = vld [vmem:[#allocation18_spill] sm:$0xff]  ;;  %v12977_v53 = vmov 14  }
 0x8dd   : > { %v6215_v62 = vpop.eup %6214  ;;  %v2930_v54 = vmul.f32 %v6213_v31, %v6197_v18  ;;  %2936 = vst [vmem:[#allocation2 + $0x78] sm:$0xff] %v9063_v4  ;;  %2983 = vrot.lane.b32.xlu1 %v2975_v50, %s6430_s25  ;;  %v3070_v18 = vmul.f32 %v12974_v10, %v9056_v25 }
 0x8de   : > { %v6217_v49 = vpop.eup %6216  ;;  %v2931_v26 = vmul.f32 %v6215_v62, %v6199_v12  ;;  %2937 = vst [vmem:[#allocation2 + $0x48] sm:$0xff] %v2929_v3 }
 0x8df   : > { %v2932_v14 = vmul.f32 %v6217_v49, %v6201_v16  ;;  %2938 = vst [vmem:[#allocation2 + $0x68] sm:$0xff] %v2930_v54  ;;  %v12975_v16 = vmov 4   ;;  %v12979_v54 = vmov 5   ;;  %v9195_v49 = vld [vmem:[%s12000_s5] sm:$0xff] }
 0x8e0   : > { %2939 = vst [vmem:[#allocation2 + $0x70] sm:$0xff] %v2931_v26  ;;  %2994 = vperm.xlu0 %6072, %v12956_v13   ;;  %v12980_v26 = vmov 19  }
 0x8e1   : > { %2940 = vst [vmem:[#allocation2 + $0x38] sm:$0xff] %v2932_v14 }
 0x8e4   : > { %6078 = vset.pattern.permute.xlu0 %v12957_v60 }
 0x92a   : > { %v9094_v23 = vpop.permute.xlu1 %2979 }
 0x92b   : > { %12961 = vst [vmem:[#allocation169_spill] sm:$0xff] %v9094_v23 }
 0x94e   : > { %v9076_v24 = vpop.permute.xlu0 %2981 }
 0x94f   : > { %12959 = vst [vmem:[#allocation92_spill] sm:$0xff] %v9076_v24  ;;  %v9096_v55 = vpop.permute.xlu1 %2983 }
 0x950   : > { %12962 = vst [vmem:[#allocation144_spill] sm:$0xff] %v9096_v55 }
 0x95b   : > { %v9078_v47 = vpop.permute.xlu0 %2994 }
 0x95c   : > { %v2999_v15 = vmul.f32 %v9078_v47, %v9056_v25  ;;  %v9084_v8 = vmul.f32 %v9035_v29, %v9078_v47  ;;  %v2998_v38 = vmul.f32 %v9078_v47, %v9054_v22 }
 0x95e   : > { %3007 = vrot.lane.b32.xlu0 %v2999_v15, %s6430_s25  ;;  %3003 = vrot.lane.b32.xlu1 %v9084_v8, %s6430_s25 }
 0x962   : > { %3005 = vrot.lane.b32.xlu1 %v2998_v38, %s6430_s25 }
 0x966   : > { %3021 = vperm.xlu1 %6073, %v12956_v13  }
 0x96a   : > { %6074 = vset.pattern.permute.xlu1 %v12960_v19 }
 0x9d0   : > { %v9098_v28 = vpop.permute.xlu1 %3003  ;;  %v9199_v14 = vpop.permute.xlu0 %3007 }
 0x9d1   : > { %12963 = vst [vmem:[#allocation145_spill] sm:$0xff] %v9098_v28  ;;  %12981 = vst [vmem:[#allocation100_spill] sm:$0xff] %v9199_v14  ;;  %v13020_v28 = vld [vmem:[#allocation49_spill] sm:$0xff] }
 0x9d4   : > { %v9100_v11 = vpop.permute.xlu1 %3005 }
 0x9d5   : > { %12964 = vst [vmem:[#allocation96_spill] sm:$0xff] %v9100_v11 }
 0x9e1   : > { %v9108_v48 = vpop.permute.xlu1 %3021 }
 0x9e2   : > { %v3025_v46 = vmul.f32 %v9108_v48, %v3018_v9  ;;  %v9113_v58 = vmul.f32 %v9108_v48, %v9106_v1  ;;  %v3026_v34 = vmul.f32 %v9108_v48, %v3019_v40 }
 0x9e4   : > { %3032 = vrot.lane.b32.xlu1 %v3025_v46, %s6444_s29  ;;  %3030 = vrot.lane.b32.xlu0 %v9113_v58, %s6444_s29 }
 0x9e8   : > { %3045 = vperm.xlu1 %6074, %v12956_v13   ;;  %3034 = vrot.lane.b32.xlu0 %v3026_v34, %s6444_s29 }
 0x9ec   : > { %6075 = vset.pattern.permute.xlu1 %v12968_v61 }
 0xa56   : > { %v9124_v52 = vpop.permute.xlu1 %3032  ;;  %v9201_v60 = vpop.permute.xlu0 %3030 }
 0xa57   : > { %12969 = vst [vmem:[#allocation83_spill] sm:$0xff] %v9124_v52  ;;  %12982 = vst [vmem:[#allocation102_spill] sm:$0xff] %v9201_v60 }
 0xa5a   : > { %v9203_v15 = vpop.permute.xlu0 %3034 }
 0xa5b   : > { %12983 = vst [vmem:[#allocation103_spill] sm:$0xff] %v9203_v15 }
 0xa63   : > { %v9126_v51 = vpop.permute.xlu1 %3045 }
 0xa64   : > { %v3049_v42 = vmul.f32 %v9126_v51, %v3018_v9  ;;  %v9131_v63 = vmul.f32 %v9126_v51, %v9106_v1  ;;  %v3050_v27 = vmul.f32 %v9126_v51, %v3019_v40 }
 0xa66   : > { %3056 = vrot.lane.b32.xlu1 %v3049_v42, %s6444_s29  ;;  %3054 = vrot.lane.b32.xlu0 %v9131_v63, %s6444_s29 }
 0xa6a   : > { %3072 = vperm.xlu1 %6075, %v12956_v13   ;;  %3058 = vrot.lane.b32.xlu0 %v3050_v27, %s6444_s29 }
 0xa6e   : > { %6076 = vset.pattern.permute.xlu1 %v12970_v37  ;;  %v12991_v37 = vld [vmem:[#allocation20_spill] sm:$0xff] }
 0xad8   : > { %v9140_v41 = vpop.permute.xlu1 %3056  ;;  %v9205_v38 = vpop.permute.xlu0 %3054 }
 0xad9   : > { %12971 = vst [vmem:[#allocation155_spill] sm:$0xff] %v9140_v41  ;;  %12984 = vst [vmem:[#allocation147_spill] sm:$0xff] %v9205_v38  ;;  %v13017_v41 = vld [vmem:[#allocation52_spill] sm:$0xff] }
 0xada   : > { %v3311_v15 = vmul.f32 %v9056_v25, %v13017_v41 }
 0xae5   : > { %v9148_v39 = vpop.permute.xlu1 %3072 }
 0xae6   : > { %v3076_v32 = vmul.f32 %v9148_v39, %v3069_v43  ;;  %v9153_v45 = vmul.f32 %v9148_v39, %v9146_v36  ;;  %v3077_v12 = vmul.f32 %v9148_v39, %v3070_v18 }
 0xae8   : > { %3083 = vrot.lane.b32.xlu1 %v3076_v32, %s6445_s30  ;;  %3081 = vrot.lane.b32.xlu0 %v9153_v45, %s6445_s30 }
 0xaec   : > { %3096 = vperm.xlu1 %6076, %v12956_v13   ;;  %3085 = vrot.lane.b32.xlu0 %v3077_v12, %s6445_s30 }
 0xaf0   : > { %6077 = vset.pattern.permute.xlu1 %v12975_v16 }
 0xb5a   : > { %v9164_v17 = vpop.permute.xlu1 %3083 }
 0xb5b   : > { %12976 = vst [vmem:[#allocation152_spill] sm:$0xff] %v9164_v17 }
 0xb67   : > { %v9166_v30 = vpop.permute.xlu1 %3096 }
 0xb68   : > { %v3100_v56 = vmul.f32 %v9166_v30, %v3069_v43  ;;  %v9171_v2 = vmul.f32 %v9166_v30, %v9146_v36  ;;  %v3101_v57 = vmul.f32 %v9166_v30, %v3070_v18  ;;  %v9226_v43 = vmul.f32 %v9035_v29, %v12991_v37 }
 0xb6a   : > { %3107 = vrot.lane.b32.xlu1 %v3100_v56, %s6445_s30  ;;  %3105 = vrot.lane.b32.xlu0 %v9171_v2, %s6445_s30  ;;  %v12992_v56 = vld [vmem:[#allocation15_spill] sm:$0xff] }
 0xb6e   : > { %3120 = vperm.xlu1 %6077, %v12956_v13   ;;  %3109 = vrot.lane.b32.xlu0 %v3101_v57, %s6445_s30  ;;  %v3160_v57 = vmul.f32 %v12992_v56, %v9054_v22 }
 0xb72   : > { %6080 = vset.pattern.permute.xlu1 %v12977_v53 }
 0xbdc   : > { %v9180_v50 = vpop.permute.xlu1 %3107 }
 0xbdd   : > { %12978 = vst [vmem:[#allocation135_spill] sm:$0xff] %v9180_v50  ;;  %v13007_v50 = vmov 7  }
 0xbe9   : > { %v9182_v31 = vpop.permute.xlu1 %3120 }
 0xbea   : > { %v3124_v3 = vmul.f32 %v9182_v31, %v9056_v25  ;;  %v3123_v62 = vmul.f32 %v9182_v31, %v9054_v22 }
 0xbec   : > { %3129 = vrot.lane.b32.xlu1 %v3124_v3, %s6426_s20  ;;  %3127 = vrot.lane.b32.xlu0 %v3123_v62, %s6426_s20  ;;  %v12994_v3 = vld [vmem:[#allocation21_spill] sm:$0xff] }
 0xbed   : > { %v3161_v62 = vmul.f32 %v9056_v25, %v12994_v3 }
 0xbf0   : > { %3139 = vperm.xlu0 %6078, %v12956_v13   ;;  %v9207_v13 = vpop.permute.xlu0 %3058 }
 0xbf1   : > { %12985 = vst [vmem:[#allocation107_spill] sm:$0xff] %v9207_v13 }
 0xbf4   : > { %6079 = vset.pattern.permute.xlu0 %v12979_v54  ;;  %v9209_v19 = vpop.permute.xlu0 %3081 }
 0xbf5   : > { %3164 = vperm.xlu0 %6079, %v9195_v49   ;;  %12986 = vst [vmem:[#allocation119_spill] sm:$0xff] %v9209_v19 }
 0xbf8   : > { %v9211_v9 = vpop.permute.xlu0 %3085 }
 0xbf9   : > { %6088 = vset.pattern.permute.xlu0 %v12980_v26  ;;  %12987 = vst [vmem:[#allocation154_spill] sm:$0xff] %v9211_v9 }
 0xbfc   : > { %v9213_v46 = vpop.permute.xlu0 %3105 }
 0xbfd   : > { %12988 = vst [vmem:[#allocation163_spill] sm:$0xff] %v9213_v46  ;;  %v13006_v46 = vld [vmem:[#allocation22_spill] sm:$0xff] }
 0xc00   : > { %v9215_v40 = vpop.permute.xlu0 %3109 }
 0xc01   : > { %12989 = vst [vmem:[#allocation120_spill] sm:$0xff] %v9215_v40 }
 0xc5e   : > { %v9217_v34 = vpop.permute.xlu0 %3127 }
 0xc5f   : > { %12990 = vst [vmem:[#allocation122_spill] sm:$0xff] %v9217_v34 }
 0xc6b   : > { %v9219_v42 = vpop.permute.xlu0 %3139 }
 0xc6c   : > { %v3142_v27 = vmul.f32 %v9219_v42, %v9054_v22  ;;  %v3143_v18 = vmul.f32 %v9219_v42, %v9056_v25 }
 0xc6e   : > { %3146 = vrot.lane.b32.xlu1 %v3142_v27, %s6426_s20  ;;  %v12995_v27 = vmov 6  }
 0xc70   : > { %v9228_v32 = vpop.permute.xlu0 %3164 }
 0xc71   : > { %v9234_v12 = vmul.f32 %v9228_v32, %v9226_v43  ;;  %v3167_v53 = vmul.f32 %v9228_v32, %v3160_v57  ;;  %v3168_v26 = vmul.f32 %v9228_v32, %v3161_v62 }
 0xc72   : > { %3148 = vrot.lane.b32.xlu1 %v3143_v18, %s6426_s20  ;;  %v9249_v18 = vpop.permute.xlu1 %3129 }
 0xc73   : > { %3177 = vrot.lane.b32.xlu0 %v9234_v12, %s12993_s11  ;;  %12996 = vst [vmem:[#allocation162_spill] sm:$0xff] %v9249_v18 }
 0xc76   : > { %3173 = vrot.lane.b32.xlu1 %v3167_v53, %s12993_s11 }
 0xc7a   : > { %3175 = vrot.lane.b32.xlu1 %v3168_v26, %s12993_s11 }
 0xc7e   : > { %3188 = vperm.xlu1 %6080, %v9195_v49  }
 0xc82   : > { %6081 = vset.pattern.permute.xlu1 %v12995_v27 }
 0xce0   : > { %v9251_v54 = vpop.permute.xlu1 %3146 }
 0xce1   : > { %12997 = vst [vmem:[#allocation38_spill] sm:$0xff] %v9251_v54 }
 0xce4   : > { %v9253_v16 = vpop.permute.xlu1 %3148 }
 0xce5   : > { %12998 = vst [vmem:[#allocation111_spill] sm:$0xff] %v9253_v16 }
 0xce8   : > { %v9255_v61 = vpop.permute.xlu1 %3173 }
 0xce9   : > { %12999 = vst [vmem:[#allocation123_spill] sm:$0xff] %v9255_v61  ;;  %v13001_v61 = vmov 15  }
 0xcec   : > { %v9257_v53 = vpop.permute.xlu1 %3175 }
 0xced   : > { %13000 = vst [vmem:[#allocation126_spill] sm:$0xff] %v9257_v53 }
 0xcf9   : > { %v9259_v34 = vpop.permute.xlu1 %3188 }
 0xcfa   : > { %v3192_v40 = vmul.f32 %v9259_v34, %v3161_v62  ;;  %v3191_v26 = vmul.f32 %v9259_v34, %v3160_v57  ;;  %v9267_v27 = vmul.f32 %v9259_v34, %v9226_v43  ;;  %v13003_v62 = vld [vmem:[#allocation23_spill] sm:$0xff] }
 0xcfb   : > { %v3212_v57 = vmul.f32 %v9056_v25, %v13003_v62 }
 0xcfc   : > { %3199 = vrot.lane.b32.xlu1 %v3192_v40, %s12993_s11  ;;  %3197 = vrot.lane.b32.xlu0 %v3191_v26, %s12993_s11  ;;  %v13004_v40 = vld [vmem:[#allocation14_spill] sm:$0xff] }
 0xcfd   : > { %v3211_v54 = vmul.f32 %v13004_v40, %v9054_v22 }
 0xd00   : > { %3215 = vperm.xlu1 %6081, %v9195_v49   ;;  %3201 = vrot.lane.b32.xlu0 %v9267_v27, %s12993_s11 }
 0xd04   : > { %6082 = vset.pattern.permute.xlu1 %v13001_v61  ;;  %v9287_v61 = vmul.f32 %v9035_v29, %v13006_v46 }
 0xd6e   : > { %v9273_v53 = vpop.permute.xlu1 %3199 }
 0xd6f   : > { %13002 = vst [vmem:[#allocation26_spill] sm:$0xff] %v9273_v53 }
 0xd7b   : > { %v9279_v26 = vpop.permute.xlu1 %3215 }
 0xd7c   : > { %v3219_v16 = vmul.f32 %v9279_v26, %v3212_v57  ;;  %v3218_v18 = vmul.f32 %v9279_v26, %v3211_v54  ;;  %v9291_v53 = vmul.f32 %v9279_v26, %v9287_v61 }
 0xd7e   : > { %3226 = vrot.lane.b32.xlu1 %v3219_v16, %s13005_s12  ;;  %3224 = vrot.lane.b32.xlu0 %v3218_v18, %s13005_s12 }
 0xd82   : > { %3239 = vperm.xlu1 %6082, %v9195_v49   ;;  %3228 = vrot.lane.b32.xlu0 %v9291_v53, %s13005_s12 }
 0xd86   : > { %6083 = vset.pattern.permute.xlu1 %v13007_v50  ;;  %v13009_v50 = vmov 16  }
 0xdf0   : > { %v9297_v9 = vpop.permute.xlu1 %3226 }
 0xdf1   : > { %13008 = vst [vmem:[#allocation34_spill] sm:$0xff] %v9297_v9 }
 0xdfd   : > { %v9299_v16 = vpop.permute.xlu1 %3239 }
 0xdfe   : > { %v3243_v18 = vmul.f32 %v9299_v16, %v3212_v57  ;;  %v3242_v19 = vmul.f32 %v9299_v16, %v3211_v54  ;;  %v9307_v17 = vmul.f32 %v9299_v16, %v9287_v61 }
 0xe00   : > { %3250 = vrot.lane.b32.xlu1 %v3243_v18, %s13005_s12  ;;  %3248 = vrot.lane.b32.xlu0 %v3242_v19, %s13005_s12 }
 0xe04   : > { %3263 = vperm.xlu1 %6083, %v9195_v49   ;;  %3252 = vrot.lane.b32.xlu0 %v9307_v17, %s13005_s12 }
 0xe08   : > { %6084 = vset.pattern.permute.xlu1 %v13009_v50  ;;  %v13012_v50 = vmov 8  }
 0xe72   : > { %v9313_v9 = vpop.permute.xlu1 %3250 }
 0xe73   : > { %13010 = vst [vmem:[#allocation115_spill] sm:$0xff] %v9313_v9 }
 0xe7f   : > { %v9315_v57 = vpop.permute.xlu1 %3263 }
 0xe80   : > { %v3267_v54 = vmul.f32 %v9315_v57, %v9056_v25  ;;  %v3266_v19 = vmul.f32 %v9315_v57, %v9054_v22  ;;  %v9325_v18 = vmul.f32 %v9035_v29, %v9315_v57 }
 0xe82   : > { %3274 = vrot.lane.b32.xlu1 %v3267_v54, %s13011_s28  ;;  %3272 = vrot.lane.b32.xlu0 %v3266_v19, %s13011_s28 }
 0xe86   : > { %3287 = vperm.xlu1 %6084, %v9195_v49   ;;  %3276 = vrot.lane.b32.xlu0 %v9325_v18, %s13011_s28 }
 0xe8a   : > { %6085 = vset.pattern.permute.xlu1 %v13012_v50  ;;  %v13015_v50 = vmov 17  }
 0xef4   : > { %v9331_v9 = vpop.permute.xlu1 %3274 }
 0xef5   : > { %13013 = vst [vmem:[#allocation127_spill] sm:$0xff] %v9331_v9 }
 0xf01   : > { %v9333_v13 = vpop.permute.xlu1 %3287 }
 0xf02   : > { %v3291_v54 = vmul.f32 %v9333_v13, %v9056_v25  ;;  %v3290_v19 = vmul.f32 %v9333_v13, %v9054_v22  ;;  %v9343_v38 = vmul.f32 %v9035_v29, %v9333_v13 }
 0xf04   : > { %3298 = vrot.lane.b32.xlu1 %v3291_v54, %s13011_s28  ;;  %3296 = vrot.lane.b32.xlu0 %v3290_v19, %s13011_s28  ;;  %13014 = vst [vmem:[#allocation69_spill] sm:$0xff] %v9343_v38  ;;  %v13018_v54 = vld [vmem:[#allocation50_spill] sm:$0xff] }
 0xf05   : > { %v3310_v60 = vmul.f32 %v13018_v54, %v9054_v22  ;;  %v13021_v22 = vmov 18  }
 0xf08   : > { %3314 = vperm.xlu1 %6085, %v9195_v49   ;;  %3300 = vrot.lane.b32.xlu0 %v9343_v38, %s13011_s28 }
 0xf0c   : > { %6086 = vset.pattern.permute.xlu1 %v13015_v50  ;;  %v9363_v50 = vmul.f32 %v9035_v29, %v13020_v28 }
 0xf76   : > { %v9349_v9 = vpop.permute.xlu1 %3298 }
 0xf77   : > { %13016 = vst [vmem:[#allocation64_spill] sm:$0xff] %v9349_v9 }
 0xf83   : > { %v9355_v19 = vpop.permute.xlu1 %3314 }
 0xf84   : > { %v3318_v52 = vmul.f32 %v9355_v19, %v3311_v15  ;;  %v3317_v14 = vmul.f32 %v9355_v19, %v3310_v60  ;;  %v9367_v25 = vmul.f32 %v9355_v19, %v9363_v50 }
 0xf86   : > { %3325 = vrot.lane.b32.xlu1 %v3318_v52, %s13019_s21  ;;  %3323 = vrot.lane.b32.xlu0 %v3317_v14, %s13019_s21 }
 0xf8a   : > { %3338 = vperm.xlu1 %6086, %v9195_v49   ;;  %3327 = vrot.lane.b32.xlu0 %v9367_v25, %s13019_s21 }
 0xf8e   : > { %6087 = vset.pattern.permute.xlu1 %v13021_v22  ;;  %v3381_v22 = vmul.f32 %v9024_v6, %v9058_v21 }
 0xff8   : > { %v9373_v9 = vpop.permute.xlu1 %3325 }
 0xff9   : > { %13022 = vst [vmem:[#allocation9_spill] sm:$0xff] %v9373_v9 }
0x1005   : > { %v9375_v52 = vpop.permute.xlu1 %3338 }
0x1006   : > { %v3342_v14 = vmul.f32 %v9375_v52, %v3311_v15  ;;  %v3341_v11 = vmul.f32 %v9375_v52, %v3310_v60  ;;  %v9383_v55 = vmul.f32 %v9375_v52, %v9363_v50  ;;  %v13023_v60 = vmov 20  }
0x1007   : > { %v3402_v15 = vmul.f32 %v9078_v47, %v9063_v4 }
0x1008   : > { %3349 = vrot.lane.b32.xlu1 %v3342_v14, %s13019_s21  ;;  %3347 = vrot.lane.b32.xlu0 %v3341_v11, %s13019_s21  ;;  %v3382_v11 = vmul.f32 %v9024_v6, %v9063_v4  ;;  %v3401_v14 = vmul.f32 %v9078_v47, %v9058_v21 }
0x100c   : > { %3374 = vperm.xlu1 %6087, %v9195_v49   ;;  %3351 = vrot.lane.b32.xlu0 %v9383_v55, %s13019_s21 }
0x1010   : > { %3388 = vrot.lane.b32.xlu1 %v3381_v22, %s6430_s25  ;;  %3386 = vrot.lane.b32.xlu0 %v9039_v35, %s6430_s25  ;;  %v13024_v22 = vmov 23  }
0x1011   : > { %6089 = vset.pattern.permute.xlu1 %v13023_v60  ;;  %v9407_v60 = vpop.permute.xlu0 %3177 }
0x1012   : > { %13025 = vst [vmem:[#allocation53_spill] sm:$0xff] %v9407_v60 }
0x1014   : > { %3406 = vrot.lane.b32.xlu1 %v9084_v8, %s6430_s25  ;;  %3390 = vrot.lane.b32.xlu0 %v3382_v11, %s6430_s25 }
0x1015   : > { %v9409_v9 = vpop.permute.xlu0 %3197 }
0x1016   : > { %13026 = vst [vmem:[#allocation85_spill] sm:$0xff] %v9409_v9 }
0x1018   : > { %3410 = vrot.lane.b32.xlu1 %v3402_v15, %s6430_s25  ;;  %3408 = vrot.lane.b32.xlu0 %v3401_v14, %s6430_s25 }
0x1019   : > { %v9411_v23 = vpop.permute.xlu0 %3201 }
0x101a   : > { %13027 = vst [vmem:[#allocation74_spill] sm:$0xff] %v9411_v23 }
0x101c   : > { %3421 = vperm.xlu0 %6088, %v9195_v49  }
0x101d   : > { %v9413_v11 = vpop.permute.xlu0 %3224 }
0x101e   : > { %13028 = vst [vmem:[#allocation90_spill] sm:$0xff] %v9413_v11 }
0x1020   : > { %6092 = vset.pattern.permute.xlu0 %v13024_v22 }
0x1021   : > { %v9415_v24 = vpop.permute.xlu0 %3228 }
0x1022   : > { %13029 = vst [vmem:[#allocation78_spill] sm:$0xff] %v9415_v24 }
0x1025   : > { %v9417_v59 = vpop.permute.xlu0 %3248 }
0x1026   : > { %13030 = vst [vmem:[#allocation65_spill] sm:$0xff] %v9417_v59 }
0x1029   : > { %v9419_v20 = vpop.permute.xlu0 %3252 }
0x102a   : > { %13031 = vst [vmem:[#allocation45_spill] sm:$0xff] %v9419_v20 }
0x102d   : > { %v9421_v15 = vpop.permute.xlu0 %3272 }
0x102e   : > { %13032 = vst [vmem:[#allocation167_spill] sm:$0xff] %v9421_v15 }
0x1031   : > { %v9423_v14 = vpop.permute.xlu0 %3276 }
0x1032   : > { %13033 = vst [vmem:[#allocation75_spill] sm:$0xff] %v9423_v14 }
0x1035   : > { %v9425_v28 = vpop.permute.xlu0 %3296 }
0x1036   : > { %13034 = vst [vmem:[#allocation79_spill] sm:$0xff] %v9425_v28 }
0x1039   : > { %v9427_v22 = vpop.permute.xlu0 %3300 }
0x103a   : > { %13035 = vst [vmem:[#allocation82_spill] sm:$0xff] %v9427_v22 }
0x103d   : > { %v9429_v60 = vpop.permute.xlu0 %3323 }
0x103e   : > { %13036 = vst [vmem:[#allocation95_spill] sm:$0xff] %v9429_v60 }
0x1041   : > { %v9431_v9 = vpop.permute.xlu0 %3327 }
0x1042   : > { %13037 = vst [vmem:[#allocation98_spill] sm:$0xff] %v9431_v9 }
0x107a   : > { %v9433_v23 = vpop.permute.xlu0 %3347 }
0x107b   : > { %13038 = vst [vmem:[#allocation101_spill] sm:$0xff] %v9433_v23 }
0x107e   : > { %v9435_v11 = vpop.permute.xlu0 %3351 }
0x107f   : > { %13039 = vst [vmem:[#allocation105_spill] sm:$0xff] %v9435_v11  ;;  %v3445_v11 = vmul.f32 %v9058_v21, %v12965_v7 }
0x1082   : > { %v9437_v24 = vpop.permute.xlu0 %3386 }
0x1083   : > { %13040 = vst [vmem:[#allocation139_spill] sm:$0xff] %v9437_v24  ;;  %v3448_v24 = vmul.f32 %v3445_v11, %v9108_v48 }
0x1086   : > { %v9439_v59 = vpop.permute.xlu0 %3390 }
0x1087   : > { %13041 = vst [vmem:[#allocation99_spill] sm:$0xff] %v9439_v59 }
0x108a   : > { %v9441_v20 = vpop.permute.xlu0 %3408 }
0x108b   : > { %13042 = vst [vmem:[#allocation118_spill] sm:$0xff] %v9441_v20 }
0x1097   : > { %v9443_v15 = vpop.permute.xlu0 %3421 }
0x1098   : > { %v3426_v28 = vmul.f32 %v9443_v15, %v9063_v4  ;;  %v3424_v60 = vmul.f32 %v9035_v29, %v9443_v15  ;;  %v3425_v59 = vmul.f32 %v9443_v15, %v9058_v21 }
0x109a   : > { %3434 = vrot.lane.b32.xlu0 %v3426_v28, %s6430_s25  ;;  %3430 = vrot.lane.b32.xlu1 %v3424_v60, %s6430_s25  ;;  %v3446_v28 = vmul.f32 %v12967_v5, %v9063_v4 }
0x109c   : > { %v3469_v60 = vmul.f32 %v3446_v28, %v9126_v51  ;;  %v3449_v20 = vmul.f32 %v3446_v28, %v9108_v48 }
0x109e   : > { %3455 = vrot.lane.b32.xlu0 %v3448_v24, %s6444_s29  ;;  %3432 = vrot.lane.b32.xlu1 %v3425_v59, %s6430_s25  ;;  %v3468_v24 = vmul.f32 %v3445_v11, %v9126_v51  ;;  %v13043_v59 = vmov 21  }
0x10a2   : > { %3473 = vrot.lane.b32.xlu0 %v9131_v63, %s6444_s29  ;;  %3453 = vrot.lane.b32.xlu1 %v9113_v58, %s6444_s29  ;;  %v9472_v58 = vpop.permute.xlu1 %3349 }
0x10a3   : > { %13044 = vst [vmem:[#allocation109_spill] sm:$0xff] %v9472_v58 }
0x10a6   : > { %3477 = vrot.lane.b32.xlu0 %v3469_v60, %s6444_s29  ;;  %3457 = vrot.lane.b32.xlu1 %v3449_v20, %s6444_s29  ;;  %v9474_v63 = vpop.permute.xlu1 %3374 }
0x10a7   : > { %13045 = vst [vmem:[#allocation11_spill] sm:$0xff] %v9474_v63 }
0x10aa   : > { %3475 = vrot.lane.b32.xlu1 %v3468_v24, %s6444_s29  ;;  %v9476_v23 = vpop.permute.xlu1 %3388 }
0x10ab   : > { %13046 = vst [vmem:[#allocation106_spill] sm:$0xff] %v9476_v23 }
0x10ae   : > { %3488 = vperm.xlu1 %6089, %v9195_v49   ;;  %v9478_v9 = vpop.permute.xlu1 %3406 }
0x10af   : > { %13047 = vst [vmem:[#allocation121_spill] sm:$0xff] %v9478_v9 }
0x10b2   : > { %6090 = vset.pattern.permute.xlu1 %v13043_v59  ;;  %v9480_v22 = vpop.permute.xlu1 %3410 }
0x10b3   : > { %13048 = vst [vmem:[#allocation113_spill] sm:$0xff] %v9480_v22 }
0x110c   : > { %v9482_v60 = vpop.permute.xlu1 %3430 }
0x1110   : > { %v9484_v20 = vpop.permute.xlu1 %3432 }
0x1114   : > { %v9486_v14 = vpop.permute.xlu1 %3453 }
0x1115   : > { %13049 = vst [vmem:[#allocation110_spill] sm:$0xff] %v9486_v14 }
0x1118   : > { %v9488_v24 = vpop.permute.xlu1 %3457 }
0x1119   : > { %13050 = vst [vmem:[#allocation125_spill] sm:$0xff] %v9488_v24  ;;  %v3513_v24 = vmul.f32 %v12974_v10, %v9063_v4 }
0x111b   : > { %v3516_v14 = vmul.f32 %v3513_v24, %v9148_v39 }
0x111c   : > { %v9490_v46 = vpop.permute.xlu1 %3475 }
0x111d   : > { %13051 = vst [vmem:[#allocation130_spill] sm:$0xff] %v9490_v46 }
0x1129   : > { %v9492_v59 = vpop.permute.xlu1 %3488 }
0x112a   : > { %v3492_v58 = vmul.f32 %v9492_v59, %v3445_v11  ;;  %v3491_v23 = vmul.f32 %v9492_v59, %v9106_v1  ;;  %v3493_v22 = vmul.f32 %v9492_v59, %v3446_v28  ;;  %v3512_v11 = vmul.f32 %v9058_v21, %v12972_v44 }
0x112c   : > { %3499 = vrot.lane.b32.xlu1 %v3492_v58, %s6444_s29  ;;  %3497 = vrot.lane.b32.xlu0 %v3491_v23, %s6444_s29  ;;  %v3515_v1 = vmul.f32 %v3512_v11, %v9148_v39  ;;  %v3535_v23 = vmul.f32 %v3512_v11, %v9166_v30 }
0x1130   : > { %3520 = vrot.lane.b32.xlu1 %v9153_v45, %s6445_s30  ;;  %3501 = vrot.lane.b32.xlu0 %v3493_v22, %s6444_s29  ;;  %v3536_v45 = vmul.f32 %v3513_v24, %v9166_v30  ;;  %v13052_v22 = vmov 22  }
0x1134   : > { %3524 = vrot.lane.b32.xlu1 %v3516_v14, %s6445_s30  ;;  %3522 = vrot.lane.b32.xlu0 %v3515_v1, %s6445_s30 }
0x1138   : > { %3542 = vrot.lane.b32.xlu1 %v3535_v23, %s6445_s30  ;;  %3540 = vrot.lane.b32.xlu0 %v9171_v2, %s6445_s30 }
0x113c   : > { %3555 = vperm.xlu1 %6090, %v9195_v49   ;;  %3544 = vrot.lane.b32.xlu0 %v3536_v45, %s6445_s30  ;;  %v3578_v45 = vmul.f32 %v9182_v31, %v9058_v21 }
0x1140   : > { %6091 = vset.pattern.permute.xlu1 %v13052_v22 }
0x119e   : > { %v9519_v28 = vpop.permute.xlu1 %3499 }
0x119f   : > { %13053 = vst [vmem:[#allocation128_spill] sm:$0xff] %v9519_v28 }
0x11a2   : > { %v9521_v14 = vpop.permute.xlu1 %3520 }
0x11a3   : > { %13054 = vst [vmem:[#allocation129_spill] sm:$0xff] %v9521_v14 }
0x11a6   : > { %v9523_v58 = vpop.permute.xlu1 %3524 }
0x11a7   : > { %13055 = vst [vmem:[#allocation131_spill] sm:$0xff] %v9523_v58  ;;  %v3593_v58 = vmul.f32 %v9219_v42, %v9058_v21 }
0x11aa   : > { %v9525_v1 = vpop.permute.xlu1 %3542 }
0x11ab   : > { %13056 = vst [vmem:[#allocation132_spill] sm:$0xff] %v9525_v1 }
0x11b7   : > { %v9527_v23 = vpop.permute.xlu1 %3555 }
0x11b8   : > { %v3559_v2 = vmul.f32 %v9527_v23, %v3512_v11  ;;  %v3558_v46 = vmul.f32 %v9527_v23, %v9146_v36  ;;  %v3560_v22 = vmul.f32 %v9527_v23, %v3513_v24  ;;  %v3579_v11 = vmul.f32 %v9182_v31, %v9063_v4 }
0x11b9   : > { %v3594_v36 = vmul.f32 %v9219_v42, %v9063_v4 }
0x11ba   : > { %3566 = vrot.lane.b32.xlu1 %v3559_v2, %s6445_s30  ;;  %3564 = vrot.lane.b32.xlu0 %v3558_v46, %s6445_s30  ;;  %v13057_v46 = vmov 24  }
0x11be   : > { %3582 = vrot.lane.b32.xlu1 %v3578_v45, %s6426_s20  ;;  %3568 = vrot.lane.b32.xlu0 %v3560_v22, %s6445_s30 }
0x11c2   : > { %3597 = vrot.lane.b32.xlu1 %v3593_v58, %s6426_s20  ;;  %3584 = vrot.lane.b32.xlu0 %v3579_v11, %s6426_s20 }
0x11c6   : > { %3609 = vperm.xlu1 %6091, %v9195_v49   ;;  %3599 = vrot.lane.b32.xlu0 %v3594_v36, %s6426_s20  ;;  %v3631_v36 = vmul.f32 %v9063_v4, %v12994_v3 }
0x11ca   : > { %6094 = vset.pattern.permute.xlu1 %v13057_v46  ;;  %v3630_v46 = vmul.f32 %v12992_v56, %v9058_v21 }
0x11cc   : > { %v3633_v14 = vmul.f32 %v3630_v46, %v9228_v32 }
0x122c   : > { %v9550_v24 = vpop.permute.xlu1 %3566 }
0x122d   : > { %13058 = vst [vmem:[#allocation114_spill] sm:$0xff] %v9550_v24 }
0x1230   : > { %v9552_v2 = vpop.permute.xlu1 %3582 }
0x1231   : > { %13059 = vst [vmem:[#allocation134_spill] sm:$0xff] %v9552_v2  ;;  %v3634_v2 = vmul.f32 %v3631_v36, %v9228_v32 }
0x1234   : > { %v9554_v45 = vpop.permute.xlu1 %3597 }
0x1235   : > { %13060 = vst [vmem:[#allocation141_spill] sm:$0xff] %v9554_v45  ;;  %v3653_v45 = vmul.f32 %v3630_v46, %v9259_v34 }
0x1241   : > { %v9556_v22 = vpop.permute.xlu1 %3609 }
0x1242   : > { %v3613_v58 = vmul.f32 %v9556_v22, %v9063_v4  ;;  %v3612_v11 = vmul.f32 %v9556_v22, %v9058_v21 }
0x1244   : > { %3618 = vrot.lane.b32.xlu1 %v3613_v58, %s6426_s20  ;;  %3616 = vrot.lane.b32.xlu0 %v3612_v11, %s6426_s20  ;;  %v3654_v58 = vmul.f32 %v3631_v36, %v9259_v34 }
0x1248   : > { %3641 = vrot.lane.b32.xlu1 %v3634_v2, %s12993_s11  ;;  %3639 = vrot.lane.b32.xlu0 %v3633_v14, %s12993_s11  ;;  %v2942_v14 = vld [vmem:[%s12001_s6] sm:$0xff]  ;;  %v13061_v2 = vmov 0  }
0x124c   : > { %3659 = vrot.lane.b32.xlu1 %v3653_v45, %s12993_s11  ;;  %3643 = vrot.lane.b32.xlu0 %v9234_v12, %s12993_s11  ;;  %v9585_v45 = vpop.permute.xlu0 %3434 }
0x124d   : > { %13062 = vst [vmem:[#allocation137_spill] sm:$0xff] %v9585_v45 }
0x1250   : > { %3663 = vrot.lane.b32.xlu1 %v9267_v27, %s12993_s11  ;;  %3661 = vrot.lane.b32.xlu0 %v3654_v58, %s12993_s11  ;;  %v9587_v11 = vpop.permute.xlu0 %3455 }
0x1251   : > { %13063 = vst [vmem:[#allocation143_spill] sm:$0xff] %v9587_v11 }
0x1254   : > { %3674 = vperm.xlu0 %6092, %v9195_v49   ;;  %v9589_v12 = vpop.permute.xlu0 %3473 }
0x1255   : > { %13064 = vst [vmem:[#allocation140_spill] sm:$0xff] %v9589_v12 }
0x1258   : > { %6093 = vset.pattern.permute.xlu0 %v13061_v2  ;;  %v9591_v1 = vpop.permute.xlu0 %3477 }
0x1259   : > { %2945 = vperm.xlu0 %6093, %v2942_v14   ;;  %13065 = vst [vmem:[#allocation138_spill] sm:$0xff] %v9591_v1 }
0x125c   : > { %v9593_v27 = vpop.permute.xlu0 %3497 }
0x125d   : > { %13066 = vst [vmem:[#allocation142_spill] sm:$0xff] %v9593_v27 }
0x1260   : > { %v9595_v58 = vpop.permute.xlu0 %3501 }
0x1261   : > { %13067 = vst [vmem:[#allocation148_spill] sm:$0xff] %v9595_v58 }
0x1264   : > { %v9597_v24 = vpop.permute.xlu0 %3522 }
0x1265   : > { %13068 = vst [vmem:[#allocation149_spill] sm:$0xff] %v9597_v24 }
0x1268   : > { %v9599_v9 = vpop.permute.xlu0 %3540 }
0x1269   : > { %13069 = vst [vmem:[#allocation150_spill] sm:$0xff] %v9599_v9 }
0x126c   : > { %v9601_v28 = vpop.permute.xlu0 %3544 }
0x126d   : > { %13070 = vst [vmem:[#allocation151_spill] sm:$0xff] %v9601_v28 }
0x1270   : > { %v9603_v2 = vpop.permute.xlu0 %3564 }
0x1274   : > { %v9605_v14 = vpop.permute.xlu0 %3568 }
0x1278   : > { %v9607_v45 = vpop.permute.xlu0 %3584 }
0x1279   : > { %13071 = vst [vmem:[#allocation146_spill] sm:$0xff] %v9607_v45  ;;  %v3698_v45 = vmul.f32 %v9063_v4, %v13003_v62 }
0x127c   : > { %v9609_v11 = vpop.permute.xlu0 %3599 }
0x127d   : > { %13072 = vst [vmem:[#allocation153_spill] sm:$0xff] %v9609_v11 }
0x12b6   : > { %v9611_v12 = vpop.permute.xlu0 %3616 }
0x12b7   : > { %13073 = vst [vmem:[#allocation156_spill] sm:$0xff] %v9611_v12 }
0x12ba   : > { %v9613_v1 = vpop.permute.xlu0 %3639 }
0x12bb   : > { %13074 = vst [vmem:[#allocation157_spill] sm:$0xff] %v9613_v1  ;;  %v3701_v1 = vmul.f32 %v3698_v45, %v9279_v26 }
0x12be   : > { %v9615_v27 = vpop.permute.xlu0 %3643 }
0x12bf   : > { %13075 = vst [vmem:[#allocation165_spill] sm:$0xff] %v9615_v27 }
0x12c2   : > { %v9617_v58 = vpop.permute.xlu0 %3661 }
0x12c3   : > { %13076 = vst [vmem:[#allocation166_spill] sm:$0xff] %v9617_v58 }
0x12cf   : > { %v9619_v24 = vpop.permute.xlu0 %3674 }
0x12d0   : > { %v3679_v28 = vmul.f32 %v9619_v24, %v9226_v43  ;;  %v3677_v9 = vmul.f32 %v9619_v24, %v3630_v46  ;;  %v3678_v27 = vmul.f32 %v9619_v24, %v3631_v36  ;;  %v3697_v43 = vmul.f32 %v13004_v40, %v9058_v21  ;;  %v9646_v36 = vpop.permute.xlu1 %3618 }
0x12d2   : > { %3687 = vrot.lane.b32.xlu0 %v3679_v28, %s12993_s11  ;;  %3683 = vrot.lane.b32.xlu1 %v3677_v9, %s12993_s11  ;;  %v3720_v46 = vmul.f32 %v3697_v43, %v9299_v16  ;;  %v3700_v28 = vmul.f32 %v3697_v43, %v9279_v26  ;;  %v3721_v9 = vmul.f32 %v3698_v45, %v9299_v16 }
0x12d6   : > { %3708 = vrot.lane.b32.xlu0 %v3701_v1, %s13005_s12  ;;  %3685 = vrot.lane.b32.xlu1 %v3678_v27, %s12993_s11  ;;  %v13077_v1 = vmov 25   ;;  %v9648_v27 = vpop.permute.xlu1 %3641 }
0x12d7   : > { %13078 = vst [vmem:[#allocation159_spill] sm:$0xff] %v9648_v27 }
0x12da   : > { %3726 = vrot.lane.b32.xlu0 %v3720_v46, %s13005_s12  ;;  %3706 = vrot.lane.b32.xlu1 %v3700_v28, %s13005_s12  ;;  %v9650_v46 = vpop.permute.xlu1 %3659 }
0x12db   : > { %13079 = vst [vmem:[#allocation160_spill] sm:$0xff] %v9650_v46 }
0x12de   : > { %3730 = vrot.lane.b32.xlu0 %v9307_v17, %s13005_s12  ;;  %3710 = vrot.lane.b32.xlu1 %v9291_v53, %s13005_s12  ;;  %v9652_v28 = vpop.permute.xlu1 %3663 }
0x12df   : > { %13080 = vst [vmem:[#allocation36_spill] sm:$0xff] %v9652_v28  ;;  %v3764_v28 = vmul.f32 %v9315_v57, %v9058_v21 }
0x12e2   : > { %3728 = vrot.lane.b32.xlu1 %v3721_v9, %s13005_s12 }
0x12e6   : > { %3741 = vperm.xlu1 %6094, %v9195_v49  }
0x12ea   : > { %6095 = vset.pattern.permute.xlu1 %v13077_v1 }
0x1344   : > { %v9654_v17 = vpop.permute.xlu1 %3683 }
0x1348   : > { %v9656_v58 = vpop.permute.xlu1 %3685 }
0x134c   : > { %v9658_v53 = vpop.permute.xlu1 %3706 }
0x134d   : > { %13081 = vst [vmem:[#allocation24_spill] sm:$0xff] %v9658_v53 }
0x1350   : > { %v9660_v11 = vpop.permute.xlu1 %3710 }
0x1351   : > { %13082 = vst [vmem:[#allocation30_spill] sm:$0xff] %v9660_v11  ;;  %v3765_v11 = vmul.f32 %v9315_v57, %v9063_v4 }
0x1354   : > { %v9662_v9 = vpop.permute.xlu1 %3728 }
0x1355   : > { %13083 = vst [vmem:[#allocation54_spill] sm:$0xff] %v9662_v9 }
0x1361   : > { %v9664_v12 = vpop.permute.xlu1 %3741 }
0x1362   : > { %v3745_v1 = vmul.f32 %v9664_v12, %v3698_v45  ;;  %v3744_v27 = vmul.f32 %v9664_v12, %v3697_v43  ;;  %v3746_v53 = vmul.f32 %v9664_v12, %v9287_v61  ;;  %v3785_v45 = vmul.f32 %v9333_v13, %v9063_v4 }
0x1363   : > { %v3784_v43 = vmul.f32 %v9333_v13, %v9058_v21  ;;  %v13084_v61 = vmov 26  }
0x1364   : > { %3752 = vrot.lane.b32.xlu1 %v3745_v1, %s13005_s12  ;;  %3750 = vrot.lane.b32.xlu0 %v3744_v27, %s13005_s12 }
0x1368   : > { %3770 = vrot.lane.b32.xlu1 %v3764_v28, %s13011_s28  ;;  %3754 = vrot.lane.b32.xlu0 %v3746_v53, %s13005_s12 }
0x136c   : > { %3774 = vrot.lane.b32.xlu1 %v9325_v18, %s13011_s28  ;;  %3772 = vrot.lane.b32.xlu0 %v3765_v11, %s13011_s28 }
0x1370   : > { %3792 = vrot.lane.b32.xlu1 %v3785_v45, %s13011_s28  ;;  %3790 = vrot.lane.b32.xlu0 %v3784_v43, %s13011_s28 }
0x1374   : > { %3805 = vperm.xlu1 %6095, %v9195_v49   ;;  %3794 = vrot.lane.b32.xlu0 %v9343_v38, %s13011_s28 }
0x1378   : > { %6096 = vset.pattern.permute.xlu1 %v13084_v61  ;;  %v3828_v61 = vmul.f32 %v13018_v54, %v9058_v21 }
0x13d6   : > { %v9691_v27 = vpop.permute.xlu1 %3752 }
0x13da   : > { %v9693_v11 = vpop.permute.xlu1 %3770 }
0x13db   : > { %13085 = vst [vmem:[#allocation171_spill] sm:$0xff] %v9693_v11  ;;  %v3831_v11 = vmul.f32 %v3828_v61, %v9355_v19 }
0x13de   : > { %v9695_v28 = vpop.permute.xlu1 %3774 }
0x13df   : > { %13086 = vst [vmem:[#allocation170_spill] sm:$0xff] %v9695_v28 }
0x13e2   : > { %v9697_v53 = vpop.permute.xlu1 %3792 }
0x13e3   : > { %13087 = vst [vmem:[#allocation41_spill] sm:$0xff] %v9697_v53  ;;  %v3829_v53 = vmul.f32 %v9063_v4, %v13017_v41 }
0x13e5   : > { %v3832_v9 = vmul.f32 %v3829_v53, %v9355_v19 }
0x13ef   : > { %v9699_v1 = vpop.permute.xlu1 %3805 }
0x13f0   : > { %v3809_v45 = vmul.f32 %v9699_v1, %v9063_v4  ;;  %v3808_v43 = vmul.f32 %v9699_v1, %v9058_v21  ;;  %v3810_v28 = vmul.f32 %v9035_v29, %v9699_v1  ;;  %v3852_v21 = vmul.f32 %v3829_v53, %v9375_v52 }
0x13f1   : > { %v13088_v29 = vmov 1  }
0x13f2   : > { %3816 = vrot.lane.b32.xlu1 %v3809_v45, %s13011_s28  ;;  %3814 = vrot.lane.b32.xlu0 %v3808_v43, %s13011_s28  ;;  %v3851_v45 = vmul.f32 %v3828_v61, %v9375_v52 }
0x13f6   : > { %3837 = vrot.lane.b32.xlu1 %v3831_v11, %s13019_s21  ;;  %3818 = vrot.lane.b32.xlu0 %v3810_v28, %s13011_s28 }
0x13fa   : > { %3841 = vrot.lane.b32.xlu1 %v9367_v25, %s13019_s21  ;;  %3839 = vrot.lane.b32.xlu0 %v3832_v9, %s13019_s21 }
0x13fe   : > { %3859 = vrot.lane.b32.xlu1 %v3852_v21, %s13019_s21  ;;  %3857 = vrot.lane.b32.xlu0 %v3851_v45, %s13019_s21  ;;  %v9746_v45 = vld [vmem:[#allocation2 + $0x48] sm:$0xff] }
0x1402   : > { %3872 = vperm.xlu1 %6096, %v9195_v49   ;;  %3861 = vrot.lane.b32.xlu0 %v9383_v55, %s13019_s21  ;;  %v9744_v49 = vld [vmem:[#allocation2 + $0x68] sm:$0xff] }
0x1406   : > { %6097 = vset.pattern.permute.xlu1 %v13088_v29 }
0x1464   : > { %v9728_v4 = vpop.permute.xlu1 %3816 }
0x1465   : > { %13089 = vst [vmem:[#allocation47_spill] sm:$0xff] %v9728_v4 }
0x1468   : > { %v9730_v25 = vpop.permute.xlu1 %3837 }
0x1469   : > { %13090 = vst [vmem:[#allocation33_spill] sm:$0xff] %v9730_v25 }
0x146c   : > { %v9732_v9 = vpop.permute.xlu1 %3841 }
0x146d   : > { %13091 = vst [vmem:[#allocation58_spill] sm:$0xff] %v9732_v9 }
0x1470   : > { %v9734_v11 = vpop.permute.xlu1 %3859 }
0x1471   : > { %13092 = vst [vmem:[#allocation31_spill] sm:$0xff] %v9734_v11 }
0x147d   : > { %v9736_v28 = vpop.permute.xlu1 %3872 }
0x147e   : > { %13093 = vst [vmem:[#allocation40_spill] sm:$0xff] %v9736_v28  ;;  %v3876_v43 = vmul.f32 %v9736_v28, %v3829_v53  ;;  %v3875_v21 = vmul.f32 %v9736_v28, %v3828_v61  ;;  %v3877_v55 = vmul.f32 %v9736_v28, %v9363_v50  ;;  %v3912_v53 = vmul.f32 %v9744_v49, %v9024_v6 }
0x147f   : > { %v3911_v61 = vmul.f32 %v9746_v45, %v9024_v6  ;;  %v3931_v50 = vmul.f32 %v9746_v45, %v9078_v47  ;;  %v3932_v6 = vmul.f32 %v9744_v49, %v9078_v47 }
0x1480   : > { %3883 = vrot.lane.b32.xlu1 %v3876_v43, %s13019_s21  ;;  %3881 = vrot.lane.b32.xlu0 %v3875_v21, %s13019_s21  ;;  %v3952_v21 = vmul.f32 %v9744_v49, %v9443_v15 }
0x1484   : > { %3916 = vrot.lane.b32.xlu1 %v9039_v35, %s6430_s25  ;;  %3885 = vrot.lane.b32.xlu0 %v3877_v55, %s13019_s21  ;;  %v9762_v35 = vld [vmem:[#allocation2 + $0x58] sm:$0xff]  ;;  %v3971_v55 = vmul.f32 %v9746_v45, %v12965_v7 }
0x1485   : > { %v9766_v43 = vmul.f32 %v9762_v35, %v9443_v15 }
0x1486   : > { %v3994_v29 = vmul.f32 %v3971_v55, %v9126_v51 }
0x1488   : > { %3920 = vrot.lane.b32.xlu1 %v3912_v53, %s6430_s25  ;;  %3918 = vrot.lane.b32.xlu0 %v3911_v61, %s6430_s25  ;;  %v3970_v53 = vmul.f32 %v9762_v35, %v12966_v0  ;;  %v3974_v61 = vmul.f32 %v3971_v55, %v9108_v48 }
0x148a   : > { %v9804_v9 = vmul.f32 %v3970_v53, %v9492_v59 }
0x148c   : > { %3938 = vrot.lane.b32.xlu1 %v3931_v50, %s6430_s25  ;;  %3936 = vrot.lane.b32.xlu0 %v9084_v8, %s6430_s25  ;;  %v3951_v8 = vmul.f32 %v9746_v45, %v9443_v15  ;;  %v3973_v50 = vmul.f32 %v3970_v53, %v9108_v48 }
0x1490   : > { %3956 = vrot.lane.b32.xlu1 %v9766_v43, %s6430_s25  ;;  %3940 = vrot.lane.b32.xlu0 %v3932_v6, %s6430_s25  ;;  %v3972_v6 = vmul.f32 %v12967_v5, %v9744_v49 }
0x1492   : > { %v3995_v0 = vmul.f32 %v3972_v6, %v9126_v51 }
0x1494   : > { %3960 = vrot.lane.b32.xlu1 %v3952_v21, %s6430_s25  ;;  %3958 = vrot.lane.b32.xlu0 %v3951_v8, %s6430_s25  ;;  %v9790_v21 = vmul.f32 %v3970_v53, %v9126_v51  ;;  %v3975_v8 = vmul.f32 %v3972_v6, %v9108_v48 }
0x1498   : > { %3981 = vrot.lane.b32.xlu1 %v3974_v61, %s6444_s29  ;;  %3979 = vrot.lane.b32.xlu0 %v3973_v50, %s6444_s29  ;;  %v9798_v61 = vpop.permute.xlu0 %2945  ;;  %v4014_v50 = vmul.f32 %v3971_v55, %v9492_v59  ;;  %v4034_v55 = vmul.f32 %v9746_v45, %v12972_v44 }
0x1499   : > { %13094 = vst [vmem:[#allocation56_spill] sm:$0xff] %v9798_v61 }
0x149a   : > { %v4077_v11 = vmul.f32 %v4034_v55, %v9527_v23 }
0x149c   : > { %3999 = vrot.lane.b32.xlu1 %v9790_v21, %s6444_s29  ;;  %3983 = vrot.lane.b32.xlu0 %v3975_v8, %s6444_s29  ;;  %v9806_v48 = vpop.permute.xlu0 %3687  ;;  %v4033_v8 = vmul.f32 %v9762_v35, %v12973_v33  ;;  %v4037_v33 = vmul.f32 %v4034_v55, %v9148_v39 }
0x149d   : > { %13095 = vst [vmem:[#allocation77_spill] sm:$0xff] %v9806_v48 }
0x149e   : > { %v4036_v25 = vmul.f32 %v4033_v8, %v9148_v39 }
0x14a0   : > { %4003 = vrot.lane.b32.xlu1 %v3995_v0, %s6444_s29  ;;  %4001 = vrot.lane.b32.xlu0 %v3994_v29, %s6444_s29  ;;  %v4015_v0 = vmul.f32 %v3972_v6, %v9492_v59  ;;  %v4035_v29 = vmul.f32 %v12974_v10, %v9744_v49  ;;  %v9821_v53 = vpop.permute.xlu0 %3708  ;;  %v9829_v6 = vmul.f32 %v4033_v8, %v9166_v30 }
0x14a1   : > { %13096 = vst [vmem:[#allocation81_spill] sm:$0xff] %v9821_v53  ;;  %v9837_v53 = vmul.f32 %v4033_v8, %v9527_v23  ;;  %v4097_v8 = vmul.f32 %v9744_v49, %v9182_v31 }
0x14a4   : > { %4021 = vrot.lane.b32.xlu1 %v4014_v50, %s6444_s29  ;;  %4019 = vrot.lane.b32.xlu0 %v9804_v9, %s6444_s29  ;;  %v4038_v50 = vmul.f32 %v4035_v29, %v9148_v39  ;;  %v4058_v39 = vmul.f32 %v4035_v29, %v9166_v30 }
0x14a8   : > { %4042 = vrot.lane.b32.xlu1 %v4036_v25, %s6445_s30  ;;  %4023 = vrot.lane.b32.xlu0 %v4015_v0, %s6444_s29  ;;  %v4057_v25 = vmul.f32 %v4034_v55, %v9166_v30  ;;  %v9831_v0 = vpop.permute.xlu0 %3726  ;;  %v4111_v55 = vmul.f32 %v9746_v45, %v9219_v42 }
0x14a9   : > { %13097 = vst [vmem:[#allocation32_spill] sm:$0xff] %v9831_v0  ;;  %v4096_v0 = vmul.f32 %v9746_v45, %v9182_v31  ;;  %v4126_v31 = vmul.f32 %v9746_v45, %v9556_v22 }
0x14ac   : > { %4046 = vrot.lane.b32.xlu1 %v4038_v50, %s6445_s30  ;;  %4044 = vrot.lane.b32.xlu0 %v4037_v33, %s6445_s30  ;;  %v9843_v50 = vpop.permute.xlu0 %3730  ;;  %v4078_v33 = vmul.f32 %v4035_v29, %v9527_v23  ;;  %v4112_v29 = vmul.f32 %v9744_v49, %v9219_v42 }
0x14ad   : > { %13098 = vst [vmem:[#allocation37_spill] sm:$0xff] %v9843_v50 }
0x14b0   : > { %4064 = vrot.lane.b32.xlu1 %v4057_v25, %s6445_s30  ;;  %4062 = vrot.lane.b32.xlu0 %v9829_v6, %s6445_s30  ;;  %v9849_v25 = vpop.permute.xlu0 %3750 }
0x14b4   : > { %4082 = vrot.lane.b32.xlu1 %v9837_v53, %s6445_s30  ;;  %4066 = vrot.lane.b32.xlu0 %v4058_v39, %s6445_s30  ;;  %v9861_v39 = vpop.permute.xlu0 %3754 }
0x14b5   : > { %13099 = vst [vmem:[#allocation42_spill] sm:$0xff] %v9861_v39 }
0x14b8   : > { %4086 = vrot.lane.b32.xlu1 %v4078_v33, %s6445_s30  ;;  %4084 = vrot.lane.b32.xlu0 %v4077_v11, %s6445_s30  ;;  %v4127_v11 = vmul.f32 %v9744_v49, %v9556_v22  ;;  %v4142_v33 = vmul.f32 %v12992_v56, %v9746_v45 }
0x14bc   : > { %4102 = vrot.lane.b32.xlu1 %v4097_v8, %s6426_s20  ;;  %4100 = vrot.lane.b32.xlu0 %v4096_v0, %s6426_s20  ;;  %v4143_v0 = vmul.f32 %v9744_v49, %v12994_v3  ;;  %v9875_v8 = vpop.permute.xlu0 %3772 }
0x14bd   : > { %13100 = vst [vmem:[#allocation29_spill] sm:$0xff] %v9875_v8 }
0x14c0   : > { %4117 = vrot.lane.b32.xlu1 %v4112_v29, %s6426_s20  ;;  %4115 = vrot.lane.b32.xlu0 %v4111_v55, %s6426_s20  ;;  %v4146_v29 = vmul.f32 %v4143_v0, %v9228_v32  ;;  %v4145_v55 = vmul.f32 %v4142_v33, %v9228_v32  ;;  %v9885_v61 = vpop.permute.xlu0 %3790 }
0x14c1   : > { %13101 = vst [vmem:[#allocation55_spill] sm:$0xff] %v9885_v61 }
0x14c4   : > { %4132 = vrot.lane.b32.xlu1 %v4127_v11, %s6426_s20  ;;  %4130 = vrot.lane.b32.xlu0 %v4126_v31, %s6426_s20  ;;  %v4144_v11 = vmul.f32 %v9762_v35, %v12991_v37  ;;  %v4165_v31 = vmul.f32 %v4142_v33, %v9259_v34  ;;  %v9896_v37 = vpop.permute.xlu0 %3794 }
0x14c5   : > { %13102 = vst [vmem:[#allocation35_spill] sm:$0xff] %v9896_v37 }
0x14c6   : > { %v4147_v50 = vmul.f32 %v4144_v11, %v9228_v32  ;;  %v9890_v8 = vmul.f32 %v4144_v11, %v9259_v34  ;;  %v4186_v32 = vmul.f32 %v4143_v0, %v9619_v24  ;;  %v9908_v39 = vmul.f32 %v4144_v11, %v9619_v24 }
0x14c8   : > { %4153 = vrot.lane.b32.xlu1 %v4146_v29, %s12993_s11  ;;  %4151 = vrot.lane.b32.xlu0 %v4145_v55, %s12993_s11  ;;  %v4166_v29 = vmul.f32 %v4143_v0, %v9259_v34  ;;  %v4185_v55 = vmul.f32 %v4142_v33, %v9619_v24  ;;  %v13104_v0 = vld [vmem:[#allocation22_spill] sm:$0xff] }
0x14c9   : > { %v4207_v33 = vmul.f32 %v9762_v35, %v13104_v0 }
0x14cc   : > { %4171 = vrot.lane.b32.xlu1 %v4165_v31, %s12993_s11  ;;  %4155 = vrot.lane.b32.xlu0 %v4147_v50, %s12993_s11  ;;  %v4205_v50 = vmul.f32 %v13004_v40, %v9746_v45  ;;  %v9904_v31 = vpop.permute.xlu0 %3814 }
0x14cd   : > { %13103 = vst [vmem:[#allocation73_spill] sm:$0xff] %v9904_v31  ;;  %v13181_v31 = vld [vmem:[#allocation163_spill] sm:$0xff] }
0x14ce   : > { %v4208_v61 = vmul.f32 %v4205_v50, %v9279_v26  ;;  %v4228_v11 = vmul.f32 %v4205_v50, %v9299_v16  ;;  %v4248_v46 = vmul.f32 %v4205_v50, %v9664_v12  ;;  %v4269_v50 = vmul.f32 %v9744_v49, %v9315_v57 }
0x14d0   : > { %4175 = vrot.lane.b32.xlu1 %v9890_v8, %s12993_s11  ;;  %4173 = vrot.lane.b32.xlu0 %v4166_v29, %s12993_s11  ;;  %v4206_v29 = vmul.f32 %v9744_v49, %v13003_v62  ;;  %v9919_v37 = vpop.permute.xlu0 %3818 }
0x14d1   : > { %13105 = vst [vmem:[#allocation72_spill] sm:$0xff] %v9919_v37 }
0x14d4   : > { %4193 = vrot.lane.b32.xlu1 %v4186_v32, %s12993_s11  ;;  %4191 = vrot.lane.b32.xlu0 %v4185_v55, %s12993_s11  ;;  %v4210_v32 = vmul.f32 %v4207_v33, %v9279_v26  ;;  %v4209_v55 = vmul.f32 %v4206_v29, %v9279_v26  ;;  %v9927_v0 = vpop.permute.xlu0 %3839  ;;  %v9931_v26 = vmul.f32 %v4207_v33, %v9299_v16 }
0x14d5   : > { %13106 = vst [vmem:[#allocation84_spill] sm:$0xff] %v9927_v0  ;;  %v4328_v0 = vmul.f32 %v13018_v54, %v9746_v45 }
0x14d8   : > { %4214 = vrot.lane.b32.xlu1 %v4208_v61, %s13005_s12  ;;  %4195 = vrot.lane.b32.xlu0 %v9908_v39, %s12993_s11  ;;  %v4229_v61 = vmul.f32 %v4206_v29, %v9299_v16 }
0x14dc   : > { %4218 = vrot.lane.b32.xlu1 %v4210_v32, %s13005_s12  ;;  %4216 = vrot.lane.b32.xlu0 %v4209_v55, %s13005_s12  ;;  %v9937_v32 = vmul.f32 %v4207_v33, %v9664_v12  ;;  %v4249_v55 = vmul.f32 %v4206_v29, %v9664_v12  ;;  %v4288_v29 = vmul.f32 %v9746_v45, %v9333_v13 }
0x14e0   : > { %4236 = vrot.lane.b32.xlu1 %v4229_v61, %s13005_s12  ;;  %4234 = vrot.lane.b32.xlu0 %v4228_v11, %s13005_s12  ;;  %v9940_v61 = vpop.permute.xlu0 %3857 }
0x14e1   : > { %13107 = vst [vmem:[#allocation68_spill] sm:$0xff] %v9940_v61  ;;  %v9986_v61 = vmul.f32 %v9762_v35, %v9699_v1 }
0x14e3   : > { %13115 = vst [vmem:[#allocation61_spill] sm:$0xff] %v9986_v61 }
0x14e4   : > { %4254 = vrot.lane.b32.xlu1 %v4248_v46, %s13005_s12  ;;  %4238 = vrot.lane.b32.xlu0 %v9931_v26, %s13005_s12  ;;  %v4268_v46 = vmul.f32 %v9746_v45, %v9315_v57  ;;  %v9951_v33 = vpop.permute.xlu0 %3861  ;;  %v4289_v57 = vmul.f32 %v9744_v49, %v9333_v13 }
0x14e5   : > { %13108 = vst [vmem:[#allocation88_spill] sm:$0xff] %v9951_v33 }
0x14e8   : > { %4258 = vrot.lane.b32.xlu1 %v9937_v32, %s13005_s12  ;;  %4256 = vrot.lane.b32.xlu0 %v4249_v55, %s13005_s12 }
0x14ec   : > { %4276 = vrot.lane.b32.xlu1 %v4269_v50, %s13011_s28  ;;  %4274 = vrot.lane.b32.xlu0 %v4268_v46, %s13011_s28 }
0x14f0   : > { %4294 = vrot.lane.b32.xlu1 %v4288_v29, %s13011_s28  ;;  %4278 = vrot.lane.b32.xlu0 %v9325_v18, %s13011_s28  ;;  %v4309_v29 = vmul.f32 %v9744_v49, %v9699_v1  ;;  %v4308_v18 = vmul.f32 %v9746_v45, %v9699_v1 }
0x14f2   : > { %v9958_v11 = vpop.permute.xlu1 %3883  ;;  %v9960_v55 = vpop.permute.xlu0 %3881 }
0x14f3   : > { %13109 = vst [vmem:[#allocation89_spill] sm:$0xff] %v9958_v11  ;;  %13110 = vst [vmem:[#allocation94_spill] sm:$0xff] %v9960_v55  ;;  %v4351_v11 = vmul.f32 %v4328_v0, %v9375_v52 }
0x14f4   : > { %4298 = vrot.lane.b32.xlu1 %v9343_v38, %s13011_s28  ;;  %4296 = vrot.lane.b32.xlu0 %v4289_v57, %s13011_s28 }
0x14f6   : > { %v9967_v50 = vpop.permute.xlu1 %3916  ;;  %v9969_v46 = vpop.permute.xlu0 %3885 }
0x14f7   : > { %13111 = vst [vmem:[#allocation93_spill] sm:$0xff] %v9967_v50  ;;  %13112 = vst [vmem:[#allocation117_spill] sm:$0xff] %v9969_v46  ;;  %v4331_v50 = vmul.f32 %v4328_v0, %v9355_v19  ;;  %v4329_v46 = vmul.f32 %v9744_v49, %v13017_v41 }
0x14f8   : > { %4316 = vrot.lane.b32.xlu1 %v4309_v29, %s13011_s28  ;;  %4314 = vrot.lane.b32.xlu0 %v4308_v18, %s13011_s28  ;;  %v13116_v29 = vld [vmem:[#allocation49_spill] sm:$0xff] }
0x14f9   : > { %v4330_v18 = vmul.f32 %v9762_v35, %v13116_v29  ;;  %v4332_v55 = vmul.f32 %v4329_v46, %v9355_v19  ;;  %v4352_v29 = vmul.f32 %v4329_v46, %v9375_v52 }
0x14fa   : > { %v9979_v33 = vpop.permute.xlu1 %3920  ;;  %v9981_v57 = vpop.permute.xlu0 %3918 }
0x14fb   : > { %13113 = vst [vmem:[#allocation60_spill] sm:$0xff] %v9979_v33  ;;  %13114 = vst [vmem:[#allocation116_spill] sm:$0xff] %v9981_v57  ;;  %v4333_v37 = vmul.f32 %v4330_v18, %v9355_v19  ;;  %v4371_v19 = vmul.f32 %v4328_v0, %v9736_v28  ;;  %v10033_v0 = vld [vmem:[#allocation2 + $0x70] sm:$0xff] }
0x14fc   : > { %4337 = vrot.lane.b32.xlu1 %v4331_v50, %s13019_s21  ;;  %4318 = vrot.lane.b32.xlu0 %v9986_v61, %s13011_s28  ;;  %13127 = vst [vmem:[#allocation87_spill] sm:$0xff] %v10033_v0 }
0x14fe   : > { %v9995_v33 = vpop.permute.xlu1 %3938  ;;  %v9997_v57 = vpop.permute.xlu0 %3936 }
0x14ff   : > { %13117 = vst [vmem:[#allocation76_spill] sm:$0xff] %v9995_v33  ;;  %13118 = vst [vmem:[#allocation86_spill] sm:$0xff] %v9997_v57 }
0x1500   : > { %4341 = vrot.lane.b32.xlu1 %v4333_v37, %s13019_s21  ;;  %4339 = vrot.lane.b32.xlu0 %v4332_v55, %s13019_s21  ;;  %v10017_v37 = vmul.f32 %v4330_v18, %v9375_v52 }
0x1502   : > { %v10003_v50 = vpop.permute.xlu1 %3956  ;;  %v10005_v61 = vpop.permute.xlu0 %3940  ;;  %13123 = vst [vmem:[#allocation57_spill] sm:$0xff] %v10017_v37 }
0x1503   : > { %13119 = vst [vmem:[#allocation168_spill] sm:$0xff] %v10003_v50  ;;  %13120 = vst [vmem:[#allocation67_spill] sm:$0xff] %v10005_v61 }
0x1504   : > { %4359 = vrot.lane.b32.xlu1 %v4352_v29, %s13019_s21  ;;  %4357 = vrot.lane.b32.xlu0 %v4351_v11, %s13019_s21  ;;  %v10027_v11 = vmul.f32 %v4330_v18, %v9736_v28  ;;  %v4372_v29 = vmul.f32 %v4329_v46, %v9736_v28  ;;  %v4403_v18 = vmul.f32 %v9762_v35, %v9078_v47  ;;  %v10045_v46 = vld [vmem:[#allocation2 + $0x38] sm:$0xff] }
0x1505   : > { %13130 = vst [vmem:[#allocation28_spill] sm:$0xff] %v10045_v46 }
0x1506   : > { %v10011_v57 = vpop.permute.xlu1 %3960  ;;  %v10013_v33 = vpop.permute.xlu0 %3958  ;;  %13126 = vst [vmem:[#allocation25_spill] sm:$0xff] %v10027_v11 }
0x1507   : > { %13121 = vst [vmem:[#allocation51_spill] sm:$0xff] %v10011_v57  ;;  %13122 = vst [vmem:[#allocation63_spill] sm:$0xff] %v10013_v33  ;;  %v10210_v33 = vmul.f32 %v13004_v40, %v10033_v0 }
0x1508   : > { %4377 = vrot.lane.b32.xlu1 %v4371_v19, %s13019_s21  ;;  %4361 = vrot.lane.b32.xlu0 %v10017_v37, %s13019_s21  ;;  %v13169_v37 = vld [vmem:[#allocation83_spill] sm:$0xff] }
0x150a   : > { %v10022_v55 = vpop.permute.xlu1 %3981  ;;  %v10024_v50 = vpop.permute.xlu0 %3979 }
0x150b   : > { %13124 = vst [vmem:[#allocation10_spill] sm:$0xff] %v10022_v55  ;;  %13125 = vst [vmem:[#allocation27_spill] sm:$0xff] %v10024_v50  ;;  %v4404_v55 = vmul.f32 %v10033_v0, %v9078_v47 }
0x150c   : > { %4381 = vrot.lane.b32.xlu1 %v10027_v11, %s13019_s21  ;;  %4379 = vrot.lane.b32.xlu0 %v4372_v29, %s13019_s21 }
0x150e   : > { %v10035_v19 = vpop.permute.xlu1 %3999  ;;  %v10037_v57 = vpop.permute.xlu0 %3983 }
0x150f   : > { %13128 = vst [vmem:[#allocation80_spill] sm:$0xff] %v10035_v19  ;;  %13129 = vst [vmem:[#allocation91_spill] sm:$0xff] %v10037_v57  ;;  %v4405_v19 = vmul.f32 %v10045_v46, %v9078_v47  ;;  %v4444_v47 = vmul.f32 %v10033_v0, %v12965_v7 }
0x1510   : > { %4411 = vrot.lane.b32.xlu1 %v4404_v55, %s6430_s25  ;;  %4409 = vrot.lane.b32.xlu0 %v4403_v18, %s6430_s25  ;;  %v4425_v55 = vmul.f32 %v10045_v46, %v9443_v15  ;;  %v4424_v18 = vmul.f32 %v10033_v0, %v9443_v15  ;;  %v4445_v15 = vmul.f32 %v12967_v5, %v10045_v46 }
0x1511   : > { %v4487_v5 = vmul.f32 %v10033_v0, %v12972_v44 }
0x1512   : > { %v10047_v50 = vpop.permute.xlu1 %4003  ;;  %v10049_v29 = vpop.permute.xlu0 %4001  ;;  %v4448_v7 = vmul.f32 %v4445_v15, %v9126_v51 }
0x1513   : > { %13131 = vst [vmem:[#allocation70_spill] sm:$0xff] %v10047_v50  ;;  %13132 = vst [vmem:[#allocation62_spill] sm:$0xff] %v10049_v29  ;;  %v10183_v50 = vmul.f32 %v10045_v46, %v12994_v3 }
0x1514   : > { %4429 = vrot.lane.b32.xlu1 %v9766_v43, %s6430_s25  ;;  %4413 = vrot.lane.b32.xlu0 %v4405_v19, %s6430_s25 }
0x1516   : > { %v10056_v11 = vpop.permute.xlu1 %4021  ;;  %v10058_v57 = vpop.permute.xlu0 %4019 }
0x1517   : > { %13133 = vst [vmem:[#allocation112_spill] sm:$0xff] %v10056_v11  ;;  %13134 = vst [vmem:[#allocation124_spill] sm:$0xff] %v10058_v57  ;;  %v4447_v11 = vmul.f32 %v4444_v47, %v9126_v51 }
0x1518   : > { %4433 = vrot.lane.b32.xlu1 %v4425_v55, %s6430_s25  ;;  %4431 = vrot.lane.b32.xlu0 %v4424_v18, %s6430_s25  ;;  %s11848_s25 = sand.u32 1, %s6410_s14  }
0x1519   : > { %s5745_s26 = scalar_lea.sflag [#allocation6], %s11848_s25 }
0x151a   : > { %v10068_v43 = vpop.permute.xlu1 %4042  ;;  %v10070_v19 = vpop.permute.xlu0 %4023 }
0x151b   : > { %13135 = vst [vmem:[#allocation46_spill] sm:$0xff] %v10068_v43  ;;  %13136 = vst [vmem:[#allocation59_spill] sm:$0xff] %v10070_v19  ;;  %v4467_v19 = vmul.f32 %v4444_v47, %v9492_v59  ;;  %v6324_v47 = vld [vmem:[#allocation2 + $0x8] sm:$0xff] }
0x151c   : > { %4454 = vrot.lane.b32.xlu1 %v4447_v11, %s6444_s29  ;;  %4452 = vrot.lane.b32.xlu0 %v9790_v21, %s6444_s29  ;;  %v4468_v21 = vmul.f32 %v4445_v15, %v9492_v59  ;;  %v4488_v59 = vmul.f32 %v12974_v10, %v10045_v46  ;;  %v13143_v15 = vld [vmem:[#allocation164_spill] sm:$0xff]  ;;  %v6327_v10 = vld [vmem:[#allocation2 + $0x40] sm:$0xff] }
0x151e   : > { %v10078_v55 = vpop.permute.xlu1 %4046  ;;  %v10080_v18 = vpop.permute.xlu0 %4044 }
0x151f   : > { %13137 = vst [vmem:[#allocation39_spill] sm:$0xff] %v10078_v55  ;;  %13138 = vst [vmem:[#allocation66_spill] sm:$0xff] %v10080_v18  ;;  %v13147_v18 = vld [vmem:[#allocation158_spill] sm:$0xff] }
0x1520   : > { %4472 = vrot.lane.b32.xlu1 %v9804_v9, %s6444_s29  ;;  %4456 = vrot.lane.b32.xlu0 %v4448_v7, %s6444_s29  ;;  %v4490_v7 = vmul.f32 %v4487_v5, %v9166_v30 }
0x1522   : > { %v10086_v43 = vpop.permute.xlu1 %4064  ;;  %v10088_v11 = vpop.permute.xlu0 %4062 }
0x1523   : > { %13139 = vst [vmem:[#allocation71_spill] sm:$0xff] %v10086_v43  ;;  %13140 = vst [vmem:[#allocation44_spill] sm:$0xff] %v10088_v11  ;;  %v13144_v11 = vld [vmem:[#allocation161_spill] sm:$0xff] }
0x1524   : > { %4476 = vrot.lane.b32.xlu1 %v4468_v21, %s6444_s29  ;;  %4474 = vrot.lane.b32.xlu0 %v4467_v19, %s6444_s29  ;;  %v2952_v19 = vmul.f32 %v6324_v47, %v13143_v15  ;;  %v6325_v21 = vld [vmem:[#allocation2 + $0x18] sm:$0xff]  ;;  %v10121_v47 = vmul.f32 %v6327_v10, %v13143_v15  ;;  %s12504_s29 = sshll.u32 %s11848_s25, 6 }
0x1525   : > { %v2953_v44 = vmul.f32 %v6325_v21, %v13144_v11  ;;  %v10125_v21 = vmul.f32 %v13144_v11, %v9744_v49 }
0x1526   : > { %v10096_v51 = vpop.permute.xlu1 %4082  ;;  %v10098_v9 = vpop.permute.xlu0 %4066  ;;  %13149 = vst [vmem:[#allocation18_spill] sm:$0xff] %v10121_v47 }
0x1527   : > { %13141 = vst [vmem:[#allocation17_spill] sm:$0xff] %v10096_v51  ;;  %13142 = vst [vmem:[#allocation12_spill] sm:$0xff] %v10098_v9  ;;  %v4491_v9 = vmul.f32 %v4488_v59, %v9166_v30  ;;  %v13151_v30 = vld [vmem:[#allocation136_spill] sm:$0xff] }
0x1528   : > { %4497 = vrot.lane.b32.xlu1 %v4490_v7, %s6445_s30  ;;  %4495 = vrot.lane.b32.xlu0 %v9829_v6, %s6445_s30  ;;  %v10115_v7 = vmul.f32 %v9762_v35, %v13147_v18  ;;  %v6326_v6 = vld [vmem:[#allocation2 + $0x78] sm:$0xff]  ;;  %v2960_v18 = vmul.f32 %v13151_v30, %v2952_v19  ;;  %v2961_v49 = vmul.f32 %v13151_v30, %v2953_v44 }
0x1529   : > { %v10118_v55 = vmul.f32 %v6326_v6, %v13144_v11  ;;  %v13153_v6 = vld [vmem:[#allocation133_spill] sm:$0xff] }
0x152a   : > { %v10108_v43 = vpop.permute.xlu1 %4086  ;;  %v10110_v51 = vpop.permute.xlu0 %4084  ;;  %v10136_v35 = vmul.f32 %v13151_v30, %v10115_v7  ;;  %v10141_v10 = vmul.f32 %v13153_v6, %v10115_v7  ;;  %v10154_v57 = vmul.f32 %v10121_v47, %v13153_v6 }
0x152b   : > { %13145 = vst [vmem:[#allocation16_spill] sm:$0xff] %v10108_v43  ;;  %13146 = vst [vmem:[#allocation19_spill] sm:$0xff] %v10110_v51  ;;  %v10129_v43 = vmul.f32 %v9746_v45, %v13143_v15  ;;  %v2967_v45 = vmul.f32 %v13153_v6, %v2952_v19  ;;  %v2968_v51 = vmul.f32 %v13153_v6, %v2953_v44 }
0x152c   : > { %13148 = vst [vmem:[#allocation13_spill] sm:$0xff] %v10118_v55  ;;  %4515 = vrot.lane.b32.xlu1 %v9837_v53, %s6445_s30  ;;  %4499 = vrot.lane.b32.xlu0 %v4491_v9, %s6445_s30  ;;  %13152 = vst [vmem:[#allocation15_spill] sm:$0xff] %v10136_v35  ;;  %v4511_v53 = vmul.f32 %v4488_v59, %v9527_v23  ;;  %v4510_v9 = vmul.f32 %v4487_v5, %v9527_v23 }
0x152d   : > { %13150 = vst [vmem:[#allocation20_spill] sm:$0xff] %v10129_v43  ;;  %13154 = vst [vmem:[#allocation21_spill] sm:$0xff] %v10141_v10  ;;  %v10158_v29 = vmul.f32 %v10118_v55, %v13153_v6  ;;  %v10162_v19 = vmul.f32 %v10125_v21, %v13151_v30  ;;  %v10169_v23 = vmul.f32 %v10129_v43, %v13151_v30 }
0x152e   : > { %v10145_v15 = vpop.permute.xlu1 %4102  ;;  %v10147_v11 = vpop.permute.xlu0 %4100  ;;  %v10173_v5 = vmul.f32 %v10129_v43, %v13153_v6  ;;  %v10179_v44 = vmul.f32 %v10125_v21, %v13153_v6  ;;  %v10191_v30 = vmul.f32 %v10045_v46, %v13003_v62  ;;  %v13173_v43 = vld [vmem:[#allocation147_spill] sm:$0xff] }
0x152f   : > { %13155 = vst [vmem:[#allocation23_spill] sm:$0xff] %v10145_v15  ;;  %13156 = vst [vmem:[#allocation14_spill] sm:$0xff] %v10147_v11  ;;  %v13158_v15 = vld [vmem:[#allocation92_spill] sm:$0xff]  ;;  %v13159_v11 = vld [vmem:[#allocation169_spill] sm:$0xff] }
0x1530   : > { %13157 = vst [vmem:[#allocation52_spill] sm:$0xff] %v10162_v19  ;;  %v2985_v59 = vsel %vm498_vm5, %v13159_v11, %v13158_v15  ;;  %13160 = vst [vmem:[#allocation50_spill] sm:$0xff] %v10169_v23  ;;  %4519 = vrot.lane.b32.xlu1 %v4511_v53, %s6445_s30  ;;  %4517 = vrot.lane.b32.xlu0 %v4510_v9, %s6445_s30  ;;  %v10187_v11 = vmul.f32 %v12992_v56, %v10033_v0  ;;  %v13164_v9 = vld [vmem:[#allocation96_spill] sm:$0xff]  ;;  %v13165_v23 = vld [vmem:[#allocation145_spill] sm:$0xff]  ;;  %s11883_s30 = scalar_lea.vmem [#allocation5], %s12504_s29 }
0x1531   : > { %13161 = vst [vmem:[#allocation22_spill] sm:$0xff] %v10173_v5  ;;  %13162 = vst [vmem:[#allocation49_spill] sm:$0xff] %v10179_v44  ;;  %v13163_v5 = vld [vmem:[#allocation144_spill] sm:$0xff]  ;;  %v3009_v6 = vsel %vm498_vm5, %v13165_v23, %v13164_v9  ;;  %v4530_v56 = vmul.f32 %v10045_v46, %v9219_v42  ;;  %v4529_v19 = vmul.f32 %v10033_v0, %v9219_v42  ;;  %v13170_v42 = vld [vmem:[#allocation102_spill] sm:$0xff] }
0x1532   : > { %v2986_v53 = vsel %vm498_vm5, %v13158_v15, %v13163_v5  ;;  %v10199_v44 = vpop.permute.xlu1 %4117  ;;  %v10201_v3 = vpop.permute.xlu0 %4115  ;;  %v2990_v62 = vadd.f32 %v2985_v59, %v10136_v35  ;;  %v10214_v15 = vmul.f32 %v10045_v46, %v13017_v41  ;;  %v10218_v23 = vmul.f32 %v13018_v54, %v10033_v0  ;;  %v13171_v35 = vld [vmem:[#allocation103_spill] sm:$0xff] }
0x1533   : > { %13166 = vst [vmem:[#allocation158_spill] sm:$0xff] %v10199_v44  ;;  %13167 = vst [vmem:[#allocation92_spill] sm:$0xff] %v10201_v3  ;;  %v13168_v3 = vld [vmem:[#allocation100_spill] sm:$0xff]  ;;  %v3036_v59 = vsel %vm573_vm10, %v13170_v42, %v13169_v37  ;;  %v3037_v40 = vsel %vm573_vm10, %v13169_v37, %v13171_v35  ;;  %v2991_v41 = vadd.f32 %v2986_v53, %v2960_v18  ;;  %v13174_v42 = vld [vmem:[#allocation107_spill] sm:$0xff] }
0x1534   : > { %v3010_v44 = vsel %vm498_vm5, %v13164_v9, %v13168_v3  ;;  %4535 = vrot.lane.b32.xlu1 %v4530_v56, %s6426_s20  ;;  %4533 = vrot.lane.b32.xlu0 %v4529_v19, %s6426_s20  ;;  %v2992_v54 = vadd.f32 %v13163_v5, %v2961_v49  ;;  %v3016_v61 = vadd.f32 %v13168_v3, %v2968_v51  ;;  %v13172_v9 = vld [vmem:[#allocation155_spill] sm:$0xff] }
0x1535   : > { %v3014_v28 = vadd.f32 %v3009_v6, %v10141_v10  ;;  %v3060_v38 = vsel %vm573_vm10, %v13173_v43, %v13172_v9  ;;  %v3061_v48 = vsel %vm573_vm10, %v13172_v9, %v13174_v42  ;;  %v4545_v18 = vmul.f32 %v10045_v46, %v9556_v22  ;;  %v13177_v43 = vld [vmem:[#allocation152_spill] sm:$0xff]  ;;  %v13178_v53 = vld [vmem:[#allocation119_spill] sm:$0xff]  ;;  %v13179_v9 = vld [vmem:[#allocation154_spill] sm:$0xff] }
0x1536   : > { %v10240_v37 = vpop.permute.xlu1 %4132  ;;  %v10242_v56 = vpop.permute.xlu0 %4130  ;;  %v4544_v51 = vmul.f32 %v10033_v0, %v9556_v22  ;;  %v3015_v49 = vadd.f32 %v3010_v44, %v2967_v45  ;;  %v3041_v6 = vadd.f32 %v3036_v59, %v2990_v62  ;;  %v3042_v19 = vadd.f32 %v3037_v40, %v2991_v41  ;;  %v13182_v44 = vld [vmem:[#allocation120_spill] sm:$0xff]  ;;  %v13183_v40 = vld [vmem:[#allocation162_spill] sm:$0xff] }
0x1537   : > { %13175 = vst [vmem:[#allocation169_spill] sm:$0xff] %v10240_v37  ;;  %13176 = vst [vmem:[#allocation144_spill] sm:$0xff] %v10242_v56  ;;  %v3043_v5 = vadd.f32 %v13171_v35, %v2992_v54  ;;  %v3087_v3 = vsel %vm633_vm11, %v13178_v53, %v13177_v43  ;;  %v3088_v37 = vsel %vm633_vm11, %v13177_v43, %v13179_v9  ;;  %v13180_v56 = vld [vmem:[#allocation135_spill] sm:$0xff]  ;;  %v13184_v41 = vld [vmem:[#allocation122_spill] sm:$0xff] }
0x1538   : > { %v3111_v4 = vsel %vm633_vm11, %v13181_v31, %v13180_v56  ;;  %4550 = vrot.lane.b32.xlu1 %v4545_v18, %s6426_s20  ;;  %4548 = vrot.lane.b32.xlu0 %v4544_v51, %s6426_s20  ;;  %v3065_v22 = vadd.f32 %v3060_v38, %v3014_v28  ;;  %v3066_v45 = vadd.f32 %v3061_v48, %v3015_v49  ;;  %v13186_v49 = vld [vmem:[#allocation111_spill] sm:$0xff]  ;;  %s6460_s20 = smov [#allocation5]  }
0x1539   : > { %v3067_v35 = vadd.f32 %v13174_v42, %v3016_v61  ;;  %v3112_v62 = vsel %vm633_vm11, %v13180_v56, %v13182_v44  ;;  %v3094_v59 = vadd.f32 %v13179_v9, %v3043_v5  ;;  %v3131_v54 = vsel %vm459_vm9, %v13184_v41, %v13183_v40  ;;  %v13187_v5 = vld [vmem:[#allocation38_spill] sm:$0xff] }
0x153a   : > { %v10268_v43 = vpop.permute.xlu1 %4153  ;;  %v10270_v31 = vpop.permute.xlu0 %4151  ;;  %v4564_v38 = vmul.f32 %v10183_v50, %v9259_v34  ;;  %v4563_v28 = vmul.f32 %v10187_v11, %v9259_v34  ;;  %v3092_v48 = vadd.f32 %v3087_v3, %v3041_v6  ;;  %v3093_v61 = vadd.f32 %v3088_v37, %v3042_v19  ;;  %v13188_v34 = vld [vmem:[#allocation126_spill] sm:$0xff]  ;;  %v13189_v6 = vld [vmem:[#allocation123_spill] sm:$0xff]  ;;  %v13190_v37 = vld [vmem:[#allocation53_spill] sm:$0xff] }
0x153b   : > { %13185 = vst [vmem:[#allocation96_spill] sm:$0xff] %v10270_v31  ;;  %v3116_v42 = vadd.f32 %v3111_v4, %v3065_v22  ;;  %v3118_v56 = vadd.f32 %v13182_v44, %v3067_v35  ;;  %v3117_v18 = vadd.f32 %v3112_v62, %v3066_v45  ;;  %v3137_v51 = vadd.f32 %v13183_v40, %v3094_v59  ;;  %v13191_v22 = vld [vmem:[#allocation26_spill] sm:$0xff]  ;;  %v13192_v45 = vld [vmem:[#allocation85_spill] sm:$0xff] }
0x153c   : > { %v3150_v53 = vsel %vm459_vm9, %v13187_v5, %v13186_v49  ;;  %4571 = vrot.lane.b32.xlu1 %v4564_v38, %s12993_s11  ;;  %4569 = vrot.lane.b32.xlu0 %v4563_v28, %s12993_s11  ;;  %v3135_v9 = vadd.f32 %v13184_v41, %v3092_v48  ;;  %v3136_v31 = vadd.f32 %v3131_v54, %v3093_v61  ;;  %v13193_v44 = vld [vmem:[#allocation74_spill] sm:$0xff] }
0x153d   : > { %v3179_v4 = vsel %vm735_vm13, %v13189_v6, %v13188_v34  ;;  %v3180_v19 = vsel %vm735_vm13, %v13188_v34, %v13190_v37  ;;  %v3154_v3 = vadd.f32 %v13187_v5, %v3116_v42  ;;  %v3203_v35 = vsel %vm735_vm13, %v13192_v45, %v13191_v22  ;;  %v13194_v48 = vld [vmem:[#allocation34_spill] sm:$0xff] }
0x153e   : > { %v3204_v62 = vsel %vm735_vm13, %v13191_v22, %v13193_v44  ;;  %v10297_v59 = vpop.permute.xlu1 %4171  ;;  %v10299_v40 = vpop.permute.xlu0 %4155  ;;  %v4583_v41 = vmul.f32 %v10187_v11, %v9619_v24  ;;  %v3155_v54 = vadd.f32 %v3150_v53, %v3117_v18  ;;  %v3156_v38 = vadd.f32 %v13186_v49, %v3118_v56  ;;  %v13195_v61 = vld [vmem:[#allocation90_spill] sm:$0xff] }
0x153f   : > { %v3184_v28 = vadd.f32 %v13189_v6, %v3135_v9  ;;  %v3230_v42 = vsel %vm796_vm14, %v13195_v61, %v13194_v48  ;;  %v3185_v5 = vadd.f32 %v3179_v4, %v3136_v31  ;;  %v3186_v34 = vadd.f32 %v3180_v19, %v3137_v51  ;;  %v13196_v37 = vld [vmem:[#allocation78_spill] sm:$0xff]  ;;  %v13197_v9 = vld [vmem:[#allocation115_spill] sm:$0xff]  ;;  %v13198_v6 = vld [vmem:[#allocation65_spill] sm:$0xff] }
0x1540   : > { %v3231_v22 = vsel %vm796_vm14, %v13194_v48, %v13196_v37  ;;  %4589 = vrot.lane.b32.xlu1 %v4583_v41, %s12993_s11  ;;  %4573 = vrot.lane.b32.xlu0 %v9890_v8, %s12993_s11  ;;  %v3208_v11 = vadd.f32 %v13192_v45, %v3154_v3  ;;  %v3209_v56 = vadd.f32 %v3203_v35, %v3155_v54  ;;  %v13199_v51 = vld [vmem:[#allocation45_spill] sm:$0xff]  ;;  %v13200_v45 = vld [vmem:[#allocation127_spill] sm:$0xff]  ;;  %v13203_v48 = vld [vmem:[#allocation64_spill] sm:$0xff] }
0x1541   : > { %v3210_v18 = vadd.f32 %v3204_v62, %v3156_v38  ;;  %v3235_v49 = vadd.f32 %v13195_v61, %v3184_v28  ;;  %v3236_v53 = vadd.f32 %v3230_v42, %v3185_v5  ;;  %v3254_v31 = vsel %vm796_vm14, %v13198_v6, %v13197_v9  ;;  %v13201_v35 = vld [vmem:[#allocation167_spill] sm:$0xff]  ;;  %v13205_v37 = vld [vmem:[#allocation82_spill] sm:$0xff] }
0x1542   : > { %v3255_v4 = vsel %vm796_vm14, %v13197_v9, %v13199_v51  ;;  %v10322_v19 = vpop.permute.xlu1 %4175  ;;  %v10324_v44 = vpop.permute.xlu0 %4173  ;;  %v4584_v8 = vmul.f32 %v10183_v50, %v9619_v24  ;;  %v3237_v3 = vadd.f32 %v3231_v22, %v3186_v34  ;;  %v3278_v62 = vsel %vm845_vm12, %v13201_v35, %v13200_v45  ;;  %v13202_v41 = vld [vmem:[#allocation75_spill] sm:$0xff] }
0x1543   : > { %v3279_v54 = vsel %vm845_vm12, %v13200_v45, %v13202_v41  ;;  %v4607_v38 = vmul.f32 %v10191_v30, %v9299_v16  ;;  %v3259_v28 = vadd.f32 %v13198_v6, %v3208_v11  ;;  %v13204_v61 = vld [vmem:[#allocation79_spill] sm:$0xff]  ;;  %v4606_v24 = vmul.f32 %v10210_v33, %v9299_v16  ;;  %v13206_v6 = vld [vmem:[#allocation9_spill] sm:$0xff] }
0x1544   : > { %v3302_v42 = vsel %vm845_vm12, %v13204_v61, %v13203_v48  ;;  %4593 = vrot.lane.b32.xlu1 %v9908_v39, %s12993_s11  ;;  %4591 = vrot.lane.b32.xlu0 %v4584_v8, %s12993_s11  ;;  %v3260_v50 = vadd.f32 %v3254_v31, %v3209_v56  ;;  %v3261_v5 = vadd.f32 %v3255_v4, %v3210_v18  ;;  %v13207_v51 = vld [vmem:[#allocation95_spill] sm:$0xff]  ;;  %v13208_v39 = vld [vmem:[#allocation98_spill] sm:$0xff]  ;;  %s5773_s11 = sshll.u32 %s11883_s30, 4  ;;  %s11921_s11 = int_to_ptr.vmem [resolvable:$true] %s5773_s11 }
0x1545   : > { %v3283_v34 = vadd.f32 %v13201_v35, %v3235_v49  ;;  %v3303_v22 = vsel %vm845_vm12, %v13203_v48, %v13205_v37  ;;  %v3284_v11 = vadd.f32 %v3278_v62, %v3236_v53  ;;  %v3285_v9 = vadd.f32 %v3279_v54, %v3237_v3  ;;  %v13211_v48 = vld [vmem:[#allocation101_spill] sm:$0xff]  ;;  %s6328_s27 = scalar_lea.vmem %s11921_s11, 1024 }
0x1546   : > { %v3329_v45 = vsel %vm906_vm15, %v13207_v51, %v13206_v6  ;;  %v3330_v8 = vsel %vm906_vm15, %v13206_v6, %v13208_v39  ;;  %v10355_v41 = vpop.permute.xlu1 %4193  ;;  %v10357_v16 = vpop.permute.xlu0 %4191  ;;  %v3307_v56 = vadd.f32 %v13204_v61, %v3259_v28  ;;  %v3308_v18 = vadd.f32 %v3302_v42, %v3260_v50  ;;  %v13210_v28 = vld [vmem:[#allocation109_spill] sm:$0xff]  ;;  %v13213_v42 = vld [vmem:[#allocation128_spill] sm:$0xff]  ;;  %p6329_p11 = scmp.ne.s32.totalorder %s11921_s11, %s6328_s27 }
0x1547   : > { %v4647_v49 = vmul.f32 %v10045_v46, %v9333_v13  ;;  %v4646_v53 = vmul.f32 %v10033_v0, %v9333_v13  ;;  %v3309_v31 = vadd.f32 %v3303_v22, %v3261_v5  ;;  %v10365_v4 = vadd.f32 %v13207_v51, %v3283_v34  ;;  %v13212_v61 = vld [vmem:[#allocation105_spill] sm:$0xff]  ;;  %v13216_v51 = vld [vmem:[#allocation118_spill] sm:$0xff] }
0x1548   : > { %v3436_v3 = vsel %vm498_vm5, %v9482_v60, %v9484_v20  ;;  %4614 = vrot.lane.b32.xlu1 %v4607_v38, %s13005_s12  ;;  %4612 = vrot.lane.b32.xlu0 %v4606_v24, %s13005_s12  ;;  %v10372_v35 = vadd.f32 %v3329_v45, %v3284_v11  ;;  %v10374_v62 = vadd.f32 %v3330_v8, %v3285_v9  ;;  %v13214_v24 = vld [vmem:[#allocation142_spill] sm:$0xff]  ;;  %v13215_v22 = vld [vmem:[#allocation137_spill] sm:$0xff]  ;;  %p6330_p12 = pnand %p6329_p11, %p6555_p5 }
0x1549   : > { %v10378_v54 = vmul.f32 %v9474_v63, %v10115_v7  ;;  %v10382_v13 = vmul.f32 %v10214_v15, %v9375_v52  ;;  %v3353_v60 = vsel %vm906_vm15, %v13211_v48, %v13210_v28  ;;  %v3354_v38 = vsel %vm906_vm15, %v13210_v28, %v13212_v61  ;;  %v13217_v45 = vld [vmem:[#allocation121_spill] sm:$0xff]  ;;  %v13218_v8 = vld [vmem:[#allocation114_spill] sm:$0xff]  ;;  %v13219_v28 = vld [vmem:[#allocation148_spill] sm:$0xff] }
0x154a   : > { %v3503_v50 = vsel %vm573_vm10, %v13214_v24, %v13213_v42  ;;  %v10393_v5 = vpop.permute.xlu1 %4214  ;;  %v10395_v7 = vpop.permute.xlu0 %4195  ;;  %v4626_v34 = vmul.f32 %v10210_v33, %v9664_v12  ;;  %v10400_v37 = vadd.f32 %v13211_v48, %v3307_v56  ;;  %v3437_v11 = vsel %vm498_vm5, %v9484_v20, %v13215_v22  ;;  %v13220_v61 = vld [vmem:[#allocation113_spill] sm:$0xff]  ;;  %p6331_p13 = pneg %p6330_p12 }
0x154b   : > { %13209 = vst [vmem:[#allocation145_spill] sm:$0xff] %v10378_v54  ;;  %v3441_v9 = vadd.f32 %v3436_v3, %v10378_v54  ;;  %v10408_v6 = vmul.f32 %v10218_v23, %v9375_v52  ;;  %v3412_v39 = vsel %vm498_vm5, %v13217_v45, %v13216_v51  ;;  %v3378_v33 = vmul.f32 %v9474_v63, %v10121_v47 }
0x154c   : > { %v3570_v56 = vsel %vm633_vm11, %v9603_v2, %v13218_v8  ;;  %4632 = vrot.lane.b32.xlu1 %v4626_v34, %s13005_s12  ;;  %4616 = vrot.lane.b32.xlu0 %v9931_v26, %s13005_s12  ;;  %v10421_v20 = vadd.f32 %v3353_v60, %v3308_v18  ;;  %v10423_v52 = vadd.f32 %v3354_v38, %v3309_v31 }
0x154d   : > { %v3508_v3 = vadd.f32 %v3503_v50, %v3441_v9  ;;  %v3504_v48 = vsel %vm573_vm10, %v13213_v42, %v13219_v28  ;;  %v3413_v24 = vsel %vm498_vm5, %v13216_v51, %v13220_v61  ;;  %v3379_v2 = vmul.f32 %v9474_v63, %v10118_v55  ;;  %v13222_v9 = vld [vmem:[#allocation140_spill] sm:$0xff]  ;;  %v13266_v55 = vld [vmem:[#allocation51_spill] sm:$0xff] }
0x154e   : > { %v3442_v34 = vadd.f32 %v3437_v11, %v3378_v33  ;;  %v10433_v45 = vpop.permute.xlu1 %4218  ;;  %v10435_v26 = vpop.permute.xlu0 %4216  ;;  %v4627_v18 = vmul.f32 %v10191_v30, %v9664_v12  ;;  %v3417_v31 = vadd.f32 %v3412_v39, %v10141_v10  ;;  %v3571_v38 = vsel %vm633_vm11, %v13218_v8, %v9605_v14  ;;  %v13221_v11 = vld [vmem:[#allocation130_spill] sm:$0xff]  ;;  %v13224_v39 = vld [vmem:[#allocation156_spill] sm:$0xff]  ;;  %v13274_v10 = vld [vmem:[#allocation25_spill] sm:$0xff] }
0x154f   : > { %v3575_v60 = vadd.f32 %v3570_v56, %v3508_v3  ;;  %v10445_v42 = vmul.f32 %v10125_v21, %v9474_v63  ;;  %v3419_v50 = vadd.f32 %v13220_v61, %v10158_v29  ;;  %v3479_v51 = vsel %vm573_vm10, %v13222_v9, %v13221_v11  ;;  %v13223_v30 = vld [vmem:[#allocation138_spill] sm:$0xff] }
0x1550   : > { %v3509_v33 = vadd.f32 %v3504_v48, %v3442_v34  ;;  %4636 = vrot.lane.b32.xlu1 %v9937_v32, %s13005_s12  ;;  %4634 = vrot.lane.b32.xlu0 %v4627_v18, %s13005_s12  ;;  %v3418_v12 = vadd.f32 %v3413_v24, %v10154_v57  ;;  %v3480_v21 = vsel %vm573_vm10, %v13221_v11, %v13223_v30  ;;  %v13225_v48 = vld [vmem:[#allocation132_spill] sm:$0xff]  ;;  %v13226_v32 = vld [vmem:[#allocation150_spill] sm:$0xff]  ;;  %v13227_v11 = vld [vmem:[#allocation151_spill] sm:$0xff]  ;;  %s6332_s12 = sshll.u32 %s6460_s20, 4  ;;  %s6333_s12 = int_to_ptr.vmem [resolvable:$false] %s6332_s12 }
0x1551   : > { %v3620_v29 = vsel %vm459_vm9, %v13224_v39, %v9646_v36  ;;  %v3624_v8 = vadd.f32 %v13224_v39, %v3575_v60  ;;  %v3443_v56 = vadd.f32 %v13215_v22, %v3379_v2  ;;  %v3486_v3 = vadd.f32 %v13223_v30, %v3419_v50  ;;  %p6335_p0 = scmp.lt.s32.totalorder %s11921_s11, %s6333_s12 }
0x1552   : > { %v3546_v61 = vsel %vm633_vm11, %v13226_v32, %v13225_v48  ;;  %v3576_v34 = vadd.f32 %v3571_v38, %v3509_v33  ;;  %v10468_v57 = vpop.permute.xlu1 %4236  ;;  %v10470_v24 = vpop.permute.xlu0 %4234  ;;  %v3484_v18 = vadd.f32 %v3479_v51, %v3417_v31  ;;  %v3547_v9 = vsel %vm633_vm11, %v13225_v48, %v13227_v11  ;;  %v13231_v48 = vld [vmem:[#allocation73_spill] sm:$0xff] }
0x1553   : > { %v3694_v60 = vadd.f32 %v9654_v17, %v3624_v8  ;;  %v3689_v22 = vsel %vm735_vm13, %v9654_v17, %v9656_v58  ;;  %v3485_v2 = vadd.f32 %v3480_v21, %v3418_v12  ;;  %v3510_v50 = vadd.f32 %v13219_v28, %v3443_v56  ;;  %v13228_v8 = vld [vmem:[#allocation153_spill] sm:$0xff] }
0x1554   : > { %v3625_v30 = vadd.f32 %v3620_v29, %v3576_v34  ;;  %4654 = vrot.lane.b32.xlu1 %v4647_v49, %s13011_s28  ;;  %4652 = vrot.lane.b32.xlu0 %v4646_v53, %s13011_s28  ;;  %v3551_v38 = vadd.f32 %v3546_v61, %v3484_v18  ;;  %v3553_v31 = vadd.f32 %v13227_v11, %v3486_v3  ;;  %v13229_v17 = vld [vmem:[#allocation141_spill] sm:$0xff]  ;;  %v13230_v3 = vld [vmem:[#allocation47_spill] sm:$0xff] }
0x1555   : > { %v3756_v51 = vsel %vm796_vm14, %v9849_v25, %v9691_v27  ;;  %v3761_v33 = vadd.f32 %v9849_v25, %v3694_v60  ;;  %v3552_v39 = vadd.f32 %v3547_v9, %v3485_v2  ;;  %v3601_v12 = vsel %vm459_vm9, %v13229_v17, %v13228_v8  ;;  %v13232_v34 = vld [vmem:[#allocation77_spill] sm:$0xff]  ;;  %v13235_v2 = vld [vmem:[#allocation94_spill] sm:$0xff] }
0x1556   : > { %v3695_v28 = vadd.f32 %v3689_v22, %v3625_v30  ;;  %v10490_v21 = vpop.permute.xlu1 %4254  ;;  %v10492_v49 = vpop.permute.xlu0 %4238  ;;  %v4666_v53 = vmul.f32 %v10033_v0, %v9699_v1  ;;  %v3577_v29 = vadd.f32 %v9605_v14, %v3510_v50  ;;  %v3605_v56 = vadd.f32 %v13229_v17, %v3551_v38  ;;  %v13233_v9 = vld [vmem:[#allocation69_spill] sm:$0xff]  ;;  %v13236_v38 = vld [vmem:[#allocation166_spill] sm:$0xff]  ;;  %v13275_v0 = vld [vmem:[#allocation23_spill] sm:$0xff] }
0x1557   : > { %v3820_v25 = vsel %vm845_vm12, %v13231_v48, %v13230_v3  ;;  %v3825_v32 = vadd.f32 %v13231_v48, %v3761_v33  ;;  %v3607_v61 = vadd.f32 %v13228_v8, %v3553_v31  ;;  %v3690_v18 = vsel %vm735_vm13, %v9656_v58, %v13232_v34  ;;  %v13234_v22 = vld [vmem:[#allocation89_spill] sm:$0xff]  ;;  %v13237_v31 = vld [vmem:[#allocation160_spill] sm:$0xff]  ;;  %v13238_v58 = vld [vmem:[#allocation42_spill] sm:$0xff] }
0x1558   : > { %v3762_v11 = vadd.f32 %v3756_v51, %v3695_v28  ;;  %4672 = vrot.lane.b32.xlu1 %v4666_v53, %s13011_s28  ;;  %4656 = vrot.lane.b32.xlu0 %v13233_v9, %s13011_s28  ;;  %v3606_v14 = vadd.f32 %v3601_v12, %v3552_v39  ;;  %v3626_v60 = vadd.f32 %v9646_v36, %v3577_v29  ;;  %v13239_v28 = vld [vmem:[#allocation36_spill] sm:$0xff]  ;;  %v13241_v34 = vld [vmem:[#allocation54_spill] sm:$0xff] }
0x1559   : > { %v3887_v50 = vsel %vm906_vm15, %v13235_v2, %v13234_v22  ;;  %v3892_v30 = vadd.f32 %v13235_v2, %v3825_v32  ;;  %v3665_v33 = vsel %vm735_vm13, %v13237_v31, %v13236_v38  ;;  %v3757_v51 = vsel %vm796_vm14, %v9691_v27, %v13238_v58  ;;  %v13240_v48 = vld [vmem:[#allocation56_spill] sm:$0xff] }
0x155a   : > { %v3826_v8 = vadd.f32 %v3820_v25, %v3762_v11  ;;  %v10520_v17 = vpop.permute.xlu1 %4258  ;;  %v10522_v39 = vpop.permute.xlu0 %4256  ;;  %v4667_v36 = vmul.f32 %v10045_v46, %v9699_v1  ;;  %v3670_v12 = vadd.f32 %v13237_v31, %v3605_v56  ;;  %v3666_v53 = vsel %vm735_vm13, %v13236_v38, %v13239_v28  ;;  %v13242_v27 = vld [vmem:[#allocation32_spill] sm:$0xff]  ;;  %v13244_v1 = vld [vmem:[#allocation61_spill] sm:$0xff]  ;;  %v13276_v46 = vld [vmem:[#allocation14_spill] sm:$0xff] }
0x155b   : > { %v3696_v29 = vadd.f32 %v3690_v18, %v3626_v60  ;;  %v4729_v32 = vadd.f32 %v10400_v37, %v13240_v48  ;;  %v3732_v25 = vsel %vm796_vm14, %v13242_v27, %v13241_v34  ;;  %v13243_v11 = vld [vmem:[#allocation72_spill] sm:$0xff]  ;;  %v3671_v56 = vadd.f32 %v3665_v33, %v3606_v14  ;;  %v13245_v38 = vld [vmem:[#allocation37_spill] sm:$0xff] }
0x155c   : > { %v3821_v9 = vsel %vm845_vm12, %v13230_v3, %v13243_v11  ;;  %v3893_v2 = vadd.f32 %v3887_v50, %v3826_v8  ;;  %4676 = vrot.lane.b32.xlu1 %v13244_v1, %s13011_s28  ;;  %4674 = vrot.lane.b32.xlu0 %v4667_v36, %s13011_s28  ;;  %v3733_v18 = vsel %vm796_vm14, %v13241_v34, %v13245_v38  ;;  %v13246_v28 = vld [vmem:[#allocation117_spill] sm:$0xff]  ;;  %v13248_v11 = vld [vmem:[#allocation55_spill] sm:$0xff]  ;;  %s6334_s28 = scalar_lea.vmem %s6333_s12, 2048 }
0x155d   : > { %v3763_v37 = vadd.f32 %v3757_v51, %v3696_v29  ;;  %v4732_v60 = vadd.f32 %v4729_v32, %v3892_v30  ;;  %v3672_v31 = vadd.f32 %v3666_v53, %v3607_v61  ;;  %v4730_v58 = vadd.f32 %v10421_v20, %v13240_v48  ;;  %v13247_v36 = vld [vmem:[#allocation41_spill] sm:$0xff]  ;;  %v13249_v53 = vld [vmem:[#allocation35_spill] sm:$0xff]  ;;  %v13251_v32 = vld [vmem:[#allocation68_spill] sm:$0xff]  ;;  %p6336_p1 = scmp.lt.s32.totalorder %s6334_s28, %s6328_s27 }
0x155e   : > { %v3888_v3 = vsel %vm906_vm15, %v13234_v22, %v13246_v28  ;;  %v10549_v50 = vpop.permute.xlu1 %4276  ;;  %v10551_v8 = vpop.permute.xlu0 %4274  ;;  %v3737_v14 = vadd.f32 %v13242_v27, %v3670_v12  ;;  %v3738_v33 = vadd.f32 %v3732_v25, %v3671_v56  ;;  %v3796_v51 = vsel %vm845_vm12, %v13248_v11, %v13247_v36  ;;  %v13250_v12 = vld [vmem:[#allocation31_spill] sm:$0xff] }
0x155f   : > { %v3827_v30 = vadd.f32 %v3821_v9, %v3763_v37  ;;  %v3739_v61 = vadd.f32 %v3733_v18, %v3672_v31  ;;  %v3797_v20 = vsel %vm845_vm12, %v13247_v36, %v13249_v53  ;;  %v4733_v29 = vadd.f32 %v4730_v58, %v3893_v2  ;;  %v13252_v2 = vld [vmem:[#allocation20_spill] sm:$0xff]  ;;  %p6337_p2 = por %p6336_p1, %p6335_p0 }
0x1560   : > { %4697 = vrot.lane.b32.xlu1 %v10382_v13, %s13019_s21  ;;  %4695 = vrot.lane.b32.xlu0 %v10408_v6, %s13019_s21  ;;  %v3801_v22 = vadd.f32 %v13248_v11, %v3737_v14  ;;  %v3863_v34 = vsel %vm906_vm15, %v13251_v32, %v13250_v12  ;;  %v4735_v27 = vmax.f32 %v4732_v60, 0.0  ;;  %v3802_v9 = vadd.f32 %v3796_v51, %v3738_v33  ;;  %v13253_v6 = vld [vmem:[#allocation40_spill] sm:$0xff]  ;;  %v13256_v33 = vld [vmem:[#allocation67_spill] sm:$0xff] }
0x1561   : > { %v3894_v25 = vadd.f32 %v3888_v3, %v3827_v30  ;;  %v10570_v1 = vadd.f32 %v10365_v4, %v13240_v48  ;;  %v3908_v56 = vmul.f32 %v13252_v2, %v9474_v63  ;;  %v4709_v18 = vmul.f32 %v10218_v23, %v13253_v6  ;;  %v13254_v4 = vld [vmem:[#allocation60_spill] sm:$0xff]  ;;  %v13258_v23 = vld [vmem:[#allocation57_spill] sm:$0xff]  ;;  %v13264_v2 = vld [vmem:[#allocation50_spill] sm:$0xff]  ;;  %p6338_p3 = pnand %p6337_p2, %p6331_p13 }
0x1562   : > { %v10574_v13 = vpop.permute.xlu1 %4294  ;;  %v10576_v38 = vpop.permute.xlu0 %4278  ;;  %v10580_v37 = vadd.f32 %v3797_v20, %v3739_v61  ;;  %v10583_v60 = vadd.f32 %v13251_v32, %v3801_v22  ;;  %v4731_v31 = vadd.f32 %v10423_v52, %v13240_v48  ;;  %v13255_v58 = vld [vmem:[#allocation116_spill] sm:$0xff]  ;;  %v10590_v3 = vadd.f32 %v3863_v34, %v3802_v9  ;;  %v13259_v61 = vld [vmem:[#allocation63_spill] sm:$0xff]  ;;  %v13265_v63 = vld [vmem:[#allocation49_spill] sm:$0xff] }
0x1563   : > { %v3923_v28 = vsel %vm498_vm5, %v13255_v58, %v13254_v4  ;;  %v4736_v14 = vmax.f32 %v4733_v29, 0.0  ;;  %v13257_v36 = vld [vmem:[#allocation76_spill] sm:$0xff]  ;;  %v4710_v51 = vmul.f32 %v10214_v15, %v13253_v6  ;;  %v4738_v52 = vmin.f32 %v4735_v27, 6.0  ;;  %v13261_v22 = vld [vmem:[#allocation91_spill] sm:$0xff]  ;;  %v13262_v29 = vld [vmem:[#allocation10_spill] sm:$0xff] }
0x1564   : > { %v3943_v11 = vsel %vm498_vm5, %v13257_v36, %v13256_v33  ;;  %4715 = vrot.lane.b32.xlu1 %v4709_v18, %s13019_s21  ;;  %4699 = vrot.lane.b32.xlu0 %v13258_v23, %s13019_s21  ;;  %v4734_v30 = vadd.f32 %v4731_v31, %v3894_v25  ;;  %v13260_v53 = vld [vmem:[#allocation168_spill] sm:$0xff]  ;;  %v3986_v32 = vsel %vm573_vm10, %v13262_v29, %v13261_v22  ;;  %v13267_v6 = vld [vmem:[#allocation22_spill] sm:$0xff] }
0x1565   : > { %v3962_v20 = vsel %vm498_vm5, %v13260_v53, %v13259_v61  ;;  %v13263_v34 = vld [vmem:[#allocation52_spill] sm:$0xff]  ;;  %v3928_v18 = vadd.f32 %v3923_v28, %v13264_v2  ;;  %v3949_v23 = vadd.f32 %v13256_v33, %v13265_v63  ;;  %v3963_v15 = vsel %vm498_vm5, %v13259_v61, %v13266_v55  ;;  %v13268_v53 = vld [vmem:[#allocation70_spill] sm:$0xff]  ;;  %v13272_v2 = vld [vmem:[#allocation39_spill] sm:$0xff] }
0x1566   : > { %v3929_v9 = vadd.f32 %v13254_v4, %v13263_v34  ;;  %v10614_v27 = vpop.permute.xlu1 %4298  ;;  %v10616_v25 = vpop.permute.xlu0 %4296  ;;  %v3948_v31 = vadd.f32 %v3943_v11, %v13267_v6  ;;  %v13269_v29 = vld [vmem:[#allocation62_spill] sm:$0xff]  ;;  %v13270_v4 = vld [vmem:[#allocation112_spill] sm:$0xff]  ;;  %v3967_v61 = vadd.f32 %v3962_v20, %v10378_v54  ;;  %v4739_v11 = vmin.f32 %v4736_v14, 6.0  ;;  %v10642_v20 = vld [vmem:[%s12002_s7] sm:$0xff] }
0x1567   : > { %v4006_v36 = vsel %vm573_vm10, %v13269_v29, %v13268_v53  ;;  %v13271_v34 = vld [vmem:[#allocation124_spill] sm:$0xff]  ;;  %v13273_v63 = vld [vmem:[#allocation66_spill] sm:$0xff]  ;;  %v3991_v47 = vadd.f32 %v3986_v32, %v3928_v18  ;;  %v3969_v6 = vadd.f32 %v13266_v55, %v10445_v42  ;;  %v3968_v29 = vadd.f32 %v3963_v15, %v3908_v56  ;;  %13277 = vst [vmem:[#allocation100_spill] sm:$0xff] %v10642_v20  ;;  %v13278_v42 = vld [vmem:[#allocation59_spill] sm:$0xff] }
0x1568   : > { %v4025_v28 = vsel %vm573_vm10, %v13271_v34, %v13270_v4  ;;  %v4049_v33 = vsel %vm633_vm11, %v13273_v63, %v13272_v2  ;;  %v3992_v58 = vadd.f32 %v13261_v22, %v3929_v9  ;;  %4719 = vrot.lane.b32.xlu1 %v13274_v10, %s13019_s21  ;;  %4717 = vrot.lane.b32.xlu0 %v4710_v51, %s13019_s21  ;;  %v13279_v9 = vld [vmem:[#allocation12_spill] sm:$0xff]  ;;  %v13280_v18 = vld [vmem:[#allocation71_spill] sm:$0xff] }
0x1569   : > { %v4012_v34 = vadd.f32 %v13268_v53, %v3949_v23  ;;  %v4104_v63 = vsel %vm459_vm9, %v13276_v46, %v13275_v0  ;;  %v4011_v22 = vadd.f32 %v4006_v36, %v3948_v31  ;;  %v4030_v10 = vadd.f32 %v4025_v28, %v3967_v61  ;;  %v13281_v15 = vld [vmem:[#allocation96_spill] sm:$0xff]  ;;  %v13282_v31 = vld [vmem:[#allocation19_spill] sm:$0xff]  ;;  %v13283_v53 = vld [vmem:[#allocation17_spill] sm:$0xff] }
0x156a   : > { %v4055_v51 = vadd.f32 %v13272_v2, %v3992_v58  ;;  %v4054_v14 = vadd.f32 %v4049_v33, %v3991_v47  ;;  %v10645_v32 = vpop.permute.xlu1 %4316  ;;  %v10647_v55 = vpop.permute.xlu0 %4314  ;;  %v4026_v56 = vsel %vm573_vm10, %v13270_v4, %v13278_v42  ;;  %v4069_v23 = vsel %vm633_vm11, %v13280_v18, %v13279_v9  ;;  %v13284_v61 = vld [vmem:[#allocation158_spill] sm:$0xff]  ;;  %v13285_v54 = vld [vmem:[#allocation92_spill] sm:$0xff] }
0x156b   : > { %v4157_v36 = vsel %vm735_vm13, %v13281_v15, %v10268_v43  ;;  %v4158_v47 = vsel %vm735_vm13, %v10268_v43, %v10299_v40  ;;  %v4737_v58 = vmax.f32 %v4734_v30, 0.0  ;;  %v4088_v28 = vsel %vm633_vm11, %v13283_v53, %v13282_v31 }
0x156c   : > { %v4110_v2 = vadd.f32 %v13275_v0, %v4055_v51  ;;  %v4109_v4 = vadd.f32 %v4104_v63, %v4054_v14  ;;  %4910 = vperm.xlu1 %6097, %v10642_v20   ;;  %4840 = vperm.xlu0 %6093, %v10642_v20   ;;  %v4032_v33 = vadd.f32 %v13278_v42, %v3969_v6 }
0x156d   : > { %v4119_v15 = vsel %vm459_vm9, %v13285_v54, %v13284_v61  ;;  %v4220_v43 = vsel %vm796_vm14, %v10393_v5, %v10435_v26  ;;  %v4221_v40 = vsel %vm796_vm14, %v10435_v26, %v10433_v45  ;;  %v4031_v0 = vadd.f32 %v4026_v56, %v3968_v29 }
0x156e   : > { %v4074_v30 = vadd.f32 %v4069_v23, %v4011_v22  ;;  %v4163_v63 = vadd.f32 %v4157_v36, %v4109_v4  ;;  %v4164_v51 = vadd.f32 %v4158_v47, %v4110_v2  ;;  %v10677_v14 = vpop.permute.xlu1 %4337  ;;  %v4319_v53 = vpop.permute.xlu0 %4318  ;;  %v4093_v6 = vadd.f32 %v4088_v28, %v4030_v10  ;;  %v13286_v23 = vld [vmem:[#allocation16_spill] sm:$0xff] }
0x156f   : > { %v4177_v42 = vsel %vm735_vm13, %v10297_v59, %v10324_v44  ;;  %v4280_v20 = vsel %vm845_vm12, %v10551_v8, %v10549_v50  ;;  %v4281_v45 = vsel %vm845_vm12, %v10549_v50, %v10576_v38  ;;  %v4740_v10 = vmin.f32 %v4737_v58, 6.0  ;;  %v13289_v38 = vld [vmem:[#allocation144_spill] sm:$0xff] }
0x1570   : > { %v4124_v26 = vadd.f32 %v4119_v15, %v4074_v30  ;;  %v4226_v29 = vadd.f32 %v4220_v43, %v4163_v63  ;;  %v4227_v22 = vadd.f32 %v4221_v40, %v4164_v51  ;;  %4786 = vrot.lane.b32.xlu1 %v4738_v52, %s6448_s18  ;;  %4788 = vrot.lane.b32.xlu0 %v4739_v11, %s6448_s18  ;;  %v13287_v28 = vmov 2  }
0x1571   : > { %v4075_v56 = vadd.f32 %v13279_v9, %v4012_v34  ;;  %v4089_v36 = vsel %vm633_vm11, %v13282_v31, %v13286_v23  ;;  %v4240_v47 = vsel %vm796_vm14, %v10470_v24, %v10468_v57  ;;  %6098 = vset.pattern.permute.xlu1 %v13287_v28  ;;  %v13288_v50 = vmov 3   ;;  %v13321_v28 = vld [vmem:[#allocation27_spill] sm:$0xff] }
0x1572   : > { %6099 = vset.pattern.permute.xlu0 %v13288_v50  ;;  %v4138_v15 = vadd.f32 %v13289_v38, %v4093_v6  ;;  %v4183_v52 = vadd.f32 %v4177_v42, %v4124_v26  ;;  %v4286_v2 = vadd.f32 %v4280_v20, %v4226_v29  ;;  %v4287_v11 = vadd.f32 %v4281_v45, %v4227_v22  ;;  %v4342_v58 = vpop.permute.xlu1 %4341  ;;  %v4340_v4 = vpop.permute.xlu0 %4339  ;;  %v13319_v50 = vld [vmem:[#allocation86_spill] sm:$0xff] }
0x1573   : > { %v4178_v34 = vsel %vm735_vm13, %v10324_v44, %v10322_v19  ;;  %v4300_v9 = vsel %vm845_vm12, %v10574_v13, %v10616_v25  ;;  %v4343_v31 = vsel %vm906_vm15, %v10677_v14, %v4340_v4  ;;  %v4344_v43 = vsel %vm906_vm15, %v4340_v4, %v4342_v58  ;;  %v13291_v44 = vld [vmem:[#allocation169_spill] sm:$0xff] }
0x1574   : > { %v4125_v40 = vadd.f32 %v13284_v61, %v4075_v56  ;;  %v4246_v30 = vadd.f32 %v4240_v47, %v4183_v52  ;;  %v10710_v20 = vadd.f32 %v4343_v31, %v4286_v2  ;;  %v10712_v63 = vadd.f32 %v4344_v43, %v4287_v11  ;;  %4790 = vrot.lane.b32.xlu1 %v4740_v10, %s6448_s18  ;;  %v13293_v47 = vld [vmem:[#allocation88_spill] sm:$0xff] }
0x1575   : > { %v4095_v19 = vadd.f32 %v13286_v23, %v4032_v33  ;;  %v4134_v51 = vsel %vm459_vm9, %v13289_v38, %v13291_v44  ;;  %v4202_v6 = vadd.f32 %v10357_v16, %v4138_v15  ;;  %v4241_v42 = vsel %vm796_vm14, %v10468_v57, %v10492_v49 }
0x1576   : > { %13290 = vst [vmem:[#allocation83_spill] sm:$0xff] %v10712_v63  ;;  %v4094_v61 = vadd.f32 %v4089_v36, %v4031_v0  ;;  %v4184_v45 = vadd.f32 %v4178_v34, %v4125_v40  ;;  %v4197_v26 = vsel %vm735_vm13, %v10357_v16, %v10355_v41  ;;  %v4306_v29 = vadd.f32 %v4300_v9, %v4246_v30  ;;  %v4360_v22 = vpop.permute.xlu1 %4359  ;;  %v10726_v10 = vpop.permute.xlu0 %4357 }
0x1577   : > { %v4198_v33 = vsel %vm735_vm13, %v10355_v41, %v10395_v7  ;;  %v4265_v56 = vadd.f32 %v10490_v21, %v4202_v6  ;;  %v4301_v57 = vsel %vm845_vm12, %v10616_v25, %v10614_v27  ;;  %v4363_v49 = vsel %vm906_vm15, %v10726_v10, %v4360_v22 }
0x1578   : > { %v4140_v0 = vadd.f32 %v13291_v44, %v4095_v19  ;;  %v4139_v16 = vadd.f32 %v4134_v51, %v4094_v61  ;;  %v4247_v23 = vadd.f32 %v4241_v42, %v4184_v45  ;;  %v10738_v36 = vadd.f32 %v4363_v49, %v4306_v29 }
0x1579   : > { %v3864_v38 = vsel %vm906_vm15, %v13250_v12, %v13293_v47  ;;  %v4260_v41 = vsel %vm796_vm14, %v10490_v21, %v10522_v39  ;;  %v4261_v7 = vsel %vm796_vm14, %v10522_v39, %v10520_v17  ;;  %v4325_v27 = vadd.f32 %v10647_v55, %v4265_v56  ;;  %v13295_v47 = vld [vmem:[#allocation28_spill] sm:$0xff] }
0x157a   : > { %13292 = vst [vmem:[#allocation102_spill] sm:$0xff] %v10738_v36  ;;  %v4744_v25 = vadd.f32 %v10570_v1, %v10583_v60  ;;  %v4203_v15 = vadd.f32 %v4197_v26, %v4139_v16  ;;  %v4204_v52 = vadd.f32 %v4198_v33, %v4140_v0  ;;  %v4307_v2 = vadd.f32 %v4301_v57, %v4247_v23  ;;  %v4378_v11 = vpop.permute.xlu1 %4377  ;;  %v4362_v58 = vpop.permute.xlu0 %4361 }
0x157b   : > { %v4320_v12 = vsel %vm845_vm12, %v10647_v55, %v10645_v32  ;;  %v4321_v21 = vsel %vm845_vm12, %v10645_v32, %v4319_v53  ;;  %v4388_v4 = vadd.f32 %v4378_v11, %v4325_v27  ;;  %v4364_v17 = vsel %vm906_vm15, %v4360_v22, %v4362_v58  ;;  %v13297_v27 = vld [vmem:[#allocation164_spill] sm:$0xff] }
0x157c   : > { %v3870_v39 = vadd.f32 %v3864_v38, %v10580_v37  ;;  %v4266_v34 = vadd.f32 %v4260_v41, %v4203_v15  ;;  %v4267_v9 = vadd.f32 %v4261_v7, %v4204_v52  ;;  %v10759_v1 = vadd.f32 %v4364_v17, %v4307_v2  ;;  %v13296_v38 = vld [vmem:[#allocation161_spill] sm:$0xff] }
0x157d   : > { %v4747_v60 = vadd.f32 %v4744_v25, %v4388_v4  ;;  %v4742_v31 = vadd.f32 %v10372_v35, %v13240_v48  ;;  %v4743_v43 = vadd.f32 %v10374_v62, %v13240_v48  ;;  %v10781_v41 = vmul.f32 %v13296_v38, %v13295_v47  ;;  %v13298_v25 = vld [vmem:[#allocation87_spill] sm:$0xff]  ;;  %v13299_v52 = vld [vmem:[#allocation21_spill] sm:$0xff]  ;;  %v13308_v38 = vld [vmem:[#allocation116_spill] sm:$0xff] }
0x157e   : > { %13294 = vst [vmem:[#allocation103_spill] sm:$0xff] %v10759_v1  ;;  %v4326_v55 = vadd.f32 %v4320_v12, %v4266_v34  ;;  %v4327_v40 = vadd.f32 %v4321_v21, %v4267_v9  ;;  %v4382_v30 = vpop.permute.xlu1 %4381  ;;  %v4380_v32 = vpop.permute.xlu0 %4379  ;;  %v10790_v15 = vmul.f32 %v13298_v25, %v13297_v27  ;;  %v13300_v12 = vld [vmem:[#allocation133_spill] sm:$0xff] }
0x157f   : > { %v4750_v53 = vmax.f32 %v4747_v60, 0.0  ;;  %v4383_v19 = vsel %vm906_vm15, %v4378_v11, %v4380_v32  ;;  %v4384_v37 = vsel %vm906_vm15, %v4380_v32, %v4382_v30  ;;  %v4745_v44 = vadd.f32 %v4742_v31, %v10590_v3  ;;  %v13309_v27 = vld [vmem:[#allocation93_spill] sm:$0xff] }
0x1580   : > { %v4746_v51 = vadd.f32 %v4743_v43, %v3870_v39  ;;  %v4389_v6 = vadd.f32 %v4383_v19, %v4326_v55  ;;  %v4390_v42 = vadd.f32 %v4384_v37, %v4327_v40  ;;  %v4399_v21 = vmul.f32 %v10781_v41, %v13300_v12  ;;  %v13322_v1 = vld [vmem:[#allocation125_spill] sm:$0xff] }
0x1581   : > { %v4753_v61 = vmin.f32 %v4750_v53, 6.0  ;;  %v4398_v17 = vmul.f32 %v10790_v15, %v13300_v12  ;;  %v3922_v25 = vsel %vm498_vm5, %v13309_v27, %v13308_v38  ;;  %v13320_v27 = vld [vmem:[#allocation10_spill] sm:$0xff] }
0x1582   : > { %v4748_v45 = vadd.f32 %v4745_v44, %v4389_v6  ;;  %v4749_v35 = vadd.f32 %v4746_v51, %v4390_v42  ;;  %v4412_v26 = vpop.permute.xlu1 %4411  ;;  %v4410_v29 = vpop.permute.xlu0 %4409 }
0x1583   : > { %v4415_v62 = vsel %vm498_vm5, %v4410_v29, %v4412_v26  ;;  %4799 = vrot.lane.b32.xlu0 %v4753_v61, %s6448_s18 }
0x1584   : > { %v4751_v22 = vmax.f32 %v4748_v45, 0.0  ;;  %v4752_v33 = vmax.f32 %v4749_v35, 0.0  ;;  %v4420_v2 = vadd.f32 %v4415_v62, %v13299_v52 }
0x1586   : > { %v4754_v56 = vmin.f32 %v4751_v22, 6.0  ;;  %v4755_v57 = vmin.f32 %v4752_v33, 6.0  ;;  %v10770_v49 = vpop.permute.xlu1 %4429  ;;  %v4414_v0 = vpop.permute.xlu0 %4413  ;;  %v13304_v33 = vld [vmem:[#allocation106_spill] sm:$0xff] }
0x1587   : > { %v4416_v3 = vsel %vm498_vm5, %v4412_v26, %v4414_v0  ;;  %v4422_v34 = vadd.f32 %v4414_v0, %v4399_v21  ;;  %v13306_v0 = vld [vmem:[#allocation143_spill] sm:$0xff] }
0x1588   : > { %4803 = vrot.lane.b32.xlu0 %v4755_v57, %s6448_s18  ;;  %4801 = vrot.lane.b32.xlu1 %v4754_v56, %s6448_s18  ;;  %v4421_v9 = vadd.f32 %v4416_v3, %v4398_v17  ;;  %v13305_v56 = vld [vmem:[#allocation139_spill] sm:$0xff]  ;;  %v13307_v3 = vld [vmem:[#allocation110_spill] sm:$0xff]  ;;  %v13314_v17 = vld [vmem:[#allocation136_spill] sm:$0xff]  ;;  %v3460_v36 = vsel %vm573_vm10, %v13306_v0, %v13322_v1 }
0x1589   : > { %v3392_v57 = vsel %vm498_vm5, %v13305_v56, %v13304_v33  ;;  %v3459_v47 = vsel %vm573_vm10, %v13307_v3, %v13306_v0  ;;  %v13318_v3 = vld [vmem:[#allocation76_spill] sm:$0xff] }
0x158a   : > { %v10775_v16 = vpop.permute.xlu1 %4433  ;;  %v10777_v23 = vpop.permute.xlu0 %4431  ;;  %v3942_v38 = vsel %vm498_vm5, %v13319_v50, %v13318_v3  ;;  %v13326_v50 = vld [vmem:[#allocation66_spill] sm:$0xff] }
0x158b   : > { %v10786_v7 = vsel %vm498_vm5, %v10777_v23, %v10775_v16  ;;  %v13327_v3 = vld [vmem:[#allocation46_spill] sm:$0xff]  ;;  %v3947_v0 = vadd.f32 %v3942_v38, %v13299_v52 }
0x158e   : > { %v4455_v11 = vpop.permute.xlu1 %4454  ;;  %v4453_v58 = vpop.permute.xlu0 %4452 }
0x158f   : > { %v4458_v4 = vsel %vm573_vm10, %v4453_v58, %v4455_v11  ;;  %v13311_v58 = vld [vmem:[#allocation15_spill] sm:$0xff] }
0x1590   : > { %v10798_v39 = vadd.f32 %v4458_v4, %v4420_v2  ;;  %v13310_v2 = vld [vmem:[#allocation99_spill] sm:$0xff]  ;;  %v3397_v12 = vadd.f32 %v3392_v57, %v13311_v58  ;;  %v3927_v63 = vadd.f32 %v3922_v25, %v13311_v58 }
0x1592   : > { %v10800_v60 = vpop.permute.xlu1 %4472  ;;  %v4457_v31 = vpop.permute.xlu0 %4456  ;;  %v3464_v57 = vadd.f32 %v3459_v47, %v3397_v12 }
0x1593   : > { %v4459_v43 = vsel %vm573_vm10, %v4455_v11, %v4457_v31  ;;  %v10803_v55 = vadd.f32 %v4457_v31, %v4422_v34  ;;  %v3393_v11 = vsel %vm498_vm5, %v13304_v33, %v13310_v2  ;;  %v13315_v34 = vld [vmem:[#allocation18_spill] sm:$0xff]  ;;  %v13316_v31 = vld [vmem:[#allocation149_spill] sm:$0xff]  ;;  %v3985_v33 = vsel %vm573_vm10, %v13321_v28, %v13320_v27  ;;  %v13328_v28 = vld [vmem:[#allocation131_spill] sm:$0xff] }
0x1594   : > { %v10805_v40 = vadd.f32 %v4459_v43, %v4421_v9  ;;  %v3368_v9 = vmul.f32 %v13315_v34, %v13314_v17  ;;  %v13317_v43 = vld [vmem:[#allocation129_spill] sm:$0xff]  ;;  %v3527_v47 = vsel %vm633_vm11, %v13316_v31, %v13328_v28  ;;  %v3990_v25 = vadd.f32 %v3985_v33, %v3927_v63  ;;  %v13332_v33 = vld [vmem:[#allocation159_spill] sm:$0xff] }
0x1595   : > { %v3526_v56 = vsel %vm633_vm11, %v13317_v43, %v13316_v31  ;;  %v13323_v34 = vld [vmem:[#allocation13_spill] sm:$0xff]  ;;  %v13324_v43 = vld [vmem:[#allocation62_spill] sm:$0xff] }
0x1596   : > { %v10807_v30 = vpop.permute.xlu1 %4476  ;;  %v10809_v32 = vpop.permute.xlu0 %4474  ;;  %v3531_v12 = vadd.f32 %v3526_v56, %v3464_v57  ;;  %v13333_v57 = vld [vmem:[#allocation157_spill] sm:$0xff] }
0x159a   : > { %v10811_v53 = vpop.permute.xlu1 %4497  ;;  %v10813_v19 = vpop.permute.xlu0 %4495 }
0x159e   : > { %v10815_v37 = vpop.permute.xlu1 %4515  ;;  %v10817_v44 = vpop.permute.xlu0 %4499 }
0x15a2   : > { %v10819_v51 = vpop.permute.xlu1 %4519  ;;  %v10821_v6 = vpop.permute.xlu0 %4517 }
0x15a6   : > { %v10823_v42 = vpop.permute.xlu1 %4535  ;;  %v10825_v61 = vpop.permute.xlu0 %4533 }
0x15aa   : > { %v10827_v45 = vpop.permute.xlu1 %4550  ;;  %v10829_v35 = vpop.permute.xlu0 %4548 }
0x15ab   : > { %13301 = vst [vmem:[#allocation155_spill] sm:$0xff] %v10827_v45 }
0x15ae   : > { %v10831_v26 = vpop.permute.xlu1 %4571  ;;  %v10833_v29 = vpop.permute.xlu0 %4569 }
0x15b2   : > { %v10835_v62 = vpop.permute.xlu1 %4589  ;;  %v10837_v22 = vpop.permute.xlu0 %4573 }
0x15b3   : > { %13302 = vst [vmem:[#allocation147_spill] sm:$0xff] %v10835_v62  ;;  %13303 = vst [vmem:[#allocation107_spill] sm:$0xff] %v10837_v22  ;;  %v13325_v62 = vld [vmem:[#allocation80_spill] sm:$0xff]  ;;  %v4048_v22 = vsel %vm633_vm11, %v13327_v3, %v13326_v50  ;;  %v13331_v50 = vld [vmem:[#allocation146_spill] sm:$0xff] }
0x15b4   : > { %v4005_v45 = vsel %vm573_vm10, %v13325_v62, %v13324_v43  ;;  %v13329_v62 = vld [vmem:[#allocation44_spill] sm:$0xff]  ;;  %v4053_v52 = vadd.f32 %v4048_v22, %v3990_v25  ;;  %v13334_v22 = vld [vmem:[#allocation165_spill] sm:$0xff] }
0x15b5   : > { %v4068_v27 = vsel %vm633_vm11, %v13329_v62, %v13280_v18  ;;  %v4010_v56 = vadd.f32 %v4005_v45, %v3947_v0  ;;  %v13336_v0 = vld [vmem:[#allocation24_spill] sm:$0xff] }
0x15b6   : > { %v10852_v21 = vpop.permute.xlu1 %4593  ;;  %v10854_v4 = vpop.permute.xlu0 %4591  ;;  %v4108_v18 = vadd.f32 %v13276_v46, %v4053_v52  ;;  %v13337_v46 = vld [vmem:[#allocation96_spill] sm:$0xff]  ;;  %v13340_v52 = vld [vmem:[#allocation29_spill] sm:$0xff] }
0x15b7   : > { %13312 = vst [vmem:[#allocation152_spill] sm:$0xff] %v10852_v21  ;;  %13313 = vst [vmem:[#allocation119_spill] sm:$0xff] %v10854_v4  ;;  %v3369_v21 = vmul.f32 %v13323_v34, %v13314_v17  ;;  %v3398_v4 = vadd.f32 %v3393_v11, %v3368_v9  ;;  %v13330_v34 = vld [vmem:[#allocation134_spill] sm:$0xff] }
0x15b8   : > { %v3590_v43 = vadd.f32 %v13330_v34, %v3531_v12  ;;  %v3586_v31 = vsel %vm459_vm9, %v13330_v34, %v13331_v50  ;;  %v4162_v62 = vadd.f32 %v13337_v46, %v4108_v18  ;;  %v13342_v18 = vld [vmem:[#allocation33_spill] sm:$0xff] }
0x15b9   : > { %v3399_v11 = vadd.f32 %v13310_v2, %v3369_v21  ;;  %v3465_v9 = vadd.f32 %v3460_v36, %v3398_v4  ;;  %v3645_v2 = vsel %vm735_vm13, %v13333_v57, %v13332_v33  ;;  %v4073_v21 = vadd.f32 %v4068_v27, %v4010_v56 }
0x15ba   : > { %v10883_v58 = vpop.permute.xlu1 %4614  ;;  %v10885_v17 = vpop.permute.xlu0 %4612  ;;  %v3650_v36 = vadd.f32 %v13333_v57, %v3590_v43  ;;  %v13338_v43 = vld [vmem:[#allocation30_spill] sm:$0xff] }
0x15bb   : > { %v3466_v63 = vadd.f32 %v13322_v1, %v3399_v11  ;;  %v3532_v38 = vadd.f32 %v3527_v47, %v3465_v9  ;;  %v3646_v1 = vsel %vm735_vm13, %v13332_v33, %v13334_v22  ;;  %v13335_v47 = vld [vmem:[#allocation81_spill] sm:$0xff]  ;;  %v4123_v9 = vadd.f32 %v13285_v54, %v4073_v21 }
0x15bc   : > { %v3712_v25 = vsel %vm796_vm14, %v13336_v0, %v13335_v47  ;;  %v3717_v11 = vadd.f32 %v13336_v0, %v3650_v36  ;;  %v4225_v33 = vadd.f32 %v10393_v5, %v4162_v62  ;;  %v13341_v36 = vld [vmem:[#allocation170_spill] sm:$0xff]  ;;  %v13343_v0 = vld [vmem:[#allocation84_spill] sm:$0xff] }
0x15bd   : > { %v3533_v12 = vadd.f32 %v13328_v28, %v3466_v63  ;;  %v3591_v45 = vadd.f32 %v3586_v31, %v3532_v38  ;;  %v3713_v28 = vsel %vm796_vm14, %v13335_v47, %v13338_v43  ;;  %v13339_v31 = vld [vmem:[#allocation171_spill] sm:$0xff]  ;;  %v4182_v38 = vadd.f32 %v10297_v59, %v4123_v9 }
0x15be   : > { %v10901_v4 = vpop.permute.xlu1 %4632  ;;  %v10903_v3 = vpop.permute.xlu0 %4616  ;;  %v3781_v56 = vadd.f32 %v13339_v31, %v3717_v11  ;;  %v3776_v63 = vsel %vm845_vm12, %v13339_v31, %v13340_v52  ;;  %v3777_v21 = vsel %vm845_vm12, %v13340_v52, %v13341_v36  ;;  %v4285_v22 = vadd.f32 %v10551_v8, %v4225_v33  ;;  %v13344_v11 = vld [vmem:[#allocation58_spill] sm:$0xff] }
0x15bf   : > { %v3592_v27 = vadd.f32 %v13331_v50, %v3533_v12  ;;  %v3651_v34 = vadd.f32 %v3645_v2, %v3591_v45  ;;  %v4245_v45 = vadd.f32 %v10470_v24, %v4182_v38  ;;  %v3843_v5 = vsel %vm906_vm15, %v13342_v18, %v13343_v0 }
0x15c0   : > { %v3848_v12 = vadd.f32 %v13342_v18, %v3781_v56  ;;  %v4348_v9 = vadd.f32 %v10677_v14, %v4285_v22  ;;  %v4435_v24 = vsel %vm498_vm5, %v10770_v49, %v10777_v23  ;;  %v4501_v8 = vsel %vm633_vm11, %v10813_v19, %v10811_v53 }
0x15c1   : > { %v3652_v50 = vadd.f32 %v3646_v1, %v3592_v27  ;;  %v3718_v2 = vadd.f32 %v3712_v25, %v3651_v34  ;;  %v3844_v1 = vsel %vm906_vm15, %v13343_v0, %v13344_v11  ;;  %v4305_v25 = vadd.f32 %v10574_v13, %v4245_v45  ;;  %v13345_v34 = vld [vmem:[#allocation11_spill] sm:$0xff] }
0x15c2   : > { %v10925_v54 = vpop.permute.xlu1 %4636  ;;  %v10927_v57 = vpop.permute.xlu0 %4634  ;;  %v4402_v43 = vmul.f32 %v10781_v41, %v13345_v34  ;;  %v4502_v13 = vsel %vm633_vm11, %v10811_v53, %v10817_v44  ;;  %v4756_v14 = vadd.f32 %v3848_v12, %v13240_v48  ;;  %v4478_v19 = vsel %vm573_vm10, %v10800_v60, %v10809_v32  ;;  %v13346_v41 = vld [vmem:[#allocation145_spill] sm:$0xff] }
0x15c3   : > { %v3719_v47 = vadd.f32 %v3713_v28, %v3652_v50  ;;  %v3782_v59 = vadd.f32 %v3776_v63, %v3718_v2  ;;  %v4401_v28 = vmul.f32 %v10790_v15, %v13345_v34  ;;  %v4368_v23 = vadd.f32 %v10726_v10, %v4305_v25  ;;  %v13350_v34 = vld [vmem:[#allocation119_spill] sm:$0xff] }
0x15c4   : > { %v4440_v56 = vadd.f32 %v4435_v24, %v13346_v41  ;;  %v4506_v15 = vadd.f32 %v4501_v8, %v10798_v39  ;;  %v4537_v53 = vsel %vm459_vm9, %v10825_v61, %v10823_v42  ;;  %v4771_v52 = vadd.f32 %v4348_v9, %v13240_v48  ;;  %v13349_v24 = vld [vmem:[#allocation147_spill] sm:$0xff] }
0x15c5   : > { %v3783_v27 = vadd.f32 %v3777_v21, %v3719_v47  ;;  %v10957_v49 = vadd.f32 %v3843_v5, %v3782_v59  ;;  %v4772_v63 = vadd.f32 %v10710_v20, %v13240_v48  ;;  %v4507_v10 = vadd.f32 %v4502_v13, %v10805_v40  ;;  %v13347_v5 = vld [vmem:[#allocation107_spill] sm:$0xff] }
0x15c6   : > { %v4655_v46 = vpop.permute.xlu1 %4654  ;;  %v4653_v62 = vpop.permute.xlu0 %4652  ;;  %v4521_v60 = vsel %vm633_vm11, %v10815_v37, %v10821_v6  ;;  %v4479_v39 = vsel %vm573_vm10, %v10809_v32, %v10807_v30  ;;  %v4483_v50 = vadd.f32 %v4478_v19, %v4440_v56  ;;  %v4541_v2 = vadd.f32 %v10825_v61, %v4506_v15 }
0x15c7   : > { %v10963_v31 = vadd.f32 %v3844_v1, %v3783_v27  ;;  %v4575_v36 = vsel %vm735_vm13, %v10833_v29, %v10831_v26  ;;  %v4759_v20 = vadd.f32 %v4756_v14, %v4368_v23  ;;  %v4442_v40 = vadd.f32 %v10775_v16, %v4402_v43  ;;  %v13351_v43 = vld [vmem:[#allocation152_spill] sm:$0xff] }
0x15c8   : > { %v4441_v21 = vadd.f32 %v10786_v7, %v4401_v28  ;;  %v4542_v18 = vadd.f32 %v4537_v53, %v4507_v10  ;;  %v4522_v37 = vsel %vm633_vm11, %v10821_v6, %v10819_v51  ;;  %v4526_v12 = vadd.f32 %v4521_v60, %v4483_v50 }
0x15c9   : > { %v4580_v32 = vadd.f32 %v10833_v29, %v4541_v2  ;;  %v4618_v61 = vsel %vm796_vm14, %v10885_v17, %v10883_v58  ;;  %v4485_v45 = vadd.f32 %v10807_v30, %v4442_v40  ;;  %v4508_v16 = vadd.f32 %v10817_v44, %v10803_v55  ;;  %v13348_v55 = vld [vmem:[#allocation155_spill] sm:$0xff] }
0x15ca   : > { %v4673_v38 = vpop.permute.xlu1 %4672  ;;  %v4657_v33 = vpop.permute.xlu0 %4656  ;;  %v4484_v22 = vadd.f32 %v4479_v39, %v4441_v21  ;;  %v4581_v47 = vadd.f32 %v4575_v36, %v4542_v18  ;;  %v4556_v0 = vadd.f32 %v10829_v35, %v4526_v12  ;;  %v4576_v6 = vsel %vm735_vm13, %v10831_v26, %v13347_v5  ;;  %v13353_v5 = vld [vmem:[#allocation102_spill] sm:$0xff] }
0x15cb   : > { %v4623_v29 = vadd.f32 %v10885_v17, %v4580_v32  ;;  %v4658_v11 = vsel %vm845_vm12, %v4653_v62, %v4655_v46  ;;  %v4528_v1 = vadd.f32 %v10819_v51, %v4485_v45  ;;  %v4543_v25 = vadd.f32 %v10823_v42, %v4508_v16 }
0x15cc   : > { %v4527_v30 = vadd.f32 %v4522_v37, %v4484_v22  ;;  %v4624_v9 = vadd.f32 %v4618_v61, %v4581_v47  ;;  %v4552_v44 = vsel %vm459_vm9, %v10829_v35, %v13348_v55  ;;  %v4600_v8 = vadd.f32 %v13349_v24, %v4556_v0 }
0x15cd   : > { %v4619_v26 = vsel %vm796_vm14, %v10883_v58, %v10903_v3  ;;  %v4663_v27 = vadd.f32 %v4653_v62, %v4623_v29  ;;  %v4582_v17 = vadd.f32 %v4576_v6, %v4543_v25  ;;  %v4595_v51 = vsel %vm735_vm13, %v13349_v24, %v13350_v34  ;;  %v13354_v29 = vld [vmem:[#allocation103_spill] sm:$0xff] }
0x15ce   : > { %v4677_v7 = vpop.permute.xlu1 %4676  ;;  %v4675_v59 = vpop.permute.xlu0 %4674  ;;  %v4596_v42 = vsel %vm735_vm13, %v13350_v34, %v13351_v43  ;;  %v4664_v28 = vadd.f32 %v4658_v11, %v4624_v9  ;;  %v4643_v35 = vadd.f32 %v10901_v4, %v4600_v8  ;;  %v4659_v23 = vsel %vm845_vm12, %v4655_v46, %v4657_v33  ;;  %v13355_v34 = vld [vmem:[#allocation100_spill] sm:$0xff] }
0x15cf   : > { %v4558_v3 = vadd.f32 %v13348_v55, %v4528_v1  ;;  %v4557_v62 = vadd.f32 %v4552_v44, %v4527_v30  ;;  %v4625_v41 = vadd.f32 %v4619_v26, %v4582_v17  ;;  %v4638_v15 = vsel %vm796_vm14, %v10901_v4, %v10927_v57  ;;  %v13352_v4 = vld [vmem:[#allocation83_spill] sm:$0xff] }
0x15d0   : > { %v4639_v53 = vsel %vm796_vm14, %v10927_v57, %v10925_v54  ;;  %v4683_v10 = vadd.f32 %v4673_v38, %v4643_v35  ;;  %v4678_v40 = vsel %vm845_vm12, %v4673_v38, %v4675_v59  ;;  %v4679_v21 = vsel %vm845_vm12, %v4675_v59, %v4677_v7  ;;  %v4837_v35 = vld [vmem:[%s12002_s7 + $0x10] sm:$0xff] }
0x15d1   : > { %v4601_v39 = vadd.f32 %v4595_v51, %v4557_v62  ;;  %v4602_v46 = vadd.f32 %v4596_v42, %v4558_v3  ;;  %v4665_v33 = vadd.f32 %v4659_v23, %v4625_v41  ;;  %v4773_v12 = vadd.f32 %v13352_v4, %v13240_v48  ;;  %v5555_v62 = vld [vmem:[%s12003_s8 + $0x10] sm:$0xff]  ;;  %v5554_v41 = vld [vmem:[%s12003_s8 + $0x8] sm:$0xff] }
0x15d2   : > { %v4698_v13 = vpop.permute.xlu1 %4697  ;;  %v4696_v14 = vpop.permute.xlu0 %4695  ;;  %v13356_v51 = vmov 4   ;;  %v13357_v43 = vmov 6   ;;  %v13358_v42 = vmov 5   ;;  %v13361_v23 = vmov 0  }
0x15d3   : > { %v4701_v19 = vsel %vm906_vm15, %v4696_v14, %v4698_v13  ;;  %v4706_v58 = vadd.f32 %v4696_v14, %v4663_v27  ;;  %v4644_v32 = vadd.f32 %v4638_v15, %v4601_v39  ;;  %v4645_v54 = vadd.f32 %v4639_v53, %v4602_v46 }
0x15d4   : > { %v4707_v56 = vadd.f32 %v4701_v19, %v4664_v28  ;;  %v4836_v28 = vld [vmem:[%s12002_s7 + $0x8] sm:$0xff]  ;;  %v13360_v14 = vmov 7   ;;  %v5553_v19 = vld [vmem:[%s12003_s8] sm:$0xff]  ;;  %v13363_v3 = vmov 3  }
0x15d5   : > { %v4774_v60 = vadd.f32 %v4771_v52, %v4706_v58  ;;  %v4757_v52 = vadd.f32 %v10957_v49, %v13240_v48  ;;  %v4684_v45 = vadd.f32 %v4678_v40, %v4644_v32  ;;  %v4685_v38 = vadd.f32 %v4679_v21, %v4645_v54  ;;  %v13364_v40 = vld [vmem:[#allocation97_spill] sm:$0xff] }
0x15d6   : > { %v4775_v50 = vadd.f32 %v4772_v63, %v4707_v56  ;;  %v4716_v2 = vpop.permute.xlu1 %4715  ;;  %v4700_v36 = vpop.permute.xlu0 %4699  ;;  %v4758_v63 = vadd.f32 %v10963_v31, %v13240_v48  ;;  %v13362_v58 = vmov 2   ;;  %v11092_v21 = vsub.s32 4, %v13364_v40 }
0x15d7   : > { %v4726_v18 = vadd.f32 %v4716_v2, %v4683_v10  ;;  %v4702_v37 = vsel %vm906_vm15, %v4698_v13, %v4700_v36  ;;  %v4760_v6 = vadd.f32 %v4757_v52, %v13353_v5  ;;  %v4777_v9 = vmax.f32 %v4774_v60, 0.0 }
0x15d8   : > { %v4708_v57 = vadd.f32 %v4702_v37, %v4665_v33  ;;  %v4761_v11 = vadd.f32 %v4758_v63, %v13354_v29  ;;  %v4778_v55 = vmax.f32 %v4775_v50, 0.0  ;;  %v13359_v13 = vmov 1   ;;  %v13365_v37 = vld [vmem:[#allocation48_spill] sm:$0xff] }
0x15d9   : > { %v4762_v61 = vadd.f32 %v4759_v20, %v4726_v18  ;;  %v4780_v8 = vmin.f32 %v4777_v9, 6.0  ;;  %v11095_v18 = vsub.s32 5, %v13364_v40  ;;  %v11110_v52 = vsub.s32 6, %v13364_v40 }
0x15da   : > { %v4776_v22 = vadd.f32 %v4773_v12, %v4708_v57  ;;  %v4720_v16 = vpop.permute.xlu1 %4719  ;;  %v4718_v47 = vpop.permute.xlu0 %4717  ;;  %v4781_v26 = vmin.f32 %v4778_v55, 6.0  ;;  %v13367_v12 = vld [vmem:[#allocation43_spill] sm:$0xff] }
0x15db   : > { %v4765_v7 = vmax.f32 %v4762_v61, 0.0  ;;  %v4721_v59 = vsel %vm906_vm15, %v4716_v2, %v4718_v47  ;;  %v4722_v0 = vsel %vm906_vm15, %v4718_v47, %v4720_v16  ;;  %v11113_v61 = vsub.s32 7, %v13364_v40 }
0x15dc   : > { %v4727_v1 = vadd.f32 %v4721_v59, %v4684_v45  ;;  %v4728_v49 = vadd.f32 %v4722_v0, %v4685_v38  ;;  %v4779_v27 = vmax.f32 %v4776_v22, 0.0  ;;  %v13371_v45 = vld [vmem:[#allocation104_spill] sm:$0xff] }
0x15dd   : > { %v4768_v20 = vmin.f32 %v4765_v7, 6.0  ;;  %v13373_v22 = vld [vmem:[#allocation108_spill] sm:$0xff] }
0x15de   : > { %v4763_v30 = vadd.f32 %v4760_v6, %v4727_v1  ;;  %v4764_v25 = vadd.f32 %v4761_v11, %v4728_v49  ;;  %v4782_v17 = vmin.f32 %v4779_v27, 6.0 }
0x15df   : > { %4812 = vrot.lane.b32.xlu1 %v4768_v20, %s6448_s18 }
0x15e0   : > { %v4766_v48 = vmax.f32 %v4763_v30, 0.0  ;;  %v4767_v31 = vmax.f32 %v4764_v25, 0.0 }
0x15e2   : > { %v4769_v44 = vmin.f32 %v4766_v48, 6.0  ;;  %v4770_v24 = vmin.f32 %v4767_v31, 6.0 }
0x15e4   : > { %4816 = vrot.lane.b32.xlu1 %v4770_v24, %s6448_s18  ;;  %4814 = vrot.lane.b32.xlu0 %v4769_v44, %s6448_s18 }
0x15e7   : > { %v11085_v56 = vpop.permute.xlu1 %4910  ;;  %v11087_v15 = vpop.permute.xlu0 %4840 }
0x15e8   : > { %4827 = vrot.lane.b32.xlu1 %v4781_v26, %s6448_s18  ;;  %4825 = vrot.lane.b32.xlu0 %v4780_v8, %s6448_s18 }
0x15eb   : > { %v4787_v53 = vpop.permute.xlu1 %4786  ;;  %v4789_v10 = vpop.permute.xlu0 %4788 }
0x15ec   : > { %5002 = vperm.xlu1 %6098, %v13355_v34   ;;  %4829 = vrot.lane.b32.xlu0 %v4782_v17, %s6448_s18  ;;  %v4792_v33 = vsel %vm882_vm8, %v4787_v53, %v4789_v10  ;;  %s12503_s18 = sshll.u32 %s6538_s17, 10 }
0x15ed   : > { %v11098_v4 = vrot.slane %v4792_v33, %v13365_v37  ;;  %v11101_v32 = vrot.slane %v4792_v33, %v13367_v12  ;;  %v11116_v38 = vrot.slane %v4792_v33, %v13371_v45  ;;  %v11119_v16 = vrot.slane %v4792_v33, %v13373_v22  ;;  %s11919_s21 = scalar_lea.hbm %s12005_s10, %s12503_s18 }
0x15ee   : > { %v11124_v59 = vrot.slane %v4792_v33, %v11092_v21  ;;  %v11127_v0 = vrot.slane %v4792_v33, %v11095_v18  ;;  %v11138_v49 = vrot.slane %v4792_v33, %v11110_v52  ;;  %v11141_v20 = vrot.slane %v4792_v33, %v11113_v61 }
0x15ef   : > { %v4791_v60 = vpop.permute.xlu1 %4790  ;;  %13366 = vst [vmem:[#allocation154_spill] sm:$0xff] %v11098_v4  ;;  %13368 = vst [vmem:[#allocation135_spill] sm:$0xff] %v11101_v32  ;;  %v4885_v7 = vmul.f32 %v11098_v4, %v11087_v15  ;;  %v4953_v6 = vmul.f32 %v11101_v32, %v11085_v56 }
0x15f0   : > { %6100 = vset.pattern.permute.xlu1 %v13356_v51  ;;  %5094 = vperm.xlu0 %6099, %v13355_v34   ;;  %v4793_v2 = vsel %vm882_vm8, %v4789_v10, %v4791_v60  ;;  %13372 = vst [vmem:[#allocation162_spill] sm:$0xff] %v11116_v38  ;;  %13374 = vst [vmem:[#allocation122_spill] sm:$0xff] %v11119_v16 }
0x15f1   : > { %5186 = vperm.xlu1 %6100, %v13355_v34   ;;  %v11104_v54 = vrot.slane %v4793_v2, %v13365_v37  ;;  %v11107_v57 = vrot.slane %v4793_v2, %v13367_v12  ;;  %13375 = vst [vmem:[#allocation111_spill] sm:$0xff] %v11127_v0  ;;  %13376 = vst [vmem:[#allocation38_spill] sm:$0xff] %v11138_v49  ;;  %v11144_v30 = vrot.slane %v4793_v2, %v13371_v45 }
0x15f2   : > { %13377 = vst [vmem:[#allocation126_spill] sm:$0xff] %v11141_v20  ;;  %v11147_v25 = vrot.slane %v4793_v2, %v13373_v22  ;;  %v11150_v31 = vrot.slane %v4793_v2, %v11092_v21  ;;  %v11153_v9 = vrot.slane %v4793_v2, %v11095_v18  ;;  %v11162_v24 = vrot.slane %v4793_v2, %v11110_v52 }
0x15f3   : > { %13369 = vst [vmem:[#allocation163_spill] sm:$0xff] %v11104_v54  ;;  %13370 = vst [vmem:[#allocation120_spill] sm:$0xff] %v11107_v57  ;;  %v4886_v29 = vmul.f32 %v11104_v54, %v11087_v15  ;;  %v4954_v11 = vmul.f32 %v11107_v57, %v11085_v56  ;;  %v11165_v8 = vrot.slane %v4793_v2, %v11113_v61 }
0x15f4   : > { %6102 = vset.pattern.permute.xlu0 %v13357_v43  ;;  %13378 = vst [vmem:[#allocation123_spill] sm:$0xff] %v11144_v30  ;;  %13379 = vst [vmem:[#allocation53_spill] sm:$0xff] %v11147_v25 }
0x15f5   : > { %6101 = vset.pattern.permute.xlu1 %v13358_v42  ;;  %5370 = vperm.xlu0 %6102, %v13355_v34   ;;  %v4800_v39 = vpop.permute.xlu0 %4799  ;;  %13380 = vst [vmem:[#allocation26_spill] sm:$0xff] %v11153_v9  ;;  %13383 = vst [vmem:[#allocation34_spill] sm:$0xff] %v11162_v24 }
0x15f6   : > { %5278 = vperm.xlu1 %6101, %v13355_v34   ;;  %13384 = vst [vmem:[#allocation90_spill] sm:$0xff] %v11165_v8 }
0x15f9   : > { %6105 = vset.pattern.permute.xlu0 %v13359_v13 }
0x15fa   : > { %6103 = vset.pattern.permute.xlu1 %v13360_v14  ;;  %4914 = vperm.xlu0 %6105, %v4836_v28   ;;  %v4802_v46 = vpop.permute.xlu1 %4801  ;;  %v4804_v36 = vpop.permute.xlu0 %4803 }
0x15fb   : > { %5462 = vperm.xlu1 %6103, %v13355_v34   ;;  %v4805_v5 = vsel %vm882_vm8, %v4800_v39, %v4802_v46  ;;  %v4806_v1 = vsel %vm882_vm8, %v4802_v46, %v4804_v36 }
0x15fc   : > { %v11156_v55 = vrot.slane %v4805_v5, %v13365_v37  ;;  %v11159_v44 = vrot.slane %v4805_v5, %v13367_v12  ;;  %v11168_v26 = vrot.slane %v4806_v1, %v13365_v37  ;;  %v11171_v27 = vrot.slane %v4806_v1, %v13367_v12 }
0x15fd   : > { %v11174_v17 = vrot.slane %v4805_v5, %v13371_v45  ;;  %v11177_v34 = vrot.slane %v4805_v5, %v13373_v22  ;;  %v11187_v13 = vrot.slane %v4805_v5, %v11095_v18  ;;  %v11232_v2 = vrot.slane %v4806_v1, %v13371_v45 }
0x15fe   : > { %4918 = vperm.xlu0 %6105, %v4837_v35   ;;  %13381 = vst [vmem:[#allocation85_spill] sm:$0xff] %v11156_v55  ;;  %13382 = vst [vmem:[#allocation74_spill] sm:$0xff] %v11159_v44  ;;  %v4956_v53 = vmul.f32 %v11171_v27, %v11085_v56  ;;  %v11235_v36 = vrot.slane %v4806_v1, %v13373_v22  ;;  %v11238_v40 = vrot.slane %v4806_v1, %v11092_v21 }
0x15ff   : > { %6104 = vset.pattern.permute.xlu1 %v13361_v23  ;;  %13385 = vst [vmem:[#allocation78_spill] sm:$0xff] %v11168_v26  ;;  %13386 = vst [vmem:[#allocation115_spill] sm:$0xff] %v11171_v27 }
0x1600   : > { %4845 = vperm.xlu1 %6104, %v4836_v28   ;;  %13387 = vst [vmem:[#allocation65_spill] sm:$0xff] %v11174_v17  ;;  %13388 = vst [vmem:[#allocation45_spill] sm:$0xff] %v11177_v34 }
0x1601   : > { %13389 = vst [vmem:[#allocation127_spill] sm:$0xff] %v11187_v13  ;;  %13396 = vst [vmem:[#allocation95_spill] sm:$0xff] %v11232_v2 }
0x1602   : > { %6107 = vset.pattern.permute.xlu0 %v13362_v58  ;;  %13397 = vst [vmem:[#allocation98_spill] sm:$0xff] %v11235_v36  ;;  %13398 = vst [vmem:[#allocation109_spill] sm:$0xff] %v11238_v40 }
0x1603   : > { %5010 = vperm.xlu0 %6107, %v4837_v35  }
0x1604   : > { %5558 = vperm.xlu1 %6104, %v5553_v19   ;;  %v4887_v19 = vmul.f32 %v11156_v55, %v11087_v15 }
0x1607   : > { %6109 = vset.pattern.permute.xlu0 %v13356_v51 }
0x1608   : > { %4850 = vperm.xlu1 %6104, %v4837_v35   ;;  %5190 = vperm.xlu0 %6109, %v4836_v28  }
0x160c   : > { %6106 = vset.pattern.permute.xlu1 %v13362_v58  ;;  %6112 = vset.pattern.permute.xlu0 %v13358_v42  ;;  %v4955_v58 = vmul.f32 %v11159_v44, %v11085_v56 }
0x160d   : > { %5006 = vperm.xlu1 %6106, %v4836_v28   ;;  %5286 = vperm.xlu0 %6112, %v4837_v35  }
0x1611   : > { %6108 = vset.pattern.permute.xlu1 %v13363_v3  ;;  %6114 = vset.pattern.permute.xlu0 %v13360_v14  ;;  %v11200_v3 = vrot.slane %v4805_v5, %v11110_v52 }
0x1612   : > { %5098 = vperm.xlu1 %6108, %v4836_v28   ;;  %5466 = vperm.xlu0 %6114, %v4836_v28  }
0x1613   : > { %13390 = vst [vmem:[#allocation167_spill] sm:$0xff] %v11200_v3 }
0x1616   : > { %5102 = vperm.xlu1 %6108, %v4837_v35   ;;  %6117 = vset.pattern.permute.xlu0 %v13361_v23 }
0x1617   : > { %5568 = vperm.xlu0 %6117, %v5555_v62   ;;  %v11203_v62 = vrot.slane %v4805_v5, %v11113_v61 }
0x1619   : > { %13391 = vst [vmem:[#allocation75_spill] sm:$0xff] %v11203_v62 }
0x161a   : > { %6110 = vset.pattern.permute.xlu1 %v13356_v51 }
0x161b   : > { %5194 = vperm.xlu1 %6110, %v4837_v35  }
0x161f   : > { %6111 = vset.pattern.permute.xlu1 %v13358_v42  ;;  %v11181_v42 = vadd.f32 %v4954_v11, %v4886_v29  ;;  %v11260_v29 = vrot.slane %v4806_v1, %v11110_v52  ;;  %v11263_v11 = vrot.slane %v4806_v1, %v11113_v61 }
0x1620   : > { %5282 = vperm.xlu1 %6111, %v4836_v28  }
0x1621   : > { %13404 = vst [vmem:[#allocation118_spill] sm:$0xff] %v11260_v29  ;;  %13405 = vst [vmem:[#allocation121_spill] sm:$0xff] %v11263_v11 }
0x1624   : > { %6113 = vset.pattern.permute.xlu1 %v13357_v43  ;;  %v11179_v43 = vadd.f32 %v4953_v6, %v4885_v7 }
0x1625   : > { %5374 = vperm.xlu1 %6113, %v4836_v28   ;;  %v11184_v28 = vrot.slane %v4805_v5, %v11092_v21 }
0x1629   : > { %5378 = vperm.xlu1 %6113, %v4837_v35  }
0x162d   : > { %6115 = vset.pattern.permute.xlu1 %v13360_v14 }
0x162e   : > { %5470 = vperm.xlu1 %6115, %v4837_v35  }
0x1632   : > { %6116 = vset.pattern.permute.xlu1 %v13361_v23 }
0x1633   : > { %5563 = vperm.xlu1 %6116, %v5554_v41   ;;  %v4888_v41 = vmul.f32 %v11168_v26, %v11087_v15 }
0x1651   : > { %v4813_v50 = vpop.permute.xlu1 %4812 }
0x1656   : > { %v4815_v63 = vpop.permute.xlu0 %4814  ;;  %v4817_v47 = vpop.permute.xlu1 %4816 }
0x1657   : > { %v11190_v14 = vsel %vm882_vm8, %v4813_v50, %v4815_v63  ;;  %v11193_v35 = vsel %vm882_vm8, %v4815_v63, %v4817_v47  ;;  %v11241_v63 = vrot.slane %v4806_v1, %v11095_v18 }
0x1658   : > { %v11217_v39 = vrot.slane %v11190_v14, %v13365_v37  ;;  %v11221_v46 = vrot.slane %v11193_v35, %v13365_v37  ;;  %v11225_v33 = vrot.slane %v11190_v14, %v13367_v12  ;;  %v11229_v50 = vrot.slane %v11193_v35, %v13367_v12 }
0x1659   : > { %13399 = vst [vmem:[#allocation101_spill] sm:$0xff] %v11241_v63  ;;  %v11275_v55 = vrot.slane %v11190_v14, %v13371_v45  ;;  %v11279_v1 = vrot.slane %v11193_v35, %v13371_v45  ;;  %v11299_v4 = vrot.slane %v11190_v14, %v11092_v21  ;;  %v11303_v11 = vrot.slane %v11193_v35, %v11092_v21 }
0x165a   : > { %v4826_v48 = vpop.permute.xlu0 %4825  ;;  %v4828_v51 = vpop.permute.xlu1 %4827  ;;  %13392 = vst [vmem:[#allocation64_spill] sm:$0xff] %v11217_v39  ;;  %13393 = vst [vmem:[#allocation79_spill] sm:$0xff] %v11221_v46  ;;  %v4890_v26 = vmul.f32 %v11221_v46, %v11087_v15  ;;  %v11311_v62 = vrot.slane %v11193_v35, %v11095_v18 }
0x165b   : > { %v11210_v10 = vsel %vm882_vm8, %v4826_v48, %v4828_v51  ;;  %13394 = vst [vmem:[#allocation82_spill] sm:$0xff] %v11225_v33  ;;  %13395 = vst [vmem:[#allocation9_spill] sm:$0xff] %v11229_v50  ;;  %v4979_v48 = vadd.f32 %v4955_v58, %v4887_v19  ;;  %v11283_v19 = vrot.slane %v11190_v14, %v13373_v22 }
0x165c   : > { %v11245_v47 = vrot.slane %v11210_v10, %v13365_v37  ;;  %v11249_v7 = vrot.slane %v11210_v10, %v13367_v12  ;;  %13406 = vst [vmem:[#allocation114_spill] sm:$0xff] %v11275_v55  ;;  %13407 = vst [vmem:[#allocation148_spill] sm:$0xff] %v11279_v1  ;;  %v11287_v58 = vrot.slane %v11193_v35, %v13373_v22 }
0x165d   : > { %13408 = vst [vmem:[#allocation113_spill] sm:$0xff] %v11283_v19  ;;  %13410 = vst [vmem:[#allocation140_spill] sm:$0xff] %v11299_v4  ;;  %v11323_v20 = vrot.slane %v11210_v10, %v13371_v45 }
0x165e   : > { %v4830_v23 = vpop.permute.xlu0 %4829  ;;  %13400 = vst [vmem:[#allocation105_spill] sm:$0xff] %v11245_v47  ;;  %13401 = vst [vmem:[#allocation128_spill] sm:$0xff] %v11249_v7 }
0x165f   : > { %v11213_v60 = vsel %vm882_vm8, %v4828_v51, %v4830_v23  ;;  %v4980_v51 = vadd.f32 %v4956_v53, %v4888_v41  ;;  %v4889_v23 = vmul.f32 %v11217_v39, %v11087_v15  ;;  %13409 = vst [vmem:[#allocation130_spill] sm:$0xff] %v11287_v58  ;;  %v4891_v41 = vmul.f32 %v11245_v47, %v11087_v15 }
0x1660   : > { %v11253_v5 = vrot.slane %v11213_v60, %v13365_v37  ;;  %v11257_v6 = vrot.slane %v11213_v60, %v13367_v12  ;;  %v4957_v37 = vmul.f32 %v11225_v33, %v11085_v56  ;;  %v4958_v12 = vmul.f32 %v11229_v50, %v11085_v56  ;;  %13411 = vst [vmem:[#allocation138_spill] sm:$0xff] %v11303_v11 }
0x1661   : > { %v4959_v53 = vmul.f32 %v11249_v7, %v11085_v56  ;;  %v11307_v47 = vrot.slane %v11190_v14, %v11095_v18  ;;  %13413 = vst [vmem:[#allocation132_spill] sm:$0xff] %v11311_v62  ;;  %13416 = vst [vmem:[#allocation153_spill] sm:$0xff] %v11323_v20  ;;  %v11331_v7 = vrot.slane %v11210_v10, %v11092_v21 }
0x1662   : > { %13402 = vst [vmem:[#allocation142_spill] sm:$0xff] %v11253_v5  ;;  %13403 = vst [vmem:[#allocation137_spill] sm:$0xff] %v11257_v6  ;;  %v4892_v46 = vmul.f32 %v11253_v5, %v11087_v15  ;;  %v4960_v39 = vmul.f32 %v11257_v6, %v11085_v56  ;;  %v11315_v56 = vrot.slane %v11190_v14, %v11110_v52 }
0x1663   : > { %13412 = vst [vmem:[#allocation156_spill] sm:$0xff] %v11307_v47  ;;  %v11319_v15 = vrot.slane %v11193_v35, %v11110_v52  ;;  %v4981_v5 = vadd.f32 %v4957_v37, %v4889_v23  ;;  %v4982_v8 = vadd.f32 %v4958_v12, %v4890_v26  ;;  %v11327_v6 = vrot.slane %v11210_v10, %v13373_v22 }
0x1664   : > { %13414 = vst [vmem:[#allocation150_spill] sm:$0xff] %v11315_v56  ;;  %13418 = vst [vmem:[#allocation47_spill] sm:$0xff] %v11331_v7  ;;  %v11335_v50 = vrot.slane %v11213_v60, %v13371_v45  ;;  %v11339_v23 = vrot.slane %v11213_v60, %v13373_v22  ;;  %v11343_v26 = vrot.slane %v11213_v60, %v11092_v21 }
0x1665   : > { %13415 = vst [vmem:[#allocation151_spill] sm:$0xff] %v11319_v15  ;;  %13417 = vst [vmem:[#allocation141_spill] sm:$0xff] %v11327_v6  ;;  %v4983_v37 = vadd.f32 %v4959_v53, %v4891_v41  ;;  %v4984_v12 = vadd.f32 %v4960_v39, %v4892_v46 }
0x1666   : > { %13419 = vst [vmem:[#allocation73_spill] sm:$0xff] %v11335_v50  ;;  %13420 = vst [vmem:[#allocation77_spill] sm:$0xff] %v11339_v23 }
0x1667   : > { %v5003_v54 = vpop.permute.xlu1 %5002  ;;  %13421 = vst [vmem:[#allocation69_spill] sm:$0xff] %v11343_v26 }
0x1668   : > { %v5045_v27 = vmul.f32 %v11116_v38, %v5003_v54  ;;  %v5046_v44 = vmul.f32 %v11144_v30, %v5003_v54  ;;  %v5047_v57 = vmul.f32 %v11174_v17, %v5003_v54  ;;  %v5048_v45 = vmul.f32 %v11232_v2, %v5003_v54 }
0x1669   : > { %v5049_v15 = vmul.f32 %v11275_v55, %v5003_v54  ;;  %v5050_v22 = vmul.f32 %v11279_v1, %v5003_v54  ;;  %v5051_v56 = vmul.f32 %v11323_v20, %v5003_v54  ;;  %v5052_v21 = vmul.f32 %v11335_v50, %v5003_v54 }
0x166a   : > { %v5069_v20 = vadd.f32 %v5045_v27, %v11179_v43  ;;  %v5070_v54 = vadd.f32 %v5046_v44, %v11181_v42  ;;  %v5071_v50 = vadd.f32 %v5047_v57, %v4979_v48  ;;  %v11393_v42 = vrot.slane %v11213_v60, %v11095_v18 }
0x166b   : > { %v5095_v33 = vpop.permute.xlu0 %5094  ;;  %v5073_v30 = vadd.f32 %v5049_v15, %v4981_v5  ;;  %v5075_v38 = vadd.f32 %v5051_v56, %v4983_v37 }
0x166c   : > { %v5187_v32 = vpop.permute.xlu1 %5186  ;;  %v5137_v39 = vmul.f32 %v11119_v16, %v5095_v33  ;;  %v5138_v46 = vmul.f32 %v11147_v25, %v5095_v33  ;;  %v5139_v41 = vmul.f32 %v11177_v34, %v5095_v33  ;;  %v5140_v53 = vmul.f32 %v11235_v36, %v5095_v33  ;;  %13427 = vst [vmem:[#allocation36_spill] sm:$0xff] %v11393_v42 }
0x166d   : > { %v5141_v17 = vmul.f32 %v11283_v19, %v5095_v33  ;;  %v5142_v2 = vmul.f32 %v11287_v58, %v5095_v33  ;;  %v5143_v55 = vmul.f32 %v11327_v6, %v5095_v33  ;;  %v5144_v1 = vmul.f32 %v11339_v23, %v5095_v33  ;;  %v13438_v23 = vld [vmem:[#allocation120_spill] sm:$0xff] }
0x166e   : > { %v5072_v16 = vadd.f32 %v5048_v45, %v4980_v51  ;;  %v5074_v25 = vadd.f32 %v5050_v22, %v4982_v8  ;;  %v5076_v34 = vadd.f32 %v5052_v21, %v4984_v12  ;;  %v5161_v36 = vadd.f32 %v5137_v39, %v5069_v20  ;;  %v13433_v45 = vld [vmem:[#allocation167_spill] sm:$0xff]  ;;  %v13434_v21 = vld [vmem:[#allocation118_spill] sm:$0xff] }
0x166f   : > { %v5162_v3 = vadd.f32 %v5138_v46, %v5070_v54  ;;  %v5163_v19 = vadd.f32 %v5139_v41, %v5071_v50  ;;  %v5165_v58 = vadd.f32 %v5141_v17, %v5073_v30  ;;  %v5167_v6 = vadd.f32 %v5143_v55, %v5075_v38  ;;  %v13435_v46 = vld [vmem:[#allocation150_spill] sm:$0xff] }
0x1670   : > { %v5164_v24 = vadd.f32 %v5140_v53, %v5072_v16  ;;  %v5166_v49 = vadd.f32 %v5142_v2, %v5074_v25  ;;  %v5168_v62 = vadd.f32 %v5144_v1, %v5076_v34  ;;  %v5229_v33 = vmul.f32 %v11124_v59, %v5187_v32  ;;  %v5371_v30 = vpop.permute.xlu0 %5370  ;;  %v13436_v53 = vld [vmem:[#allocation151_spill] sm:$0xff] }
0x1671   : > { %v5279_v29 = vpop.permute.xlu1 %5278  ;;  %v5230_v27 = vmul.f32 %v11150_v31, %v5187_v32  ;;  %v5231_v57 = vmul.f32 %v11184_v28, %v5187_v32  ;;  %v5232_v44 = vmul.f32 %v11238_v40, %v5187_v32  ;;  %v5233_v8 = vmul.f32 %v11299_v4, %v5187_v32 }
0x1672   : > { %v5234_v43 = vmul.f32 %v11303_v11, %v5187_v32  ;;  %v5235_v20 = vmul.f32 %v11331_v7, %v5187_v32  ;;  %v5236_v16 = vmul.f32 %v11343_v26, %v5187_v32  ;;  %v11373_v38 = vrot.slane %v11190_v14, %v11113_v61  ;;  %v13450_v11 = vld [vmem:[#allocation163_spill] sm:$0xff] }
0x1673   : > { %v11377_v25 = vrot.slane %v11193_v35, %v11113_v61  ;;  %v11381_v55 = vrot.slane %v11210_v10, %v11095_v18  ;;  %v11385_v17 = vrot.slane %v11210_v10, %v11110_v52  ;;  %v11389_v32 = vrot.slane %v11210_v10, %v11113_v61 }
0x1674   : > { %13422 = vst [vmem:[#allocation89_spill] sm:$0xff] %v11373_v38  ;;  %v11397_v14 = vrot.slane %v11213_v60, %v11110_v52  ;;  %v11401_v35 = vrot.slane %v11213_v60, %v11113_v61  ;;  %v5253_v50 = vadd.f32 %v5229_v33, %v5161_v36  ;;  %v5254_v2 = vadd.f32 %v5230_v27, %v5162_v3  ;;  %v13430_v61 = vld [vmem:[#allocation132_spill] sm:$0xff] }
0x1675   : > { %13423 = vst [vmem:[#allocation94_spill] sm:$0xff] %v11377_v25  ;;  %13424 = vst [vmem:[#allocation166_spill] sm:$0xff] %v11381_v55  ;;  %v5255_v5 = vadd.f32 %v5231_v57, %v5163_v19  ;;  %v5256_v48 = vadd.f32 %v5232_v44, %v5164_v24  ;;  %v5257_v51 = vadd.f32 %v5233_v8, %v5165_v58  ;;  %v4915_v36 = vpop.permute.xlu0 %4914  ;;  %v13432_v19 = vld [vmem:[#allocation34_spill] sm:$0xff] }
0x1676   : > { %13425 = vst [vmem:[#allocation160_spill] sm:$0xff] %v11385_v17  ;;  %v5463_v34 = vpop.permute.xlu1 %5462  ;;  %13426 = vst [vmem:[#allocation42_spill] sm:$0xff] %v11389_v32  ;;  %v5258_v1 = vadd.f32 %v5234_v43, %v5166_v49  ;;  %v5259_v10 = vadd.f32 %v5235_v20, %v5167_v6  ;;  %v5260_v56 = vadd.f32 %v5236_v16, %v5168_v62  ;;  %v13431_v62 = vld [vmem:[#allocation38_spill] sm:$0xff] }
0x1677   : > { %13428 = vst [vmem:[#allocation56_spill] sm:$0xff] %v11397_v14  ;;  %13429 = vst [vmem:[#allocation54_spill] sm:$0xff] %v11401_v35  ;;  %v5321_v15 = vmul.f32 %v11127_v0, %v5279_v29  ;;  %v5322_v18 = vmul.f32 %v11153_v9, %v5279_v29  ;;  %v5323_v37 = vmul.f32 %v11187_v13, %v5279_v29 }
0x1678   : > { %v5324_v52 = vmul.f32 %v11241_v63, %v5279_v29  ;;  %v5325_v12 = vmul.f32 %v11307_v47, %v5279_v29  ;;  %v5326_v60 = vmul.f32 %v13430_v61, %v5279_v29  ;;  %v5327_v3 = vmul.f32 %v11381_v55, %v5279_v29 }
0x1679   : > { %v5328_v24 = vmul.f32 %v11393_v42, %v5279_v29  ;;  %v5413_v6 = vmul.f32 %v13431_v62, %v5371_v30  ;;  %v5414_v58 = vmul.f32 %v13432_v19, %v5371_v30  ;;  %v5415_v22 = vmul.f32 %v13433_v45, %v5371_v30  ;;  %v13437_v45 = vld [vmem:[#allocation135_spill] sm:$0xff]  ;;  %v13439_v42 = vld [vmem:[#allocation74_spill] sm:$0xff] }
0x167a   : > { %v5416_v39 = vmul.f32 %v13434_v21, %v5371_v30  ;;  %v5417_v41 = vmul.f32 %v13435_v46, %v5371_v30  ;;  %v5418_v54 = vmul.f32 %v13436_v53, %v5371_v30  ;;  %v5419_v33 = vmul.f32 %v11385_v17, %v5371_v30  ;;  %v13440_v17 = vld [vmem:[#allocation115_spill] sm:$0xff] }
0x167b   : > { %v11411_v49 = vpop.permute.xlu1 %4845  ;;  %v5420_v27 = vmul.f32 %v11397_v14, %v5371_v30  ;;  %v5345_v29 = vadd.f32 %v5321_v15, %v5253_v50  ;;  %v5346_v57 = vadd.f32 %v5322_v18, %v5254_v2  ;;  %v5347_v44 = vadd.f32 %v5323_v37, %v5255_v5  ;;  %v13441_v30 = vld [vmem:[#allocation82_spill] sm:$0xff]  ;;  %v13442_v2 = vld [vmem:[#allocation9_spill] sm:$0xff] }
0x167c   : > { %v5348_v8 = vadd.f32 %v5324_v52, %v5256_v48  ;;  %v5349_v43 = vadd.f32 %v5325_v12, %v5257_v51  ;;  %v5350_v20 = vadd.f32 %v5326_v60, %v5258_v1  ;;  %v5351_v16 = vadd.f32 %v5327_v3, %v5259_v10  ;;  %v13443_v48 = vld [vmem:[#allocation128_spill] sm:$0xff]  ;;  %v13444_v1 = vld [vmem:[#allocation137_spill] sm:$0xff]  ;;  %v13445_v15 = vld [vmem:[#allocation126_spill] sm:$0xff] }
0x167d   : > { %v5352_v19 = vadd.f32 %v5328_v24, %v5260_v56  ;;  %v4961_v21 = vmul.f32 %v13437_v45, %v4915_v36  ;;  %v4962_v46 = vmul.f32 %v13438_v23, %v4915_v36  ;;  %v11426_v53 = vmul.f32 %v13439_v42, %v4915_v36  ;;  %v4919_v56 = vpop.permute.xlu0 %4918  ;;  %v13446_v37 = vld [vmem:[#allocation90_spill] sm:$0xff]  ;;  %v13447_v12 = vld [vmem:[#allocation75_spill] sm:$0xff]  ;;  %v13448_v3 = vld [vmem:[#allocation121_spill] sm:$0xff] }
0x167e   : > { %v11429_v55 = vmul.f32 %v13440_v17, %v4915_v36  ;;  %v11432_v50 = vmul.f32 %v13441_v30, %v4915_v36  ;;  %v11435_v5 = vmul.f32 %v13442_v2, %v4915_v36  ;;  %v11438_v51 = vmul.f32 %v13443_v48, %v4915_v36 }
0x167f   : > { %v11421_v62 = vpop.permute.xlu1 %5558  ;;  %v11441_v10 = vmul.f32 %v13444_v1, %v4915_v36  ;;  %v5505_v18 = vmul.f32 %v13445_v15, %v5463_v34  ;;  %v5506_v52 = vmul.f32 %v13446_v37, %v5463_v34  ;;  %v5507_v60 = vmul.f32 %v13447_v12, %v5463_v34 }
0x1680   : > { %v5508_v24 = vmul.f32 %v13448_v3, %v5463_v34  ;;  %v5509_v14 = vmul.f32 %v11373_v38, %v5463_v34  ;;  %v5510_v61 = vmul.f32 %v11377_v25, %v5463_v34  ;;  %v5511_v47 = vmul.f32 %v11389_v32, %v5463_v34 }
0x1681   : > { %v5512_v63 = vmul.f32 %v11401_v35, %v5463_v34  ;;  %v11452_v36 = vmul.f32 %v13437_v45, %v4919_v56  ;;  %v11455_v13 = vmul.f32 %v13438_v23, %v4919_v56  ;;  %v11458_v37 = vmul.f32 %v13439_v42, %v4919_v56 }
0x1682   : > { %v11461_v12 = vmul.f32 %v13440_v17, %v4919_v56  ;;  %v11464_v38 = vmul.f32 %v13441_v30, %v4919_v56  ;;  %v11467_v25 = vmul.f32 %v13442_v2, %v4919_v56  ;;  %v11470_v34 = vmul.f32 %v13443_v48, %v4919_v56  ;;  %v13449_v17 = vld [vmem:[#allocation154_spill] sm:$0xff] }
0x1683   : > { %v11473_v45 = vmul.f32 %v13444_v1, %v4919_v56  ;;  %v11475_v23 = vpop.permute.xlu1 %4850  ;;  %v5437_v35 = vadd.f32 %v5413_v6, %v5345_v29  ;;  %v5438_v42 = vadd.f32 %v5414_v58, %v5346_v57  ;;  %v5439_v32 = vadd.f32 %v5415_v22, %v5347_v44  ;;  %v13455_v44 = vld [vmem:[#allocation105_spill] sm:$0xff] }
0x1684   : > { %v5440_v3 = vadd.f32 %v5416_v39, %v5348_v8  ;;  %v4893_v15 = vmul.f32 %v13449_v17, %v11411_v49  ;;  %v5441_v30 = vadd.f32 %v5417_v41, %v5349_v43  ;;  %v5442_v9 = vadd.f32 %v5418_v54, %v5350_v20  ;;  %v13451_v41 = vld [vmem:[#allocation85_spill] sm:$0xff] }
0x1685   : > { %v5443_v0 = vadd.f32 %v5419_v33, %v5351_v16  ;;  %v5529_v2 = vadd.f32 %v5505_v18, %v5437_v35  ;;  %v5530_v26 = vadd.f32 %v5506_v52, %v5438_v42  ;;  %v5531_v7 = vadd.f32 %v5507_v60, %v5439_v32  ;;  %v13452_v32 = vld [vmem:[#allocation78_spill] sm:$0xff]  ;;  %v13453_v33 = vld [vmem:[#allocation64_spill] sm:$0xff] }
0x1686   : > { %v5532_v48 = vadd.f32 %v5508_v24, %v5440_v3  ;;  %v4894_v1 = vmul.f32 %v13450_v11, %v11411_v49  ;;  %v5444_v56 = vadd.f32 %v5420_v27, %v5352_v19  ;;  %v5533_v4 = vadd.f32 %v5509_v14, %v5441_v30  ;;  %v13454_v27 = vld [vmem:[#allocation79_spill] sm:$0xff]  ;;  %v13456_v16 = vld [vmem:[#allocation142_spill] sm:$0xff] }
0x1687   : > { %v5534_v40 = vadd.f32 %v5510_v61, %v5442_v9  ;;  %v5571_v6 = vadd.f32 %v11421_v62, %v5529_v2  ;;  %v5572_v58 = vadd.f32 %v11421_v62, %v5530_v26  ;;  %v5573_v22 = vadd.f32 %v11421_v62, %v5531_v7  ;;  %v13457_v42 = vld [vmem:[#allocation162_spill] sm:$0xff]  ;;  %v13458_v2 = vld [vmem:[#allocation123_spill] sm:$0xff] }
0x1688   : > { %v5574_v39 = vadd.f32 %v11421_v62, %v5532_v48  ;;  %v4895_v35 = vmul.f32 %v13451_v41, %v11411_v49  ;;  %v4896_v54 = vmul.f32 %v13452_v32, %v11411_v49  ;;  %v4897_v29 = vmul.f32 %v13453_v33, %v11411_v49  ;;  %v11492_v9 = vpop.permute.xlu1 %5006 }
0x1689   : > { %v5575_v14 = vadd.f32 %v11421_v62, %v5533_v4  ;;  %v5535_v61 = vadd.f32 %v5511_v47, %v5443_v0  ;;  %v5576_v26 = vadd.f32 %v11421_v62, %v5534_v40  ;;  %v5892_v19 = vmul.f32 -1.442695, %v5571_v6  ;;  %v5011_v40 = vpop.permute.xlu0 %5010 }
0x168a   : > { %v5893_v7 = vmul.f32 -1.442695, %v5572_v58  ;;  %v4898_v57 = vmul.f32 %v13454_v27, %v11411_v49  ;;  %v4899_v8 = vmul.f32 %v13455_v44, %v11411_v49  ;;  %v5536_v43 = vadd.f32 %v5512_v63, %v5444_v56 }
0x168b   : > { %v5894_v20 = vmul.f32 -1.442695, %v5573_v22  ;;  %v4900_v18 = vmul.f32 %v13456_v16, %v11411_v49  ;;  %v11501_v52 = vadd.f32 %v4961_v21, %v4893_v15  ;;  %v5577_v4 = vadd.f32 %v11421_v62, %v5535_v61  ;;  %v13459_v22 = vld [vmem:[#allocation65_spill] sm:$0xff] }
0x168c   : > { %v5895_v0 = vmul.f32 -1.442695, %v5574_v39  ;;  %v11504_v47 = vadd.f32 %v4962_v46, %v4894_v1  ;;  %v5578_v60 = vadd.f32 %v11421_v62, %v5536_v43  ;;  %6218 = vpow2.f32 %v5892_v19  ;;  %v13460_v39 = vld [vmem:[#allocation95_spill] sm:$0xff]  ;;  %v13464_v61 = vld [vmem:[#allocation73_spill] sm:$0xff] }
0x168d   : > { %v5896_v3 = vmul.f32 -1.442695, %v5575_v14  ;;  %v11508_v24 = vadd.f32 %v11426_v53, %v4895_v35  ;;  %v11511_v63 = vadd.f32 %v11429_v55, %v4896_v54  ;;  %6220 = vpow2.f32 %v5893_v7  ;;  %v11522_v62 = vpop.permute.xlu1 %5098  ;;  %v13461_v35 = vld [vmem:[#allocation114_spill] sm:$0xff]  ;;  %v13462_v54 = vld [vmem:[#allocation148_spill] sm:$0xff] }
0x168e   : > { %v5897_v49 = vmul.f32 -1.442695, %v5576_v26  ;;  %v11514_v21 = vadd.f32 %v11432_v50, %v4897_v29  ;;  %v11517_v15 = vadd.f32 %v11435_v5, %v4898_v57  ;;  %v11520_v46 = vadd.f32 %v11438_v51, %v4899_v8  ;;  %v13463_v29 = vld [vmem:[#allocation153_spill] sm:$0xff] }
0x168f   : > { %6222 = vpow2.f32 %v5894_v20  ;;  %v11525_v53 = vadd.f32 %v11441_v10, %v4900_v18  ;;  %v11528_v55 = vmul.f32 %v13457_v42, %v5011_v40  ;;  %v5898_v30 = vmul.f32 -1.442695, %v5577_v4 }
0x1690   : > { %6224 = vpow2.f32 %v5895_v0  ;;  %v11531_v50 = vmul.f32 %v13458_v2, %v5011_v40  ;;  %v5899_v5 = vmul.f32 -1.442695, %v5578_v60  ;;  %v4901_v51 = vmul.f32 %v13449_v17, %v11475_v23 }
0x1691   : > { %6226 = vpow2.f32 %v5896_v3  ;;  %v4902_v48 = vmul.f32 %v13450_v11, %v11475_v23  ;;  %v4903_v10 = vmul.f32 %v13451_v41, %v11475_v23  ;;  %v4904_v1 = vmul.f32 %v13452_v32, %v11475_v23  ;;  %v11567_v19 = vpop.permute.xlu1 %5102 }
0x1692   : > { %6228 = vpow2.f32 %v5897_v49  ;;  %v4905_v56 = vmul.f32 %v13453_v33, %v11475_v23  ;;  %v4906_v6 = vmul.f32 %v13454_v27, %v11475_v23  ;;  %v4907_v58 = vmul.f32 %v13455_v44, %v11475_v23 }
0x1693   : > { %v4908_v17 = vmul.f32 %v13456_v16, %v11475_v23  ;;  %v11550_v11 = vmul.f32 %v13459_v22, %v5011_v40  ;;  %v11553_v41 = vmul.f32 %v13460_v39, %v5011_v40  ;;  %v11556_v32 = vmul.f32 %v13461_v35, %v5011_v40  ;;  %v5191_v23 = vpop.permute.xlu0 %5190 }
0x1694   : > { %6230 = vpow2.f32 %v5898_v30  ;;  %v11559_v33 = vmul.f32 %v13462_v54, %v5011_v40  ;;  %v11562_v14 = vmul.f32 %v13463_v29, %v5011_v40  ;;  %v11565_v26 = vmul.f32 %v13464_v61, %v5011_v40  ;;  %v13468_v40 = vld [vmem:[#allocation109_spill] sm:$0xff] }
0x1695   : > { %6232 = vpow2.f32 %v5899_v5  ;;  %v11570_v7 = vadd.f32 %v11452_v36, %v4901_v51  ;;  %v11573_v27 = vadd.f32 %v11455_v13, %v4902_v48  ;;  %v11576_v57 = vadd.f32 %v11458_v37, %v4903_v10  ;;  %v13474_v51 = vld [vmem:[#allocation47_spill] sm:$0xff]  ;;  %v13476_v10 = vld [vmem:[#allocation69_spill] sm:$0xff] }
0x1696   : > { %v11579_v44 = vadd.f32 %v11461_v12, %v4904_v1  ;;  %v11582_v8 = vadd.f32 %v11464_v38, %v4905_v56  ;;  %v11585_v43 = vadd.f32 %v11467_v25, %v4906_v6  ;;  %v11588_v20 = vadd.f32 %v11470_v34, %v4907_v58  ;;  %v11633_v6 = vpop.permute.xlu1 %5194 }
0x1697   : > { %v11591_v36 = vadd.f32 %v11473_v45, %v4908_v17  ;;  %v5053_v13 = vmul.f32 %v13457_v42, %v11492_v9  ;;  %v5054_v37 = vmul.f32 %v13458_v2, %v11492_v9  ;;  %v5055_v12 = vmul.f32 %v13459_v22, %v11492_v9  ;;  %v13470_v42 = vld [vmem:[#allocation140_spill] sm:$0xff]  ;;  %v13472_v2 = vld [vmem:[#allocation138_spill] sm:$0xff]  ;;  %v5287_v56 = vpop.permute.xlu0 %5286 }
0x1698   : > { %v5056_v38 = vmul.f32 %v13460_v39, %v11492_v9  ;;  %v11602_v25 = vmul.f32 %v11124_v59, %v5191_v23  ;;  %v5057_v34 = vmul.f32 %v13461_v35, %v11492_v9  ;;  %v5058_v45 = vmul.f32 %v13462_v54, %v11492_v9 }
0x1699   : > { %v5059_v16 = vmul.f32 %v13463_v29, %v11492_v9  ;;  %v6219_v18 = vpop.eup %6218  ;;  %v11611_v4 = vmul.f32 %v11150_v31, %v5191_v23  ;;  %v11614_v0 = vmul.f32 %v11184_v28, %v5191_v23  ;;  %v11617_v60 = vmul.f32 %v13468_v40, %v5191_v23 }
0x169a   : > { %13465 = vst [vmem:[#allocation32_spill] sm:$0xff] %v11602_v25  ;;  %v5060_v3 = vmul.f32 %v13464_v61, %v11492_v9  ;;  %v6221_v49 = vpop.eup %6220  ;;  %v11622_v30 = vmul.f32 %v13470_v42, %v5191_v23  ;;  %v11625_v5 = vmul.f32 %v13472_v2, %v5191_v23  ;;  %v11628_v48 = vmul.f32 %v13474_v51, %v5191_v23  ;;  %v13491_v25 = vld [vmem:[#allocation45_spill] sm:$0xff] }
0x169b   : > { %13466 = vst [vmem:[#allocation72_spill] sm:$0xff] %v11611_v4  ;;  %13467 = vst [vmem:[#allocation61_spill] sm:$0xff] %v11614_v0  ;;  %v11631_v1 = vmul.f32 %v13476_v10, %v5191_v23  ;;  %v5077_v17 = vadd.f32 %v5053_v13, %v11501_v52  ;;  %v5078_v9 = vadd.f32 %v5054_v37, %v11504_v47  ;;  %v5619_v54 = vadd.f32 1.0, %v6219_v18  ;;  %v13490_v0 = vld [vmem:[#allocation166_spill] sm:$0xff] }
0x169c   : > { %13469 = vst [vmem:[#allocation37_spill] sm:$0xff] %v11617_v60  ;;  %13471 = vst [vmem:[#allocation117_spill] sm:$0xff] %v11622_v30  ;;  %v6223_v58 = vpop.eup %6222  ;;  %v5079_v22 = vadd.f32 %v5055_v12, %v11508_v24  ;;  %v11639_v39 = vadd.f32 %v5056_v38, %v11511_v63  ;;  %v11642_v29 = vadd.f32 %v5057_v34, %v11514_v21  ;;  %v5620_v52 = vadd.f32 1.0, %v6221_v49  ;;  %v13482_v24 = vld [vmem:[#allocation111_spill] sm:$0xff]  ;;  %v13483_v63 = vld [vmem:[#allocation26_spill] sm:$0xff] }
0x169d   : > { %13473 = vst [vmem:[#allocation41_spill] sm:$0xff] %v11625_v5  ;;  %13475 = vst [vmem:[#allocation55_spill] sm:$0xff] %v11628_v48  ;;  %v6225_v35 = vpop.eup %6224  ;;  %v11645_v61 = vadd.f32 %v5058_v45, %v11517_v15  ;;  %v11648_v23 = vadd.f32 %v5059_v16, %v11520_v46  ;;  %v11651_v47 = vadd.f32 %v5060_v3, %v11525_v53  ;;  %v5621_v21 = vadd.f32 1.0, %v6223_v58  ;;  %v13484_v38 = vld [vmem:[#allocation127_spill] sm:$0xff]  ;;  %v13485_v15 = vld [vmem:[#allocation101_spill] sm:$0xff] }
0x169e   : > { %13477 = vst [vmem:[#allocation35_spill] sm:$0xff] %v11631_v1  ;;  %13478 = vst [vmem:[#allocation31_spill] sm:$0xff] %v11642_v29  ;;  %v6227_v1 = vpop.eup %6226  ;;  %v11654_v13 = vmul.f32 %v13482_v24, %v5287_v56  ;;  %v11657_v37 = vmul.f32 %v13483_v63, %v5287_v56  ;;  %v11660_v34 = vmul.f32 %v13484_v38, %v5287_v56  ;;  %v13486_v46 = vld [vmem:[#allocation156_spill] sm:$0xff]  ;;  %v5622_v18 = vadd.f32 1.0, %v6225_v35  ;;  %v13488_v49 = vld [vmem:[#allocation122_spill] sm:$0xff] }
0x169f   : > { %13479 = vst [vmem:[#allocation68_spill] sm:$0xff] %v11645_v61  ;;  %13480 = vst [vmem:[#allocation20_spill] sm:$0xff] %v11648_v23  ;;  %v6229_v12 = vpop.eup %6228  ;;  %v11663_v45 = vmul.f32 %v13485_v15, %v5287_v56  ;;  %v11666_v16 = vmul.f32 %v13486_v46, %v5287_v56  ;;  %v13487_v53 = vld [vmem:[#allocation132_spill] sm:$0xff]  ;;  %v5145_v48 = vmul.f32 %v13488_v49, %v11522_v62  ;;  %v13489_v5 = vld [vmem:[#allocation53_spill] sm:$0xff]  ;;  %v5623_v60 = vadd.f32 1.0, %v6227_v1  ;;  %v11680_v15 = vpop.permute.xlu1 %5282 }
0x16a0   : > { %13481 = vst [vmem:[#allocation40_spill] sm:$0xff] %v11651_v47  ;;  %v11669_v3 = vmul.f32 %v13487_v53, %v5287_v56  ;;  %v5146_v30 = vmul.f32 %v13489_v5, %v11522_v62  ;;  %6234 = vrcp.f32 %v5619_v54  ;;  %v11676_v4 = vmul.f32 %v13490_v0, %v5287_v56  ;;  %13492 = vst [vmem:[#allocation60_spill] sm:$0xff] %v11680_v15  ;;  %v13493_v38 = vld [vmem:[#allocation36_spill] sm:$0xff]  ;;  %v13494_v24 = vld [vmem:[#allocation98_spill] sm:$0xff] }
0x16a1   : > { %v6231_v58 = vpop.eup %6230  ;;  %v5147_v46 = vmul.f32 %v13491_v25, %v11522_v62  ;;  %v5624_v53 = vadd.f32 1.0, %v6229_v12  ;;  %6236 = vrcp.f32 %v5620_v52  ;;  %v11683_v63 = vmul.f32 %v13493_v38, %v5287_v56  ;;  %v13495_v1 = vld [vmem:[#allocation113_spill] sm:$0xff]  ;;  %v13497_v0 = vld [vmem:[#allocation130_spill] sm:$0xff] }
0x16a2   : > { %v6233_v35 = vpop.eup %6232  ;;  %v11687_v47 = vmul.f32 %v13494_v24, %v11522_v62  ;;  %6238 = vrcp.f32 %v5621_v21  ;;  %v11691_v54 = vmul.f32 %v13495_v1, %v11522_v62  ;;  %v11695_v23 = vmul.f32 %v13497_v0, %v11522_v62  ;;  %v13498_v15 = vld [vmem:[#allocation141_spill] sm:$0xff] }
0x16a3   : > { %v11699_v12 = vmul.f32 %v13498_v15, %v11522_v62  ;;  %6240 = vrcp.f32 %v5622_v18  ;;  %v13500_v56 = vld [vmem:[#allocation77_spill] sm:$0xff]  ;;  %v11705_v38 = vadd.f32 %v5145_v48, %v5077_v17  ;;  %v11707_v21 = vadd.f32 %v5146_v30, %v5078_v9  ;;  %v11729_v9 = vpop.permute.xlu1 %5374 }
0x16a4   : > { %13496 = vst [vmem:[#allocation67_spill] sm:$0xff] %v11691_v54  ;;  %v11703_v52 = vmul.f32 %v13500_v56, %v11522_v62  ;;  %v11709_v61 = vadd.f32 1.0, %v6231_v58  ;;  %v11711_v54 = vadd.f32 1.0, %v6233_v35  ;;  %6242 = vrcp.f32 %v5623_v60 }
0x16a5   : > { %13499 = vst [vmem:[#allocation57_spill] sm:$0xff] %v11699_v12  ;;  %v11713_v29 = vadd.f32 %v5147_v46, %v5079_v22  ;;  %6244 = vrcp.f32 %v5624_v53  ;;  %v5085_v12 = vadd.f32 %v11528_v55, %v11570_v7  ;;  %v5086_v18 = vadd.f32 %v11531_v50, %v11573_v27 }
0x16a6   : > { %v5087_v62 = vadd.f32 %v11550_v11, %v11576_v57  ;;  %v5088_v30 = vadd.f32 %v11553_v41, %v11579_v44  ;;  %v5089_v48 = vadd.f32 %v11556_v32, %v11582_v8  ;;  %v5090_v60 = vadd.f32 %v11559_v33, %v11585_v43 }
0x16a7   : > { %v5091_v17 = vadd.f32 %v11562_v14, %v11588_v20  ;;  %v5092_v55 = vadd.f32 %v11565_v26, %v11591_v36  ;;  %v5153_v50 = vmul.f32 %v13488_v49, %v11567_v19  ;;  %v5154_v11 = vmul.f32 %v13489_v5, %v11567_v19 }
0x16a8   : > { %v5155_v41 = vmul.f32 %v13491_v25, %v11567_v19  ;;  %v5156_v32 = vmul.f32 %v13494_v24, %v11567_v19  ;;  %v5157_v33 = vmul.f32 %v13495_v1, %v11567_v19  ;;  %v5158_v14 = vmul.f32 %v13497_v0, %v11567_v19 }
0x16a9   : > { %v5159_v26 = vmul.f32 %v13498_v15, %v11567_v19  ;;  %v5160_v7 = vmul.f32 %v13500_v56, %v11567_v19  ;;  %v5245_v27 = vmul.f32 %v11124_v59, %v11633_v6  ;;  %v5246_v57 = vmul.f32 %v11150_v31, %v11633_v6  ;;  %v13502_v56 = vld [vmem:[#allocation34_spill] sm:$0xff] }
0x16aa   : > { %v5247_v44 = vmul.f32 %v11184_v28, %v11633_v6  ;;  %v5248_v8 = vmul.f32 %v13468_v40, %v11633_v6  ;;  %v5249_v43 = vmul.f32 %v13470_v42, %v11633_v6  ;;  %v5250_v20 = vmul.f32 %v13472_v2, %v11633_v6  ;;  %v5379_v40 = vpop.permute.xlu1 %5378 }
0x16ab   : > { %v5251_v19 = vmul.f32 %v13474_v51, %v11633_v6  ;;  %v5177_v36 = vadd.f32 %v5153_v50, %v5085_v12  ;;  %v5178_v59 = vadd.f32 %v5154_v11, %v5086_v18  ;;  %v5179_v25 = vadd.f32 %v5155_v41, %v5087_v62  ;;  %v13503_v62 = vld [vmem:[#allocation167_spill] sm:$0xff] }
0x16ac   : > { %v5252_v31 = vmul.f32 %v13476_v10, %v11633_v6  ;;  %v5180_v0 = vadd.f32 %v5156_v32, %v5088_v30  ;;  %v5181_v28 = vadd.f32 %v5157_v33, %v5089_v48  ;;  %v5182_v5 = vadd.f32 %v5158_v14, %v5090_v60  ;;  %v13501_v6 = vld [vmem:[#allocation38_spill] sm:$0xff]  ;;  %v13506_v11 = vld [vmem:[#allocation151_spill] sm:$0xff]  ;;  %v13507_v32 = vld [vmem:[#allocation160_spill] sm:$0xff] }
0x16ad   : > { %v5183_v22 = vadd.f32 %v5159_v26, %v5091_v17  ;;  %v11765_v24 = vpop.eup %6234  ;;  %v5184_v42 = vadd.f32 %v5160_v7, %v5092_v55  ;;  %v5269_v15 = vadd.f32 %v5245_v27, %v5177_v36  ;;  %v5270_v46 = vadd.f32 %v5246_v57, %v5178_v59  ;;  %v13504_v60 = vld [vmem:[#allocation118_spill] sm:$0xff]  ;;  %v13508_v26 = vld [vmem:[#allocation56_spill] sm:$0xff] }
0x16ae   : > { %v5271_v2 = vadd.f32 %v5247_v44, %v5179_v25  ;;  %v11767_v53 = vpop.eup %6236  ;;  %v5272_v51 = vadd.f32 %v5248_v8, %v5180_v0  ;;  %v5273_v49 = vadd.f32 %v5249_v43, %v5181_v28  ;;  %v5274_v58 = vadd.f32 %v5250_v20, %v5182_v5  ;;  %v13505_v55 = vld [vmem:[#allocation150_spill] sm:$0xff]  ;;  %v11788_v43 = vpop.permute.xlu0 %5466 }
0x16af   : > { %v5275_v35 = vadd.f32 %v5251_v19, %v5183_v22  ;;  %v11769_v1 = vpop.eup %6238  ;;  %v5276_v10 = vadd.f32 %v5252_v31, %v5184_v42  ;;  %v5429_v12 = vmul.f32 %v13501_v6, %v5379_v40  ;;  %v5430_v18 = vmul.f32 %v13502_v56, %v5379_v40  ;;  %v5471_v20 = vpop.permute.xlu1 %5470 }
0x16b0   : > { %v5431_v30 = vmul.f32 %v13503_v62, %v5379_v40  ;;  %v11774_v48 = vpop.eup %6240  ;;  %v5432_v17 = vmul.f32 %v13504_v60, %v5379_v40  ;;  %v5433_v50 = vmul.f32 %v13505_v55, %v5379_v40  ;;  %v5434_v41 = vmul.f32 %v13506_v11, %v5379_v40 }
0x16b1   : > { %v5435_v33 = vmul.f32 %v13507_v32, %v5379_v40  ;;  %v11780_v14 = vpop.eup %6242  ;;  %v5436_v7 = vmul.f32 %v13508_v26, %v5379_v40  ;;  %v5361_v27 = vadd.f32 %v11654_v13, %v5269_v15  ;;  %v5362_v57 = vadd.f32 %v11657_v37, %v5270_v46  ;;  %v13509_v40 = vld [vmem:[#allocation126_spill] sm:$0xff] }
0x16b2   : > { %v5363_v44 = vadd.f32 %v11660_v34, %v5271_v2  ;;  %v11786_v8 = vpop.eup %6244  ;;  %v5364_v19 = vadd.f32 %v11663_v45, %v5272_v51  ;;  %v5365_v36 = vadd.f32 %v11666_v16, %v5273_v49  ;;  %v5366_v59 = vadd.f32 %v11669_v3, %v5274_v58  ;;  %v13510_v15 = vld [vmem:[#allocation90_spill] sm:$0xff]  ;;  %v13511_v45 = vld [vmem:[#allocation75_spill] sm:$0xff]  ;;  %v13512_v16 = vld [vmem:[#allocation121_spill] sm:$0xff] }
0x16b3   : > { %v5367_v25 = vadd.f32 %v11676_v4, %v5275_v35  ;;  %v5368_v31 = vadd.f32 %v11683_v63, %v5276_v10  ;;  %v5453_v13 = vadd.f32 %v5429_v12, %v5361_v27  ;;  %v5454_v0 = vadd.f32 %v5430_v18, %v5362_v57  ;;  %v13513_v3 = vld [vmem:[#allocation89_spill] sm:$0xff]  ;;  %v13514_v4 = vld [vmem:[#allocation94_spill] sm:$0xff]  ;;  %v5569_v18 = vpop.permute.xlu0 %5568 }
0x16b4   : > { %v5455_v37 = vadd.f32 %v5431_v30, %v5363_v44  ;;  %v5456_v28 = vadd.f32 %v5432_v17, %v5364_v19  ;;  %v5457_v34 = vadd.f32 %v5433_v50, %v5365_v36  ;;  %v5458_v5 = vadd.f32 %v5434_v41, %v5366_v59  ;;  %v13515_v63 = vld [vmem:[#allocation42_spill] sm:$0xff] }
0x16b5   : > { %v5459_v22 = vadd.f32 %v5435_v33, %v5367_v25  ;;  %v5521_v42 = vmul.f32 %v13509_v40, %v5471_v20  ;;  %v5522_v46 = vmul.f32 %v13510_v15, %v5471_v20  ;;  %v5523_v2 = vmul.f32 %v13511_v45, %v5471_v20  ;;  %v13516_v10 = vld [vmem:[#allocation54_spill] sm:$0xff] }
0x16b6   : > { %v5524_v51 = vmul.f32 %v13512_v16, %v5471_v20  ;;  %v5525_v49 = vmul.f32 %v13513_v3, %v5471_v20  ;;  %v5526_v58 = vmul.f32 %v13514_v4, %v5471_v20  ;;  %v5527_v35 = vmul.f32 %v13515_v63, %v5471_v20 }
0x16b7   : > { %v5528_v12 = vmul.f32 %v13516_v10, %v5471_v20  ;;  %v5545_v30 = vadd.f32 %v5521_v42, %v5453_v13  ;;  %v5546_v17 = vadd.f32 %v5522_v46, %v5454_v0  ;;  %v5547_v50 = vadd.f32 %v5523_v2, %v5455_v37  ;;  %v13517_v13 = vld [vmem:[#allocation31_spill] sm:$0xff]  ;;  %v13523_v46 = vld [vmem:[#allocation60_spill] sm:$0xff]  ;;  %v13525_v2 = vld [vmem:[#allocation26_spill] sm:$0xff] }
0x16b8   : > { %v5548_v41 = vadd.f32 %v5524_v51, %v5456_v28  ;;  %6246 = vrcp.f32 %v11709_v61  ;;  %v5460_v33 = vadd.f32 %v5436_v7, %v5368_v31  ;;  %v5549_v27 = vadd.f32 %v5525_v49, %v5457_v34  ;;  %v13518_v0 = vld [vmem:[#allocation67_spill] sm:$0xff]  ;;  %v13519_v28 = vld [vmem:[#allocation68_spill] sm:$0xff]  ;;  %v13521_v34 = vld [vmem:[#allocation57_spill] sm:$0xff] }
0x16b9   : > { %v5550_v57 = vadd.f32 %v5526_v58, %v5458_v5  ;;  %v5551_v44 = vadd.f32 %v5527_v35, %v5459_v22  ;;  %v5587_v19 = vadd.f32 %v5569_v18, %v5545_v30  ;;  %v5588_v36 = vadd.f32 %v5569_v18, %v5546_v17  ;;  %v13520_v31 = vld [vmem:[#allocation20_spill] sm:$0xff]  ;;  %v13527_v35 = vld [vmem:[#allocation101_spill] sm:$0xff] }
0x16ba   : > { %v5589_v59 = vadd.f32 %v5569_v18, %v5547_v50  ;;  %6248 = vrcp.f32 %v11711_v54  ;;  %v5172_v25 = vadd.f32 %v11687_v47, %v11639_v39  ;;  %v5552_v20 = vadd.f32 %v5528_v12, %v5460_v33  ;;  %v13522_v22 = vld [vmem:[#allocation40_spill] sm:$0xff]  ;;  %v13524_v39 = vld [vmem:[#allocation111_spill] sm:$0xff]  ;;  %v13530_v33 = vld [vmem:[#allocation166_spill] sm:$0xff] }
0x16bb   : > { %v5590_v10 = vadd.f32 %v5569_v18, %v5548_v41  ;;  %v5173_v37 = vadd.f32 %v13518_v0, %v13517_v13  ;;  %v5174_v61 = vadd.f32 %v11695_v23, %v13519_v28  ;;  %v5591_v7 = vadd.f32 %v5569_v18, %v5549_v27  ;;  %v13526_v23 = vld [vmem:[#allocation127_spill] sm:$0xff]  ;;  %v13529_v50 = vld [vmem:[#allocation132_spill] sm:$0xff] }
0x16bc   : > { %6250 = vtanh.f32 %v5587_v19  ;;  %v5175_v5 = vadd.f32 %v13521_v34, %v13520_v31  ;;  %v5176_v42 = vadd.f32 %v11703_v52, %v13522_v22  ;;  %v5592_v54 = vadd.f32 %v5569_v18, %v5550_v57  ;;  %v13528_v52 = vld [vmem:[#allocation156_spill] sm:$0xff]  ;;  %v13537_v22 = vld [vmem:[#allocation41_spill] sm:$0xff] }
0x16bd   : > { %6252 = vtanh.f32 %v5588_v36  ;;  %v5329_v47 = vmul.f32 %v13524_v39, %v13523_v46  ;;  %v5330_v51 = vmul.f32 %v13525_v2, %v13523_v46  ;;  %v5593_v49 = vadd.f32 %v5569_v18, %v5551_v44  ;;  %v13531_v57 = vld [vmem:[#allocation36_spill] sm:$0xff]  ;;  %v13538_v39 = vld [vmem:[#allocation55_spill] sm:$0xff] }
0x16be   : > { %6254 = vtanh.f32 %v5589_v59  ;;  %v5331_v58 = vmul.f32 %v13526_v23, %v13523_v46  ;;  %v5332_v12 = vmul.f32 %v13527_v35, %v13523_v46  ;;  %v5594_v30 = vadd.f32 %v5569_v18, %v5552_v20  ;;  %v13532_v59 = vld [vmem:[#allocation32_spill] sm:$0xff] }
0x16bf   : > { %6256 = vtanh.f32 %v5590_v10  ;;  %v5333_v17 = vmul.f32 %v13528_v52, %v13523_v46  ;;  %v5334_v41 = vmul.f32 %v13529_v50, %v13523_v46  ;;  %v5335_v27 = vmul.f32 %v13530_v33, %v13523_v46 }
0x16c0   : > { %6258 = vtanh.f32 %v5591_v7  ;;  %v5336_v44 = vmul.f32 %v13531_v57, %v13523_v46  ;;  %v5421_v19 = vmul.f32 %v13501_v6, %v11729_v9  ;;  %v5422_v10 = vmul.f32 %v13502_v56, %v11729_v9  ;;  %v13533_v56 = vld [vmem:[#allocation72_spill] sm:$0xff]  ;;  %v13535_v7 = vld [vmem:[#allocation37_spill] sm:$0xff] }
0x16c1   : > { %6260 = vtanh.f32 %v5592_v54  ;;  %v5423_v18 = vmul.f32 %v13503_v62, %v11729_v9  ;;  %v5424_v36 = vmul.f32 %v13504_v60, %v11729_v9  ;;  %v5261_v20 = vadd.f32 %v13532_v59, %v11705_v38  ;;  %v13534_v38 = vld [vmem:[#allocation61_spill] sm:$0xff] }
0x16c2   : > { %6262 = vtanh.f32 %v5593_v49  ;;  %v5425_v13 = vmul.f32 %v13505_v55, %v11729_v9  ;;  %v5426_v6 = vmul.f32 %v13506_v11, %v11729_v9  ;;  %v5262_v0 = vadd.f32 %v13533_v56, %v11707_v21  ;;  %v13536_v11 = vld [vmem:[#allocation117_spill] sm:$0xff]  ;;  %v13539_v49 = vld [vmem:[#allocation35_spill] sm:$0xff] }
0x16c3   : > { %6264 = vtanh.f32 %v5594_v30  ;;  %v5427_v62 = vmul.f32 %v13507_v32, %v11729_v9  ;;  %v5428_v60 = vmul.f32 %v13508_v26, %v11729_v9  ;;  %v5263_v28 = vadd.f32 %v13534_v38, %v11713_v29 }
0x16c4   : > { %v5353_v55 = vadd.f32 %v5329_v47, %v5261_v20  ;;  %v5264_v31 = vadd.f32 %v13535_v7, %v5172_v25  ;;  %v5265_v34 = vadd.f32 %v13536_v11, %v5173_v37  ;;  %v5266_v54 = vadd.f32 %v13537_v22, %v5174_v61 }
0x16c5   : > { %v5354_v21 = vadd.f32 %v5330_v51, %v5262_v0  ;;  %v6247_v46 = vpop.eup %6246  ;;  %v5267_v2 = vadd.f32 %v13538_v39, %v5175_v5  ;;  %v5268_v23 = vadd.f32 %v13539_v49, %v5176_v42  ;;  %v5355_v32 = vadd.f32 %v5331_v58, %v5263_v28  ;;  %v5564_v51 = vpop.permute.xlu1 %5563 }
0x16c6   : > { %v5445_v35 = vadd.f32 %v5421_v19, %v5353_v55  ;;  %v5356_v9 = vadd.f32 %v5332_v12, %v5264_v31  ;;  %v5357_v26 = vadd.f32 %v5333_v17, %v5265_v34  ;;  %v5358_v30 = vadd.f32 %v5334_v41, %v5266_v54 }
0x16c7   : > { %v5446_v29 = vadd.f32 %v5422_v10, %v5354_v21  ;;  %v6249_v47 = vpop.eup %6248  ;;  %v5359_v52 = vadd.f32 %v5335_v27, %v5267_v2  ;;  %v5360_v25 = vadd.f32 %v5336_v44, %v5268_v23  ;;  %v5447_v50 = vadd.f32 %v5423_v18, %v5355_v32 }
0x16c8   : > { %v5513_v37 = vmul.f32 %v13509_v40, %v11788_v43  ;;  %v5448_v33 = vadd.f32 %v5424_v36, %v5356_v9  ;;  %v5449_v5 = vadd.f32 %v5425_v13, %v5357_v26  ;;  %v5450_v57 = vadd.f32 %v5426_v6, %v5358_v30 }
0x16c9   : > { %v6251_v61 = vpop.eup %6250  ;;  %v5514_v42 = vmul.f32 %v13510_v15, %v11788_v43  ;;  %v5451_v17 = vadd.f32 %v5427_v62, %v5359_v52  ;;  %v5515_v41 = vmul.f32 %v13511_v45, %v11788_v43  ;;  %v5452_v19 = vadd.f32 %v5428_v60, %v5360_v25  ;;  %v13540_v60 = vld [vmem:[#allocation54_spill] sm:$0xff] }
0x16ca   : > { %v6253_v58 = vpop.eup %6252  ;;  %v11867_v12 = vmul.f32 %v6251_v61, %v11765_v24  ;;  %v5537_v27 = vadd.f32 %v5513_v37, %v5445_v35  ;;  %v5516_v10 = vmul.f32 %v13512_v16, %v11788_v43  ;;  %v5517_v24 = vmul.f32 %v13513_v3, %v11788_v43 }
0x16cb   : > { %v6255_v44 = vpop.eup %6254  ;;  %v11872_v40 = vmul.f32 %v6253_v58, %v11767_v53  ;;  %v5538_v18 = vadd.f32 %v5514_v42, %v5446_v29  ;;  %v5539_v59 = vadd.f32 %v5515_v41, %v5447_v50  ;;  %v5519_v56 = vmul.f32 %v13515_v63, %v11788_v43 }
0x16cc   : > { %v6257_v15 = vpop.eup %6256  ;;  %v11877_v36 = vmul.f32 %v6255_v44, %v11769_v1  ;;  %v5579_v45 = vadd.f32 %v5564_v51, %v5537_v27  ;;  %5731 = vst [vmem:[%s11883_s30] sm:$0xff] %v11867_v12  ;;  %v5518_v1 = vmul.f32 %v13514_v4, %v11788_v43  ;;  %v5540_v3 = vadd.f32 %v5516_v10, %v5448_v33 }
0x16cd   : > { %v6259_v53 = vpop.eup %6258  ;;  %v11888_v16 = vmul.f32 %v6257_v15, %v11774_v48  ;;  %v5580_v20 = vadd.f32 %v5564_v51, %v5538_v18  ;;  %5732 = vst [vmem:[%s11883_s30 + $0x8] sm:$0xff] %v11872_v40  ;;  %v5541_v0 = vadd.f32 %v5517_v24, %v5449_v5  ;;  %v5581_v62 = vadd.f32 %v5564_v51, %v5539_v59 }
0x16ce   : > { %v6261_v13 = vpop.eup %6260  ;;  %v11895_v6 = vmul.f32 %v6259_v53, %v11780_v14  ;;  %5733 = vst [vmem:[%s11883_s30 + $0x10] sm:$0xff] %v11877_v36  ;;  %v5520_v14 = vmul.f32 %v13540_v60, %v11788_v43  ;;  %v5542_v38 = vadd.f32 %v5518_v1, %v5450_v57  ;;  %v5582_v28 = vadd.f32 %v5564_v51, %v5540_v3 }
0x16cf   : > { %v6263_v48 = vpop.eup %6262  ;;  %v11904_v4 = vmul.f32 %v6261_v13, %v11786_v8  ;;  %5734 = vst [vmem:[%s11883_s30 + $0x18] sm:$0xff] %v11888_v16  ;;  %v5543_v7 = vadd.f32 %v5519_v56, %v5451_v17  ;;  %v5583_v31 = vadd.f32 %v5564_v51, %v5541_v0  ;;  %v5900_v11 = vmul.f32 -1.442695, %v5579_v45 }
0x16d0   : > { %v6265_v63 = vpop.eup %6264  ;;  %v5705_v55 = vmul.f32 %v6263_v48, %v6247_v46  ;;  %5735 = vst [vmem:[%s11883_s30 + $0x20] sm:$0xff] %v11895_v6  ;;  %v5544_v34 = vadd.f32 %v5520_v14, %v5452_v19  ;;  %v5584_v22 = vadd.f32 %v5564_v51, %v5542_v38  ;;  %v5901_v54 = vmul.f32 -1.442695, %v5580_v20 }
0x16d1   : > { %v5706_v8 = vmul.f32 %v6265_v63, %v6249_v47  ;;  %5736 = vst [vmem:[%s11883_s30 + $0x28] sm:$0xff] %v11904_v4  ;;  %v5585_v43 = vadd.f32 %v5564_v51, %v5543_v7  ;;  %v5902_v21 = vmul.f32 -1.442695, %v5581_v62  ;;  %v5903_v39 = vmul.f32 -1.442695, %v5582_v28 }
0x16d2   : > { %5737 = vst [vmem:[%s11883_s30 + $0x30] sm:$0xff] %v5705_v55  ;;  %v5586_v46 = vadd.f32 %v5564_v51, %v5544_v34  ;;  %6266 = vpow2.f32 %v5900_v11  ;;  %v5904_v2 = vmul.f32 -1.442695, %v5583_v31 }
0x16d3   : > { %5738 = vst [vmem:[%s11883_s30 + $0x38] sm:$0xff] %v5706_v8 }
0x16d4   : > { %6341 = shalt.err (!%p6338_p3)
}
0x16d5   : > { %s6342_s30 = scalar_lea.hbm %s11919_s21, 1024  ;;  %s6346_s20 = scalar_lea.hbm %s12005_s10, 2048 }
0x16d6   : > { %p6343_p4 = scmp.ne.s32.totalorder %s11919_s21, %s6342_s30  ;;  %p6347_p9 = scmp.lt.s32.totalorder %s11919_s21, %s12005_s10 }
0x16d7   : > { %p6348_p10 = scmp.lt.s32.totalorder %s6346_s20, %s6342_s30 }
0x16d8   : > { %p6344_p7 = pnand %p6343_p4, %p6555_p5 }
0x16d9   : > { %p6349_p11 = por %p6348_p10, %p6347_p9 }
0x16da   : > { %p6345_p8 = pneg %p6344_p7 }
0x16dc   : > { %p6350_p12 = pnand %p6349_p11, %p6345_p8 }
0x16de   : > { %6353 = shalt.err (!%p6350_p12)
}
0x16df   : > { %5920 = dma.vmem_to_hbm [thread:$0]  (%p6555_p5), %s11921_s11, 1024, %s11919_s21, %s5745_s26   ;;  %6268 = vpow2.f32 %v5901_v54  ;;  %v5905_v49 = vmul.f32 -1.442695, %v5584_v22  ;;  %v5906_v23 = vmul.f32 -1.442695, %v5585_v43  ;;  %v6267_v35 = vpop.eup %6266 }
0x16e0   : > { %6270 = vpow2.f32 %v5902_v21  ;;  %v5907_v32 = vmul.f32 -1.442695, %v5586_v46  ;;  %v5667_v26 = vadd.f32 1.0, %v6267_v35  ;;  %s13541_s0 = sshll.u32 %s11848_s25, 6  ;;  %s13542_s18 = sshll.u32 %s6538_s17, 10 }
0x16e1   : > { %6272 = vpow2.f32 %v5903_v39  ;;  %s356_s1 = scalar_lea.vmem [#allocation3], %s13541_s0  ;;  %s11959_s26 = scalar_lea.hbm %s12004_s9, %s13542_s18 }
0x16e2   : > { %6274 = vpow2.f32 %v5904_v2  ;;  %s5759_s29 = sshll.u32 %s356_s1, 4  ;;  %s5740_s27 = scalar_lea.sflag [#allocation4], %s11848_s25  ;;  %s5760_s29 = int_to_ptr.vmem [resolvable:$true] %s5759_s29 }
0x16e3   : > { %6276 = vpow2.f32 %v5905_v49  ;;  %s6354_s12 = scalar_lea.vmem %s5760_s29, 1024  ;;  %s6461_s28 = smov [#allocation3]  }
0x16e4   : > { %6278 = vpow2.f32 %v5906_v23  ;;  %p6355_p13 = scmp.ne.s32.totalorder %s5760_s29, %s6354_s12  ;;  %s6358_s30 = sshll.u32 %s6461_s28, 4  ;;  %s6359_s30 = int_to_ptr.vmem [resolvable:$false] %s6358_s30 }
0x16e5   : > { %6280 = vpow2.f32 %v5907_v32  ;;  %s6360_s20 = scalar_lea.vmem %s6359_s30, 2048  ;;  %p6361_p2 = scmp.lt.s32.totalorder %s5760_s29, %s6359_s30 }
0x16e6   : > { %6282 = vtanh.f32 %v11867_v12  ;;  %p6356_p0 = pnand %p6355_p13, %p6555_p5  ;;  %p6362_p3 = scmp.lt.s32.totalorder %s6360_s20, %s6354_s12 }
0x16e7   : > { %6284 = vtanh.f32 %v11872_v40 }
0x16e8   : > { %6286 = vtanh.f32 %v11877_v36  ;;  %p6357_p1 = pneg %p6356_p0  ;;  %p6363_p4 = por %p6362_p3, %p6361_p2 }
0x16e9   : > { %6288 = vtanh.f32 %v11888_v16 }
0x16ea   : > { %6290 = vtanh.f32 %v11895_v6  ;;  %p6364_p7 = pnand %p6363_p4, %p6357_p1 }
0x16eb   : > { %6292 = vtanh.f32 %v11904_v4 }
0x16ec   : > { %v6269_v9 = vpop.eup %6268  ;;  %6294 = vtanh.f32 %v5705_v55 }
0x16ed   : > { %v6271_v30 = vpop.eup %6270  ;;  %6296 = vtanh.f32 %v5706_v8  ;;  %v5668_v29 = vadd.f32 1.0, %v6269_v9 }
0x16ee   : > { %v6273_v47 = vpop.eup %6272  ;;  %v5669_v52 = vadd.f32 1.0, %v6271_v30  ;;  %6298 = vrcp.f32 %v5667_v26 }
0x16ef   : > { %v6275_v25 = vpop.eup %6274  ;;  %v5670_v50 = vadd.f32 1.0, %v6273_v47  ;;  %6300 = vrcp.f32 %v5668_v29 }
0x16f0   : > { %v6277_v37 = vpop.eup %6276  ;;  %v5671_v61 = vadd.f32 1.0, %v6275_v25  ;;  %6302 = vrcp.f32 %v5669_v52 }
0x16f1   : > { %v6279_v51 = vpop.eup %6278  ;;  %v5672_v33 = vadd.f32 1.0, %v6277_v37  ;;  %6304 = vrcp.f32 %v5670_v50 }
0x16f2   : > { %v6281_v5 = vpop.eup %6280  ;;  %v5673_v57 = vadd.f32 1.0, %v6279_v51  ;;  %6306 = vrcp.f32 %v5671_v61 }
0x16f3   : > { %v6283_v42 = vpop.eup %6282  ;;  %v5674_v58 = vadd.f32 1.0, %v6281_v5  ;;  %6308 = vrcp.f32 %v5672_v33 }
0x16f4   : > { %v6285_v12 = vpop.eup %6284  ;;  %6310 = vrcp.f32 %v5673_v57 }
0x16f5   : > { %v6287_v17 = vpop.eup %6286  ;;  %6312 = vrcp.f32 %v5674_v58 }
0x16f6   : > { %v6289_v41 = vpop.eup %6288 }
0x16f7   : > { %v6291_v27 = vpop.eup %6290 }
0x16f8   : > { %v6293_v44 = vpop.eup %6292 }
0x16f9   : > { %v6295_v40 = vpop.eup %6294 }
0x16fa   : > { %v6297_v19 = vpop.eup %6296 }
0x16fb   : > { %v6299_v10 = vpop.eup %6298 }
0x16fc   : > { %v6301_v18 = vpop.eup %6300  ;;  %v5715_v15 = vmul.f32 %v6299_v10, %v6283_v42 }
0x16fd   : > { %v6303_v36 = vpop.eup %6302  ;;  %v5716_v24 = vmul.f32 %v6301_v18, %v6285_v12 }
0x16fe   : > { %v6305_v59 = vpop.eup %6304  ;;  %v5717_v45 = vmul.f32 %v6303_v36, %v6287_v17  ;;  %5723 = vst [vmem:[%s356_s1] sm:$0xff] %v5715_v15 }
0x16ff   : > { %v6307_v53 = vpop.eup %6306  ;;  %v5718_v16 = vmul.f32 %v6305_v59, %v6289_v41  ;;  %5724 = vst [vmem:[%s356_s1 + $0x8] sm:$0xff] %v5716_v24 }
0x1700   : > { %v6309_v1 = vpop.eup %6308  ;;  %v5719_v3 = vmul.f32 %v6307_v53, %v6291_v27  ;;  %5725 = vst [vmem:[%s356_s1 + $0x10] sm:$0xff] %v5717_v45 }
0x1701   : > { %v6311_v20 = vpop.eup %6310  ;;  %v5720_v13 = vmul.f32 %v6309_v1, %v6293_v44  ;;  %5726 = vst [vmem:[%s356_s1 + $0x18] sm:$0xff] %v5718_v16 }
0x1702   : > { %v6313_v6 = vpop.eup %6312  ;;  %v5721_v56 = vmul.f32 %v6311_v20, %v6295_v40  ;;  %5727 = vst [vmem:[%s356_s1 + $0x20] sm:$0xff] %v5719_v3 }
0x1703   : > { %v5722_v0 = vmul.f32 %v6313_v6, %v6297_v19  ;;  %5728 = vst [vmem:[%s356_s1 + $0x28] sm:$0xff] %v5720_v13 }
0x1704   : > { %5729 = vst [vmem:[%s356_s1 + $0x30] sm:$0xff] %v5721_v56 }
0x1705   : > { %5730 = vst [vmem:[%s356_s1 + $0x38] sm:$0xff] %v5722_v0 }
0x1706   : > { %6367 = shalt.err (!%p6364_p7)
}
0x1707   : > { %s6368_s17 = scalar_lea.hbm %s11959_s26, 1024  ;;  %s6372_s1 = scalar_lea.hbm %s12004_s9, 2048 }
0x1708   : > { %p6369_p8 = scmp.ne.s32.totalorder %s11959_s26, %s6368_s17  ;;  %p6373_p11 = scmp.lt.s32.totalorder %s11959_s26, %s12004_s9 }
0x1709   : > { %p6374_p12 = scmp.lt.s32.totalorder %s6372_s1, %s6368_s17 }
0x170a   : > { %p6370_p9 = pnand %p6369_p8, %p6555_p5 }
0x170b   : > { %p6375_p13 = por %p6374_p12, %p6373_p11 }
0x170c   : > { %p6371_p10 = pneg %p6370_p9 }
0x170e   : > { %p6376_p0 = pnand %p6375_p13, %p6371_p10 }
0x1710   : > { %6379 = shalt.err (!%p6376_p0)
}
0x1711   : > { %5919 = dma.vmem_to_hbm [thread:$0]  (%p6555_p5), %s5760_s29, 1024, %s11959_s26, %s5740_s27  }
0x1712 PF: > { %p5930_p1 = scmp.ge.s32.totalorder %s6418_s16, 2  ;;  %s5785_s21 = sand.u32 1, %s6406_s13  }
0x1713   : > { %s5786_s12 = scalar_lea.sflag [#allocation4], %s5785_s21 }
0x1714   : > { %p5924_p2 = pnand %p5930_p1, %p6559_p6 }
0x1716   : > { %p5925_p3 = pneg %p5924_p2 }
0x1718   : > { %6397 = dma.done.wait (%p5925_p3), %s5786_s12, 1024  }
0x1719   : > { %6399 = vsyncadd (%p5925_p3), %s5786_s12, 4294966272  ;;  %s5795_s28 = scalar_lea.sflag [#allocation6], %s5785_s21 }
0x171a   : > { %6401 = dma.done.wait (%p5925_p3), %s5795_s28, 1024  }
0x171b   : > { %6403 = vsyncadd (%p5925_p3), %s5795_s28, 4294966272  ;;  %p24_p5 = scmp.ge.s32.totalorder %s6542_s19, 4   ;;  %s13543_s13 = smov %s6410_s14 }
0x171c   : > { %s13544_s14 = smov %s6414_s15  ;;  %s13545_s15 = smov %s6553_s22 }
0x171d   : > { %s13546_s16 = smov %s6542_s19  ;;  %26 = sbr.rel (!%p24_p5) target bundleno = 8 (0x8), region = 111 }
0x1722   :  { %5800 = vsyncpa [#allocation4], 1 }
0x1723   :  { %5802 = vsyncpa [#allocation4 + $0x1], 1 }
0x1724   :  { %5803 = vsyncpa [#allocation6], 1 }
0x1725   :  { %5805 = vsyncpa [#allocation6 + $0x1], 1 }

</bundles_post_ra>
